<compile_context>
chip_gen: v5e
topology: v5e:2x2
jax: 0.10.0
libtpu: 0.0.40
codegen_flags: <defaults>
</compile_context>

<pallas_src>
import functools

import jax
import jax.numpy as jnp
from jax.experimental import pallas as pl
from jax.experimental.pallas import tpu as pltpu


# -----------------------------------------------------------------------------
# Chip-aware VMEM budget (v5e/v6e: 128 MiB/TC, v7x: 64 MiB/TC)
# -----------------------------------------------------------------------------
@functools.lru_cache(maxsize=None)
def _vmem_limit_bytes():
    """~85% of physical VMEM, capped at 96 MiB (=> ~54 MiB on v7x, 96 MiB on v5e/v6e)."""
    cap = 64 * 1024 * 1024                  # conservative fallback (v7x physical)
    try:
        cap = int(pltpu.get_tpu_info().vmem_capacity_bytes)
    except Exception:
        pass
    return min(int(cap * 0.85), 96 * 1024 * 1024)


# -----------------------------------------------------------------------------
# Fused per-sample kernel: [27-tap conv] -> [GroupNorm + ReLU] -> [1x1 projection]
# -----------------------------------------------------------------------------
def _fused_stage_kernel(*refs, tap_offsets, S, groups, eps, apply_gn, has_mask,
                        has_proj, inv_count):
    """refs = x, [w_taps], [gamma, beta, [mask]], [w_proj], out   (no scratch).

    x      : (1, Cin, Stot)  bf16 (conv path) / f32 (norm-only).  Stot = S + 2*halo.
    w_taps : (T, Cout, Cin)  bf16 per-tap weight matrices.
    gamma/beta : (Cout, 1) f32.    mask : (1, S) f32, 1.0 at valid output positions.
    w_proj : (Cproj, Cout) bf16.   out  : (1, C_final, S).
    """
    pos = 0
    x_ref = refs[pos]
    pos += 1

    if tap_offsets is not None:
        # In-kernel im2col: each tap is a static lane-offset window of the
        # zero-padded flat activation feeding one accumulating MXU dot.
        w_ref = refs[pos]
        pos += 1
        acc = None
        for t, off in enumerate(tap_offsets):          # static unroll (27 taps)
            a = x_ref[0, :, off:off + S]               # (Cin, S) bf16
            d = jnp.dot(w_ref[t], a, preferred_element_type=jnp.float32)
            acc = d if acc is None else acc + d
    else:
        acc = x_ref[0].astype(jnp.float32)             # (C, S)

    if apply_gn:
        gamma = refs[pos][...]                         # (C, 1) f32
        beta = refs[pos + 1][...]
        pos += 2
        # One-pass statistics: lane-reduce sum / sum-of-squares into (C,1)
        # columns (junk border positions of the padded output grid are masked).
        if has_mask:
            mask = refs[pos][...]                      # (1, S) f32
            pos += 1
            xm = acc * mask
            row_s1 = jnp.sum(xm, axis=1, keepdims=True)         # sum(mask*x)
            row_s2 = jnp.sum(xm * acc, axis=1, keepdims=True)   # sum(mask*x^2)
        else:
            row_s1 = jnp.sum(acc, axis=1, keepdims=True)
            row_s2 = jnp.sum(acc * acc, axis=1, keepdims=True)

        C = acc.shape[0]
        cg = C // groups
        ch = jax.lax.broadcasted_iota(jnp.int32, (C, 1), 0)
        inv_col = jnp.zeros((C, 1), jnp.float32)
        mean_col = jnp.zeros((C, 1), jnp.float32)
        for g in range(groups):                        # static unroll (4 groups)
            lo, hi = g * cg, (g + 1) * cg
            mean = jnp.sum(row_s1[lo:hi, :]) * inv_count
            var = jnp.sum(row_s2[lo:hi, :]) * inv_count - mean * mean
            inv = jax.lax.rsqrt(jnp.maximum(var, 0.0) + eps)
            sel = (ch >= lo) & (ch < hi)
            inv_col = jnp.where(sel, inv, inv_col)
            mean_col = jnp.where(sel, mean, mean_col)
        # Dense norm + ReLU over the whole (C, S) block -> one dense store.
        scale = gamma * inv_col                        # (C, 1)
        shift = beta - mean_col * scale
        y = jnp.maximum(acc * scale + shift, 0.0)
    else:
        y = acc

    out_ref = refs[-1]
    if has_proj:
        # Fused 1x1 conv2 projection on the normalized value (no f32 scratch).
        wproj_ref = refs[pos]
        out_ref[0] = jnp.dot(wproj_ref[...], y.astype(jnp.bfloat16),
                             preferred_element_type=jnp.float32
                             ).astype(out_ref.dtype)
    else:
        out_ref[0] = y.astype(out_ref.dtype)


def fused_stage(x_flat, *, S, w_taps=None, tap_offsets=None,
                gamma=None, beta=None, mask=None, n_valid=None, w_proj=None,
                out_dtype=jnp.float32, groups=4, eps=1e-5):
    """Per-sample fused [multi-tap conv] + [GroupNorm + ReLU] + [1x1 projection].

    x_flat : (N, Cin, Stot), Stot = S (+ 2*halo when tap_offsets is given).
    Returns (N, C_final, S) in out_dtype (padded output grid when conv; caller crops).
    """
    N, Cin, Stot = x_flat.shape
    has_conv = tap_offsets is not None
    Cout = int(w_taps.shape[1]) if has_conv else Cin
    apply_gn = gamma is not None
    has_mask = mask is not None
    has_proj = w_proj is not None
    C_final = int(w_proj.shape[0]) if has_proj else Cout
    if n_valid is None:
        n_valid = S
    inv_count = 1.0 / float((Cout // groups) * n_valid)

    args = [x_flat]
    in_specs = [pl.BlockSpec((1, Cin, Stot), lambda n: (n, 0, 0))]
    if has_conv:
        T = int(w_taps.shape[0])
        args.append(w_taps.astype(jnp.bfloat16))
        in_specs.append(pl.BlockSpec((T, Cout, Cin), lambda n: (0, 0, 0)))
    if apply_gn:
        args += [gamma.reshape(Cout, 1).astype(jnp.float32),
                 beta.reshape(Cout, 1).astype(jnp.float32)]
        in_specs += [pl.BlockSpec((Cout, 1), lambda n: (0, 0)),
                     pl.BlockSpec((Cout, 1), lambda n: (0, 0))]
        if has_mask:
            args.append(mask.astype(jnp.float32))
            in_specs.append(pl.BlockSpec((1, S), lambda n: (0, 0)))
    if has_proj:
        args.append(w_proj.astype(jnp.bfloat16))
        in_specs.append(pl.BlockSpec((C_final, Cout), lambda n: (0, 0)))

    # Advisory cost hint so XLA schedules the surrounding glue sensibly.
    flops = 2 * N * S * Cout * Cin * (len(tap_offsets) if has_conv else 0)
    if has_proj:
        flops += 2 * N * S * C_final * Cout
    flops += 10 * N * Cout * S
    bytes_accessed = sum(int(a.size) * a.dtype.itemsize for a in args)
    bytes_accessed += N * C_final * S * jnp.dtype(out_dtype).itemsize
    cost = pl.CostEstimate(flops=int(flops), transcendentals=int(N * groups),
                           bytes_accessed=int(bytes_accessed))

    kern = functools.partial(
        _fused_stage_kernel,
        tap_offsets=tuple(int(o) for o in tap_offsets) if has_conv else None,
        S=int(S), groups=groups, eps=eps, apply_gn=apply_gn, has_mask=has_mask,
        has_proj=has_proj, inv_count=inv_count)

    # TODO(synk): for volumes where a per-sample (Cin, Stot) slab no longer fits
    # the VMEM budget (>~96^3 at these channel counts; v7x first), add an S grid
    # axis ('arbitrary') with halo'd lane-dense input blocks and streaming
    # per-group sum/sum-of-squares scratch finalized under pl.when.
    # TODO(synk): for tiny volumes (S < 128, as in this toy test) fold the batch
    # axis into the lane dimension so stores are unmasked lane-dense.
    return pl.pallas_call(
        kern,
        out_shape=jax.ShapeDtypeStruct((N, C_final, S), out_dtype),
        grid=(N,),
        in_specs=in_specs,
        out_specs=pl.BlockSpec((1, C_final, S), lambda n: (n, 0, 0)),
        compiler_params=pltpu.CompilerParams(
            dimension_semantics=("parallel",),
            vmem_limit_bytes=_vmem_limit_bytes()),
        cost_estimate=cost,
    )(*args)


# -----------------------------------------------------------------------------
# Plain-JAX glue (layout plumbing / pure data movement)
# -----------------------------------------------------------------------------
def _pad_flat(x5):
    """(N,C,D,H,W) -> zero-pad spatial by 1, flatten, then pad the flat axis by a
    halo so every 3x3x3 tap is a non-negative static lane offset inside the kernel."""
    N, C, D, H, W = x5.shape
    Dp, Hp, Wp = D + 2, H + 2, W + 2
    halo = Hp * Wp + Wp + 1
    xp = jnp.pad(x5, ((0, 0), (0, 0), (1, 1), (1, 1), (1, 1)))
    flat = xp.reshape(N, C, Dp * Hp * Wp)
    flat = jnp.pad(flat, ((0, 0), (0, 0), (halo, halo)))
    return flat, (Dp, Hp, Wp)


def _tap_offsets(Hp, Wp):
    # Enumeration order must match _conv_tap_weights (kd slowest, kw fastest).
    return tuple(kd * Hp * Wp + kh * Wp + kw
                 for kd in range(3) for kh in range(3) for kw in range(3))


def _conv_tap_weights(w):
    """(Cout, Cin, 3, 3, 3) -> (27, Cout, Cin), tap-major, matching _tap_offsets."""
    Cout, Cin = w.shape[:2]
    return jnp.transpose(w, (2, 3, 4, 0, 1)).reshape(27, Cout, Cin)


def _interior_mask(D, H, W):
    """(1, (D+2)(H+2)(W+2)) f32: 1 at interior (valid conv output) positions."""
    m = jnp.pad(jnp.ones((D, H, W), jnp.float32), ((1, 1), (1, 1), (1, 1)))
    return m.reshape(1, (D + 2) * (H + 2) * (W + 2))


def _crop_interior(flat, C, D, H, W):
    """(N, C, (D+2)(H+2)(W+2)) -> (N, C, D, H, W) by dropping padded border outputs."""
    N = flat.shape[0]
    x5 = flat.reshape(N, C, D + 2, H + 2, W + 2)
    return x5[:, :, 1:-1, 1:-1, 1:-1]


def upsample_trilinear_2x(x):
    """(N, C, D, H, W) -> (N, C, 2D, 2H, 2W); PyTorch trilinear, align_corners=False.

    Gather-free: edge-pad once, 8 parity phases from static slices, one
    interleave stack+reshape.
    """
    # TODO(synk): fuse this per-channel 8-tap stencil into the GN2 Pallas kernel
    # to drop one f32 HBM round trip of the s_hi tensor.
    N, C, D, H, W = x.shape
    xp = jnp.pad(x, ((0, 0), (0, 0), (1, 1), (1, 1), (1, 1)), mode="edge")

    def taps(a):  # (offset, weight) pairs for output parity a along one axis
        return ((0, 0.25), (1, 0.75)) if a == 0 else ((1, 0.75), (2, 0.25))

    def phase(a, b, c):
        acc = None
        for od, wd in taps(a):
            for oh, wh in taps(b):
                for ow, ww in taps(c):
                    term = (wd * wh * ww) * xp[:, :, od:od + D, oh:oh + H, ow:ow + W]
                    acc = term if acc is None else acc + term
        return acc

    a_stack = []
    for a in (0, 1):
        b_stack = []
        for b in (0, 1):
            pair_c = jnp.stack([phase(a, b, 0), phase(a, b, 1)], axis=-1)
            b_stack.append(pair_c)                     # (N,C,D,H,W,2)
        a_stack.append(jnp.stack(b_stack, axis=-3))    # (N,C,D,H,2,W,2)
    out = jnp.stack(a_stack, axis=-5)                  # (N,C,D,2,H,2,W,2)
    return out.reshape(N, C, 2 * D, 2 * H, 2 * W)


# -----------------------------------------------------------------------------
# ConvU forward
# -----------------------------------------------------------------------------
def conv_u_forward(x_ncdhw, prev_ncdhw, params, first=False, groups=4, eps=1e-5):
    """PyTorch-equivalent ConvU.forward. Inputs/outputs are NCDHW."""
    x = x_ncdhw.astype(jnp.float32)
    prev = prev_ncdhw.astype(jnp.float32)
    N, _, D, H, W = x.shape
    half = prev.shape[1]                    # planes // 2
    planes = 2 * half
    bf = jnp.bfloat16

    w2m = params["conv2_w"].reshape(half, -1)          # (planes//2, planes)

    if not first:
        # conv1 (3^3) + GN1 + ReLU + conv2 (1x1 projection) fused; taps in-kernel.
        x_flat, (Dp, Hp, Wp) = _pad_flat(x.astype(bf))
        Sp = Dp * Hp * Wp
        y2p = fused_stage(
            x_flat, S=Sp,
            w_taps=_conv_tap_weights(params["conv1_w"]),
            tap_offsets=_tap_offsets(Hp, Wp),
            gamma=params["bn1_w"], beta=params["bn1_b"],
            mask=_interior_mask(D, H, W), n_valid=D * H * W,
            w_proj=w2m, out_dtype=jnp.float32, groups=groups, eps=eps)
        y2 = _crop_interior(y2p, half, D, H, W)        # (N, half, D, H, W) f32
    else:
        # first=True: only conv2 (1x1) applies before the upsample (commuted, exact).
        x_flat = x.reshape(N, planes, D * H * W).astype(bf)
        y2 = fused_stage(x_flat, S=D * H * W,
                         w_taps=w2m[None], tap_offsets=(0,),
                         out_dtype=jnp.float32, groups=groups, eps=eps)
        y2 = y2.reshape(N, half, D, H, W)

    # Trilinear 2x upsample, commuted with the 1x1 bias-free conv2 (exact).
    y_up = upsample_trilinear_2x(y2)                   # (N, half, 2D, 2H, 2W) f32
    D2, H2, W2 = 2 * D, 2 * H, 2 * W
    S_hi = D2 * H2 * W2

    # GN2 + ReLU on the upsampled tensor; bf16 out (consumer is the bf16 conv3 input).
    y = fused_stage(y_up.reshape(N, half, S_hi), S=S_hi,
                    gamma=params["bn2_w"], beta=params["bn2_b"],
                    out_dtype=jnp.bfloat16, groups=groups, eps=eps)
    y = y.reshape(N, half, D2, H2, W2)

    # conv3 (3^3 over cat([prev, y], 1)) + GN3 + ReLU: single concatenated bf16
    # activation -> one (Cout, Cin) dot per tap.
    cat5 = jnp.concatenate([prev.astype(bf), y], axis=1)   # (N, planes, D2,H2,W2) bf16
    cat_flat, (Dp2, Hp2, Wp2) = _pad_flat(cat5)
    Sp_hi = Dp2 * Hp2 * Wp2
    outp = fused_stage(
        cat_flat, S=Sp_hi,
        w_taps=_conv_tap_weights(params["conv3_w"]),
        tap_offsets=_tap_offsets(Hp2, Wp2),
        gamma=params["bn3_w"], beta=params["bn3_b"],
        mask=_interior_mask(D2, H2, W2), n_valid=S_hi,
        out_dtype=jnp.float32, groups=groups, eps=eps)
    return _crop_interior(outp, planes, D2, H2, W2)    # (N, planes, 2D, 2H, 2W)


def init_params(key, planes=8, first=False):
    ks = jax.random.split(key, 6)
    p = {}
    if not first:
        fan1 = 2 * planes * 27
        p["conv1_w"] = jax.random.normal(
            ks[0], (planes, 2 * planes, 3, 3, 3), jnp.float32) * (2.0 / fan1) ** 0.5
        p["bn1_w"] = 1.0 + 0.1 * jax.random.normal(ks[1], (planes,), jnp.float32)
        p["bn1_b"] = 0.1 * jax.random.normal(ks[2], (planes,), jnp.float32)
    p["conv2_w"] = jax.random.normal(
        ks[3], (planes // 2, planes, 1, 1, 1), jnp.float32) * (2.0 / planes) ** 0.5
    p["bn2_w"] = jnp.ones((planes // 2,), jnp.float32)
    p["bn2_b"] = jnp.zeros((planes // 2,), jnp.float32)
    p["conv3_w"] = jax.random.normal(
        ks[4], (planes, planes, 3, 3, 3), jnp.float32) * (2.0 / (planes * 27)) ** 0.5
    p["bn3_w"] = 1.0 + 0.1 * jax.random.normal(ks[5], (planes,), jnp.float32)
    p["bn3_b"] = jnp.zeros((planes,), jnp.float32)
    return p


if __name__ == "__main__":
    planes = 8
    N, D, H, W = 2, 4, 4, 4

    key = jax.random.PRNGKey(0)
    kx, kp, kw = jax.random.split(key, 3)
    # x: skip-path input with 2*planes channels at low resolution,
    # prev: encoder feature with planes//2 channels at 2x resolution.
    x = jax.random.normal(kx, (N, 2 * planes, D, H, W), jnp.float32)
    prev = jax.random.normal(kp, (N, planes // 2, 2 * D, 2 * H, 2 * W), jnp.float32)
    params = init_params(kw, planes=planes, first=False)

    fwd = jax.jit(lambda a, b: conv_u_forward(a, b, params, first=False))
    out = jax.block_until_ready(fwd(x, prev))

    assert out.shape == (N, planes, 2 * D, 2 * H, 2 * W), out.shape
    assert bool(jnp.all(jnp.isfinite(out)))
    print("KERNEL_OK")
</pallas_src>

<mosaic_0001>
module attributes {stable_mosaic.version = 11 : i64} {
  func.func @_fused_stage_kernel(%arg0: i32, %arg1: memref<1x16x302xbf16, #tpu.memory_space<vmem>>, %arg2: memref<27x8x16xbf16, #tpu.memory_space<vmem>>, %arg3: memref<8x1xf32, #tpu.memory_space<vmem>>, %arg4: memref<8x1xf32, #tpu.memory_space<vmem>>, %arg5: memref<1x216xf32, #tpu.memory_space<vmem>>, %arg6: memref<4x8xbf16, #tpu.memory_space<vmem>>, %arg7: memref<1x4x216xf32, #tpu.memory_space<vmem>>) attributes {dimension_semantics = [#tpu.dimension_semantics<parallel>], iteration_bounds = array<i64: 2>, scalar_prefetch = 0 : i64, scratch_operands = 0 : i64, tpu.core_type = #tpu.core_type<tc>, window_params = [{transform_indices = @transform_0, window_bounds = array<i64: 1, 16, 302>}, {pipeline_mode = #tpu.pipeline_mode<synchronous>, transform_indices = @transform_1, window_bounds = array<i64: 27, 8, 16>}, {pipeline_mode = #tpu.pipeline_mode<synchronous>, transform_indices = @transform_2, window_bounds = array<i64: 8, 1>}, {pipeline_mode = #tpu.pipeline_mode<synchronous>, transform_indices = @transform_3, window_bounds = array<i64: 8, 1>}, {pipeline_mode = #tpu.pipeline_mode<synchronous>, transform_indices = @transform_4, window_bounds = array<i64: 1, 216>}, {pipeline_mode = #tpu.pipeline_mode<synchronous>, transform_indices = @transform_5, window_bounds = array<i64: 4, 8>}, {transform_indices = @transform_6, window_bounds = array<i64: 1, 4, 216>}]} {
    %c0 = arith.constant 0 : index
    %c0_0 = arith.constant 0 : index
    %c0_1 = arith.constant 0 : index
    %0 = vector.load %arg1[%c0, %c0_0, %c0_1] : memref<1x16x302xbf16, #tpu.memory_space<vmem>>, vector<1x16x216xbf16>
    %1 = vector.shape_cast %0 : vector<1x16x216xbf16> to vector<16x216xbf16>
    %c0_2 = arith.constant 0 : index
    %c0_3 = arith.constant 0 : index
    %c0_4 = arith.constant 0 : index
    %2 = vector.load %arg2[%c0_2, %c0_3, %c0_4] : memref<27x8x16xbf16, #tpu.memory_space<vmem>>, vector<1x8x16xbf16>
    %3 = vector.shape_cast %2 : vector<1x8x16xbf16> to vector<8x16xbf16>
    %cst = arith.constant dense<0.000000e+00> : vector<8x216xf32>
    %4 = tpu.matmul %3, %1, %cst {dimension_numbers = #tpu.dot_dimension_numbers<[1], [0], [0], [1], [0, 0, 1, 1], [], []>} : vector<8x16xbf16>, vector<16x216xbf16>, vector<8x216xf32> -> vector<8x216xf32>
    %c0_5 = arith.constant 0 : index
    %c0_6 = arith.constant 0 : index
    %c1 = arith.constant 1 : index
    %5 = vector.load %arg1[%c0_5, %c0_6, %c1] : memref<1x16x302xbf16, #tpu.memory_space<vmem>>, vector<1x16x216xbf16>
    %6 = vector.shape_cast %5 : vector<1x16x216xbf16> to vector<16x216xbf16>
    %c1_7 = arith.constant 1 : index
    %c0_8 = arith.constant 0 : index
    %c0_9 = arith.constant 0 : index
    %7 = vector.load %arg2[%c1_7, %c0_8, %c0_9] : memref<27x8x16xbf16, #tpu.memory_space<vmem>>, vector<1x8x16xbf16>
    %8 = vector.shape_cast %7 : vector<1x8x16xbf16> to vector<8x16xbf16>
    %cst_10 = arith.constant dense<0.000000e+00> : vector<8x216xf32>
    %9 = tpu.matmul %8, %6, %cst_10 {dimension_numbers = #tpu.dot_dimension_numbers<[1], [0], [0], [1], [0, 0, 1, 1], [], []>} : vector<8x16xbf16>, vector<16x216xbf16>, vector<8x216xf32> -> vector<8x216xf32>
    %10 = arith.addf %4, %9 : vector<8x216xf32>
    %c0_11 = arith.constant 0 : index
    %c0_12 = arith.constant 0 : index
    %c2 = arith.constant 2 : index
    %11 = vector.load %arg1[%c0_11, %c0_12, %c2] : memref<1x16x302xbf16, #tpu.memory_space<vmem>>, vector<1x16x216xbf16>
    %12 = vector.shape_cast %11 : vector<1x16x216xbf16> to vector<16x216xbf16>
    %c2_13 = arith.constant 2 : index
    %c0_14 = arith.constant 0 : index
    %c0_15 = arith.constant 0 : index
    %13 = vector.load %arg2[%c2_13, %c0_14, %c0_15] : memref<27x8x16xbf16, #tpu.memory_space<vmem>>, vector<1x8x16xbf16>
    %14 = vector.shape_cast %13 : vector<1x8x16xbf16> to vector<8x16xbf16>
    %cst_16 = arith.constant dense<0.000000e+00> : vector<8x216xf32>
    %15 = tpu.matmul %14, %12, %cst_16 {dimension_numbers = #tpu.dot_dimension_numbers<[1], [0], [0], [1], [0, 0, 1, 1], [], []>} : vector<8x16xbf16>, vector<16x216xbf16>, vector<8x216xf32> -> vector<8x216xf32>
    %16 = arith.addf %10, %15 : vector<8x216xf32>
    %c0_17 = arith.constant 0 : index
    %c0_18 = arith.constant 0 : index
    %c6 = arith.constant 6 : index
    %17 = vector.load %arg1[%c0_17, %c0_18, %c6] : memref<1x16x302xbf16, #tpu.memory_space<vmem>>, vector<1x16x216xbf16>
    %18 = vector.shape_cast %17 : vector<1x16x216xbf16> to vector<16x216xbf16>
    %c3 = arith.constant 3 : index
    %c0_19 = arith.constant 0 : index
    %c0_20 = arith.constant 0 : index
    %19 = vector.load %arg2[%c3, %c0_19, %c0_20] : memref<27x8x16xbf16, #tpu.memory_space<vmem>>, vector<1x8x16xbf16>
    %20 = vector.shape_cast %19 : vector<1x8x16xbf16> to vector<8x16xbf16>
    %cst_21 = arith.constant dense<0.000000e+00> : vector<8x216xf32>
    %21 = tpu.matmul %20, %18, %cst_21 {dimension_numbers = #tpu.dot_dimension_numbers<[1], [0], [0], [1], [0, 0, 1, 1], [], []>} : vector<8x16xbf16>, vector<16x216xbf16>, vector<8x216xf32> -> vector<8x216xf32>
    %22 = arith.addf %16, %21 : vector<8x216xf32>
    %c0_22 = arith.constant 0 : index
    %c0_23 = arith.constant 0 : index
    %c7 = arith.constant 7 : index
    %23 = vector.load %arg1[%c0_22, %c0_23, %c7] : memref<1x16x302xbf16, #tpu.memory_space<vmem>>, vector<1x16x216xbf16>
    %24 = vector.shape_cast %23 : vector<1x16x216xbf16> to vector<16x216xbf16>
    %c4 = arith.constant 4 : index
    %c0_24 = arith.constant 0 : index
    %c0_25 = arith.constant 0 : index
    %25 = vector.load %arg2[%c4, %c0_24, %c0_25] : memref<27x8x16xbf16, #tpu.memory_space<vmem>>, vector<1x8x16xbf16>
    %26 = vector.shape_cast %25 : vector<1x8x16xbf16> to vector<8x16xbf16>
    %cst_26 = arith.constant dense<0.000000e+00> : vector<8x216xf32>
    %27 = tpu.matmul %26, %24, %cst_26 {dimension_numbers = #tpu.dot_dimension_numbers<[1], [0], [0], [1], [0, 0, 1, 1], [], []>} : vector<8x16xbf16>, vector<16x216xbf16>, vector<8x216xf32> -> vector<8x216xf32>
    %28 = arith.addf %22, %27 : vector<8x216xf32>
    %c0_27 = arith.constant 0 : index
    %c0_28 = arith.constant 0 : index
    %c8 = arith.constant 8 : index
    %29 = vector.load %arg1[%c0_27, %c0_28, %c8] : memref<1x16x302xbf16, #tpu.memory_space<vmem>>, vector<1x16x216xbf16>
    %30 = vector.shape_cast %29 : vector<1x16x216xbf16> to vector<16x216xbf16>
    %c5 = arith.constant 5 : index
    %c0_29 = arith.constant 0 : index
    %c0_30 = arith.constant 0 : index
    %31 = vector.load %arg2[%c5, %c0_29, %c0_30] : memref<27x8x16xbf16, #tpu.memory_space<vmem>>, vector<1x8x16xbf16>
    %32 = vector.shape_cast %31 : vector<1x8x16xbf16> to vector<8x16xbf16>
    %cst_31 = arith.constant dense<0.000000e+00> : vector<8x216xf32>
    %33 = tpu.matmul %32, %30, %cst_31 {dimension_numbers = #tpu.dot_dimension_numbers<[1], [0], [0], [1], [0, 0, 1, 1], [], []>} : vector<8x16xbf16>, vector<16x216xbf16>, vector<8x216xf32> -> vector<8x216xf32>
    %34 = arith.addf %28, %33 : vector<8x216xf32>
    %c0_32 = arith.constant 0 : index
    %c0_33 = arith.constant 0 : index
    %c12 = arith.constant 12 : index
    %35 = vector.load %arg1[%c0_32, %c0_33, %c12] : memref<1x16x302xbf16, #tpu.memory_space<vmem>>, vector<1x16x216xbf16>
    %36 = vector.shape_cast %35 : vector<1x16x216xbf16> to vector<16x216xbf16>
    %c6_34 = arith.constant 6 : index
    %c0_35 = arith.constant 0 : index
    %c0_36 = arith.constant 0 : index
    %37 = vector.load %arg2[%c6_34, %c0_35, %c0_36] : memref<27x8x16xbf16, #tpu.memory_space<vmem>>, vector<1x8x16xbf16>
    %38 = vector.shape_cast %37 : vector<1x8x16xbf16> to vector<8x16xbf16>
    %cst_37 = arith.constant dense<0.000000e+00> : vector<8x216xf32>
    %39 = tpu.matmul %38, %36, %cst_37 {dimension_numbers = #tpu.dot_dimension_numbers<[1], [0], [0], [1], [0, 0, 1, 1], [], []>} : vector<8x16xbf16>, vector<16x216xbf16>, vector<8x216xf32> -> vector<8x216xf32>
    %40 = arith.addf %34, %39 : vector<8x216xf32>
    %c0_38 = arith.constant 0 : index
    %c0_39 = arith.constant 0 : index
    %c13 = arith.constant 13 : index
    %41 = vector.load %arg1[%c0_38, %c0_39, %c13] : memref<1x16x302xbf16, #tpu.memory_space<vmem>>, vector<1x16x216xbf16>
    %42 = vector.shape_cast %41 : vector<1x16x216xbf16> to vector<16x216xbf16>
    %c7_40 = arith.constant 7 : index
    %c0_41 = arith.constant 0 : index
    %c0_42 = arith.constant 0 : index
    %43 = vector.load %arg2[%c7_40, %c0_41, %c0_42] : memref<27x8x16xbf16, #tpu.memory_space<vmem>>, vector<1x8x16xbf16>
    %44 = vector.shape_cast %43 : vector<1x8x16xbf16> to vector<8x16xbf16>
    %cst_43 = arith.constant dense<0.000000e+00> : vector<8x216xf32>
    %45 = tpu.matmul %44, %42, %cst_43 {dimension_numbers = #tpu.dot_dimension_numbers<[1], [0], [0], [1], [0, 0, 1, 1], [], []>} : vector<8x16xbf16>, vector<16x216xbf16>, vector<8x216xf32> -> vector<8x216xf32>
    %46 = arith.addf %40, %45 : vector<8x216xf32>
    %c0_44 = arith.constant 0 : index
    %c0_45 = arith.constant 0 : index
    %c14 = arith.constant 14 : index
    %47 = vector.load %arg1[%c0_44, %c0_45, %c14] : memref<1x16x302xbf16, #tpu.memory_space<vmem>>, vector<1x16x216xbf16>
    %48 = vector.shape_cast %47 : vector<1x16x216xbf16> to vector<16x216xbf16>
    %c8_46 = arith.constant 8 : index
    %c0_47 = arith.constant 0 : index
    %c0_48 = arith.constant 0 : index
    %49 = vector.load %arg2[%c8_46, %c0_47, %c0_48] : memref<27x8x16xbf16, #tpu.memory_space<vmem>>, vector<1x8x16xbf16>
    %50 = vector.shape_cast %49 : vector<1x8x16xbf16> to vector<8x16xbf16>
    %cst_49 = arith.constant dense<0.000000e+00> : vector<8x216xf32>
    %51 = tpu.matmul %50, %48, %cst_49 {dimension_numbers = #tpu.dot_dimension_numbers<[1], [0], [0], [1], [0, 0, 1, 1], [], []>} : vector<8x16xbf16>, vector<16x216xbf16>, vector<8x216xf32> -> vector<8x216xf32>
    %52 = arith.addf %46, %51 : vector<8x216xf32>
    %c0_50 = arith.constant 0 : index
    %c0_51 = arith.constant 0 : index
    %c36 = arith.constant 36 : index
    %53 = vector.load %arg1[%c0_50, %c0_51, %c36] : memref<1x16x302xbf16, #tpu.memory_space<vmem>>, vector<1x16x216xbf16>
    %54 = vector.shape_cast %53 : vector<1x16x216xbf16> to vector<16x216xbf16>
    %c9 = arith.constant 9 : index
    %c0_52 = arith.constant 0 : index
    %c0_53 = arith.constant 0 : index
    %55 = vector.load %arg2[%c9, %c0_52, %c0_53] : memref<27x8x16xbf16, #tpu.memory_space<vmem>>, vector<1x8x16xbf16>
    %56 = vector.shape_cast %55 : vector<1x8x16xbf16> to vector<8x16xbf16>
    %cst_54 = arith.constant dense<0.000000e+00> : vector<8x216xf32>
    %57 = tpu.matmul %56, %54, %cst_54 {dimension_numbers = #tpu.dot_dimension_numbers<[1], [0], [0], [1], [0, 0, 1, 1], [], []>} : vector<8x16xbf16>, vector<16x216xbf16>, vector<8x216xf32> -> vector<8x216xf32>
    %58 = arith.addf %52, %57 : vector<8x216xf32>
    %c0_55 = arith.constant 0 : index
    %c0_56 = arith.constant 0 : index
    %c37 = arith.constant 37 : index
    %59 = vector.load %arg1[%c0_55, %c0_56, %c37] : memref<1x16x302xbf16, #tpu.memory_space<vmem>>, vector<1x16x216xbf16>
    %60 = vector.shape_cast %59 : vector<1x16x216xbf16> to vector<16x216xbf16>
    %c10 = arith.constant 10 : index
    %c0_57 = arith.constant 0 : index
    %c0_58 = arith.constant 0 : index
    %61 = vector.load %arg2[%c10, %c0_57, %c0_58] : memref<27x8x16xbf16, #tpu.memory_space<vmem>>, vector<1x8x16xbf16>
    %62 = vector.shape_cast %61 : vector<1x8x16xbf16> to vector<8x16xbf16>
    %cst_59 = arith.constant dense<0.000000e+00> : vector<8x216xf32>
    %63 = tpu.matmul %62, %60, %cst_59 {dimension_numbers = #tpu.dot_dimension_numbers<[1], [0], [0], [1], [0, 0, 1, 1], [], []>} : vector<8x16xbf16>, vector<16x216xbf16>, vector<8x216xf32> -> vector<8x216xf32>
    %64 = arith.addf %58, %63 : vector<8x216xf32>
    %c0_60 = arith.constant 0 : index
    %c0_61 = arith.constant 0 : index
    %c38 = arith.constant 38 : index
    %65 = vector.load %arg1[%c0_60, %c0_61, %c38] : memref<1x16x302xbf16, #tpu.memory_space<vmem>>, vector<1x16x216xbf16>
    %66 = vector.shape_cast %65 : vector<1x16x216xbf16> to vector<16x216xbf16>
    %c11 = arith.constant 11 : index
    %c0_62 = arith.constant 0 : index
    %c0_63 = arith.constant 0 : index
    %67 = vector.load %arg2[%c11, %c0_62, %c0_63] : memref<27x8x16xbf16, #tpu.memory_space<vmem>>, vector<1x8x16xbf16>
    %68 = vector.shape_cast %67 : vector<1x8x16xbf16> to vector<8x16xbf16>
    %cst_64 = arith.constant dense<0.000000e+00> : vector<8x216xf32>
    %69 = tpu.matmul %68, %66, %cst_64 {dimension_numbers = #tpu.dot_dimension_numbers<[1], [0], [0], [1], [0, 0, 1, 1], [], []>} : vector<8x16xbf16>, vector<16x216xbf16>, vector<8x216xf32> -> vector<8x216xf32>
    %70 = arith.addf %64, %69 : vector<8x216xf32>
    %c0_65 = arith.constant 0 : index
    %c0_66 = arith.constant 0 : index
    %c42 = arith.constant 42 : index
    %71 = vector.load %arg1[%c0_65, %c0_66, %c42] : memref<1x16x302xbf16, #tpu.memory_space<vmem>>, vector<1x16x216xbf16>
    %72 = vector.shape_cast %71 : vector<1x16x216xbf16> to vector<16x216xbf16>
    %c12_67 = arith.constant 12 : index
    %c0_68 = arith.constant 0 : index
    %c0_69 = arith.constant 0 : index
    %73 = vector.load %arg2[%c12_67, %c0_68, %c0_69] : memref<27x8x16xbf16, #tpu.memory_space<vmem>>, vector<1x8x16xbf16>
    %74 = vector.shape_cast %73 : vector<1x8x16xbf16> to vector<8x16xbf16>
    %cst_70 = arith.constant dense<0.000000e+00> : vector<8x216xf32>
    %75 = tpu.matmul %74, %72, %cst_70 {dimension_numbers = #tpu.dot_dimension_numbers<[1], [0], [0], [1], [0, 0, 1, 1], [], []>} : vector<8x16xbf16>, vector<16x216xbf16>, vector<8x216xf32> -> vector<8x216xf32>
    %76 = arith.addf %70, %75 : vector<8x216xf32>
    %c0_71 = arith.constant 0 : index
    %c0_72 = arith.constant 0 : index
    %c43 = arith.constant 43 : index
    %77 = vector.load %arg1[%c0_71, %c0_72, %c43] : memref<1x16x302xbf16, #tpu.memory_space<vmem>>, vector<1x16x216xbf16>
    %78 = vector.shape_cast %77 : vector<1x16x216xbf16> to vector<16x216xbf16>
    %c13_73 = arith.constant 13 : index
    %c0_74 = arith.constant 0 : index
    %c0_75 = arith.constant 0 : index
    %79 = vector.load %arg2[%c13_73, %c0_74, %c0_75] : memref<27x8x16xbf16, #tpu.memory_space<vmem>>, vector<1x8x16xbf16>
    %80 = vector.shape_cast %79 : vector<1x8x16xbf16> to vector<8x16xbf16>
    %cst_76 = arith.constant dense<0.000000e+00> : vector<8x216xf32>
    %81 = tpu.matmul %80, %78, %cst_76 {dimension_numbers = #tpu.dot_dimension_numbers<[1], [0], [0], [1], [0, 0, 1, 1], [], []>} : vector<8x16xbf16>, vector<16x216xbf16>, vector<8x216xf32> -> vector<8x216xf32>
    %82 = arith.addf %76, %81 : vector<8x216xf32>
    %c0_77 = arith.constant 0 : index
    %c0_78 = arith.constant 0 : index
    %c44 = arith.constant 44 : index
    %83 = vector.load %arg1[%c0_77, %c0_78, %c44] : memref<1x16x302xbf16, #tpu.memory_space<vmem>>, vector<1x16x216xbf16>
    %84 = vector.shape_cast %83 : vector<1x16x216xbf16> to vector<16x216xbf16>
    %c14_79 = arith.constant 14 : index
    %c0_80 = arith.constant 0 : index
    %c0_81 = arith.constant 0 : index
    %85 = vector.load %arg2[%c14_79, %c0_80, %c0_81] : memref<27x8x16xbf16, #tpu.memory_space<vmem>>, vector<1x8x16xbf16>
    %86 = vector.shape_cast %85 : vector<1x8x16xbf16> to vector<8x16xbf16>
    %cst_82 = arith.constant dense<0.000000e+00> : vector<8x216xf32>
    %87 = tpu.matmul %86, %84, %cst_82 {dimension_numbers = #tpu.dot_dimension_numbers<[1], [0], [0], [1], [0, 0, 1, 1], [], []>} : vector<8x16xbf16>, vector<16x216xbf16>, vector<8x216xf32> -> vector<8x216xf32>
    %88 = arith.addf %82, %87 : vector<8x216xf32>
    %c0_83 = arith.constant 0 : index
    %c0_84 = arith.constant 0 : index
    %c48 = arith.constant 48 : index
    %89 = vector.load %arg1[%c0_83, %c0_84, %c48] : memref<1x16x302xbf16, #tpu.memory_space<vmem>>, vector<1x16x216xbf16>
    %90 = vector.shape_cast %89 : vector<1x16x216xbf16> to vector<16x216xbf16>
    %c15 = arith.constant 15 : index
    %c0_85 = arith.constant 0 : index
    %c0_86 = arith.constant 0 : index
    %91 = vector.load %arg2[%c15, %c0_85, %c0_86] : memref<27x8x16xbf16, #tpu.memory_space<vmem>>, vector<1x8x16xbf16>
    %92 = vector.shape_cast %91 : vector<1x8x16xbf16> to vector<8x16xbf16>
    %cst_87 = arith.constant dense<0.000000e+00> : vector<8x216xf32>
    %93 = tpu.matmul %92, %90, %cst_87 {dimension_numbers = #tpu.dot_dimension_numbers<[1], [0], [0], [1], [0, 0, 1, 1], [], []>} : vector<8x16xbf16>, vector<16x216xbf16>, vector<8x216xf32> -> vector<8x216xf32>
    %94 = arith.addf %88, %93 : vector<8x216xf32>
    %c0_88 = arith.constant 0 : index
    %c0_89 = arith.constant 0 : index
    %c49 = arith.constant 49 : index
    %95 = vector.load %arg1[%c0_88, %c0_89, %c49] : memref<1x16x302xbf16, #tpu.memory_space<vmem>>, vector<1x16x216xbf16>
    %96 = vector.shape_cast %95 : vector<1x16x216xbf16> to vector<16x216xbf16>
    %c16 = arith.constant 16 : index
    %c0_90 = arith.constant 0 : index
    %c0_91 = arith.constant 0 : index
    %97 = vector.load %arg2[%c16, %c0_90, %c0_91] : memref<27x8x16xbf16, #tpu.memory_space<vmem>>, vector<1x8x16xbf16>
    %98 = vector.shape_cast %97 : vector<1x8x16xbf16> to vector<8x16xbf16>
    %cst_92 = arith.constant dense<0.000000e+00> : vector<8x216xf32>
    %99 = tpu.matmul %98, %96, %cst_92 {dimension_numbers = #tpu.dot_dimension_numbers<[1], [0], [0], [1], [0, 0, 1, 1], [], []>} : vector<8x16xbf16>, vector<16x216xbf16>, vector<8x216xf32> -> vector<8x216xf32>
    %100 = arith.addf %94, %99 : vector<8x216xf32>
    %c0_93 = arith.constant 0 : index
    %c0_94 = arith.constant 0 : index
    %c50 = arith.constant 50 : index
    %101 = vector.load %arg1[%c0_93, %c0_94, %c50] : memref<1x16x302xbf16, #tpu.memory_space<vmem>>, vector<1x16x216xbf16>
    %102 = vector.shape_cast %101 : vector<1x16x216xbf16> to vector<16x216xbf16>
    %c17 = arith.constant 17 : index
    %c0_95 = arith.constant 0 : index
    %c0_96 = arith.constant 0 : index
    %103 = vector.load %arg2[%c17, %c0_95, %c0_96] : memref<27x8x16xbf16, #tpu.memory_space<vmem>>, vector<1x8x16xbf16>
    %104 = vector.shape_cast %103 : vector<1x8x16xbf16> to vector<8x16xbf16>
    %cst_97 = arith.constant dense<0.000000e+00> : vector<8x216xf32>
    %105 = tpu.matmul %104, %102, %cst_97 {dimension_numbers = #tpu.dot_dimension_numbers<[1], [0], [0], [1], [0, 0, 1, 1], [], []>} : vector<8x16xbf16>, vector<16x216xbf16>, vector<8x216xf32> -> vector<8x216xf32>
    %106 = arith.addf %100, %105 : vector<8x216xf32>
    %c0_98 = arith.constant 0 : index
    %c0_99 = arith.constant 0 : index
    %c72 = arith.constant 72 : index
    %107 = vector.load %arg1[%c0_98, %c0_99, %c72] : memref<1x16x302xbf16, #tpu.memory_space<vmem>>, vector<1x16x216xbf16>
    %108 = vector.shape_cast %107 : vector<1x16x216xbf16> to vector<16x216xbf16>
    %c18 = arith.constant 18 : index
    %c0_100 = arith.constant 0 : index
    %c0_101 = arith.constant 0 : index
    %109 = vector.load %arg2[%c18, %c0_100, %c0_101] : memref<27x8x16xbf16, #tpu.memory_space<vmem>>, vector<1x8x16xbf16>
    %110 = vector.shape_cast %109 : vector<1x8x16xbf16> to vector<8x16xbf16>
    %cst_102 = arith.constant dense<0.000000e+00> : vector<8x216xf32>
    %111 = tpu.matmul %110, %108, %cst_102 {dimension_numbers = #tpu.dot_dimension_numbers<[1], [0], [0], [1], [0, 0, 1, 1], [], []>} : vector<8x16xbf16>, vector<16x216xbf16>, vector<8x216xf32> -> vector<8x216xf32>
    %112 = arith.addf %106, %111 : vector<8x216xf32>
    %c0_103 = arith.constant 0 : index
    %c0_104 = arith.constant 0 : index
    %c73 = arith.constant 73 : index
    %113 = vector.load %arg1[%c0_103, %c0_104, %c73] : memref<1x16x302xbf16, #tpu.memory_space<vmem>>, vector<1x16x216xbf16>
    %114 = vector.shape_cast %113 : vector<1x16x216xbf16> to vector<16x216xbf16>
    %c19 = arith.constant 19 : index
    %c0_105 = arith.constant 0 : index
    %c0_106 = arith.constant 0 : index
    %115 = vector.load %arg2[%c19, %c0_105, %c0_106] : memref<27x8x16xbf16, #tpu.memory_space<vmem>>, vector<1x8x16xbf16>
    %116 = vector.shape_cast %115 : vector<1x8x16xbf16> to vector<8x16xbf16>
    %cst_107 = arith.constant dense<0.000000e+00> : vector<8x216xf32>
    %117 = tpu.matmul %116, %114, %cst_107 {dimension_numbers = #tpu.dot_dimension_numbers<[1], [0], [0], [1], [0, 0, 1, 1], [], []>} : vector<8x16xbf16>, vector<16x216xbf16>, vector<8x216xf32> -> vector<8x216xf32>
    %118 = arith.addf %112, %117 : vector<8x216xf32>
    %c0_108 = arith.constant 0 : index
    %c0_109 = arith.constant 0 : index
    %c74 = arith.constant 74 : index
    %119 = vector.load %arg1[%c0_108, %c0_109, %c74] : memref<1x16x302xbf16, #tpu.memory_space<vmem>>, vector<1x16x216xbf16>
    %120 = vector.shape_cast %119 : vector<1x16x216xbf16> to vector<16x216xbf16>
    %c20 = arith.constant 20 : index
    %c0_110 = arith.constant 0 : index
    %c0_111 = arith.constant 0 : index
    %121 = vector.load %arg2[%c20, %c0_110, %c0_111] : memref<27x8x16xbf16, #tpu.memory_space<vmem>>, vector<1x8x16xbf16>
    %122 = vector.shape_cast %121 : vector<1x8x16xbf16> to vector<8x16xbf16>
    %cst_112 = arith.constant dense<0.000000e+00> : vector<8x216xf32>
    %123 = tpu.matmul %122, %120, %cst_112 {dimension_numbers = #tpu.dot_dimension_numbers<[1], [0], [0], [1], [0, 0, 1, 1], [], []>} : vector<8x16xbf16>, vector<16x216xbf16>, vector<8x216xf32> -> vector<8x216xf32>
    %124 = arith.addf %118, %123 : vector<8x216xf32>
    %c0_113 = arith.constant 0 : index
    %c0_114 = arith.constant 0 : index
    %c78 = arith.constant 78 : index
    %125 = vector.load %arg1[%c0_113, %c0_114, %c78] : memref<1x16x302xbf16, #tpu.memory_space<vmem>>, vector<1x16x216xbf16>
    %126 = vector.shape_cast %125 : vector<1x16x216xbf16> to vector<16x216xbf16>
    %c21 = arith.constant 21 : index
    %c0_115 = arith.constant 0 : index
    %c0_116 = arith.constant 0 : index
    %127 = vector.load %arg2[%c21, %c0_115, %c0_116] : memref<27x8x16xbf16, #tpu.memory_space<vmem>>, vector<1x8x16xbf16>
    %128 = vector.shape_cast %127 : vector<1x8x16xbf16> to vector<8x16xbf16>
    %cst_117 = arith.constant dense<0.000000e+00> : vector<8x216xf32>
    %129 = tpu.matmul %128, %126, %cst_117 {dimension_numbers = #tpu.dot_dimension_numbers<[1], [0], [0], [1], [0, 0, 1, 1], [], []>} : vector<8x16xbf16>, vector<16x216xbf16>, vector<8x216xf32> -> vector<8x216xf32>
    %130 = arith.addf %124, %129 : vector<8x216xf32>
    %c0_118 = arith.constant 0 : index
    %c0_119 = arith.constant 0 : index
    %c79 = arith.constant 79 : index
    %131 = vector.load %arg1[%c0_118, %c0_119, %c79] : memref<1x16x302xbf16, #tpu.memory_space<vmem>>, vector<1x16x216xbf16>
    %132 = vector.shape_cast %131 : vector<1x16x216xbf16> to vector<16x216xbf16>
    %c22 = arith.constant 22 : index
    %c0_120 = arith.constant 0 : index
    %c0_121 = arith.constant 0 : index
    %133 = vector.load %arg2[%c22, %c0_120, %c0_121] : memref<27x8x16xbf16, #tpu.memory_space<vmem>>, vector<1x8x16xbf16>
    %134 = vector.shape_cast %133 : vector<1x8x16xbf16> to vector<8x16xbf16>
    %cst_122 = arith.constant dense<0.000000e+00> : vector<8x216xf32>
    %135 = tpu.matmul %134, %132, %cst_122 {dimension_numbers = #tpu.dot_dimension_numbers<[1], [0], [0], [1], [0, 0, 1, 1], [], []>} : vector<8x16xbf16>, vector<16x216xbf16>, vector<8x216xf32> -> vector<8x216xf32>
    %136 = arith.addf %130, %135 : vector<8x216xf32>
    %c0_123 = arith.constant 0 : index
    %c0_124 = arith.constant 0 : index
    %c80 = arith.constant 80 : index
    %137 = vector.load %arg1[%c0_123, %c0_124, %c80] : memref<1x16x302xbf16, #tpu.memory_space<vmem>>, vector<1x16x216xbf16>
    %138 = vector.shape_cast %137 : vector<1x16x216xbf16> to vector<16x216xbf16>
    %c23 = arith.constant 23 : index
    %c0_125 = arith.constant 0 : index
    %c0_126 = arith.constant 0 : index
    %139 = vector.load %arg2[%c23, %c0_125, %c0_126] : memref<27x8x16xbf16, #tpu.memory_space<vmem>>, vector<1x8x16xbf16>
    %140 = vector.shape_cast %139 : vector<1x8x16xbf16> to vector<8x16xbf16>
    %cst_127 = arith.constant dense<0.000000e+00> : vector<8x216xf32>
    %141 = tpu.matmul %140, %138, %cst_127 {dimension_numbers = #tpu.dot_dimension_numbers<[1], [0], [0], [1], [0, 0, 1, 1], [], []>} : vector<8x16xbf16>, vector<16x216xbf16>, vector<8x216xf32> -> vector<8x216xf32>
    %142 = arith.addf %136, %141 : vector<8x216xf32>
    %c0_128 = arith.constant 0 : index
    %c0_129 = arith.constant 0 : index
    %c84 = arith.constant 84 : index
    %143 = vector.load %arg1[%c0_128, %c0_129, %c84] : memref<1x16x302xbf16, #tpu.memory_space<vmem>>, vector<1x16x216xbf16>
    %144 = vector.shape_cast %143 : vector<1x16x216xbf16> to vector<16x216xbf16>
    %c24 = arith.constant 24 : index
    %c0_130 = arith.constant 0 : index
    %c0_131 = arith.constant 0 : index
    %145 = vector.load %arg2[%c24, %c0_130, %c0_131] : memref<27x8x16xbf16, #tpu.memory_space<vmem>>, vector<1x8x16xbf16>
    %146 = vector.shape_cast %145 : vector<1x8x16xbf16> to vector<8x16xbf16>
    %cst_132 = arith.constant dense<0.000000e+00> : vector<8x216xf32>
    %147 = tpu.matmul %146, %144, %cst_132 {dimension_numbers = #tpu.dot_dimension_numbers<[1], [0], [0], [1], [0, 0, 1, 1], [], []>} : vector<8x16xbf16>, vector<16x216xbf16>, vector<8x216xf32> -> vector<8x216xf32>
    %148 = arith.addf %142, %147 : vector<8x216xf32>
    %c0_133 = arith.constant 0 : index
    %c0_134 = arith.constant 0 : index
    %c85 = arith.constant 85 : index
    %149 = vector.load %arg1[%c0_133, %c0_134, %c85] : memref<1x16x302xbf16, #tpu.memory_space<vmem>>, vector<1x16x216xbf16>
    %150 = vector.shape_cast %149 : vector<1x16x216xbf16> to vector<16x216xbf16>
    %c25 = arith.constant 25 : index
    %c0_135 = arith.constant 0 : index
    %c0_136 = arith.constant 0 : index
    %151 = vector.load %arg2[%c25, %c0_135, %c0_136] : memref<27x8x16xbf16, #tpu.memory_space<vmem>>, vector<1x8x16xbf16>
    %152 = vector.shape_cast %151 : vector<1x8x16xbf16> to vector<8x16xbf16>
    %cst_137 = arith.constant dense<0.000000e+00> : vector<8x216xf32>
    %153 = tpu.matmul %152, %150, %cst_137 {dimension_numbers = #tpu.dot_dimension_numbers<[1], [0], [0], [1], [0, 0, 1, 1], [], []>} : vector<8x16xbf16>, vector<16x216xbf16>, vector<8x216xf32> -> vector<8x216xf32>
    %154 = arith.addf %148, %153 : vector<8x216xf32>
    %c0_138 = arith.constant 0 : index
    %c0_139 = arith.constant 0 : index
    %c86 = arith.constant 86 : index
    %155 = vector.load %arg1[%c0_138, %c0_139, %c86] : memref<1x16x302xbf16, #tpu.memory_space<vmem>>, vector<1x16x216xbf16>
    %156 = vector.shape_cast %155 : vector<1x16x216xbf16> to vector<16x216xbf16>
    %c26 = arith.constant 26 : index
    %c0_140 = arith.constant 0 : index
    %c0_141 = arith.constant 0 : index
    %157 = vector.load %arg2[%c26, %c0_140, %c0_141] : memref<27x8x16xbf16, #tpu.memory_space<vmem>>, vector<1x8x16xbf16>
    %158 = vector.shape_cast %157 : vector<1x8x16xbf16> to vector<8x16xbf16>
    %cst_142 = arith.constant dense<0.000000e+00> : vector<8x216xf32>
    %159 = tpu.matmul %158, %156, %cst_142 {dimension_numbers = #tpu.dot_dimension_numbers<[1], [0], [0], [1], [0, 0, 1, 1], [], []>} : vector<8x16xbf16>, vector<16x216xbf16>, vector<8x216xf32> -> vector<8x216xf32>
    %160 = arith.addf %154, %159 : vector<8x216xf32>
    %c0_143 = arith.constant 0 : index
    %c0_144 = arith.constant 0 : index
    %161 = vector.load %arg3[%c0_143, %c0_144] : memref<8x1xf32, #tpu.memory_space<vmem>>, vector<8x1xf32>
    %c0_145 = arith.constant 0 : index
    %c0_146 = arith.constant 0 : index
    %162 = vector.load %arg4[%c0_145, %c0_146] : memref<8x1xf32, #tpu.memory_space<vmem>>, vector<8x1xf32>
    %c0_147 = arith.constant 0 : index
    %c0_148 = arith.constant 0 : index
    %163 = vector.load %arg5[%c0_147, %c0_148] : memref<1x216xf32, #tpu.memory_space<vmem>>, vector<1x216xf32>
    %164 = vector.broadcast %163 : vector<1x216xf32> to vector<8x216xf32>
    %165 = arith.mulf %160, %164 : vector<8x216xf32>
    %cst_149 = arith.constant dense<0.000000e+00> : vector<8xf32>
    %166 = vector.multi_reduction <add>, %165, %cst_149 [1] : vector<8x216xf32> to vector<8xf32>
    %167 = vector.shape_cast %166 : vector<8xf32> to vector<8x1xf32>
    %168 = arith.mulf %165, %160 : vector<8x216xf32>
    %cst_150 = arith.constant dense<0.000000e+00> : vector<8xf32>
    %169 = vector.multi_reduction <add>, %168, %cst_150 [1] : vector<8x216xf32> to vector<8xf32>
    %170 = vector.shape_cast %169 : vector<8xf32> to vector<8x1xf32>
    %171 = tpu.iota {dimensions = array<i32: 0>} : vector<8x1xi32>
    %cst_151 = arith.constant 0.000000e+00 : f32
    %172 = vector.broadcast %cst_151 : f32 to vector<8x1xf32>
    %cst_152 = arith.constant 0.000000e+00 : f32
    %173 = vector.broadcast %cst_152 : f32 to vector<8x1xf32>
    %174 = vector.extract_strided_slice %167 {offsets = [0, 0], sizes = [2, 1], strides = [1, 1]} : vector<8x1xf32> to vector<2x1xf32>
    %175 = vector.shape_cast %174 : vector<2x1xf32> to vector<1x2x1xf32>
    %cst_153 = arith.constant dense<0.000000e+00> : vector<1xf32>
    %176 = vector.multi_reduction <add>, %175, %cst_153 [1, 2] : vector<1x2x1xf32> to vector<1xf32>
    %177 = vector.shape_cast %176 : vector<1xf32> to vector<1x1x1xf32>
    %178 = vector.extract %177[0, 0, 0] : f32 from vector<1x1x1xf32>
    %cst_154 = arith.constant 7.812500e-03 : f32
    %179 = arith.mulf %178, %cst_154 : f32
    %180 = vector.extract_strided_slice %170 {offsets = [0, 0], sizes = [2, 1], strides = [1, 1]} : vector<8x1xf32> to vector<2x1xf32>
    %181 = vector.shape_cast %180 : vector<2x1xf32> to vector<1x2x1xf32>
    %cst_155 = arith.constant dense<0.000000e+00> : vector<1xf32>
    %182 = vector.multi_reduction <add>, %181, %cst_155 [1, 2] : vector<1x2x1xf32> to vector<1xf32>
    %183 = vector.shape_cast %182 : vector<1xf32> to vector<1x1x1xf32>
    %184 = vector.extract %183[0, 0, 0] : f32 from vector<1x1x1xf32>
    %cst_156 = arith.constant 7.812500e-03 : f32
    %185 = arith.mulf %184, %cst_156 : f32
    %186 = arith.mulf %179, %179 : f32
    %187 = arith.subf %185, %186 : f32
    %cst_157 = arith.constant 0.000000e+00 : f32
    %188 = arith.maximumf %187, %cst_157 : f32
    %cst_158 = arith.constant 9.99999974E-6 : f32
    %189 = arith.addf %188, %cst_158 : f32
    %190 = math.rsqrt %189 : f32
    %c0_i32 = arith.constant 0 : i32
    %191 = vector.broadcast %c0_i32 : i32 to vector<8x1xi32>
    %192 = arith.cmpi sge, %171, %191 : vector<8x1xi32>
    %c2_i32 = arith.constant 2 : i32
    %193 = vector.broadcast %c2_i32 : i32 to vector<8x1xi32>
    %194 = arith.cmpi slt, %171, %193 : vector<8x1xi32>
    %195 = arith.andi %192, %194 : vector<8x1xi1>
    %196 = vector.broadcast %190 : f32 to vector<8x1xf32>
    %197 = arith.select %195, %196, %172 : vector<8x1xi1>, vector<8x1xf32>
    %198 = vector.broadcast %179 : f32 to vector<8x1xf32>
    %199 = arith.select %195, %198, %173 : vector<8x1xi1>, vector<8x1xf32>
    %200 = vector.extract_strided_slice %167 {offsets = [2, 0], sizes = [2, 1], strides = [1, 1]} : vector<8x1xf32> to vector<2x1xf32>
    %201 = vector.shape_cast %200 : vector<2x1xf32> to vector<1x2x1xf32>
    %cst_159 = arith.constant dense<0.000000e+00> : vector<1xf32>
    %202 = vector.multi_reduction <add>, %201, %cst_159 [1, 2] : vector<1x2x1xf32> to vector<1xf32>
    %203 = vector.shape_cast %202 : vector<1xf32> to vector<1x1x1xf32>
    %204 = vector.extract %203[0, 0, 0] : f32 from vector<1x1x1xf32>
    %cst_160 = arith.constant 7.812500e-03 : f32
    %205 = arith.mulf %204, %cst_160 : f32
    %206 = vector.extract_strided_slice %170 {offsets = [2, 0], sizes = [2, 1], strides = [1, 1]} : vector<8x1xf32> to vector<2x1xf32>
    %207 = vector.shape_cast %206 : vector<2x1xf32> to vector<1x2x1xf32>
    %cst_161 = arith.constant dense<0.000000e+00> : vector<1xf32>
    %208 = vector.multi_reduction <add>, %207, %cst_161 [1, 2] : vector<1x2x1xf32> to vector<1xf32>
    %209 = vector.shape_cast %208 : vector<1xf32> to vector<1x1x1xf32>
    %210 = vector.extract %209[0, 0, 0] : f32 from vector<1x1x1xf32>
    %cst_162 = arith.constant 7.812500e-03 : f32
    %211 = arith.mulf %210, %cst_162 : f32
    %212 = arith.mulf %205, %205 : f32
    %213 = arith.subf %211, %212 : f32
    %cst_163 = arith.constant 0.000000e+00 : f32
    %214 = arith.maximumf %213, %cst_163 : f32
    %cst_164 = arith.constant 9.99999974E-6 : f32
    %215 = arith.addf %214, %cst_164 : f32
    %216 = math.rsqrt %215 : f32
    %c2_i32_165 = arith.constant 2 : i32
    %217 = vector.broadcast %c2_i32_165 : i32 to vector<8x1xi32>
    %218 = arith.cmpi sge, %171, %217 : vector<8x1xi32>
    %c4_i32 = arith.constant 4 : i32
    %219 = vector.broadcast %c4_i32 : i32 to vector<8x1xi32>
    %220 = arith.cmpi slt, %171, %219 : vector<8x1xi32>
    %221 = arith.andi %218, %220 : vector<8x1xi1>
    %222 = vector.broadcast %216 : f32 to vector<8x1xf32>
    %223 = arith.select %221, %222, %197 : vector<8x1xi1>, vector<8x1xf32>
    %224 = vector.broadcast %205 : f32 to vector<8x1xf32>
    %225 = arith.select %221, %224, %199 : vector<8x1xi1>, vector<8x1xf32>
    %226 = vector.extract_strided_slice %167 {offsets = [4, 0], sizes = [2, 1], strides = [1, 1]} : vector<8x1xf32> to vector<2x1xf32>
    %227 = vector.shape_cast %226 : vector<2x1xf32> to vector<1x2x1xf32>
    %cst_166 = arith.constant dense<0.000000e+00> : vector<1xf32>
    %228 = vector.multi_reduction <add>, %227, %cst_166 [1, 2] : vector<1x2x1xf32> to vector<1xf32>
    %229 = vector.shape_cast %228 : vector<1xf32> to vector<1x1x1xf32>
    %230 = vector.extract %229[0, 0, 0] : f32 from vector<1x1x1xf32>
    %cst_167 = arith.constant 7.812500e-03 : f32
    %231 = arith.mulf %230, %cst_167 : f32
    %232 = vector.extract_strided_slice %170 {offsets = [4, 0], sizes = [2, 1], strides = [1, 1]} : vector<8x1xf32> to vector<2x1xf32>
    %233 = vector.shape_cast %232 : vector<2x1xf32> to vector<1x2x1xf32>
    %cst_168 = arith.constant dense<0.000000e+00> : vector<1xf32>
    %234 = vector.multi_reduction <add>, %233, %cst_168 [1, 2] : vector<1x2x1xf32> to vector<1xf32>
    %235 = vector.shape_cast %234 : vector<1xf32> to vector<1x1x1xf32>
    %236 = vector.extract %235[0, 0, 0] : f32 from vector<1x1x1xf32>
    %cst_169 = arith.constant 7.812500e-03 : f32
    %237 = arith.mulf %236, %cst_169 : f32
    %238 = arith.mulf %231, %231 : f32
    %239 = arith.subf %237, %238 : f32
    %cst_170 = arith.constant 0.000000e+00 : f32
    %240 = arith.maximumf %239, %cst_170 : f32
    %cst_171 = arith.constant 9.99999974E-6 : f32
    %241 = arith.addf %240, %cst_171 : f32
    %242 = math.rsqrt %241 : f32
    %c4_i32_172 = arith.constant 4 : i32
    %243 = vector.broadcast %c4_i32_172 : i32 to vector<8x1xi32>
    %244 = arith.cmpi sge, %171, %243 : vector<8x1xi32>
    %c6_i32 = arith.constant 6 : i32
    %245 = vector.broadcast %c6_i32 : i32 to vector<8x1xi32>
    %246 = arith.cmpi slt, %171, %245 : vector<8x1xi32>
    %247 = arith.andi %244, %246 : vector<8x1xi1>
    %248 = vector.broadcast %242 : f32 to vector<8x1xf32>
    %249 = arith.select %247, %248, %223 : vector<8x1xi1>, vector<8x1xf32>
    %250 = vector.broadcast %231 : f32 to vector<8x1xf32>
    %251 = arith.select %247, %250, %225 : vector<8x1xi1>, vector<8x1xf32>
    %252 = vector.extract_strided_slice %167 {offsets = [6, 0], sizes = [2, 1], strides = [1, 1]} : vector<8x1xf32> to vector<2x1xf32>
    %253 = vector.shape_cast %252 : vector<2x1xf32> to vector<1x2x1xf32>
    %cst_173 = arith.constant dense<0.000000e+00> : vector<1xf32>
    %254 = vector.multi_reduction <add>, %253, %cst_173 [1, 2] : vector<1x2x1xf32> to vector<1xf32>
    %255 = vector.shape_cast %254 : vector<1xf32> to vector<1x1x1xf32>
    %256 = vector.extract %255[0, 0, 0] : f32 from vector<1x1x1xf32>
    %cst_174 = arith.constant 7.812500e-03 : f32
    %257 = arith.mulf %256, %cst_174 : f32
    %258 = vector.extract_strided_slice %170 {offsets = [6, 0], sizes = [2, 1], strides = [1, 1]} : vector<8x1xf32> to vector<2x1xf32>
    %259 = vector.shape_cast %258 : vector<2x1xf32> to vector<1x2x1xf32>
    %cst_175 = arith.constant dense<0.000000e+00> : vector<1xf32>
    %260 = vector.multi_reduction <add>, %259, %cst_175 [1, 2] : vector<1x2x1xf32> to vector<1xf32>
    %261 = vector.shape_cast %260 : vector<1xf32> to vector<1x1x1xf32>
    %262 = vector.extract %261[0, 0, 0] : f32 from vector<1x1x1xf32>
    %cst_176 = arith.constant 7.812500e-03 : f32
    %263 = arith.mulf %262, %cst_176 : f32
    %264 = arith.mulf %257, %257 : f32
    %265 = arith.subf %263, %264 : f32
    %cst_177 = arith.constant 0.000000e+00 : f32
    %266 = arith.maximumf %265, %cst_177 : f32
    %cst_178 = arith.constant 9.99999974E-6 : f32
    %267 = arith.addf %266, %cst_178 : f32
    %268 = math.rsqrt %267 : f32
    %c6_i32_179 = arith.constant 6 : i32
    %269 = vector.broadcast %c6_i32_179 : i32 to vector<8x1xi32>
    %270 = arith.cmpi sge, %171, %269 : vector<8x1xi32>
    %c8_i32 = arith.constant 8 : i32
    %271 = vector.broadcast %c8_i32 : i32 to vector<8x1xi32>
    %272 = arith.cmpi slt, %171, %271 : vector<8x1xi32>
    %273 = arith.andi %270, %272 : vector<8x1xi1>
    %274 = vector.broadcast %268 : f32 to vector<8x1xf32>
    %275 = arith.select %273, %274, %249 : vector<8x1xi1>, vector<8x1xf32>
    %276 = vector.broadcast %257 : f32 to vector<8x1xf32>
    %277 = arith.select %273, %276, %251 : vector<8x1xi1>, vector<8x1xf32>
    %278 = arith.mulf %161, %275 : vector<8x1xf32>
    %279 = arith.mulf %277, %278 : vector<8x1xf32>
    %280 = arith.subf %162, %279 : vector<8x1xf32>
    %281 = vector.broadcast %278 : vector<8x1xf32> to vector<8x216xf32>
    %282 = arith.mulf %160, %281 : vector<8x216xf32>
    %283 = vector.broadcast %280 : vector<8x1xf32> to vector<8x216xf32>
    %284 = arith.addf %282, %283 : vector<8x216xf32>
    %cst_180 = arith.constant 0.000000e+00 : f32
    %285 = vector.broadcast %cst_180 : f32 to vector<8x216xf32>
    %286 = arith.maximumf %284, %285 : vector<8x216xf32>
    %c0_181 = arith.constant 0 : index
    %c0_182 = arith.constant 0 : index
    %287 = vector.load %arg6[%c0_181, %c0_182] : memref<4x8xbf16, #tpu.memory_space<vmem>>, vector<4x8xbf16>
    %288 = arith.truncf %286 : vector<8x216xf32> to vector<8x216xbf16>
    %cst_183 = arith.constant dense<0.000000e+00> : vector<4x216xf32>
    %289 = tpu.matmul %287, %288, %cst_183 {dimension_numbers = #tpu.dot_dimension_numbers<[1], [0], [0], [1], [0, 0, 1, 1], [], []>} : vector<4x8xbf16>, vector<8x216xbf16>, vector<4x216xf32> -> vector<4x216xf32>
    %c0_184 = arith.constant 0 : index
    %c0_185 = arith.constant 0 : index
    %c0_186 = arith.constant 0 : index
    %290 = vector.load %arg7[%c0_184, %c0_185, %c0_186] : memref<1x4x216xf32, #tpu.memory_space<vmem>>, vector<1x4x216xf32>
    %291 = vector.shape_cast %290 : vector<1x4x216xf32> to vector<4x216xf32>
    %292 = vector.shape_cast %289 : vector<4x216xf32> to vector<1x4x216xf32>
    tpu.vector_store %arg7[%c0_184, %c0_185, %c0_186], %292 {strides = array<i32>} : memref<1x4x216xf32, #tpu.memory_space<vmem>>, vector<1x4x216xf32>,
    return
  }
  func.func @transform_0(%arg0: i32) -> (i32, i32, i32) {
    %c0_i32 = arith.constant 0 : i32
    %c0_i32_0 = arith.constant 0 : i32
    %c0_i32_1 = arith.constant 0 : i32
    return %arg0, %c0_i32, %c0_i32_0 : i32, i32, i32
  }
  func.func @transform_1(%arg0: i32) -> (i32, i32, i32) {
    %c0_i32 = arith.constant 0 : i32
    %c0_i32_0 = arith.constant 0 : i32
    %c0_i32_1 = arith.constant 0 : i32
    %c0_i32_2 = arith.constant 0 : i32
    return %c0_i32, %c0_i32_0, %c0_i32_1 : i32, i32, i32
  }
  func.func @transform_2(%arg0: i32) -> (i32, i32) {
    %c0_i32 = arith.constant 0 : i32
    %c0_i32_0 = arith.constant 0 : i32
    %c0_i32_1 = arith.constant 0 : i32
    return %c0_i32, %c0_i32_0 : i32, i32
  }
  func.func @transform_3(%arg0: i32) -> (i32, i32) {
    %c0_i32 = arith.constant 0 : i32
    %c0_i32_0 = arith.constant 0 : i32
    %c0_i32_1 = arith.constant 0 : i32
    return %c0_i32, %c0_i32_0 : i32, i32
  }
  func.func @transform_4(%arg0: i32) -> (i32, i32) {
    %c0_i32 = arith.constant 0 : i32
    %c0_i32_0 = arith.constant 0 : i32
    %c0_i32_1 = arith.constant 0 : i32
    return %c0_i32, %c0_i32_0 : i32, i32
  }
  func.func @transform_5(%arg0: i32) -> (i32, i32) {
    %c0_i32 = arith.constant 0 : i32
    %c0_i32_0 = arith.constant 0 : i32
    %c0_i32_1 = arith.constant 0 : i32
    return %c0_i32, %c0_i32_0 : i32, i32
  }
  func.func @transform_6(%arg0: i32) -> (i32, i32, i32) {
    %c0_i32 = arith.constant 0 : i32
    %c0_i32_0 = arith.constant 0 : i32
    %c0_i32_1 = arith.constant 0 : i32
    return %arg0, %c0_i32, %c0_i32_0 : i32, i32, i32
  }
}

module attributes {stable_mosaic.version = 11 : i64} {
  func.func @_fused_stage_kernel(%arg0: i32, %arg1: memref<1x4x512xf32, #tpu.memory_space<vmem>>, %arg2: memref<4x1xf32, #tpu.memory_space<vmem>>, %arg3: memref<4x1xf32, #tpu.memory_space<vmem>>, %arg4: memref<1x4x512xbf16, #tpu.memory_space<vmem>>) attributes {dimension_semantics = [#tpu.dimension_semantics<parallel>], iteration_bounds = array<i64: 2>, scalar_prefetch = 0 : i64, scratch_operands = 0 : i64, tpu.core_type = #tpu.core_type<tc>, window_params = [{transform_indices = @transform_0, window_bounds = array<i64: 1, 4, 512>}, {pipeline_mode = #tpu.pipeline_mode<synchronous>, transform_indices = @transform_1, window_bounds = array<i64: 4, 1>}, {pipeline_mode = #tpu.pipeline_mode<synchronous>, transform_indices = @transform_2, window_bounds = array<i64: 4, 1>}, {transform_indices = @transform_3, window_bounds = array<i64: 1, 4, 512>}]} {
    %c0 = arith.constant 0 : index
    %c0_0 = arith.constant 0 : index
    %c0_1 = arith.constant 0 : index
    %0 = vector.load %arg1[%c0, %c0_0, %c0_1] : memref<1x4x512xf32, #tpu.memory_space<vmem>>, vector<1x4x512xf32>
    %1 = vector.shape_cast %0 : vector<1x4x512xf32> to vector<4x512xf32>
    %c0_2 = arith.constant 0 : index
    %c0_3 = arith.constant 0 : index
    %2 = vector.load %arg2[%c0_2, %c0_3] : memref<4x1xf32, #tpu.memory_space<vmem>>, vector<4x1xf32>
    %c0_4 = arith.constant 0 : index
    %c0_5 = arith.constant 0 : index
    %3 = vector.load %arg3[%c0_4, %c0_5] : memref<4x1xf32, #tpu.memory_space<vmem>>, vector<4x1xf32>
    %cst = arith.constant dense<0.000000e+00> : vector<4xf32>
    %4 = vector.multi_reduction <add>, %1, %cst [1] : vector<4x512xf32> to vector<4xf32>
    %5 = vector.shape_cast %4 : vector<4xf32> to vector<4x1xf32>
    %6 = arith.mulf %1, %1 : vector<4x512xf32>
    %cst_6 = arith.constant dense<0.000000e+00> : vector<4xf32>
    %7 = vector.multi_reduction <add>, %6, %cst_6 [1] : vector<4x512xf32> to vector<4xf32>
    %8 = vector.shape_cast %7 : vector<4xf32> to vector<4x1xf32>
    %9 = tpu.iota {dimensions = array<i32: 0>} : vector<4x1xi32>
    %cst_7 = arith.constant 0.000000e+00 : f32
    %10 = vector.broadcast %cst_7 : f32 to vector<4x1xf32>
    %cst_8 = arith.constant 0.000000e+00 : f32
    %11 = vector.broadcast %cst_8 : f32 to vector<4x1xf32>
    %12 = vector.extract_strided_slice %5 {offsets = [0, 0], sizes = [1, 1], strides = [1, 1]} : vector<4x1xf32> to vector<1x1xf32>
    %13 = vector.shape_cast %12 : vector<1x1xf32> to vector<1x1x1xf32>
    %cst_9 = arith.constant dense<0.000000e+00> : vector<1xf32>
    %14 = vector.multi_reduction <add>, %13, %cst_9 [1, 2] : vector<1x1x1xf32> to vector<1xf32>
    %15 = vector.shape_cast %14 : vector<1xf32> to vector<1x1x1xf32>
    %16 = vector.extract %15[0, 0, 0] : f32 from vector<1x1x1xf32>
    %cst_10 = arith.constant 0.001953125 : f32
    %17 = arith.mulf %16, %cst_10 : f32
    %18 = vector.extract_strided_slice %8 {offsets = [0, 0], sizes = [1, 1], strides = [1, 1]} : vector<4x1xf32> to vector<1x1xf32>
    %19 = vector.shape_cast %18 : vector<1x1xf32> to vector<1x1x1xf32>
    %cst_11 = arith.constant dense<0.000000e+00> : vector<1xf32>
    %20 = vector.multi_reduction <add>, %19, %cst_11 [1, 2] : vector<1x1x1xf32> to vector<1xf32>
    %21 = vector.shape_cast %20 : vector<1xf32> to vector<1x1x1xf32>
    %22 = vector.extract %21[0, 0, 0] : f32 from vector<1x1x1xf32>
    %cst_12 = arith.constant 0.001953125 : f32
    %23 = arith.mulf %22, %cst_12 : f32
    %24 = arith.mulf %17, %17 : f32
    %25 = arith.subf %23, %24 : f32
    %cst_13 = arith.constant 0.000000e+00 : f32
    %26 = arith.maximumf %25, %cst_13 : f32
    %cst_14 = arith.constant 9.99999974E-6 : f32
    %27 = arith.addf %26, %cst_14 : f32
    %28 = math.rsqrt %27 : f32
    %c0_i32 = arith.constant 0 : i32
    %29 = vector.broadcast %c0_i32 : i32 to vector<4x1xi32>
    %30 = arith.cmpi sge, %9, %29 : vector<4x1xi32>
    %c1_i32 = arith.constant 1 : i32
    %31 = vector.broadcast %c1_i32 : i32 to vector<4x1xi32>
    %32 = arith.cmpi slt, %9, %31 : vector<4x1xi32>
    %33 = arith.andi %30, %32 : vector<4x1xi1>
    %34 = vector.broadcast %28 : f32 to vector<4x1xf32>
    %35 = arith.select %33, %34, %10 : vector<4x1xi1>, vector<4x1xf32>
    %36 = vector.broadcast %17 : f32 to vector<4x1xf32>
    %37 = arith.select %33, %36, %11 : vector<4x1xi1>, vector<4x1xf32>
    %38 = vector.extract_strided_slice %5 {offsets = [1, 0], sizes = [1, 1], strides = [1, 1]} : vector<4x1xf32> to vector<1x1xf32>
    %39 = vector.shape_cast %38 : vector<1x1xf32> to vector<1x1x1xf32>
    %cst_15 = arith.constant dense<0.000000e+00> : vector<1xf32>
    %40 = vector.multi_reduction <add>, %39, %cst_15 [1, 2] : vector<1x1x1xf32> to vector<1xf32>
    %41 = vector.shape_cast %40 : vector<1xf32> to vector<1x1x1xf32>
    %42 = vector.extract %41[0, 0, 0] : f32 from vector<1x1x1xf32>
    %cst_16 = arith.constant 0.001953125 : f32
    %43 = arith.mulf %42, %cst_16 : f32
    %44 = vector.extract_strided_slice %8 {offsets = [1, 0], sizes = [1, 1], strides = [1, 1]} : vector<4x1xf32> to vector<1x1xf32>
    %45 = vector.shape_cast %44 : vector<1x1xf32> to vector<1x1x1xf32>
    %cst_17 = arith.constant dense<0.000000e+00> : vector<1xf32>
    %46 = vector.multi_reduction <add>, %45, %cst_17 [1, 2] : vector<1x1x1xf32> to vector<1xf32>
    %47 = vector.shape_cast %46 : vector<1xf32> to vector<1x1x1xf32>
    %48 = vector.extract %47[0, 0, 0] : f32 from vector<1x1x1xf32>
    %cst_18 = arith.constant 0.001953125 : f32
    %49 = arith.mulf %48, %cst_18 : f32
    %50 = arith.mulf %43, %43 : f32
    %51 = arith.subf %49, %50 : f32
    %cst_19 = arith.constant 0.000000e+00 : f32
    %52 = arith.maximumf %51, %cst_19 : f32
    %cst_20 = arith.constant 9.99999974E-6 : f32
    %53 = arith.addf %52, %cst_20 : f32
    %54 = math.rsqrt %53 : f32
    %c1_i32_21 = arith.constant 1 : i32
    %55 = vector.broadcast %c1_i32_21 : i32 to vector<4x1xi32>
    %56 = arith.cmpi sge, %9, %55 : vector<4x1xi32>
    %c2_i32 = arith.constant 2 : i32
    %57 = vector.broadcast %c2_i32 : i32 to vector<4x1xi32>
    %58 = arith.cmpi slt, %9, %57 : vector<4x1xi32>
    %59 = arith.andi %56, %58 : vector<4x1xi1>
    %60 = vector.broadcast %54 : f32 to vector<4x1xf32>
    %61 = arith.select %59, %60, %35 : vector<4x1xi1>, vector<4x1xf32>
    %62 = vector.broadcast %43 : f32 to vector<4x1xf32>
    %63 = arith.select %59, %62, %37 : vector<4x1xi1>, vector<4x1xf32>
    %64 = vector.extract_strided_slice %5 {offsets = [2, 0], sizes = [1, 1], strides = [1, 1]} : vector<4x1xf32> to vector<1x1xf32>
    %65 = vector.shape_cast %64 : vector<1x1xf32> to vector<1x1x1xf32>
    %cst_22 = arith.constant dense<0.000000e+00> : vector<1xf32>
    %66 = vector.multi_reduction <add>, %65, %cst_22 [1, 2] : vector<1x1x1xf32> to vector<1xf32>
    %67 = vector.shape_cast %66 : vector<1xf32> to vector<1x1x1xf32>
    %68 = vector.extract %67[0, 0, 0] : f32 from vector<1x1x1xf32>
    %cst_23 = arith.constant 0.001953125 : f32
    %69 = arith.mulf %68, %cst_23 : f32
    %70 = vector.extract_strided_slice %8 {offsets = [2, 0], sizes = [1, 1], strides = [1, 1]} : vector<4x1xf32> to vector<1x1xf32>
    %71 = vector.shape_cast %70 : vector<1x1xf32> to vector<1x1x1xf32>
    %cst_24 = arith.constant dense<0.000000e+00> : vector<1xf32>
    %72 = vector.multi_reduction <add>, %71, %cst_24 [1, 2] : vector<1x1x1xf32> to vector<1xf32>
    %73 = vector.shape_cast %72 : vector<1xf32> to vector<1x1x1xf32>
    %74 = vector.extract %73[0, 0, 0] : f32 from vector<1x1x1xf32>
    %cst_25 = arith.constant 0.001953125 : f32
    %75 = arith.mulf %74, %cst_25 : f32
    %76 = arith.mulf %69, %69 : f32
    %77 = arith.subf %75, %76 : f32
    %cst_26 = arith.constant 0.000000e+00 : f32
    %78 = arith.maximumf %77, %cst_26 : f32
    %cst_27 = arith.constant 9.99999974E-6 : f32
    %79 = arith.addf %78, %cst_27 : f32
    %80 = math.rsqrt %79 : f32
    %c2_i32_28 = arith.constant 2 : i32
    %81 = vector.broadcast %c2_i32_28 : i32 to vector<4x1xi32>
    %82 = arith.cmpi sge, %9, %81 : vector<4x1xi32>
    %c3_i32 = arith.constant 3 : i32
    %83 = vector.broadcast %c3_i32 : i32 to vector<4x1xi32>
    %84 = arith.cmpi slt, %9, %83 : vector<4x1xi32>
    %85 = arith.andi %82, %84 : vector<4x1xi1>
    %86 = vector.broadcast %80 : f32 to vector<4x1xf32>
    %87 = arith.select %85, %86, %61 : vector<4x1xi1>, vector<4x1xf32>
    %88 = vector.broadcast %69 : f32 to vector<4x1xf32>
    %89 = arith.select %85, %88, %63 : vector<4x1xi1>, vector<4x1xf32>
    %90 = vector.extract_strided_slice %5 {offsets = [3, 0], sizes = [1, 1], strides = [1, 1]} : vector<4x1xf32> to vector<1x1xf32>
    %91 = vector.shape_cast %90 : vector<1x1xf32> to vector<1x1x1xf32>
    %cst_29 = arith.constant dense<0.000000e+00> : vector<1xf32>
    %92 = vector.multi_reduction <add>, %91, %cst_29 [1, 2] : vector<1x1x1xf32> to vector<1xf32>
    %93 = vector.shape_cast %92 : vector<1xf32> to vector<1x1x1xf32>
    %94 = vector.extract %93[0, 0, 0] : f32 from vector<1x1x1xf32>
    %cst_30 = arith.constant 0.001953125 : f32
    %95 = arith.mulf %94, %cst_30 : f32
    %96 = vector.extract_strided_slice %8 {offsets = [3, 0], sizes = [1, 1], strides = [1, 1]} : vector<4x1xf32> to vector<1x1xf32>
    %97 = vector.shape_cast %96 : vector<1x1xf32> to vector<1x1x1xf32>
    %cst_31 = arith.constant dense<0.000000e+00> : vector<1xf32>
    %98 = vector.multi_reduction <add>, %97, %cst_31 [1, 2] : vector<1x1x1xf32> to vector<1xf32>
    %99 = vector.shape_cast %98 : vector<1xf32> to vector<1x1x1xf32>
    %100 = vector.extract %99[0, 0, 0] : f32 from vector<1x1x1xf32>
    %cst_32 = arith.constant 0.001953125 : f32
    %101 = arith.mulf %100, %cst_32 : f32
    %102 = arith.mulf %95, %95 : f32
    %103 = arith.subf %101, %102 : f32
    %cst_33 = arith.constant 0.000000e+00 : f32
    %104 = arith.maximumf %103, %cst_33 : f32
    %cst_34 = arith.constant 9.99999974E-6 : f32
    %105 = arith.addf %104, %cst_34 : f32
    %106 = math.rsqrt %105 : f32
    %c3_i32_35 = arith.constant 3 : i32
    %107 = vector.broadcast %c3_i32_35 : i32 to vector<4x1xi32>
    %108 = arith.cmpi sge, %9, %107 : vector<4x1xi32>
    %c4_i32 = arith.constant 4 : i32
    %109 = vector.broadcast %c4_i32 : i32 to vector<4x1xi32>
    %110 = arith.cmpi slt, %9, %109 : vector<4x1xi32>
    %111 = arith.andi %108, %110 : vector<4x1xi1>
    %112 = vector.broadcast %106 : f32 to vector<4x1xf32>
    %113 = arith.select %111, %112, %87 : vector<4x1xi1>, vector<4x1xf32>
    %114 = vector.broadcast %95 : f32 to vector<4x1xf32>
    %115 = arith.select %111, %114, %89 : vector<4x1xi1>, vector<4x1xf32>
    %116 = arith.mulf %2, %113 : vector<4x1xf32>
    %117 = arith.mulf %115, %116 : vector<4x1xf32>
    %118 = arith.subf %3, %117 : vector<4x1xf32>
    %119 = vector.broadcast %116 : vector<4x1xf32> to vector<4x512xf32>
    %120 = arith.mulf %1, %119 : vector<4x512xf32>
    %121 = vector.broadcast %118 : vector<4x1xf32> to vector<4x512xf32>
    %122 = arith.addf %120, %121 : vector<4x512xf32>
    %cst_36 = arith.constant 0.000000e+00 : f32
    %123 = vector.broadcast %cst_36 : f32 to vector<4x512xf32>
    %124 = arith.maximumf %122, %123 : vector<4x512xf32>
    %125 = arith.truncf %124 : vector<4x512xf32> to vector<4x512xbf16>
    %c0_37 = arith.constant 0 : index
    %c0_38 = arith.constant 0 : index
    %c0_39 = arith.constant 0 : index
    %126 = vector.load %arg4[%c0_37, %c0_38, %c0_39] : memref<1x4x512xbf16, #tpu.memory_space<vmem>>, vector<1x4x512xbf16>
    %127 = vector.shape_cast %126 : vector<1x4x512xbf16> to vector<4x512xbf16>
    %128 = vector.shape_cast %125 : vector<4x512xbf16> to vector<1x4x512xbf16>
    tpu.vector_store %arg4[%c0_37, %c0_38, %c0_39], %128 {strides = array<i32>} : memref<1x4x512xbf16, #tpu.memory_space<vmem>>, vector<1x4x512xbf16>,
    return
  }
  func.func @transform_0(%arg0: i32) -> (i32, i32, i32) {
    %c0_i32 = arith.constant 0 : i32
    %c0_i32_0 = arith.constant 0 : i32
    %c0_i32_1 = arith.constant 0 : i32
    return %arg0, %c0_i32, %c0_i32_0 : i32, i32, i32
  }
  func.func @transform_1(%arg0: i32) -> (i32, i32) {
    %c0_i32 = arith.constant 0 : i32
    %c0_i32_0 = arith.constant 0 : i32
    %c0_i32_1 = arith.constant 0 : i32
    return %c0_i32, %c0_i32_0 : i32, i32
  }
  func.func @transform_2(%arg0: i32) -> (i32, i32) {
    %c0_i32 = arith.constant 0 : i32
    %c0_i32_0 = arith.constant 0 : i32
    %c0_i32_1 = arith.constant 0 : i32
    return %c0_i32, %c0_i32_0 : i32, i32
  }
  func.func @transform_3(%arg0: i32) -> (i32, i32, i32) {
    %c0_i32 = arith.constant 0 : i32
    %c0_i32_0 = arith.constant 0 : i32
    %c0_i32_1 = arith.constant 0 : i32
    return %arg0, %c0_i32, %c0_i32_0 : i32, i32, i32
  }
}

module attributes {stable_mosaic.version = 11 : i64} {
  func.func @_fused_stage_kernel(%arg0: i32, %arg1: memref<1x8x1222xbf16, #tpu.memory_space<vmem>>, %arg2: memref<27x8x8xbf16, #tpu.memory_space<vmem>>, %arg3: memref<8x1xf32, #tpu.memory_space<vmem>>, %arg4: memref<8x1xf32, #tpu.memory_space<vmem>>, %arg5: memref<1x1000xf32, #tpu.memory_space<vmem>>, %arg6: memref<1x8x1000xf32, #tpu.memory_space<vmem>>) attributes {dimension_semantics = [#tpu.dimension_semantics<parallel>], iteration_bounds = array<i64: 2>, scalar_prefetch = 0 : i64, scratch_operands = 0 : i64, tpu.core_type = #tpu.core_type<tc>, window_params = [{transform_indices = @transform_0, window_bounds = array<i64: 1, 8, 1222>}, {pipeline_mode = #tpu.pipeline_mode<synchronous>, transform_indices = @transform_1, window_bounds = array<i64: 27, 8, 8>}, {pipeline_mode = #tpu.pipeline_mode<synchronous>, transform_indices = @transform_2, window_bounds = array<i64: 8, 1>}, {pipeline_mode = #tpu.pipeline_mode<synchronous>, transform_indices = @transform_3, window_bounds = array<i64: 8, 1>}, {pipeline_mode = #tpu.pipeline_mode<synchronous>, transform_indices = @transform_4, window_bounds = array<i64: 1, 1000>}, {transform_indices = @transform_5, window_bounds = array<i64: 1, 8, 1000>}]} {
    %c0 = arith.constant 0 : index
    %c0_0 = arith.constant 0 : index
    %c0_1 = arith.constant 0 : index
    %0 = vector.load %arg1[%c0, %c0_0, %c0_1] : memref<1x8x1222xbf16, #tpu.memory_space<vmem>>, vector<1x8x1000xbf16>
    %1 = vector.shape_cast %0 : vector<1x8x1000xbf16> to vector<8x1000xbf16>
    %c0_2 = arith.constant 0 : index
    %c0_3 = arith.constant 0 : index
    %c0_4 = arith.constant 0 : index
    %2 = vector.load %arg2[%c0_2, %c0_3, %c0_4] : memref<27x8x8xbf16, #tpu.memory_space<vmem>>, vector<1x8x8xbf16>
    %3 = vector.shape_cast %2 : vector<1x8x8xbf16> to vector<8x8xbf16>
    %cst = arith.constant dense<0.000000e+00> : vector<8x1000xf32>
    %4 = tpu.matmul %3, %1, %cst {dimension_numbers = #tpu.dot_dimension_numbers<[1], [0], [0], [1], [0, 0, 1, 1], [], []>} : vector<8x8xbf16>, vector<8x1000xbf16>, vector<8x1000xf32> -> vector<8x1000xf32>
    %c0_5 = arith.constant 0 : index
    %c0_6 = arith.constant 0 : index
    %c1 = arith.constant 1 : index
    %5 = vector.load %arg1[%c0_5, %c0_6, %c1] : memref<1x8x1222xbf16, #tpu.memory_space<vmem>>, vector<1x8x1000xbf16>
    %6 = vector.shape_cast %5 : vector<1x8x1000xbf16> to vector<8x1000xbf16>
    %c1_7 = arith.constant 1 : index
    %c0_8 = arith.constant 0 : index
    %c0_9 = arith.constant 0 : index
    %7 = vector.load %arg2[%c1_7, %c0_8, %c0_9] : memref<27x8x8xbf16, #tpu.memory_space<vmem>>, vector<1x8x8xbf16>
    %8 = vector.shape_cast %7 : vector<1x8x8xbf16> to vector<8x8xbf16>
    %cst_10 = arith.constant dense<0.000000e+00> : vector<8x1000xf32>
    %9 = tpu.matmul %8, %6, %cst_10 {dimension_numbers = #tpu.dot_dimension_numbers<[1], [0], [0], [1], [0, 0, 1, 1], [], []>} : vector<8x8xbf16>, vector<8x1000xbf16>, vector<8x1000xf32> -> vector<8x1000xf32>
    %10 = arith.addf %4, %9 : vector<8x1000xf32>
    %c0_11 = arith.constant 0 : index
    %c0_12 = arith.constant 0 : index
    %c2 = arith.constant 2 : index
    %11 = vector.load %arg1[%c0_11, %c0_12, %c2] : memref<1x8x1222xbf16, #tpu.memory_space<vmem>>, vector<1x8x1000xbf16>
    %12 = vector.shape_cast %11 : vector<1x8x1000xbf16> to vector<8x1000xbf16>
    %c2_13 = arith.constant 2 : index
    %c0_14 = arith.constant 0 : index
    %c0_15 = arith.constant 0 : index
    %13 = vector.load %arg2[%c2_13, %c0_14, %c0_15] : memref<27x8x8xbf16, #tpu.memory_space<vmem>>, vector<1x8x8xbf16>
    %14 = vector.shape_cast %13 : vector<1x8x8xbf16> to vector<8x8xbf16>
    %cst_16 = arith.constant dense<0.000000e+00> : vector<8x1000xf32>
    %15 = tpu.matmul %14, %12, %cst_16 {dimension_numbers = #tpu.dot_dimension_numbers<[1], [0], [0], [1], [0, 0, 1, 1], [], []>} : vector<8x8xbf16>, vector<8x1000xbf16>, vector<8x1000xf32> -> vector<8x1000xf32>
    %16 = arith.addf %10, %15 : vector<8x1000xf32>
    %c0_17 = arith.constant 0 : index
    %c0_18 = arith.constant 0 : index
    %c10 = arith.constant 10 : index
    %17 = vector.load %arg1[%c0_17, %c0_18, %c10] : memref<1x8x1222xbf16, #tpu.memory_space<vmem>>, vector<1x8x1000xbf16>
    %18 = vector.shape_cast %17 : vector<1x8x1000xbf16> to vector<8x1000xbf16>
    %c3 = arith.constant 3 : index
    %c0_19 = arith.constant 0 : index
    %c0_20 = arith.constant 0 : index
    %19 = vector.load %arg2[%c3, %c0_19, %c0_20] : memref<27x8x8xbf16, #tpu.memory_space<vmem>>, vector<1x8x8xbf16>
    %20 = vector.shape_cast %19 : vector<1x8x8xbf16> to vector<8x8xbf16>
    %cst_21 = arith.constant dense<0.000000e+00> : vector<8x1000xf32>
    %21 = tpu.matmul %20, %18, %cst_21 {dimension_numbers = #tpu.dot_dimension_numbers<[1], [0], [0], [1], [0, 0, 1, 1], [], []>} : vector<8x8xbf16>, vector<8x1000xbf16>, vector<8x1000xf32> -> vector<8x1000xf32>
    %22 = arith.addf %16, %21 : vector<8x1000xf32>
    %c0_22 = arith.constant 0 : index
    %c0_23 = arith.constant 0 : index
    %c11 = arith.constant 11 : index
    %23 = vector.load %arg1[%c0_22, %c0_23, %c11] : memref<1x8x1222xbf16, #tpu.memory_space<vmem>>, vector<1x8x1000xbf16>
    %24 = vector.shape_cast %23 : vector<1x8x1000xbf16> to vector<8x1000xbf16>
    %c4 = arith.constant 4 : index
    %c0_24 = arith.constant 0 : index
    %c0_25 = arith.constant 0 : index
    %25 = vector.load %arg2[%c4, %c0_24, %c0_25] : memref<27x8x8xbf16, #tpu.memory_space<vmem>>, vector<1x8x8xbf16>
    %26 = vector.shape_cast %25 : vector<1x8x8xbf16> to vector<8x8xbf16>
    %cst_26 = arith.constant dense<0.000000e+00> : vector<8x1000xf32>
    %27 = tpu.matmul %26, %24, %cst_26 {dimension_numbers = #tpu.dot_dimension_numbers<[1], [0], [0], [1], [0, 0, 1, 1], [], []>} : vector<8x8xbf16>, vector<8x1000xbf16>, vector<8x1000xf32> -> vector<8x1000xf32>
    %28 = arith.addf %22, %27 : vector<8x1000xf32>
    %c0_27 = arith.constant 0 : index
    %c0_28 = arith.constant 0 : index
    %c12 = arith.constant 12 : index
    %29 = vector.load %arg1[%c0_27, %c0_28, %c12] : memref<1x8x1222xbf16, #tpu.memory_space<vmem>>, vector<1x8x1000xbf16>
    %30 = vector.shape_cast %29 : vector<1x8x1000xbf16> to vector<8x1000xbf16>
    %c5 = arith.constant 5 : index
    %c0_29 = arith.constant 0 : index
    %c0_30 = arith.constant 0 : index
    %31 = vector.load %arg2[%c5, %c0_29, %c0_30] : memref<27x8x8xbf16, #tpu.memory_space<vmem>>, vector<1x8x8xbf16>
    %32 = vector.shape_cast %31 : vector<1x8x8xbf16> to vector<8x8xbf16>
    %cst_31 = arith.constant dense<0.000000e+00> : vector<8x1000xf32>
    %33 = tpu.matmul %32, %30, %cst_31 {dimension_numbers = #tpu.dot_dimension_numbers<[1], [0], [0], [1], [0, 0, 1, 1], [], []>} : vector<8x8xbf16>, vector<8x1000xbf16>, vector<8x1000xf32> -> vector<8x1000xf32>
    %34 = arith.addf %28, %33 : vector<8x1000xf32>
    %c0_32 = arith.constant 0 : index
    %c0_33 = arith.constant 0 : index
    %c20 = arith.constant 20 : index
    %35 = vector.load %arg1[%c0_32, %c0_33, %c20] : memref<1x8x1222xbf16, #tpu.memory_space<vmem>>, vector<1x8x1000xbf16>
    %36 = vector.shape_cast %35 : vector<1x8x1000xbf16> to vector<8x1000xbf16>
    %c6 = arith.constant 6 : index
    %c0_34 = arith.constant 0 : index
    %c0_35 = arith.constant 0 : index
    %37 = vector.load %arg2[%c6, %c0_34, %c0_35] : memref<27x8x8xbf16, #tpu.memory_space<vmem>>, vector<1x8x8xbf16>
    %38 = vector.shape_cast %37 : vector<1x8x8xbf16> to vector<8x8xbf16>
    %cst_36 = arith.constant dense<0.000000e+00> : vector<8x1000xf32>
    %39 = tpu.matmul %38, %36, %cst_36 {dimension_numbers = #tpu.dot_dimension_numbers<[1], [0], [0], [1], [0, 0, 1, 1], [], []>} : vector<8x8xbf16>, vector<8x1000xbf16>, vector<8x1000xf32> -> vector<8x1000xf32>
    %40 = arith.addf %34, %39 : vector<8x1000xf32>
    %c0_37 = arith.constant 0 : index
    %c0_38 = arith.constant 0 : index
    %c21 = arith.constant 21 : index
    %41 = vector.load %arg1[%c0_37, %c0_38, %c21] : memref<1x8x1222xbf16, #tpu.memory_space<vmem>>, vector<1x8x1000xbf16>
    %42 = vector.shape_cast %41 : vector<1x8x1000xbf16> to vector<8x1000xbf16>
    %c7 = arith.constant 7 : index
    %c0_39 = arith.constant 0 : index
    %c0_40 = arith.constant 0 : index
    %43 = vector.load %arg2[%c7, %c0_39, %c0_40] : memref<27x8x8xbf16, #tpu.memory_space<vmem>>, vector<1x8x8xbf16>
    %44 = vector.shape_cast %43 : vector<1x8x8xbf16> to vector<8x8xbf16>
    %cst_41 = arith.constant dense<0.000000e+00> : vector<8x1000xf32>
    %45 = tpu.matmul %44, %42, %cst_41 {dimension_numbers = #tpu.dot_dimension_numbers<[1], [0], [0], [1], [0, 0, 1, 1], [], []>} : vector<8x8xbf16>, vector<8x1000xbf16>, vector<8x1000xf32> -> vector<8x1000xf32>
    %46 = arith.addf %40, %45 : vector<8x1000xf32>
    %c0_42 = arith.constant 0 : index
    %c0_43 = arith.constant 0 : index
    %c22 = arith.constant 22 : index
    %47 = vector.load %arg1[%c0_42, %c0_43, %c22] : memref<1x8x1222xbf16, #tpu.memory_space<vmem>>, vector<1x8x1000xbf16>
    %48 = vector.shape_cast %47 : vector<1x8x1000xbf16> to vector<8x1000xbf16>
    %c8 = arith.constant 8 : index
    %c0_44 = arith.constant 0 : index
    %c0_45 = arith.constant 0 : index
    %49 = vector.load %arg2[%c8, %c0_44, %c0_45] : memref<27x8x8xbf16, #tpu.memory_space<vmem>>, vector<1x8x8xbf16>
    %50 = vector.shape_cast %49 : vector<1x8x8xbf16> to vector<8x8xbf16>
    %cst_46 = arith.constant dense<0.000000e+00> : vector<8x1000xf32>
    %51 = tpu.matmul %50, %48, %cst_46 {dimension_numbers = #tpu.dot_dimension_numbers<[1], [0], [0], [1], [0, 0, 1, 1], [], []>} : vector<8x8xbf16>, vector<8x1000xbf16>, vector<8x1000xf32> -> vector<8x1000xf32>
    %52 = arith.addf %46, %51 : vector<8x1000xf32>
    %c0_47 = arith.constant 0 : index
    %c0_48 = arith.constant 0 : index
    %c100 = arith.constant 100 : index
    %53 = vector.load %arg1[%c0_47, %c0_48, %c100] : memref<1x8x1222xbf16, #tpu.memory_space<vmem>>, vector<1x8x1000xbf16>
    %54 = vector.shape_cast %53 : vector<1x8x1000xbf16> to vector<8x1000xbf16>
    %c9 = arith.constant 9 : index
    %c0_49 = arith.constant 0 : index
    %c0_50 = arith.constant 0 : index
    %55 = vector.load %arg2[%c9, %c0_49, %c0_50] : memref<27x8x8xbf16, #tpu.memory_space<vmem>>, vector<1x8x8xbf16>
    %56 = vector.shape_cast %55 : vector<1x8x8xbf16> to vector<8x8xbf16>
    %cst_51 = arith.constant dense<0.000000e+00> : vector<8x1000xf32>
    %57 = tpu.matmul %56, %54, %cst_51 {dimension_numbers = #tpu.dot_dimension_numbers<[1], [0], [0], [1], [0, 0, 1, 1], [], []>} : vector<8x8xbf16>, vector<8x1000xbf16>, vector<8x1000xf32> -> vector<8x1000xf32>
    %58 = arith.addf %52, %57 : vector<8x1000xf32>
    %c0_52 = arith.constant 0 : index
    %c0_53 = arith.constant 0 : index
    %c101 = arith.constant 101 : index
    %59 = vector.load %arg1[%c0_52, %c0_53, %c101] : memref<1x8x1222xbf16, #tpu.memory_space<vmem>>, vector<1x8x1000xbf16>
    %60 = vector.shape_cast %59 : vector<1x8x1000xbf16> to vector<8x1000xbf16>
    %c10_54 = arith.constant 10 : index
    %c0_55 = arith.constant 0 : index
    %c0_56 = arith.constant 0 : index
    %61 = vector.load %arg2[%c10_54, %c0_55, %c0_56] : memref<27x8x8xbf16, #tpu.memory_space<vmem>>, vector<1x8x8xbf16>
    %62 = vector.shape_cast %61 : vector<1x8x8xbf16> to vector<8x8xbf16>
    %cst_57 = arith.constant dense<0.000000e+00> : vector<8x1000xf32>
    %63 = tpu.matmul %62, %60, %cst_57 {dimension_numbers = #tpu.dot_dimension_numbers<[1], [0], [0], [1], [0, 0, 1, 1], [], []>} : vector<8x8xbf16>, vector<8x1000xbf16>, vector<8x1000xf32> -> vector<8x1000xf32>
    %64 = arith.addf %58, %63 : vector<8x1000xf32>
    %c0_58 = arith.constant 0 : index
    %c0_59 = arith.constant 0 : index
    %c102 = arith.constant 102 : index
    %65 = vector.load %arg1[%c0_58, %c0_59, %c102] : memref<1x8x1222xbf16, #tpu.memory_space<vmem>>, vector<1x8x1000xbf16>
    %66 = vector.shape_cast %65 : vector<1x8x1000xbf16> to vector<8x1000xbf16>
    %c11_60 = arith.constant 11 : index
    %c0_61 = arith.constant 0 : index
    %c0_62 = arith.constant 0 : index
    %67 = vector.load %arg2[%c11_60, %c0_61, %c0_62] : memref<27x8x8xbf16, #tpu.memory_space<vmem>>, vector<1x8x8xbf16>
    %68 = vector.shape_cast %67 : vector<1x8x8xbf16> to vector<8x8xbf16>
    %cst_63 = arith.constant dense<0.000000e+00> : vector<8x1000xf32>
    %69 = tpu.matmul %68, %66, %cst_63 {dimension_numbers = #tpu.dot_dimension_numbers<[1], [0], [0], [1], [0, 0, 1, 1], [], []>} : vector<8x8xbf16>, vector<8x1000xbf16>, vector<8x1000xf32> -> vector<8x1000xf32>
    %70 = arith.addf %64, %69 : vector<8x1000xf32>
    %c0_64 = arith.constant 0 : index
    %c0_65 = arith.constant 0 : index
    %c110 = arith.constant 110 : index
    %71 = vector.load %arg1[%c0_64, %c0_65, %c110] : memref<1x8x1222xbf16, #tpu.memory_space<vmem>>, vector<1x8x1000xbf16>
    %72 = vector.shape_cast %71 : vector<1x8x1000xbf16> to vector<8x1000xbf16>
    %c12_66 = arith.constant 12 : index
    %c0_67 = arith.constant 0 : index
    %c0_68 = arith.constant 0 : index
    %73 = vector.load %arg2[%c12_66, %c0_67, %c0_68] : memref<27x8x8xbf16, #tpu.memory_space<vmem>>, vector<1x8x8xbf16>
    %74 = vector.shape_cast %73 : vector<1x8x8xbf16> to vector<8x8xbf16>
    %cst_69 = arith.constant dense<0.000000e+00> : vector<8x1000xf32>
    %75 = tpu.matmul %74, %72, %cst_69 {dimension_numbers = #tpu.dot_dimension_numbers<[1], [0], [0], [1], [0, 0, 1, 1], [], []>} : vector<8x8xbf16>, vector<8x1000xbf16>, vector<8x1000xf32> -> vector<8x1000xf32>
    %76 = arith.addf %70, %75 : vector<8x1000xf32>
    %c0_70 = arith.constant 0 : index
    %c0_71 = arith.constant 0 : index
    %c111 = arith.constant 111 : index
    %77 = vector.load %arg1[%c0_70, %c0_71, %c111] : memref<1x8x1222xbf16, #tpu.memory_space<vmem>>, vector<1x8x1000xbf16>
    %78 = vector.shape_cast %77 : vector<1x8x1000xbf16> to vector<8x1000xbf16>
    %c13 = arith.constant 13 : index
    %c0_72 = arith.constant 0 : index
    %c0_73 = arith.constant 0 : index
    %79 = vector.load %arg2[%c13, %c0_72, %c0_73] : memref<27x8x8xbf16, #tpu.memory_space<vmem>>, vector<1x8x8xbf16>
    %80 = vector.shape_cast %79 : vector<1x8x8xbf16> to vector<8x8xbf16>
    %cst_74 = arith.constant dense<0.000000e+00> : vector<8x1000xf32>
    %81 = tpu.matmul %80, %78, %cst_74 {dimension_numbers = #tpu.dot_dimension_numbers<[1], [0], [0], [1], [0, 0, 1, 1], [], []>} : vector<8x8xbf16>, vector<8x1000xbf16>, vector<8x1000xf32> -> vector<8x1000xf32>
    %82 = arith.addf %76, %81 : vector<8x1000xf32>
    %c0_75 = arith.constant 0 : index
    %c0_76 = arith.constant 0 : index
    %c112 = arith.constant 112 : index
    %83 = vector.load %arg1[%c0_75, %c0_76, %c112] : memref<1x8x1222xbf16, #tpu.memory_space<vmem>>, vector<1x8x1000xbf16>
    %84 = vector.shape_cast %83 : vector<1x8x1000xbf16> to vector<8x1000xbf16>
    %c14 = arith.constant 14 : index
    %c0_77 = arith.constant 0 : index
    %c0_78 = arith.constant 0 : index
    %85 = vector.load %arg2[%c14, %c0_77, %c0_78] : memref<27x8x8xbf16, #tpu.memory_space<vmem>>, vector<1x8x8xbf16>
    %86 = vector.shape_cast %85 : vector<1x8x8xbf16> to vector<8x8xbf16>
    %cst_79 = arith.constant dense<0.000000e+00> : vector<8x1000xf32>
    %87 = tpu.matmul %86, %84, %cst_79 {dimension_numbers = #tpu.dot_dimension_numbers<[1], [0], [0], [1], [0, 0, 1, 1], [], []>} : vector<8x8xbf16>, vector<8x1000xbf16>, vector<8x1000xf32> -> vector<8x1000xf32>
    %88 = arith.addf %82, %87 : vector<8x1000xf32>
    %c0_80 = arith.constant 0 : index
    %c0_81 = arith.constant 0 : index
    %c120 = arith.constant 120 : index
    %89 = vector.load %arg1[%c0_80, %c0_81, %c120] : memref<1x8x1222xbf16, #tpu.memory_space<vmem>>, vector<1x8x1000xbf16>
    %90 = vector.shape_cast %89 : vector<1x8x1000xbf16> to vector<8x1000xbf16>
    %c15 = arith.constant 15 : index
    %c0_82 = arith.constant 0 : index
    %c0_83 = arith.constant 0 : index
    %91 = vector.load %arg2[%c15, %c0_82, %c0_83] : memref<27x8x8xbf16, #tpu.memory_space<vmem>>, vector<1x8x8xbf16>
    %92 = vector.shape_cast %91 : vector<1x8x8xbf16> to vector<8x8xbf16>
    %cst_84 = arith.constant dense<0.000000e+00> : vector<8x1000xf32>
    %93 = tpu.matmul %92, %90, %cst_84 {dimension_numbers = #tpu.dot_dimension_numbers<[1], [0], [0], [1], [0, 0, 1, 1], [], []>} : vector<8x8xbf16>, vector<8x1000xbf16>, vector<8x1000xf32> -> vector<8x1000xf32>
    %94 = arith.addf %88, %93 : vector<8x1000xf32>
    %c0_85 = arith.constant 0 : index
    %c0_86 = arith.constant 0 : index
    %c121 = arith.constant 121 : index
    %95 = vector.load %arg1[%c0_85, %c0_86, %c121] : memref<1x8x1222xbf16, #tpu.memory_space<vmem>>, vector<1x8x1000xbf16>
    %96 = vector.shape_cast %95 : vector<1x8x1000xbf16> to vector<8x1000xbf16>
    %c16 = arith.constant 16 : index
    %c0_87 = arith.constant 0 : index
    %c0_88 = arith.constant 0 : index
    %97 = vector.load %arg2[%c16, %c0_87, %c0_88] : memref<27x8x8xbf16, #tpu.memory_space<vmem>>, vector<1x8x8xbf16>
    %98 = vector.shape_cast %97 : vector<1x8x8xbf16> to vector<8x8xbf16>
    %cst_89 = arith.constant dense<0.000000e+00> : vector<8x1000xf32>
    %99 = tpu.matmul %98, %96, %cst_89 {dimension_numbers = #tpu.dot_dimension_numbers<[1], [0], [0], [1], [0, 0, 1, 1], [], []>} : vector<8x8xbf16>, vector<8x1000xbf16>, vector<8x1000xf32> -> vector<8x1000xf32>
    %100 = arith.addf %94, %99 : vector<8x1000xf32>
    %c0_90 = arith.constant 0 : index
    %c0_91 = arith.constant 0 : index
    %c122 = arith.constant 122 : index
    %101 = vector.load %arg1[%c0_90, %c0_91, %c122] : memref<1x8x1222xbf16, #tpu.memory_space<vmem>>, vector<1x8x1000xbf16>
    %102 = vector.shape_cast %101 : vector<1x8x1000xbf16> to vector<8x1000xbf16>
    %c17 = arith.constant 17 : index
    %c0_92 = arith.constant 0 : index
    %c0_93 = arith.constant 0 : index
    %103 = vector.load %arg2[%c17, %c0_92, %c0_93] : memref<27x8x8xbf16, #tpu.memory_space<vmem>>, vector<1x8x8xbf16>
    %104 = vector.shape_cast %103 : vector<1x8x8xbf16> to vector<8x8xbf16>
    %cst_94 = arith.constant dense<0.000000e+00> : vector<8x1000xf32>
    %105 = tpu.matmul %104, %102, %cst_94 {dimension_numbers = #tpu.dot_dimension_numbers<[1], [0], [0], [1], [0, 0, 1, 1], [], []>} : vector<8x8xbf16>, vector<8x1000xbf16>, vector<8x1000xf32> -> vector<8x1000xf32>
    %106 = arith.addf %100, %105 : vector<8x1000xf32>
    %c0_95 = arith.constant 0 : index
    %c0_96 = arith.constant 0 : index
    %c200 = arith.constant 200 : index
    %107 = vector.load %arg1[%c0_95, %c0_96, %c200] : memref<1x8x1222xbf16, #tpu.memory_space<vmem>>, vector<1x8x1000xbf16>
    %108 = vector.shape_cast %107 : vector<1x8x1000xbf16> to vector<8x1000xbf16>
    %c18 = arith.constant 18 : index
    %c0_97 = arith.constant 0 : index
    %c0_98 = arith.constant 0 : index
    %109 = vector.load %arg2[%c18, %c0_97, %c0_98] : memref<27x8x8xbf16, #tpu.memory_space<vmem>>, vector<1x8x8xbf16>
    %110 = vector.shape_cast %109 : vector<1x8x8xbf16> to vector<8x8xbf16>
    %cst_99 = arith.constant dense<0.000000e+00> : vector<8x1000xf32>
    %111 = tpu.matmul %110, %108, %cst_99 {dimension_numbers = #tpu.dot_dimension_numbers<[1], [0], [0], [1], [0, 0, 1, 1], [], []>} : vector<8x8xbf16>, vector<8x1000xbf16>, vector<8x1000xf32> -> vector<8x1000xf32>
    %112 = arith.addf %106, %111 : vector<8x1000xf32>
    %c0_100 = arith.constant 0 : index
    %c0_101 = arith.constant 0 : index
    %c201 = arith.constant 201 : index
    %113 = vector.load %arg1[%c0_100, %c0_101, %c201] : memref<1x8x1222xbf16, #tpu.memory_space<vmem>>, vector<1x8x1000xbf16>
    %114 = vector.shape_cast %113 : vector<1x8x1000xbf16> to vector<8x1000xbf16>
    %c19 = arith.constant 19 : index
    %c0_102 = arith.constant 0 : index
    %c0_103 = arith.constant 0 : index
    %115 = vector.load %arg2[%c19, %c0_102, %c0_103] : memref<27x8x8xbf16, #tpu.memory_space<vmem>>, vector<1x8x8xbf16>
    %116 = vector.shape_cast %115 : vector<1x8x8xbf16> to vector<8x8xbf16>
    %cst_104 = arith.constant dense<0.000000e+00> : vector<8x1000xf32>
    %117 = tpu.matmul %116, %114, %cst_104 {dimension_numbers = #tpu.dot_dimension_numbers<[1], [0], [0], [1], [0, 0, 1, 1], [], []>} : vector<8x8xbf16>, vector<8x1000xbf16>, vector<8x1000xf32> -> vector<8x1000xf32>
    %118 = arith.addf %112, %117 : vector<8x1000xf32>
    %c0_105 = arith.constant 0 : index
    %c0_106 = arith.constant 0 : index
    %c202 = arith.constant 202 : index
    %119 = vector.load %arg1[%c0_105, %c0_106, %c202] : memref<1x8x1222xbf16, #tpu.memory_space<vmem>>, vector<1x8x1000xbf16>
    %120 = vector.shape_cast %119 : vector<1x8x1000xbf16> to vector<8x1000xbf16>
    %c20_107 = arith.constant 20 : index
    %c0_108 = arith.constant 0 : index
    %c0_109 = arith.constant 0 : index
    %121 = vector.load %arg2[%c20_107, %c0_108, %c0_109] : memref<27x8x8xbf16, #tpu.memory_space<vmem>>, vector<1x8x8xbf16>
    %122 = vector.shape_cast %121 : vector<1x8x8xbf16> to vector<8x8xbf16>
    %cst_110 = arith.constant dense<0.000000e+00> : vector<8x1000xf32>
    %123 = tpu.matmul %122, %120, %cst_110 {dimension_numbers = #tpu.dot_dimension_numbers<[1], [0], [0], [1], [0, 0, 1, 1], [], []>} : vector<8x8xbf16>, vector<8x1000xbf16>, vector<8x1000xf32> -> vector<8x1000xf32>
    %124 = arith.addf %118, %123 : vector<8x1000xf32>
    %c0_111 = arith.constant 0 : index
    %c0_112 = arith.constant 0 : index
    %c210 = arith.constant 210 : index
    %125 = vector.load %arg1[%c0_111, %c0_112, %c210] : memref<1x8x1222xbf16, #tpu.memory_space<vmem>>, vector<1x8x1000xbf16>
    %126 = vector.shape_cast %125 : vector<1x8x1000xbf16> to vector<8x1000xbf16>
    %c21_113 = arith.constant 21 : index
    %c0_114 = arith.constant 0 : index
    %c0_115 = arith.constant 0 : index
    %127 = vector.load %arg2[%c21_113, %c0_114, %c0_115] : memref<27x8x8xbf16, #tpu.memory_space<vmem>>, vector<1x8x8xbf16>
    %128 = vector.shape_cast %127 : vector<1x8x8xbf16> to vector<8x8xbf16>
    %cst_116 = arith.constant dense<0.000000e+00> : vector<8x1000xf32>
    %129 = tpu.matmul %128, %126, %cst_116 {dimension_numbers = #tpu.dot_dimension_numbers<[1], [0], [0], [1], [0, 0, 1, 1], [], []>} : vector<8x8xbf16>, vector<8x1000xbf16>, vector<8x1000xf32> -> vector<8x1000xf32>
    %130 = arith.addf %124, %129 : vector<8x1000xf32>
    %c0_117 = arith.constant 0 : index
    %c0_118 = arith.constant 0 : index
    %c211 = arith.constant 211 : index
    %131 = vector.load %arg1[%c0_117, %c0_118, %c211] : memref<1x8x1222xbf16, #tpu.memory_space<vmem>>, vector<1x8x1000xbf16>
    %132 = vector.shape_cast %131 : vector<1x8x1000xbf16> to vector<8x1000xbf16>
    %c22_119 = arith.constant 22 : index
    %c0_120 = arith.constant 0 : index
    %c0_121 = arith.constant 0 : index
    %133 = vector.load %arg2[%c22_119, %c0_120, %c0_121] : memref<27x8x8xbf16, #tpu.memory_space<vmem>>, vector<1x8x8xbf16>
    %134 = vector.shape_cast %133 : vector<1x8x8xbf16> to vector<8x8xbf16>
    %cst_122 = arith.constant dense<0.000000e+00> : vector<8x1000xf32>
    %135 = tpu.matmul %134, %132, %cst_122 {dimension_numbers = #tpu.dot_dimension_numbers<[1], [0], [0], [1], [0, 0, 1, 1], [], []>} : vector<8x8xbf16>, vector<8x1000xbf16>, vector<8x1000xf32> -> vector<8x1000xf32>
    %136 = arith.addf %130, %135 : vector<8x1000xf32>
    %c0_123 = arith.constant 0 : index
    %c0_124 = arith.constant 0 : index
    %c212 = arith.constant 212 : index
    %137 = vector.load %arg1[%c0_123, %c0_124, %c212] : memref<1x8x1222xbf16, #tpu.memory_space<vmem>>, vector<1x8x1000xbf16>
    %138 = vector.shape_cast %137 : vector<1x8x1000xbf16> to vector<8x1000xbf16>
    %c23 = arith.constant 23 : index
    %c0_125 = arith.constant 0 : index
    %c0_126 = arith.constant 0 : index
    %139 = vector.load %arg2[%c23, %c0_125, %c0_126] : memref<27x8x8xbf16, #tpu.memory_space<vmem>>, vector<1x8x8xbf16>
    %140 = vector.shape_cast %139 : vector<1x8x8xbf16> to vector<8x8xbf16>
    %cst_127 = arith.constant dense<0.000000e+00> : vector<8x1000xf32>
    %141 = tpu.matmul %140, %138, %cst_127 {dimension_numbers = #tpu.dot_dimension_numbers<[1], [0], [0], [1], [0, 0, 1, 1], [], []>} : vector<8x8xbf16>, vector<8x1000xbf16>, vector<8x1000xf32> -> vector<8x1000xf32>
    %142 = arith.addf %136, %141 : vector<8x1000xf32>
    %c0_128 = arith.constant 0 : index
    %c0_129 = arith.constant 0 : index
    %c220 = arith.constant 220 : index
    %143 = vector.load %arg1[%c0_128, %c0_129, %c220] : memref<1x8x1222xbf16, #tpu.memory_space<vmem>>, vector<1x8x1000xbf16>
    %144 = vector.shape_cast %143 : vector<1x8x1000xbf16> to vector<8x1000xbf16>
    %c24 = arith.constant 24 : index
    %c0_130 = arith.constant 0 : index
    %c0_131 = arith.constant 0 : index
    %145 = vector.load %arg2[%c24, %c0_130, %c0_131] : memref<27x8x8xbf16, #tpu.memory_space<vmem>>, vector<1x8x8xbf16>
    %146 = vector.shape_cast %145 : vector<1x8x8xbf16> to vector<8x8xbf16>
    %cst_132 = arith.constant dense<0.000000e+00> : vector<8x1000xf32>
    %147 = tpu.matmul %146, %144, %cst_132 {dimension_numbers = #tpu.dot_dimension_numbers<[1], [0], [0], [1], [0, 0, 1, 1], [], []>} : vector<8x8xbf16>, vector<8x1000xbf16>, vector<8x1000xf32> -> vector<8x1000xf32>
    %148 = arith.addf %142, %147 : vector<8x1000xf32>
    %c0_133 = arith.constant 0 : index
    %c0_134 = arith.constant 0 : index
    %c221 = arith.constant 221 : index
    %149 = vector.load %arg1[%c0_133, %c0_134, %c221] : memref<1x8x1222xbf16, #tpu.memory_space<vmem>>, vector<1x8x1000xbf16>
    %150 = vector.shape_cast %149 : vector<1x8x1000xbf16> to vector<8x1000xbf16>
    %c25 = arith.constant 25 : index
    %c0_135 = arith.constant 0 : index
    %c0_136 = arith.constant 0 : index
    %151 = vector.load %arg2[%c25, %c0_135, %c0_136] : memref<27x8x8xbf16, #tpu.memory_space<vmem>>, vector<1x8x8xbf16>
    %152 = vector.shape_cast %151 : vector<1x8x8xbf16> to vector<8x8xbf16>
    %cst_137 = arith.constant dense<0.000000e+00> : vector<8x1000xf32>
    %153 = tpu.matmul %152, %150, %cst_137 {dimension_numbers = #tpu.dot_dimension_numbers<[1], [0], [0], [1], [0, 0, 1, 1], [], []>} : vector<8x8xbf16>, vector<8x1000xbf16>, vector<8x1000xf32> -> vector<8x1000xf32>
    %154 = arith.addf %148, %153 : vector<8x1000xf32>
    %c0_138 = arith.constant 0 : index
    %c0_139 = arith.constant 0 : index
    %c222 = arith.constant 222 : index
    %155 = vector.load %arg1[%c0_138, %c0_139, %c222] : memref<1x8x1222xbf16, #tpu.memory_space<vmem>>, vector<1x8x1000xbf16>
    %156 = vector.shape_cast %155 : vector<1x8x1000xbf16> to vector<8x1000xbf16>
    %c26 = arith.constant 26 : index
    %c0_140 = arith.constant 0 : index
    %c0_141 = arith.constant 0 : index
    %157 = vector.load %arg2[%c26, %c0_140, %c0_141] : memref<27x8x8xbf16, #tpu.memory_space<vmem>>, vector<1x8x8xbf16>
    %158 = vector.shape_cast %157 : vector<1x8x8xbf16> to vector<8x8xbf16>
    %cst_142 = arith.constant dense<0.000000e+00> : vector<8x1000xf32>
    %159 = tpu.matmul %158, %156, %cst_142 {dimension_numbers = #tpu.dot_dimension_numbers<[1], [0], [0], [1], [0, 0, 1, 1], [], []>} : vector<8x8xbf16>, vector<8x1000xbf16>, vector<8x1000xf32> -> vector<8x1000xf32>
    %160 = arith.addf %154, %159 : vector<8x1000xf32>
    %c0_143 = arith.constant 0 : index
    %c0_144 = arith.constant 0 : index
    %161 = vector.load %arg3[%c0_143, %c0_144] : memref<8x1xf32, #tpu.memory_space<vmem>>, vector<8x1xf32>
    %c0_145 = arith.constant 0 : index
    %c0_146 = arith.constant 0 : index
    %162 = vector.load %arg4[%c0_145, %c0_146] : memref<8x1xf32, #tpu.memory_space<vmem>>, vector<8x1xf32>
    %c0_147 = arith.constant 0 : index
    %c0_148 = arith.constant 0 : index
    %163 = vector.load %arg5[%c0_147, %c0_148] : memref<1x1000xf32, #tpu.memory_space<vmem>>, vector<1x1000xf32>
    %164 = vector.broadcast %163 : vector<1x1000xf32> to vector<8x1000xf32>
    %165 = arith.mulf %160, %164 : vector<8x1000xf32>
    %cst_149 = arith.constant dense<0.000000e+00> : vector<8xf32>
    %166 = vector.multi_reduction <add>, %165, %cst_149 [1] : vector<8x1000xf32> to vector<8xf32>
    %167 = vector.shape_cast %166 : vector<8xf32> to vector<8x1xf32>
    %168 = arith.mulf %165, %160 : vector<8x1000xf32>
    %cst_150 = arith.constant dense<0.000000e+00> : vector<8xf32>
    %169 = vector.multi_reduction <add>, %168, %cst_150 [1] : vector<8x1000xf32> to vector<8xf32>
    %170 = vector.shape_cast %169 : vector<8xf32> to vector<8x1xf32>
    %171 = tpu.iota {dimensions = array<i32: 0>} : vector<8x1xi32>
    %cst_151 = arith.constant 0.000000e+00 : f32
    %172 = vector.broadcast %cst_151 : f32 to vector<8x1xf32>
    %cst_152 = arith.constant 0.000000e+00 : f32
    %173 = vector.broadcast %cst_152 : f32 to vector<8x1xf32>
    %174 = vector.extract_strided_slice %167 {offsets = [0, 0], sizes = [2, 1], strides = [1, 1]} : vector<8x1xf32> to vector<2x1xf32>
    %175 = vector.shape_cast %174 : vector<2x1xf32> to vector<1x2x1xf32>
    %cst_153 = arith.constant dense<0.000000e+00> : vector<1xf32>
    %176 = vector.multi_reduction <add>, %175, %cst_153 [1, 2] : vector<1x2x1xf32> to vector<1xf32>
    %177 = vector.shape_cast %176 : vector<1xf32> to vector<1x1x1xf32>
    %178 = vector.extract %177[0, 0, 0] : f32 from vector<1x1x1xf32>
    %cst_154 = arith.constant 9.765625E-4 : f32
    %179 = arith.mulf %178, %cst_154 : f32
    %180 = vector.extract_strided_slice %170 {offsets = [0, 0], sizes = [2, 1], strides = [1, 1]} : vector<8x1xf32> to vector<2x1xf32>
    %181 = vector.shape_cast %180 : vector<2x1xf32> to vector<1x2x1xf32>
    %cst_155 = arith.constant dense<0.000000e+00> : vector<1xf32>
    %182 = vector.multi_reduction <add>, %181, %cst_155 [1, 2] : vector<1x2x1xf32> to vector<1xf32>
    %183 = vector.shape_cast %182 : vector<1xf32> to vector<1x1x1xf32>
    %184 = vector.extract %183[0, 0, 0] : f32 from vector<1x1x1xf32>
    %cst_156 = arith.constant 9.765625E-4 : f32
    %185 = arith.mulf %184, %cst_156 : f32
    %186 = arith.mulf %179, %179 : f32
    %187 = arith.subf %185, %186 : f32
    %cst_157 = arith.constant 0.000000e+00 : f32
    %188 = arith.maximumf %187, %cst_157 : f32
    %cst_158 = arith.constant 9.99999974E-6 : f32
    %189 = arith.addf %188, %cst_158 : f32
    %190 = math.rsqrt %189 : f32
    %c0_i32 = arith.constant 0 : i32
    %191 = vector.broadcast %c0_i32 : i32 to vector<8x1xi32>
    %192 = arith.cmpi sge, %171, %191 : vector<8x1xi32>
    %c2_i32 = arith.constant 2 : i32
    %193 = vector.broadcast %c2_i32 : i32 to vector<8x1xi32>
    %194 = arith.cmpi slt, %171, %193 : vector<8x1xi32>
    %195 = arith.andi %192, %194 : vector<8x1xi1>
    %196 = vector.broadcast %190 : f32 to vector<8x1xf32>
    %197 = arith.select %195, %196, %172 : vector<8x1xi1>, vector<8x1xf32>
    %198 = vector.broadcast %179 : f32 to vector<8x1xf32>
    %199 = arith.select %195, %198, %173 : vector<8x1xi1>, vector<8x1xf32>
    %200 = vector.extract_strided_slice %167 {offsets = [2, 0], sizes = [2, 1], strides = [1, 1]} : vector<8x1xf32> to vector<2x1xf32>
    %201 = vector.shape_cast %200 : vector<2x1xf32> to vector<1x2x1xf32>
    %cst_159 = arith.constant dense<0.000000e+00> : vector<1xf32>
    %202 = vector.multi_reduction <add>, %201, %cst_159 [1, 2] : vector<1x2x1xf32> to vector<1xf32>
    %203 = vector.shape_cast %202 : vector<1xf32> to vector<1x1x1xf32>
    %204 = vector.extract %203[0, 0, 0] : f32 from vector<1x1x1xf32>
    %cst_160 = arith.constant 9.765625E-4 : f32
    %205 = arith.mulf %204, %cst_160 : f32
    %206 = vector.extract_strided_slice %170 {offsets = [2, 0], sizes = [2, 1], strides = [1, 1]} : vector<8x1xf32> to vector<2x1xf32>
    %207 = vector.shape_cast %206 : vector<2x1xf32> to vector<1x2x1xf32>
    %cst_161 = arith.constant dense<0.000000e+00> : vector<1xf32>
    %208 = vector.multi_reduction <add>, %207, %cst_161 [1, 2] : vector<1x2x1xf32> to vector<1xf32>
    %209 = vector.shape_cast %208 : vector<1xf32> to vector<1x1x1xf32>
    %210 = vector.extract %209[0, 0, 0] : f32 from vector<1x1x1xf32>
    %cst_162 = arith.constant 9.765625E-4 : f32
    %211 = arith.mulf %210, %cst_162 : f32
    %212 = arith.mulf %205, %205 : f32
    %213 = arith.subf %211, %212 : f32
    %cst_163 = arith.constant 0.000000e+00 : f32
    %214 = arith.maximumf %213, %cst_163 : f32
    %cst_164 = arith.constant 9.99999974E-6 : f32
    %215 = arith.addf %214, %cst_164 : f32
    %216 = math.rsqrt %215 : f32
    %c2_i32_165 = arith.constant 2 : i32
    %217 = vector.broadcast %c2_i32_165 : i32 to vector<8x1xi32>
    %218 = arith.cmpi sge, %171, %217 : vector<8x1xi32>
    %c4_i32 = arith.constant 4 : i32
    %219 = vector.broadcast %c4_i32 : i32 to vector<8x1xi32>
    %220 = arith.cmpi slt, %171, %219 : vector<8x1xi32>
    %221 = arith.andi %218, %220 : vector<8x1xi1>
    %222 = vector.broadcast %216 : f32 to vector<8x1xf32>
    %223 = arith.select %221, %222, %197 : vector<8x1xi1>, vector<8x1xf32>
    %224 = vector.broadcast %205 : f32 to vector<8x1xf32>
    %225 = arith.select %221, %224, %199 : vector<8x1xi1>, vector<8x1xf32>
    %226 = vector.extract_strided_slice %167 {offsets = [4, 0], sizes = [2, 1], strides = [1, 1]} : vector<8x1xf32> to vector<2x1xf32>
    %227 = vector.shape_cast %226 : vector<2x1xf32> to vector<1x2x1xf32>
    %cst_166 = arith.constant dense<0.000000e+00> : vector<1xf32>
    %228 = vector.multi_reduction <add>, %227, %cst_166 [1, 2] : vector<1x2x1xf32> to vector<1xf32>
    %229 = vector.shape_cast %228 : vector<1xf32> to vector<1x1x1xf32>
    %230 = vector.extract %229[0, 0, 0] : f32 from vector<1x1x1xf32>
    %cst_167 = arith.constant 9.765625E-4 : f32
    %231 = arith.mulf %230, %cst_167 : f32
    %232 = vector.extract_strided_slice %170 {offsets = [4, 0], sizes = [2, 1], strides = [1, 1]} : vector<8x1xf32> to vector<2x1xf32>
    %233 = vector.shape_cast %232 : vector<2x1xf32> to vector<1x2x1xf32>
    %cst_168 = arith.constant dense<0.000000e+00> : vector<1xf32>
    %234 = vector.multi_reduction <add>, %233, %cst_168 [1, 2] : vector<1x2x1xf32> to vector<1xf32>
    %235 = vector.shape_cast %234 : vector<1xf32> to vector<1x1x1xf32>
    %236 = vector.extract %235[0, 0, 0] : f32 from vector<1x1x1xf32>
    %cst_169 = arith.constant 9.765625E-4 : f32
    %237 = arith.mulf %236, %cst_169 : f32
    %238 = arith.mulf %231, %231 : f32
    %239 = arith.subf %237, %238 : f32
    %cst_170 = arith.constant 0.000000e+00 : f32
    %240 = arith.maximumf %239, %cst_170 : f32
    %cst_171 = arith.constant 9.99999974E-6 : f32
    %241 = arith.addf %240, %cst_171 : f32
    %242 = math.rsqrt %241 : f32
    %c4_i32_172 = arith.constant 4 : i32
    %243 = vector.broadcast %c4_i32_172 : i32 to vector<8x1xi32>
    %244 = arith.cmpi sge, %171, %243 : vector<8x1xi32>
    %c6_i32 = arith.constant 6 : i32
    %245 = vector.broadcast %c6_i32 : i32 to vector<8x1xi32>
    %246 = arith.cmpi slt, %171, %245 : vector<8x1xi32>
    %247 = arith.andi %244, %246 : vector<8x1xi1>
    %248 = vector.broadcast %242 : f32 to vector<8x1xf32>
    %249 = arith.select %247, %248, %223 : vector<8x1xi1>, vector<8x1xf32>
    %250 = vector.broadcast %231 : f32 to vector<8x1xf32>
    %251 = arith.select %247, %250, %225 : vector<8x1xi1>, vector<8x1xf32>
    %252 = vector.extract_strided_slice %167 {offsets = [6, 0], sizes = [2, 1], strides = [1, 1]} : vector<8x1xf32> to vector<2x1xf32>
    %253 = vector.shape_cast %252 : vector<2x1xf32> to vector<1x2x1xf32>
    %cst_173 = arith.constant dense<0.000000e+00> : vector<1xf32>
    %254 = vector.multi_reduction <add>, %253, %cst_173 [1, 2] : vector<1x2x1xf32> to vector<1xf32>
    %255 = vector.shape_cast %254 : vector<1xf32> to vector<1x1x1xf32>
    %256 = vector.extract %255[0, 0, 0] : f32 from vector<1x1x1xf32>
    %cst_174 = arith.constant 9.765625E-4 : f32
    %257 = arith.mulf %256, %cst_174 : f32
    %258 = vector.extract_strided_slice %170 {offsets = [6, 0], sizes = [2, 1], strides = [1, 1]} : vector<8x1xf32> to vector<2x1xf32>
    %259 = vector.shape_cast %258 : vector<2x1xf32> to vector<1x2x1xf32>
    %cst_175 = arith.constant dense<0.000000e+00> : vector<1xf32>
    %260 = vector.multi_reduction <add>, %259, %cst_175 [1, 2] : vector<1x2x1xf32> to vector<1xf32>
    %261 = vector.shape_cast %260 : vector<1xf32> to vector<1x1x1xf32>
    %262 = vector.extract %261[0, 0, 0] : f32 from vector<1x1x1xf32>
    %cst_176 = arith.constant 9.765625E-4 : f32
    %263 = arith.mulf %262, %cst_176 : f32
    %264 = arith.mulf %257, %257 : f32
    %265 = arith.subf %263, %264 : f32
    %cst_177 = arith.constant 0.000000e+00 : f32
    %266 = arith.maximumf %265, %cst_177 : f32
    %cst_178 = arith.constant 9.99999974E-6 : f32
    %267 = arith.addf %266, %cst_178 : f32
    %268 = math.rsqrt %267 : f32
    %c6_i32_179 = arith.constant 6 : i32
    %269 = vector.broadcast %c6_i32_179 : i32 to vector<8x1xi32>
    %270 = arith.cmpi sge, %171, %269 : vector<8x1xi32>
    %c8_i32 = arith.constant 8 : i32
    %271 = vector.broadcast %c8_i32 : i32 to vector<8x1xi32>
    %272 = arith.cmpi slt, %171, %271 : vector<8x1xi32>
    %273 = arith.andi %270, %272 : vector<8x1xi1>
    %274 = vector.broadcast %268 : f32 to vector<8x1xf32>
    %275 = arith.select %273, %274, %249 : vector<8x1xi1>, vector<8x1xf32>
    %276 = vector.broadcast %257 : f32 to vector<8x1xf32>
    %277 = arith.select %273, %276, %251 : vector<8x1xi1>, vector<8x1xf32>
    %278 = arith.mulf %161, %275 : vector<8x1xf32>
    %279 = arith.mulf %277, %278 : vector<8x1xf32>
    %280 = arith.subf %162, %279 : vector<8x1xf32>
    %281 = vector.broadcast %278 : vector<8x1xf32> to vector<8x1000xf32>
    %282 = arith.mulf %160, %281 : vector<8x1000xf32>
    %283 = vector.broadcast %280 : vector<8x1xf32> to vector<8x1000xf32>
    %284 = arith.addf %282, %283 : vector<8x1000xf32>
    %cst_180 = arith.constant 0.000000e+00 : f32
    %285 = vector.broadcast %cst_180 : f32 to vector<8x1000xf32>
    %286 = arith.maximumf %284, %285 : vector<8x1000xf32>
    %c0_181 = arith.constant 0 : index
    %c0_182 = arith.constant 0 : index
    %c0_183 = arith.constant 0 : index
    %287 = vector.load %arg6[%c0_181, %c0_182, %c0_183] : memref<1x8x1000xf32, #tpu.memory_space<vmem>>, vector<1x8x1000xf32>
    %288 = vector.shape_cast %287 : vector<1x8x1000xf32> to vector<8x1000xf32>
    %289 = vector.shape_cast %286 : vector<8x1000xf32> to vector<1x8x1000xf32>
    tpu.vector_store %arg6[%c0_181, %c0_182, %c0_183], %289 {strides = array<i32>} : memref<1x8x1000xf32, #tpu.memory_space<vmem>>, vector<1x8x1000xf32>,
    return
  }
  func.func @transform_0(%arg0: i32) -> (i32, i32, i32) {
    %c0_i32 = arith.constant 0 : i32
    %c0_i32_0 = arith.constant 0 : i32
    %c0_i32_1 = arith.constant 0 : i32
    return %arg0, %c0_i32, %c0_i32_0 : i32, i32, i32
  }
  func.func @transform_1(%arg0: i32) -> (i32, i32, i32) {
    %c0_i32 = arith.constant 0 : i32
    %c0_i32_0 = arith.constant 0 : i32
    %c0_i32_1 = arith.constant 0 : i32
    %c0_i32_2 = arith.constant 0 : i32
    return %c0_i32, %c0_i32_0, %c0_i32_1 : i32, i32, i32
  }
  func.func @transform_2(%arg0: i32) -> (i32, i32) {
    %c0_i32 = arith.constant 0 : i32
    %c0_i32_0 = arith.constant 0 : i32
    %c0_i32_1 = arith.constant 0 : i32
    return %c0_i32, %c0_i32_0 : i32, i32
  }
  func.func @transform_3(%arg0: i32) -> (i32, i32) {
    %c0_i32 = arith.constant 0 : i32
    %c0_i32_0 = arith.constant 0 : i32
    %c0_i32_1 = arith.constant 0 : i32
    return %c0_i32, %c0_i32_0 : i32, i32
  }
  func.func @transform_4(%arg0: i32) -> (i32, i32) {
    %c0_i32 = arith.constant 0 : i32
    %c0_i32_0 = arith.constant 0 : i32
    %c0_i32_1 = arith.constant 0 : i32
    return %c0_i32, %c0_i32_0 : i32, i32
  }
  func.func @transform_5(%arg0: i32) -> (i32, i32, i32) {
    %c0_i32 = arith.constant 0 : i32
    %c0_i32_0 = arith.constant 0 : i32
    %c0_i32_1 = arith.constant 0 : i32
    return %arg0, %c0_i32, %c0_i32_0 : i32, i32, i32
  }
}

</mosaic_0001>

<bundles_post_ra>
// kernel: _lambda_.3
= control target key start
LH: loop header
LB: loop body
LE: loop exit
PB: predicated region body
PF: predicated region fallthrough
CT: control target
= control target key end

     0   :  { %11 = vsyncpa [#allocation3], 0  ;;  %s2576_s0 = inlined_call_operand.vmem [shape: bf16[2,16,302], index: 0, kind: input, shape index: {}]   ;;  %s2577_s1 = inlined_call_operand.hbm [shape: bf16[27,8,16], index: 1, kind: input, shape index: {}]   ;;  %s2578_s2 = inlined_call_operand.hbm [shape: f32[8,1], index: 2, kind: input, shape index: {}]   ;;  %s2579_s3 = inlined_call_operand.hbm [shape: f32[8,1], index: 3, kind: input, shape index: {}]   ;;  %s2580_s4 = inlined_call_operand.vmem [shape: f32[1,216], index: 4, kind: input, shape index: {}]   ;;  %s2581_s5 = inlined_call_operand.hbm [shape: bf16[4,8], index: 5, kind: input, shape index: {}]   ;;  %s2582_s6 = inlined_call_operand.vmem [shape: f32[2,4,216], index: 6, kind: output, shape index: {}]  }
   0x1   :  { %12 = vsyncpa [#allocation5], 0 }
   0x2   :  { %13 = vsyncpa [#allocation8], 0  ;;  %s2288_s21 = smov 0  }
   0x3 LB: > { %s207_s24 = sshll.u32 %s2578_s2, 4  ;;  %s2297_s25 = sadd.s32 4294967295, %s2217_s21   ;;  %s2217_s21 = sphi %s2288_s21, %s19_s21   ;;  %s208_s24 = int_to_ptr.hbm [resolvable:$true] %s207_s24 }
   0x4   : > { %p1866_p0 = scmp.ge.s32.totalorder %s2217_s21, 1  ;;  %p181_p1 = scmp.lt.s32.totalorder %s2217_s21, 3 }
   0x5   : > { %p2018_p2 = scmp.eq.s32.totalorder %s2297_s25, 0  ;;  %s2219_s27 = smov [#allocation4]  }
   0x6   : > { %p2302_p3 = pnand %p1866_p0, %p181_p1  ;;  %s209_s28 = sshll.u32 %s2219_s27, 4  ;;  %s210_s28 = int_to_ptr.vmem [resolvable:$true] %s209_s28 }
   0x7   : > { %s192_s7 = sshll.u32 %s2577_s1, 4  ;;  %s2220_s9 = smov [#allocation2]   ;;  %s193_s7 = int_to_ptr.hbm [resolvable:$true] %s192_s7 }
   0x8   : > { %p2005_p4 = pneg %p2302_p3  ;;  %s194_s10 = sshll.u32 %s2220_s9, 4  ;;  %s195_s10 = int_to_ptr.vmem [resolvable:$true] %s194_s10 }
   0x9   : > { %s219_s13 = sshll.u32 %s2579_s3, 4  ;;  %s2221_s14 = smov 64   ;;  %s220_s13 = int_to_ptr.hbm [resolvable:$true] %s219_s13 }
   0xa   : > { %p2313_p5 = pnand %p2018_p2, %p2005_p4  ;;  %s2222_s15 = smov 4  }
   0xb   : > { %s2223_s16 = smov [#allocation6]   ;;  %s234_s20 = sshll.u32 %s2581_s5, 4  ;;  %s235_s20 = int_to_ptr.hbm [resolvable:$true] %s234_s20 }
   0xc   : > { %2011 = dma.hbm_to_vmem [thread:$0]  (!%p2313_p5), %s208_s24, 128, %s210_s28, [#allocation5]  }
   0xd   : > { %2008 = dma.hbm_to_vmem [thread:$0]  (!%p2313_p5), %s193_s7, 1728, %s195_s10, [#allocation3], %s2221_s14, %s2221_s14, %s2222_s15  }
   0xe   : > { %s221_s17 = sshll.u32 %s2223_s16, 4  ;;  %s2224_s22 = smov [#allocation7]   ;;  %s222_s17 = int_to_ptr.vmem [resolvable:$true] %s221_s17 }
   0xf   : > { %2014 = dma.hbm_to_vmem [thread:$0]  (!%p2313_p5), %s220_s13, 128, %s222_s17, [#allocation5]  }
  0x10   : > { %s236_s23 = sshll.u32 %s2224_s22, 4  ;;  %257 = sbr.rel (%p2302_p3) target bundleno = 1384 (0x568), region = 44  ;;  %s237_s23 = int_to_ptr.vmem [resolvable:$true] %s236_s23 }
  0x11   : > { %2017 = dma.hbm_to_vmem [thread:$0]  (!%p2313_p5), %s235_s20, 32, %s237_s23, [#allocation8]  }
  0x15   : > { %2204 = dma.done.wait (%p2018_p2), [#allocation3], 1728  }
  0x16   : > { %2206 = vsyncadd (%p2018_p2), [#allocation3], 4294965568 }
  0x17   : > { %2208 = dma.done.wait (%p2018_p2), [#allocation5], 256  }
  0x18   : > { %2210 = vsyncadd (%p2018_p2), [#allocation5], 4294967040 }
  0x19   : > { %2212 = dma.done.wait (%p2018_p2), [#allocation8], 32  }
  0x1a   : > { %2214 = vsyncadd (%p2018_p2), [#allocation8], 4294967264  ;;  %p303_p6 = scmp.lt.s32.totalorder %s2297_s25, 1  ;;  %s2225_s29 = smov 127   ;;  %v316_v15 = vld [vmem:[#allocation2] sm:$0xf] }
  0x1b   : > { %s2226_s30 = smov 126   ;;  %s2227_s7 = smov 122   ;;  %vm335_vm0 = vcmask 130048   ;;  %vm443_vm1 = vcmask 998400   ;;  %v438_v19 = vld [vmem:[#allocation2 + $0xc] sm:$0xf] }
  0x1c   : > { %s2590_s25 = smov (!%p303_p6, %s2297_s25), 1  ;;  %s2228_s8 = smov 121   ;;  %vm331_vm2 = vcmask 1039360   ;;  %vm402_vm3 = vcmask 1031168   ;;  %v318_v26 = vld [vmem:[#allocation2 + $0x4] sm:$0xf] }
  0x1d   : > { %s1964_s24 = smul.u32 24, %s2590_s25  ;;  %s2229_s9 = smov 120   ;;  %vm484_vm4 = vcmask 990208   ;;  %vm525_vm5 = vcmask 982016   ;;  %v397_v35 = vld [vmem:[#allocation2 + $0x8] sm:$0xf] }
  0x1e   : > { %s2230_s10 = smov 116   ;;  %s2231_s11 = smov 115   ;;  %v520_v37 = vld [vmem:[#allocation2 + $0x14] sm:$0xf]  ;;  %vm566_vm6 = vcmask 949248   ;;  %vm607_vm7 = vcmask 941056  }
  0x1f   : > { %s2353_s28 = scalar_lea.vmem %s2576_s0, %s1964_s24  ;;  %s2232_s12 = smov 114   ;;  %vm689_vm8 = vcmask 752640   ;;  %v479_v45 = vld [vmem:[#allocation2 + $0x10] sm:$0xf]  ;;  %v602_v46 = vld [vmem:[#allocation2 + $0x1c] sm:$0xf] }
  0x20   : > { %v1882_v0 = vld [vmem:[%s2353_s28] sm:$0xf]  ;;  %v1960_v1 = vld [vmem:[%s2353_s28 + $0x8] sm:$0xf0]  ;;  %v1959_v2 = vld [vmem:[%s2353_s28 + $0x4] sm:$0xf] }
  0x21   : > { %v1883_v3 = vor.u32 %v1960_v1, %v1882_v0  ;;  %v1884_v4 = vld [vmem:[%s2353_s28 + $0xc] sm:$0xf0]  ;;  %s2233_s13 = smov 92   ;;  %s2234_s14 = smov 91   ;;  %v1961_v6 = vld [vmem:[%s2353_s28 + $0x4] sm:$0xf] }
  0x22   : > { %v1887_v5 = vor.u32 %v1959_v2, %v1884_v4  ;;  %v1916_v7 = vld [vmem:[%s2353_s28 + $0xc] sm:$0xf0]  ;;  %s2235_s15 = smov 90   ;;  %s2236_s16 = smov 86   ;;  %v1914_v9 = vld [vmem:[%s2353_s28] sm:$0xf] }
  0x23   : > { %327 = vrot.lane.b32.xlu0 %v1883_v3, %s2225_s29  ;;  %398 = vrot.lane.b32.xlu1 %v1883_v3, %s2226_s30  ;;  %v2361_v8 = vor.u32 %v1961_v6, %v1916_v7  ;;  %v1962_v10 = vld [vmem:[%s2353_s28 + $0x8] sm:$0xf0]  ;;  %s2237_s17 = smov 85   ;;  %s2238_s18 = smov 84   ;;  %v1922_v12 = vld [vmem:[%s2353_s28 + $0x8] sm:$0xf] }
  0x24   : > { %439 = vrot.lane.b32.xlu2 %v1883_v3, %s2227_s7  ;;  %390 = vmatpush.bf16.msra.mxu3 %v1887_v5  ;;  %v2366_v11 = vor.u32 %v1962_v10, %v1914_v9  ;;  %v1963_v13 = vld [vmem:[%s2353_s28 + $0x10] sm:$0xf0]  ;;  %s2239_s19 = smov 80   ;;  %s2240_s20 = smov 79   ;;  %vm648_vm9 = vcmask 932864   ;;  %vm771_vm10 = vcmask 736256  }
  0x25   : > { %377 = vmatpush.bf16.msra.mxu2 %v1883_v3  ;;  %v2376_v14 = vor.u32 %v1963_v13, %v1922_v12  ;;  %s2241_s22 = smov 78   ;;  %s2242_s23 = smov 56   ;;  %vm730_vm11 = vcmask 744448   ;;  %v561_v54 = vld [vmem:[#allocation2 + $0x18] sm:$0xf]  ;;  %vm875_vm12 = vcmask 695296  }
  0x26   : > { %s2243_s24 = smov 55   ;;  %s2244_s26 = smov 54   ;;  %v684_v55 = vld [vmem:[#allocation2 + $0x24] sm:$0xf]  ;;  %vm831_vm13 = vcmask 703488   ;;  %vm963_vm14 = vcmask 654336  }
  0x27   : > { %1891 = vmatmul.msk.bf16.vlgmr.msra.gmra.mxu3 %vm335_vm0, %v316_v15  ;;  %s2245_s27 = smov 50   ;;  %s2246_s28 = smov 49   ;;  %v643_v1 = vld [vmem:[#allocation2 + $0x20] sm:$0xf]  ;;  %v766_v2 = vld [vmem:[#allocation2 + $0x2c] sm:$0xf] }
  0x28   : > { %1890 = vmatmul.msk.bf16.vlgmr.msra.gmra.mxu2 %vm335_vm0, %v316_v15  ;;  %vm919_vm15 = vcmask 687104   ;;  %v725_v13 = vld [vmem:[#allocation2 + $0x28] sm:$0xf]  ;;  %v868_v15 = vld [vmem:[#allocation2 + $0x34] sm:$0xf] }
  0x2b   : > { %329 = vrot.lane.b32.xlu0 %v1887_v5, %s2225_s29  ;;  %400 = vrot.lane.b32.xlu1 %v1887_v5, %s2226_s30  ;;  %s2247_s29 = smov 48   ;;  %s2248_s30 = smov 44  }
  0x2c   : > { %441 = vrot.lane.b32.xlu2 %v1887_v5, %s2227_s7  ;;  %s2249_s7 = smov 43  }
  0x33   : > { %480 = vrot.lane.b32.xlu0 %v1883_v3, %s2228_s8  ;;  %482 = vrot.lane.b32.xlu1 %v1887_v5, %s2228_s8  ;;  %s2250_s8 = smov 42  }
  0x34   : > { %521 = vrot.lane.b32.xlu2 %v1883_v3, %s2229_s9 }
  0x3b   : > { %523 = vrot.lane.b32.xlu0 %v1887_v5, %s2229_s9  ;;  %562 = vrot.lane.b32.xlu1 %v1883_v3, %s2230_s10 }
  0x3c   : > { %564 = vrot.lane.b32.xlu2 %v1887_v5, %s2230_s10 }
  0x43   : > { %605 = vrot.lane.b32.xlu1 %v1887_v5, %s2231_s11  ;;  %603 = vrot.lane.b32.xlu0 %v1883_v3, %s2231_s11 }
  0x44   : > { %644 = vrot.lane.b32.xlu2 %v1883_v3, %s2232_s12 }
  0x4b   : > { %685 = vrot.lane.b32.xlu1 %v1883_v3, %s2233_s13  ;;  %646 = vrot.lane.b32.xlu0 %v1887_v5, %s2232_s12 }
  0x4c   : > { %687 = vrot.lane.b32.xlu2 %v1887_v5, %s2233_s13 }
  0x53   : > { %726 = vrot.lane.b32.xlu0 %v1883_v3, %s2234_s14  ;;  %728 = vrot.lane.b32.xlu1 %v1887_v5, %s2234_s14 }
  0x54   : > { %767 = vrot.lane.b32.xlu2 %v1883_v3, %s2235_s15 }
  0x5b   : > { %769 = vrot.lane.b32.xlu0 %v1887_v5, %s2235_s15  ;;  %827 = vrot.lane.b32.xlu1 %v2361_v8, %s2236_s16 }
  0x5c   : > { %829 = vrot.lane.b32.xlu2 %v2376_v14, %s2236_s16 }
  0x63   : > { %825 = vrot.lane.b32.xlu0 %v2366_v11, %s2236_s16  ;;  %871 = vrot.lane.b32.xlu1 %v2361_v8, %s2237_s17 }
  0x64   : > { %873 = vrot.lane.b32.xlu2 %v2376_v14, %s2237_s17 }
  0x6b   : > { %869 = vrot.lane.b32.xlu0 %v2366_v11, %s2237_s17  ;;  %915 = vrot.lane.b32.xlu1 %v2361_v8, %s2238_s18  ;;  %s2251_s17 = smov 0.0  }
  0x6c   : > { %917 = vrot.lane.b32.xlu2 %v2376_v14, %s2238_s18 }
  0x73   : > { %913 = vrot.lane.b32.xlu0 %v2366_v11, %s2238_s18  ;;  %959 = vrot.lane.b32.xlu1 %v2361_v8, %s2239_s19 }
  0x74   : > { %961 = vrot.lane.b32.xlu2 %v2376_v14, %s2239_s19 }
  0x7b   : > { %957 = vrot.lane.b32.xlu0 %v2366_v11, %s2239_s19  ;;  %1003 = vrot.lane.b32.xlu1 %v2361_v8, %s2240_s20 }
  0x7c   : > { %1005 = vrot.lane.b32.xlu2 %v2376_v14, %s2240_s20 }
  0x7e   : > { %v440_v16 = vpop.permute.xlu2 %439 }
  0x83   : > { %1001 = vrot.lane.b32.xlu0 %v2366_v11, %s2240_s20  ;;  %1047 = vrot.lane.b32.xlu1 %v2361_v8, %s2241_s22 }
  0x84   : > { %1049 = vrot.lane.b32.xlu2 %v2376_v14, %s2241_s22 }
  0x86   : > { %v442_v17 = vpop.permute.xlu2 %441 }
  0x87   : > { %470 = vmatpush.bf16.msrb.mxu3 %v442_v17  ;;  %v444_v18 = vsel %vm443_vm1, %v440_v16, %v442_v17  ;;  %vm1051_vm1 = vcmask 637952  }
  0x88   : > { %457 = vmatpush.bf16.msrb.mxu2 %v444_v18 }
  0x8a   : > { %1895 = vmatmul.msk.bf16.vlgmr.msrb.gmra.mxu3 %vm335_vm0, %v438_v19 }
  0x8b   : > { %1045 = vrot.lane.b32.xlu0 %v2366_v11, %s2241_s22  ;;  %1894 = vmatmul.msk.bf16.vlgmr.msrb.gmra.mxu2 %vm335_vm0, %v438_v19 }
  0x8c   : > { %1091 = vrot.lane.b32.xlu1 %v2361_v8, %s2242_s23  ;;  %1093 = vrot.lane.b32.xlu2 %v2376_v14, %s2242_s23 }
  0x8e   : > { %v522_v22 = vpop.permute.xlu2 %521 }
  0x93   : > { %1089 = vrot.lane.b32.xlu0 %v2366_v11, %s2242_s23 }
  0x94   : > { %1135 = vrot.lane.b32.xlu1 %v2361_v8, %s2243_s24  ;;  %1137 = vrot.lane.b32.xlu2 %v2376_v14, %s2243_s24 }
  0x95   : > { %v328_v20 = vpop.permute.xlu0 %327  ;;  %v399_v21 = vpop.permute.xlu1 %398 }
  0x96   : > { %v565_v28 = vpop.permute.xlu2 %564 }
  0x9b   : > { %1133 = vrot.lane.b32.xlu0 %v2366_v11, %s2243_s24 }
  0x9c   : > { %1179 = vrot.lane.b32.xlu1 %v2361_v8, %s2244_s26  ;;  %1181 = vrot.lane.b32.xlu2 %v2376_v14, %s2244_s26 }
  0x9d   : > { %v330_v23 = vpop.permute.xlu0 %329  ;;  %v401_v24 = vpop.permute.xlu1 %400 }
  0x9e   : > { %359 = vmatpush.bf16.msra.mxu1 %v330_v23  ;;  %v332_v25 = vsel %vm331_vm2, %v328_v20, %v330_v23  ;;  %v403_v27 = vsel %vm402_vm3, %v399_v21, %v401_v24  ;;  %v645_v32 = vpop.permute.xlu2 %644  ;;  %vm1007_vm2 = vcmask 646144   ;;  %vm1139_vm3 = vcmask 449536  }
  0x9f   : > { %346 = vmatpush.bf16.msra.mxu0 %v332_v25  ;;  %v956_v25 = vld [vmem:[#allocation2 + $0x3c] sm:$0xf] }
  0xa1   : > { %1889 = vmatmul.msk.bf16.vlgmr.msra.gmra.mxu1 %vm335_vm0, %v318_v26 }
  0xa2   : > { %429 = vmatpush.bf16.msrb.mxu1 %v401_v24  ;;  %1888 = vmatmul.msk.bf16.vlgmr.msra.gmra.mxu0 %vm335_vm0, %v318_v26  ;;  %v811_v24 = vld [vmem:[#allocation2 + $0x30] sm:$0xf] }
  0xa3   : > { %416 = vmatpush.bf16.msrb.mxu0 %v403_v27  ;;  %1177 = vrot.lane.b32.xlu0 %v2366_v11, %s2244_s26 }
  0xa4   : > { %1223 = vrot.lane.b32.xlu1 %v2361_v8, %s2245_s27  ;;  %1225 = vrot.lane.b32.xlu2 %v2376_v14, %s2245_s27 }
  0xa5   : > { %v481_v29 = vpop.permute.xlu0 %480  ;;  %v483_v30 = vpop.permute.xlu1 %482 }
  0xa6   : > { %v485_v31 = vsel %vm484_vm4, %v481_v29, %v483_v30  ;;  %511 = vmatpush.bf16.msra.mxu1 %v483_v30  ;;  %v688_v39 = vpop.permute.xlu2 %687  ;;  %vm1095_vm4 = vcmask 457728  }
  0xa7   : > { %498 = vmatpush.bf16.msra.mxu0 %v485_v31 }
  0xaa   : > { %v392_v27 = vpop.f32.mrf.mxu3 }
  0xab   : > { %1221 = vrot.lane.b32.xlu0 %v2366_v11, %s2245_s27 }
  0xac   : > { %1267 = vrot.lane.b32.xlu1 %v2361_v8, %s2246_s28  ;;  %1269 = vrot.lane.b32.xlu2 %v2376_v14, %s2246_s28 }
  0xad   : > { %v524_v33 = vpop.permute.xlu0 %523  ;;  %v563_v34 = vpop.permute.xlu1 %562 }
  0xae   : > { %v526_v36 = vsel %vm525_vm5, %v522_v22, %v524_v33  ;;  %552 = vmatpush.bf16.msra.mxu3 %v524_v33  ;;  %v567_v38 = vsel %vm566_vm6, %v563_v34, %v565_v28  ;;  %v768_v51 = vpop.permute.xlu2 %767  ;;  %vm1227_vm5 = vcmask 408576   ;;  %vm1183_vm6 = vcmask 441344  }
  0xaf   : > { %539 = vmatpush.bf16.msra.mxu2 %v526_v36 }
  0xb1   : > { %1893 = vmatmul.msk.bf16.vlgmr.msrb.gmra.mxu1 %vm335_vm0, %v397_v35  ;;  %1899 = vmatmul.msk.bf16.vlgmr.msra.gmra.mxu3 %vm335_vm0, %v520_v37 }
  0xb2   : > { %1892 = vmatmul.msk.bf16.vlgmr.msrb.gmra.mxu0 %vm335_vm0, %v397_v35  ;;  %1898 = vmatmul.msk.bf16.vlgmr.msra.gmra.mxu2 %vm335_vm0, %v520_v37  ;;  %v394_v34 = vpop.f32.mrf.mxu3 }
  0xb3   : > { %593 = vmatpush.bf16.msrb.mxu1 %v565_v28  ;;  %1265 = vrot.lane.b32.xlu0 %v2366_v11, %s2246_s28  ;;  %v379_v28 = vpop.f32.mrf.mxu2 }
  0xb4   : > { %580 = vmatpush.bf16.msrb.mxu0 %v567_v38  ;;  %1311 = vrot.lane.b32.xlu1 %v2361_v8, %s2247_s29 }
  0xb5   : > { %v606_v40 = vpop.permute.xlu1 %605  ;;  %v604_v41 = vpop.permute.xlu0 %603  ;;  %1313 = vrot.lane.b32.xlu2 %v2376_v14, %s2247_s29 }
  0xb6   : > { %v608_v42 = vsel %vm607_vm7, %v604_v41, %v606_v40  ;;  %634 = vmatpush.bf16.msrb.mxu3 %v606_v40  ;;  %v830_v58 = vpop.permute.xlu2 %829  ;;  %v912_v40 = vld [vmem:[#allocation2 + $0x38] sm:$0xf]  ;;  %v1044_v41 = vld [vmem:[#allocation2 + $0x44] sm:$0xf]  ;;  %vm1315_vm7 = vcmask 392192  }
  0xb7   : > { %621 = vmatpush.bf16.msrb.mxu2 %v608_v42 }
  0xba   : > { %716 = vmatpush.bf16.msra.mxu3 %v688_v39 }
  0xbb   : > { %1309 = vrot.lane.b32.xlu0 %v2366_v11, %s2247_s29  ;;  %v381_v35 = vpop.f32.mrf.mxu2 }
  0xbc   : > { %1355 = vrot.lane.b32.xlu1 %v2361_v8, %s2248_s30  ;;  %v1176_v35 = vld [vmem:[#allocation2 + $0x50] sm:$0xf] }
  0xbd   : > { %v686_v43 = vpop.permute.xlu1 %685  ;;  %v647_v44 = vpop.permute.xlu0 %646  ;;  %1357 = vrot.lane.b32.xlu2 %v2376_v14, %s2248_s30 }
  0xbe   : > { %v690_v47 = vsel %vm689_vm8, %v686_v43, %v688_v39  ;;  %v649_v48 = vsel %vm648_vm9, %v645_v32, %v647_v44  ;;  %v874_v61 = vpop.permute.xlu2 %873  ;;  %vm1271_vm8 = vcmask 400384   ;;  %vm1403_vm9 = vcmask 351232  }
  0xbf   : > { %703 = vmatpush.bf16.msra.mxu2 %v690_v47 }
  0xc1   : > { %1897 = vmatmul.msk.bf16.vlgmr.msra.gmra.mxu1 %vm335_vm0, %v479_v45  ;;  %1903 = vmatmul.msk.bf16.vlgmr.msrb.gmra.mxu3 %vm335_vm0, %v602_v46 }
  0xc2   : > { %1896 = vmatmul.msk.bf16.vlgmr.msra.gmra.mxu0 %vm335_vm0, %v479_v45  ;;  %1902 = vmatmul.msk.bf16.vlgmr.msrb.gmra.mxu2 %vm335_vm0, %v602_v46 }
  0xc3   : > { %675 = vmatpush.bf16.msra.mxu1 %v647_v44  ;;  %1353 = vrot.lane.b32.xlu0 %v2366_v11, %s2248_s30 }
  0xc4   : > { %662 = vmatpush.bf16.msra.mxu0 %v649_v48  ;;  %1399 = vrot.lane.b32.xlu1 %v2361_v8, %s2249_s7 }
  0xc5   : > { %v727_v49 = vpop.permute.xlu0 %726  ;;  %v729_v50 = vpop.permute.xlu1 %728  ;;  %1401 = vrot.lane.b32.xlu2 %v2376_v14, %s2249_s7 }
  0xc6   : > { %v731_v57 = vsel %vm730_vm11, %v727_v49, %v729_v50  ;;  %v918_v6 = vpop.permute.xlu2 %917  ;;  %vm1447_vm11 = vcmask 343040  }
  0xcb   : > { %1397 = vrot.lane.b32.xlu0 %v2366_v11, %s2249_s7 }
  0xcc   : > { %1443 = vrot.lane.b32.xlu1 %v2361_v8, %s2250_s8 }
  0xcd   : > { %v770_v52 = vpop.permute.xlu0 %769  ;;  %v828_v53 = vpop.permute.xlu1 %827  ;;  %1445 = vrot.lane.b32.xlu2 %v2376_v14, %s2250_s8 }
  0xce   : > { %v772_v56 = vsel %vm771_vm10, %v768_v51, %v770_v52  ;;  %798 = vmatpush.bf16.msrb.mxu3 %v770_v52  ;;  %v833_v4 = vsel %vm831_vm13, %v828_v53, %v830_v58  ;;  %v962_v9 = vpop.permute.xlu2 %961  ;;  %v1132_v58 = vld [vmem:[#allocation2 + $0x4c] sm:$0xf]  ;;  %vm1359_vm10 = vcmask 359424  }
  0xcf   : > { %785 = vmatpush.bf16.msrb.mxu2 %v772_v56 }
  0xd1   : > { %1901 = vmatmul.msk.bf16.vlgmr.msrb.gmra.mxu1 %vm335_vm0, %v561_v54  ;;  %1907 = vmatmul.msk.bf16.vlgmr.msra.gmra.mxu3 %vm335_vm0, %v684_v55 }
  0xd2   : > { %1900 = vmatmul.msk.bf16.vlgmr.msrb.gmra.mxu0 %vm335_vm0, %v561_v54  ;;  %1906 = vmatmul.msk.bf16.vlgmr.msra.gmra.mxu2 %vm335_vm0, %v684_v55 }
  0xd3   : > { %757 = vmatpush.bf16.msrb.mxu1 %v729_v50  ;;  %744 = vmatpush.bf16.msrb.mxu0 %v731_v57  ;;  %v1000_v57 = vld [vmem:[#allocation2 + $0x40] sm:$0xf] }
  0xd4   : > { %1441 = vrot.lane.b32.xlu0 %v2366_v11, %s2250_s8 }
  0xd5   : > { %v826_v59 = vpop.permute.xlu0 %825  ;;  %v872_v60 = vpop.permute.xlu1 %871 }
  0xd6   : > { %v877_v62 = vsel %vm875_vm12, %v872_v60, %v874_v61  ;;  %v832_v5 = vsel %vm831_vm13, %v826_v59, %v828_v53  ;;  %v1006_v19 = vpop.permute.xlu2 %1005 }
  0xd7   : > { %903 = vmatpush.bf16.msra.mxu3 %v877_v62 }
  0xdd   : > { %v870_v63 = vpop.permute.xlu0 %869  ;;  %v916_v0 = vpop.permute.xlu1 %915 }
  0xde   : > { %v876_v3 = vsel %vm875_vm12, %v870_v63, %v872_v60  ;;  %v921_v17 = vsel %vm919_vm15, %v916_v0, %v918_v6  ;;  %v1050_v21 = vpop.permute.xlu2 %1049  ;;  %vm1506_vm12 = vcmask 1024  }
  0xdf   : > { %890 = vmatpush.bf16.msra.mxu2 %v876_v3 }
  0xe1   : > { %1905 = vmatmul.msk.bf16.vlgmr.msra.gmra.mxu1 %vm335_vm0, %v643_v1  ;;  %1911 = vmatmul.msk.bf16.vlgmr.msrb.gmra.mxu3 %vm335_vm0, %v766_v2 }
  0xe2   : > { %1904 = vmatmul.msk.bf16.vlgmr.msra.gmra.mxu0 %vm335_vm0, %v643_v1  ;;  %1910 = vmatmul.msk.bf16.vlgmr.msrb.gmra.mxu2 %vm335_vm0, %v766_v2 }
  0xe3   : > { %846 = vmatpush.bf16.msra.mxu0 %v832_v5  ;;  %859 = vmatpush.bf16.msra.mxu1 %v833_v4 }
  0xe5   : > { %v914_v7 = vpop.permute.xlu0 %913  ;;  %v960_v8 = vpop.permute.xlu1 %959 }
  0xe6   : > { %v965_v10 = vsel %vm963_vm14, %v960_v8, %v962_v9  ;;  %v920_v18 = vsel %vm919_vm15, %v914_v7, %v916_v0  ;;  %v1094_v31 = vpop.permute.xlu2 %1093 }
  0xe7   : > { %991 = vmatpush.bf16.msrb.mxu3 %v965_v10 }
  0xed   : > { %v958_v11 = vpop.permute.xlu0 %957  ;;  %v1004_v12 = vpop.permute.xlu1 %1003 }
  0xee   : > { %v964_v16 = vsel %vm963_vm14, %v958_v11, %v960_v8  ;;  %v1009_v29 = vsel %vm1007_vm2, %v1004_v12, %v1006_v19  ;;  %v1138_v36 = vpop.permute.xlu2 %1137  ;;  %v1088_v11 = vld [vmem:[#allocation2 + $0x48] sm:$0xf] }
  0xef   : > { %978 = vmatpush.bf16.msrb.mxu2 %v964_v16 }
  0xf1   : > { %1909 = vmatmul.msk.bf16.vlgmr.msrb.gmra.mxu1 %vm335_vm0, %v725_v13  ;;  %1927 = vmatmul.msk.bf16.vlgmr.msra.gmra.mxu3 %vm335_vm0, %v868_v15 }
  0xf2   : > { %1908 = vmatmul.msk.bf16.vlgmr.msrb.gmra.mxu0 %vm335_vm0, %v725_v13  ;;  %1926 = vmatmul.msk.bf16.vlgmr.msra.gmra.mxu2 %vm335_vm0, %v868_v15 }
  0xf3   : > { %934 = vmatpush.bf16.msrb.mxu0 %v920_v18  ;;  %947 = vmatpush.bf16.msrb.mxu1 %v921_v17 }
  0xf5   : > { %v1002_v14 = vpop.permute.xlu0 %1001  ;;  %v1048_v20 = vpop.permute.xlu1 %1047 }
  0xf6   : > { %v1053_v22 = vsel %vm1051_vm1, %v1048_v20, %v1050_v21  ;;  %v1008_v30 = vsel %vm1007_vm2, %v1002_v14, %v1004_v12  ;;  %v1182_v45 = vpop.permute.xlu2 %1181  ;;  %v1220_v12 = vld [vmem:[#allocation2 + $0x54] sm:$0xf] }
  0xf7   : > { %1079 = vmatpush.bf16.msra.mxu3 %v1053_v22 }
  0xfd   : > { %v1046_v23 = vpop.permute.xlu0 %1045 }
  0xfe   : > { %v1052_v26 = vsel %vm1051_vm1, %v1046_v23, %v1048_v20  ;;  %v1092_v32 = vpop.permute.xlu1 %1091  ;;  %v1226_v50 = vpop.permute.xlu2 %1225 }
  0xff   : > { %1066 = vmatpush.bf16.msra.mxu2 %v1052_v26  ;;  %v1097_v43 = vsel %vm1095_vm4, %v1092_v32, %v1094_v31 }
 0x101   : > { %1925 = vmatmul.msk.bf16.vlgmr.msra.gmra.mxu1 %vm335_vm0, %v811_v24  ;;  %1931 = vmatmul.msk.bf16.vlgmr.msrb.gmra.mxu3 %vm335_vm0, %v956_v25 }
 0x102   : > { %1924 = vmatmul.msk.bf16.vlgmr.msra.gmra.mxu0 %vm335_vm0, %v811_v24  ;;  %1930 = vmatmul.msk.bf16.vlgmr.msrb.gmra.mxu2 %vm335_vm0, %v956_v25 }
 0x103   : > { %1022 = vmatpush.bf16.msra.mxu0 %v1008_v30  ;;  %1035 = vmatpush.bf16.msra.mxu1 %v1009_v29 }
 0x105   : > { %v1090_v33 = vpop.permute.xlu0 %1089 }
 0x106   : > { %v1136_v37 = vpop.permute.xlu1 %1135  ;;  %v1096_v44 = vsel %vm1095_vm4, %v1090_v33, %v1092_v32  ;;  %v1270_v1 = vpop.permute.xlu2 %1269 }
 0x107   : > { %v1141_v38 = vsel %vm1139_vm3, %v1136_v37, %v1138_v36  ;;  %v1308_v36 = vld [vmem:[#allocation2 + $0x5c] sm:$0xf] }
 0x108   : > { %1167 = vmatpush.bf16.msrb.mxu3 %v1141_v38 }
 0x10d   : > { %v1134_v39 = vpop.permute.xlu0 %1133  ;;  %v472_v47 = vpop.f32.mrf.mxu3 }
 0x10e   : > { %v1140_v42 = vsel %vm1139_vm3, %v1134_v39, %v1136_v37  ;;  %v1180_v46 = vpop.permute.xlu1 %1179  ;;  %v459_v48 = vpop.f32.mrf.mxu2 }
 0x10f   : > { %1154 = vmatpush.bf16.msrb.mxu2 %v1140_v42  ;;  %v1185_v63 = vsel %vm1183_vm6, %v1180_v46, %v1182_v45  ;;  %v1314_v6 = vpop.permute.xlu2 %1313 }
 0x111   : > { %1929 = vmatmul.msk.bf16.vlgmr.msrb.gmra.mxu1 %vm335_vm0, %v912_v40  ;;  %1935 = vmatmul.msk.bf16.vlgmr.msra.gmra.mxu3 %vm335_vm0, %v1044_v41 }
 0x112   : > { %1928 = vmatmul.msk.bf16.vlgmr.msrb.gmra.mxu0 %vm335_vm0, %v912_v40  ;;  %1934 = vmatmul.msk.bf16.vlgmr.msra.gmra.mxu2 %vm335_vm0, %v1044_v41 }
 0x113   : > { %1110 = vmatpush.bf16.msrb.mxu0 %v1096_v44  ;;  %1123 = vmatpush.bf16.msrb.mxu1 %v1097_v43 }
 0x115   : > { %v1178_v49 = vpop.permute.xlu0 %1177  ;;  %v474_v53 = vpop.f32.mrf.mxu3 }
 0x116   : > { %v1224_v51 = vpop.permute.xlu1 %1223  ;;  %v461_v54 = vpop.f32.mrf.mxu2  ;;  %v1184_v0 = vsel %vm1183_vm6, %v1178_v49, %v1180_v46 }
 0x117   : > { %v1229_v52 = vsel %vm1227_vm5, %v1224_v51, %v1226_v50  ;;  %v1358_v14 = vpop.permute.xlu2 %1357 }
 0x118   : > { %1255 = vmatpush.bf16.msra.mxu3 %v1229_v52 }
 0x11d   : > { %v1222_v55 = vpop.permute.xlu0 %1221 }
 0x11e   : > { %v361_v56 = vpop.f32.mrf.mxu1  ;;  %v1228_v59 = vsel %vm1227_vm5, %v1222_v55, %v1224_v51  ;;  %v1268_v2 = vpop.permute.xlu1 %1267  ;;  %v1264_v55 = vld [vmem:[#allocation2 + $0x58] sm:$0xf] }
 0x11f   : > { %v393_v60 = vadd.f32 %v392_v27, %v361_v56  ;;  %v348_v61 = vpop.f32.mrf.mxu0  ;;  %1242 = vmatpush.bf16.msra.mxu2 %v1228_v59  ;;  %v1273_v18 = vsel %vm1271_vm8, %v1268_v2, %v1270_v1  ;;  %v1396_v56 = vld [vmem:[#allocation2 + $0x64] sm:$0xf] }
 0x120   : > { %v380_v62 = vadd.f32 %v379_v28, %v348_v61  ;;  %v1402_v28 = vpop.permute.xlu2 %1401 }
 0x121   : > { %1933 = vmatmul.msk.bf16.vlgmr.msra.gmra.mxu1 %vm335_vm0, %v1000_v57  ;;  %1939 = vmatmul.msk.bf16.vlgmr.msrb.gmra.mxu3 %vm335_vm0, %v1132_v58 }
 0x122   : > { %1932 = vmatmul.msk.bf16.vlgmr.msra.gmra.mxu0 %vm335_vm0, %v1000_v57  ;;  %1938 = vmatmul.msk.bf16.vlgmr.msrb.gmra.mxu2 %vm335_vm0, %v1132_v58 }
 0x123   : > { %1198 = vmatpush.bf16.msra.mxu0 %v1184_v0  ;;  %1211 = vmatpush.bf16.msra.mxu1 %v1185_v63 }
 0x125   : > { %v1266_v3 = vpop.permute.xlu0 %1265 }
 0x126   : > { %v363_v4 = vpop.f32.mrf.mxu1  ;;  %v1312_v7 = vpop.permute.xlu1 %1311  ;;  %v1272_v19 = vsel %vm1271_vm8, %v1266_v3, %v1268_v2 }
 0x127   : > { %v350_v5 = vpop.f32.mrf.mxu0  ;;  %v1317_v8 = vsel %vm1315_vm7, %v1312_v7, %v1314_v6 }
 0x128   : > { %1343 = vmatpush.bf16.msrb.mxu3 %v1317_v8  ;;  %v1446_v49 = vpop.permute.xlu2 %1445 }
 0x12d   : > { %v1310_v9 = vpop.permute.xlu0 %1309 }
 0x12e   : > { %v431_v10 = vpop.f32.mrf.mxu1  ;;  %v1316_v13 = vsel %vm1315_vm7, %v1310_v9, %v1312_v7  ;;  %v1356_v20 = vpop.permute.xlu1 %1355  ;;  %v1352_v7 = vld [vmem:[#allocation2 + $0x60] sm:$0xf] }
 0x12f   : > { %v436_v15 = vadd.f32 %v431_v10, %v393_v60  ;;  %v418_v16 = vpop.f32.mrf.mxu0  ;;  %1330 = vmatpush.bf16.msrb.mxu2 %v1316_v13  ;;  %v1361_v41 = vsel %vm1359_vm10, %v1356_v20, %v1358_v14 }
 0x130   : > { %v435_v17 = vadd.f32 %v418_v16, %v380_v62 }
 0x131   : > { %v477_v21 = vadd.f32 %v472_v47, %v436_v15  ;;  %1937 = vmatmul.msk.bf16.vlgmr.msrb.gmra.mxu1 %vm335_vm0, %v1088_v11  ;;  %1943 = vmatmul.msk.bf16.vlgmr.msra.gmra.mxu3 %vm335_vm0, %v1220_v12 }
 0x132   : > { %v476_v22 = vadd.f32 %v459_v48, %v435_v17  ;;  %1936 = vmatmul.msk.bf16.vlgmr.msrb.gmra.mxu0 %vm335_vm0, %v1088_v11  ;;  %1942 = vmatmul.msk.bf16.vlgmr.msra.gmra.mxu2 %vm335_vm0, %v1220_v12 }
 0x133   : > { %1286 = vmatpush.bf16.msrb.mxu0 %v1272_v19  ;;  %1299 = vmatpush.bf16.msrb.mxu1 %v1273_v18 }
 0x134   : > { %v554_v23 = vpop.f32.mrf.mxu3 }
 0x135   : > { %v541_v24 = vpop.f32.mrf.mxu2  ;;  %v1354_v25 = vpop.permute.xlu0 %1353 }
 0x136   : > { %v433_v26 = vpop.f32.mrf.mxu1  ;;  %v1400_v29 = vpop.permute.xlu1 %1399  ;;  %v1360_v42 = vsel %vm1359_vm10, %v1354_v25, %v1356_v20  ;;  %v1440_v20 = vld [vmem:[#allocation2 + $0x68] sm:$0xf] }
 0x137   : > { %v420_v27 = vpop.f32.mrf.mxu0  ;;  %v1405_v30 = vsel %vm1403_vm9, %v1400_v29, %v1402_v28 }
 0x138   : > { %1431 = vmatpush.bf16.msra.mxu3 %v1405_v30 }
 0x13c   : > { %v556_v31 = vpop.f32.mrf.mxu3 }
 0x13d   : > { %v543_v32 = vpop.f32.mrf.mxu2  ;;  %v1398_v33 = vpop.permute.xlu0 %1397 }
 0x13e   : > { %v513_v34 = vpop.f32.mrf.mxu1  ;;  %v1404_v37 = vsel %vm1403_vm9, %v1398_v33, %v1400_v29  ;;  %v1444_v51 = vpop.permute.xlu1 %1443 }
 0x13f   : > { %v518_v38 = vadd.f32 %v513_v34, %v477_v21  ;;  %v500_v39 = vpop.f32.mrf.mxu0  ;;  %1418 = vmatpush.bf16.msra.mxu2 %v1404_v37  ;;  %v1449_v60 = vsel %vm1447_vm11, %v1444_v51, %v1446_v49 }
 0x140   : > { %v517_v40 = vadd.f32 %v500_v39, %v476_v22 }
 0x141   : > { %v559_v43 = vadd.f32 %v554_v23, %v518_v38  ;;  %1941 = vmatmul.msk.bf16.vlgmr.msra.gmra.mxu1 %vm335_vm0, %v1176_v35  ;;  %1947 = vmatmul.msk.bf16.vlgmr.msrb.gmra.mxu3 %vm335_vm0, %v1308_v36 }
 0x142   : > { %v558_v44 = vadd.f32 %v541_v24, %v517_v40  ;;  %1940 = vmatmul.msk.bf16.vlgmr.msra.gmra.mxu0 %vm335_vm0, %v1176_v35  ;;  %1946 = vmatmul.msk.bf16.vlgmr.msrb.gmra.mxu2 %vm335_vm0, %v1308_v36 }
 0x143   : > { %1374 = vmatpush.bf16.msra.mxu0 %v1360_v42  ;;  %1387 = vmatpush.bf16.msra.mxu1 %v1361_v41 }
 0x144   : > { %v636_v45 = vpop.f32.mrf.mxu3 }
 0x145   : > { %v623_v46 = vpop.f32.mrf.mxu2 }
 0x146   : > { %v515_v47 = vpop.f32.mrf.mxu1  ;;  %v1442_v53 = vpop.permute.xlu0 %1441 }
 0x147   : > { %v502_v48 = vpop.f32.mrf.mxu0  ;;  %v1448_v61 = vsel %vm1447_vm11, %v1442_v53, %v1444_v51 }
 0x14c   : > { %v638_v50 = vpop.f32.mrf.mxu3 }
 0x14d   : > { %v625_v52 = vpop.f32.mrf.mxu2 }
 0x14e   : > { %v595_v54 = vpop.f32.mrf.mxu1 }
 0x14f   : > { %v600_v57 = vadd.f32 %v595_v54, %v559_v43  ;;  %v582_v58 = vpop.f32.mrf.mxu0 }
 0x150   : > { %v599_v59 = vadd.f32 %v582_v58, %v558_v44 }
 0x151   : > { %v641_v62 = vadd.f32 %v636_v45, %v600_v57  ;;  %1945 = vmatmul.msk.bf16.vlgmr.msrb.gmra.mxu1 %vm335_vm0, %v1264_v55  ;;  %1951 = vmatmul.msk.bf16.vlgmr.msra.gmra.mxu3 %vm335_vm0, %v1396_v56 }
 0x152   : > { %v640_v63 = vadd.f32 %v623_v46, %v599_v59  ;;  %1944 = vmatmul.msk.bf16.vlgmr.msrb.gmra.mxu0 %vm335_vm0, %v1264_v55  ;;  %1950 = vmatmul.msk.bf16.vlgmr.msra.gmra.mxu2 %vm335_vm0, %v1396_v56 }
 0x153   : > { %1462 = vmatpush.bf16.msrb.mxu0 %v1448_v61  ;;  %1475 = vmatpush.bf16.msrb.mxu1 %v1449_v60 }
 0x154   : > { %v718_v0 = vpop.f32.mrf.mxu3 }
 0x155   : > { %v705_v1 = vpop.f32.mrf.mxu2 }
 0x156   : > { %v597_v2 = vpop.f32.mrf.mxu1 }
 0x157   : > { %v584_v3 = vpop.f32.mrf.mxu0 }
 0x15c   : > { %v720_v4 = vpop.f32.mrf.mxu3 }
 0x15d   : > { %v707_v5 = vpop.f32.mrf.mxu2 }
 0x15e   : > { %v677_v6 = vpop.f32.mrf.mxu1 }
 0x15f   : > { %v682_v8 = vadd.f32 %v677_v6, %v641_v62  ;;  %v664_v9 = vpop.f32.mrf.mxu0 }
 0x160   : > { %v681_v10 = vadd.f32 %v664_v9, %v640_v63 }
 0x161   : > { %v723_v11 = vadd.f32 %v718_v0, %v682_v8  ;;  %1949 = vmatmul.msk.bf16.vlgmr.msra.gmra.mxu1 %vm335_vm0, %v1352_v7 }
 0x162   : > { %v722_v12 = vadd.f32 %v705_v1, %v681_v10  ;;  %1948 = vmatmul.msk.bf16.vlgmr.msra.gmra.mxu0 %vm335_vm0, %v1352_v7 }
 0x164   : > { %v800_v13 = vpop.f32.mrf.mxu3 }
 0x165   : > { %v787_v15 = vpop.f32.mrf.mxu2 }
 0x166   : > { %v679_v16 = vpop.f32.mrf.mxu1 }
 0x167   : > { %v666_v17 = vpop.f32.mrf.mxu0 }
 0x16c   : > { %v802_v18 = vpop.f32.mrf.mxu3 }
 0x16d   : > { %v789_v19 = vpop.f32.mrf.mxu2 }
 0x16e   : > { %v759_v14 = vpop.f32.mrf.mxu1 }
 0x16f   : > { %v764_v21 = vadd.f32 %v759_v14, %v723_v11  ;;  %v746_v22 = vpop.f32.mrf.mxu0 }
 0x170   : > { %v763_v23 = vadd.f32 %v746_v22, %v722_v12 }
 0x171   : > { %v805_v24 = vadd.f32 %v800_v13, %v764_v21  ;;  %1953 = vmatmul.msk.bf16.vlgmr.msrb.gmra.mxu1 %vm335_vm0, %v1440_v20 }
 0x172   : > { %v804_v25 = vadd.f32 %v787_v15, %v763_v23  ;;  %1952 = vmatmul.msk.bf16.vlgmr.msrb.gmra.mxu0 %vm335_vm0, %v1440_v20  ;;  %vm1493_vm0 = vcmask 719872  }
 0x174   : > { %v905_v26 = vpop.f32.mrf.mxu3 }
 0x175   : > { %v892_v27 = vpop.f32.mrf.mxu2 }
 0x176   : > { %v761_v28 = vpop.f32.mrf.mxu1 }
 0x177   : > { %v748_v29 = vpop.f32.mrf.mxu0 }
 0x17c   : > { %v907_v30 = vpop.f32.mrf.mxu3 }
 0x17d   : > { %v894_v31 = vpop.f32.mrf.mxu2 }
 0x17e   : > { %v861_v32 = vpop.f32.mrf.mxu1 }
 0x17f   : > { %v866_v33 = vadd.f32 %v861_v32, %v805_v24  ;;  %v848_v34 = vpop.f32.mrf.mxu0 }
 0x180   : > { %v865_v35 = vadd.f32 %v848_v34, %v804_v25 }
 0x181   : > { %v910_v36 = vadd.f32 %v905_v26, %v866_v33 }
 0x182   : > { %v909_v37 = vadd.f32 %v892_v27, %v865_v35 }
 0x184   : > { %v993_v38 = vpop.f32.mrf.mxu3 }
 0x185   : > { %v980_v39 = vpop.f32.mrf.mxu2 }
 0x186   : > { %v863_v40 = vpop.f32.mrf.mxu1 }
 0x187   : > { %v850_v41 = vpop.f32.mrf.mxu0 }
 0x18c   : > { %v995_v42 = vpop.f32.mrf.mxu3 }
 0x18d   : > { %v982_v43 = vpop.f32.mrf.mxu2 }
 0x18e   : > { %v949_v44 = vpop.f32.mrf.mxu1 }
 0x18f   : > { %v954_v45 = vadd.f32 %v949_v44, %v910_v36  ;;  %v936_v46 = vpop.f32.mrf.mxu0 }
 0x190   : > { %v953_v47 = vadd.f32 %v936_v46, %v909_v37  ;;  %v1485_v46 = vld [vmem:[%s2580_s4] sm:$0x3] }
 0x191   : > { %v998_v48 = vadd.f32 %v993_v38, %v954_v45 }
 0x192   : > { %v997_v49 = vadd.f32 %v980_v39, %v953_v47 }
 0x194   : > { %v1081_v50 = vpop.f32.mrf.mxu3 }
 0x195   : > { %v1068_v51 = vpop.f32.mrf.mxu2 }
 0x196   : > { %v951_v52 = vpop.f32.mrf.mxu1 }
 0x197   : > { %v938_v53 = vpop.f32.mrf.mxu0 }
 0x19c   : > { %v1083_v54 = vpop.f32.mrf.mxu3 }
 0x19d   : > { %v1070_v55 = vpop.f32.mrf.mxu2 }
 0x19e   : > { %v1037_v56 = vpop.f32.mrf.mxu1 }
 0x19f   : > { %v1042_v57 = vadd.f32 %v1037_v56, %v998_v48  ;;  %v1024_v58 = vpop.f32.mrf.mxu0  ;;  %v1488_v48 = vperm.slane %v1485_v46, 1 }
 0x1a0   : > { %v1041_v59 = vadd.f32 %v1024_v58, %v997_v49 }
 0x1a1   : > { %v1086_v60 = vadd.f32 %v1081_v50, %v1042_v57 }
 0x1a2   : > { %v1085_v61 = vadd.f32 %v1068_v51, %v1041_v59  ;;  %v1487_v51 = vperm.slane %v1485_v46, 0 }
 0x1a4   : > { %v1169_v62 = vpop.f32.mrf.mxu3 }
 0x1a5   : > { %v1156_v63 = vpop.f32.mrf.mxu2 }
 0x1a6   : > { %v1039_v0 = vpop.f32.mrf.mxu1 }
 0x1a7   : > { %v1026_v1 = vpop.f32.mrf.mxu0 }
 0x1ac   : > { %v1171_v2 = vpop.f32.mrf.mxu3 }
 0x1ad   : > { %v1158_v3 = vpop.f32.mrf.mxu2 }
 0x1ae   : > { %v1125_v4 = vpop.f32.mrf.mxu1 }
 0x1af   : > { %v1112_v5 = vpop.f32.mrf.mxu0  ;;  %v1130_v25 = vadd.f32 %v1125_v4, %v1086_v60 }
 0x1b0   : > { %v1129_v27 = vadd.f32 %v1112_v5, %v1085_v61 }
 0x1b1   : > { %v1174_v28 = vadd.f32 %v1169_v62, %v1130_v25 }
 0x1b2   : > { %v1173_v29 = vadd.f32 %v1156_v63, %v1129_v27 }
 0x1b4   : > { %v1257_v6 = vpop.f32.mrf.mxu3 }
 0x1b5   : > { %v1244_v7 = vpop.f32.mrf.mxu2 }
 0x1b6   : > { %v1127_v8 = vpop.f32.mrf.mxu1 }
 0x1b7   : > { %v1114_v9 = vpop.f32.mrf.mxu0 }
 0x1bc   : > { %v1259_v10 = vpop.f32.mrf.mxu3 }
 0x1bd   : > { %v1246_v11 = vpop.f32.mrf.mxu2 }
 0x1be   : > { %v1213_v12 = vpop.f32.mrf.mxu1 }
 0x1bf   : > { %v1200_v13 = vpop.f32.mrf.mxu0  ;;  %v1218_v31 = vadd.f32 %v1213_v12, %v1174_v28 }
 0x1c0   : > { %v1217_v33 = vadd.f32 %v1200_v13, %v1173_v29 }
 0x1c1   : > { %v1262_v36 = vadd.f32 %v1257_v6, %v1218_v31 }
 0x1c2   : > { %v1261_v37 = vadd.f32 %v1244_v7, %v1217_v33 }
 0x1c4   : > { %v1345_v15 = vpop.f32.mrf.mxu3 }
 0x1c5   : > { %v1332_v16 = vpop.f32.mrf.mxu2 }
 0x1c6   : > { %v1215_v17 = vpop.f32.mrf.mxu1 }
 0x1c7   : > { %v1202_v18 = vpop.f32.mrf.mxu0 }
 0x1cc   : > { %v1347_v19 = vpop.f32.mrf.mxu3 }
 0x1cd   : > { %v1334_v14 = vpop.f32.mrf.mxu2 }
 0x1ce   : > { %v1301_v20 = vpop.f32.mrf.mxu1 }
 0x1cf   : > { %v1288_v21 = vpop.f32.mrf.mxu0  ;;  %v1306_v38 = vadd.f32 %v1301_v20, %v1262_v36 }
 0x1d0   : > { %v1305_v39 = vadd.f32 %v1288_v21, %v1261_v37 }
 0x1d1   : > { %v1350_v41 = vadd.f32 %v1345_v15, %v1306_v38 }
 0x1d2   : > { %v1349_v43 = vadd.f32 %v1332_v16, %v1305_v39 }
 0x1d4   : > { %v1433_v22 = vpop.f32.mrf.mxu3 }
 0x1d5   : > { %v1420_v23 = vpop.f32.mrf.mxu2 }
 0x1d6   : > { %v1303_v24 = vpop.f32.mrf.mxu1 }
 0x1d7   : > { %v1290_v26 = vpop.f32.mrf.mxu0 }
 0x1dc   : > { %v1435_v30 = vpop.f32.mrf.mxu3 }
 0x1dd   : > { %v1422_v32 = vpop.f32.mrf.mxu2 }
 0x1de   : > { %v1389_v34 = vpop.f32.mrf.mxu1 }
 0x1df   : > { %v1376_v35 = vpop.f32.mrf.mxu0  ;;  %v1394_v44 = vadd.f32 %v1389_v34, %v1350_v41 }
 0x1e0   : > { %v1393_v45 = vadd.f32 %v1376_v35, %v1349_v43 }
 0x1e1   : > { %v1438_v47 = vadd.f32 %v1433_v22, %v1394_v44 }
 0x1e2   : > { %v1437_v49 = vadd.f32 %v1420_v23, %v1393_v45 }
 0x1e6   : > { %v1391_v40 = vpop.f32.mrf.mxu1 }
 0x1e7   : > { %v1378_v42 = vpop.f32.mrf.mxu0 }
 0x1ee   : > { %v1477_v50 = vpop.f32.mrf.mxu1 }
 0x1ef   : > { %v2503_v52 = vadd.f32 %v1477_v50, %v1438_v47  ;;  %v1464_v53 = vpop.f32.mrf.mxu0 }
 0x1f0   : > { %v2505_v54 = vadd.f32 %v1464_v53, %v1437_v49 }
 0x1f1   : > { %v1492_v55 = vmul.f32 %v1488_v48, %v2503_v52 }
 0x1f2   : > { %v1491_v56 = vmul.f32 %v1487_v51, %v2505_v54 }
 0x1f3   : > { %v1494_v57 = vsel %vm1493_vm0, %v1492_v55, 0.0  ;;  %v1499_v58 = vmul.f32 %v1492_v55, %v2503_v52  ;;  %v1504_v55 = vlaneseq }
 0x1f4   : > { %v1495_v59 = vadd.f32 %v1494_v57, %v1491_v56  ;;  %v1498_v60 = vmul.f32 %v1491_v56, %v2505_v54 }
 0x1f5   : > { %v1500_v61 = vsel %vm1493_vm0, %v1499_v58, 0.0  ;;  %v2524_v56 = vshrl.u32 %v1504_v55, 7 }
 0x1f6   : > { %v1479_v62 = vpop.f32.mrf.mxu1  ;;  %1496 = vadd.xlane.f32.xlu1 %v1495_v59  ;;  %v1501_v63 = vadd.f32 %v1500_v61, %v1498_v60 }
 0x1f7   : > { %v1466_v0 = vpop.f32.mrf.mxu0  ;;  %vm1596_vm1 = vcmp.ge.s32.totalorder %v2524_v56, 2  ;;  %vm1597_vm2 = vcmp.lt.s32.totalorder %v2524_v56, 4  ;;  %vm1546_vm3 = vcmp.lt.s32.totalorder %v2524_v56, 2  ;;  %vm1645_vm8 = vcmp.ge.s32.totalorder %v2524_v56, 4 }
 0x1f8   : > { %1502 = vadd.xlane.f32.xlu2 %v1501_v63  ;;  %vm2532_vm4 = vmand %vm1596_vm1, %vm1597_vm2  ;;  %vm1646_vm9 = vcmp.lt.s32.totalorder %v2524_v56, 6  ;;  %vm1727_vm2 = vcmask 1043456  }
 0x1f9   : > { %vm2548_vm10 = vmand %vm1645_vm8, %vm1646_vm9 }
 0x269   : > { %v1497_v1 = vpop.xlane.xlu1 %1496 }
 0x26a   : > { %v1507_v2 = vsel %vm1506_vm12, %v1497_v1, 0.0  ;;  %v1553_v3 = vrot.slane %v1497_v1, 2  ;;  %v1603_v7 = vrot.slane %v1497_v1, 4  ;;  %v1652_v15 = vrot.slane %v1497_v1, 6 }
 0x26b   : > { %v1503_v4 = vpop.xlane.xlu2 %1502  ;;  %1508 = vadd.xlane.f32.xlu0 %v1507_v2 }
 0x26c   : > { %v1518_v5 = vsel %vm1506_vm12, %v1503_v4, 0.0  ;;  %v1555_v6 = vsel %vm1506_vm12, %v1553_v3, 0.0  ;;  %v1567_v8 = vrot.slane %v1503_v4, 2  ;;  %v1616_v9 = vrot.slane %v1503_v4, 4 }
 0x26d   : > { %1519 = vadd.xlane.f32.xlu2 %v1518_v5  ;;  %1556 = vadd.xlane.f32.xlu1 %v1555_v6  ;;  %v1605_v10 = vsel %vm1506_vm12, %v1603_v7, 0.0  ;;  %v1665_v13 = vrot.slane %v1503_v4, 6  ;;  %v1654_v17 = vsel %vm1506_vm12, %v1652_v15, 0.0 }
 0x26e   : > { %v1569_v11 = vsel %vm1506_vm12, %v1567_v8, 0.0  ;;  %v1618_v12 = vsel %vm1506_vm12, %v1616_v9, 0.0 }
 0x26f   : > { %v1667_v16 = vsel %vm1506_vm12, %v1665_v13, 0.0 }
 0x273   : > { %1606 = vadd.xlane.f32.xlu0 %v1605_v10 }
 0x275   : > { %1570 = vadd.xlane.f32.xlu2 %v1569_v11  ;;  %1619 = vadd.xlane.f32.xlu1 %v1618_v12 }
 0x27b   : > { %1668 = vadd.xlane.f32.xlu0 %v1667_v16 }
 0x27d   : > { %1655 = vadd.xlane.f32.xlu2 %v1654_v17 }
 0x2de   : > { %v1509_v18 = vpop.xlane.xlu0 %1508 }
 0x2df   : > { %v1510_v19 = vrot.slane %v1509_v18, 4 }
 0x2e0   : > { %v1520_v14 = vpop.xlane.xlu2 %1519  ;;  %v1557_v31 = vpop.xlane.xlu1 %1556 }
 0x2e1   : > { %v1511_v20 = vadd.f32 %v1510_v19, %v1509_v18  ;;  %v1521_v21 = vrot.slane %v1520_v14, 4  ;;  %v1558_v33 = vrot.slane %v1557_v31, 4 }
 0x2e3   : > { %v1512_v22 = vrot.slane %v1511_v20, 2  ;;  %v1522_v23 = vadd.f32 %v1521_v21, %v1520_v14  ;;  %v1559_v36 = vadd.f32 %v1558_v33, %v1557_v31 }
 0x2e5   : > { %v1523_v24 = vrot.slane %v1522_v23, 2  ;;  %v1513_v25 = vadd.f32 %v1512_v22, %v1511_v20  ;;  %v1560_v38 = vrot.slane %v1559_v36, 2 }
 0x2e6   : > { %v1607_v62 = vpop.xlane.xlu0 %1606 }
 0x2e7   : > { %v1514_v26 = vrot.slane %v1513_v25, 1  ;;  %v1524_v27 = vadd.f32 %v1523_v24, %v1522_v23  ;;  %v1561_v43 = vadd.f32 %v1560_v38, %v1559_v36  ;;  %v1608_v0 = vrot.slane %v1607_v62, 4 }
 0x2e8   : > { %v1571_v32 = vpop.xlane.xlu2 %1570  ;;  %v1620_v63 = vpop.xlane.xlu1 %1619 }
 0x2e9   : > { %v1515_v28 = vadd.f32 %v1514_v26, %v1513_v25  ;;  %v1525_v29 = vrot.slane %v1524_v27, 1  ;;  %v1572_v34 = vrot.slane %v1571_v32, 4  ;;  %v1562_v47 = vrot.slane %v1561_v43, 1 }
 0x2ea   : > { %v1621_v1 = vrot.slane %v1620_v63, 4  ;;  %v1609_v3 = vadd.f32 %v1608_v0, %v1607_v62  ;;  %v2252_v0 = vmov 0  }
 0x2eb   : > { %1965 = vpush %v1515_v28  ;;  %v1526_v30 = vadd.f32 %v1525_v29, %v1524_v27  ;;  %v1573_v37 = vadd.f32 %v1572_v34, %v1571_v32  ;;  %v1563_v51 = vadd.f32 %v1562_v47, %v1561_v43  ;;  %2068 = vset.pattern.permute.xlu1 %v2252_v0 }
 0x2ec   : > { %v1622_v4 = vadd.f32 %v1621_v1, %v1620_v63  ;;  %v1610_v5 = vrot.slane %v1609_v3, 2  ;;  %2069 = vset.pattern.permute.xlu2 %v2252_v0  ;;  %2070 = vset.pattern.permute.xlu0 %v2252_v0  ;;  %v1483_v1 = vld [vmem:[#allocation4] sm:$0xff] }
 0x2ed   : > { %1967 = vpush %v1526_v30  ;;  %v1574_v40 = vrot.slane %v1573_v37, 2 }
 0x2ee   : > { %v1623_v7 = vrot.slane %v1622_v4, 2  ;;  %v1611_v10 = vadd.f32 %v1610_v5, %v1609_v3  ;;  %v1669_v28 = vpop.xlane.xlu0 %1668  ;;  %v1484_v5 = vld [vmem:[#allocation6] sm:$0xff] }
 0x2ef   : > { %v1575_v44 = vadd.f32 %v1574_v40, %v1573_v37  ;;  %v1670_v30 = vrot.slane %v1669_v28, 4 }
 0x2f0   : > { %v1624_v11 = vadd.f32 %v1623_v7, %v1622_v4  ;;  %v1612_v15 = vrot.slane %v1611_v10, 1  ;;  %v1656_v27 = vpop.xlane.xlu2 %1655 }
 0x2f1   : > { %v1576_v48 = vrot.slane %v1575_v44, 1  ;;  %v1657_v29 = vrot.slane %v1656_v27, 4  ;;  %v1671_v33 = vadd.f32 %v1670_v30, %v1669_v28 }
 0x2f2   : > { %v1625_v16 = vrot.slane %v1624_v11, 1  ;;  %v1613_v19 = vadd.f32 %v1612_v15, %v1611_v10 }
 0x2f3   : > { %v1577_v53 = vadd.f32 %v1576_v48, %v1575_v44  ;;  %v1658_v32 = vadd.f32 %v1657_v29, %v1656_v27  ;;  %v1672_v36 = vrot.slane %v1671_v33, 2 }
 0x2f4   : > { %v1626_v14 = vadd.f32 %v1625_v16, %v1624_v11 }
 0x2f5   : > { %v1659_v34 = vrot.slane %v1658_v32, 2  ;;  %v1673_v40 = vadd.f32 %v1672_v36, %v1671_v33 }
 0x2f7   : > { %v1674_v44 = vrot.slane %v1673_v40, 1 }
 0x2f9   : > { %v1675_v48 = vadd.f32 %v1674_v44, %v1673_v40 }
 0x31c   : > { %s1966_s11 = spop %1965 }
 0x31d   : > { %s2519_s12 = smul.f32 0.0078125, %s1966_s11 }
 0x31e   : > { %s1968_s14 = spop %1967 }
 0x31f   : > { %s1529_s13 = smul.f32 %s2519_s12, %s2519_s12  ;;  %v1550_v57 = vstv %s2519_s12 }
 0x320   : > { %s1528_s15 = smul.f32 0.0078125, %s1968_s14  ;;  %v1551_v59 = vsel %vm1546_vm3, %v1550_v57, 0.0 }
 0x322   : > { %s1530_s16 = ssub.f32 %s1528_s15, %s1529_s13 }
 0x324   : > { %s1531_s18 = smax.f32 %s2251_s17, %s1530_s16 }
 0x325   : > { %s1532_s19 = sadd.f32 1e-05, %s1531_s18 }
 0x327   : > { %v1533_v35 = vstv %s1532_s19 }
 0x328   : > { %2071 = vrsqrt.f32 %v1533_v35  ;;  %vm1540_vm14 = vweird.f32 %v1533_v35 }
 0x32e   : > { %v2072_v39 = vpop.eup %2071 }
 0x32f   : > { %v1535_v41 = vmul.f32 %v2072_v39, %v1533_v35  ;;  %vm1541_vm13 = vweird.f32 %v2072_v39 }
 0x330   : > { %vm1542_vm15 = vmor %vm1540_vm14, %vm1541_vm13  ;;  %vm1694_vm13 = vcmp.ge.s32.totalorder %v2524_v56, 6 }
 0x331   : > { %v1536_v42 = vmul.f32 %v2072_v39, %v1535_v41 }
 0x333   : > { %v1537_v45 = vmul.f32 0.5, %v1536_v42 }
 0x335   : > { %v1538_v46 = vsub.f32 1.5, %v1537_v45 }
 0x337   : > { %v1539_v49 = vmul.f32 %v2072_v39, %v1538_v46 }
 0x339   : > { %v1543_v50 = vsel %vm1542_vm15, %v2072_v39, %v1539_v49  ;;  %v1660_v39 = vadd.f32 %v1659_v34, %v1658_v32 }
 0x33a   : > { %1969 = vpush %v1543_v50 }
 0x33b   : > { %1971 = vpush %v1563_v51  ;;  %v1661_v43 = vrot.slane %v1660_v39, 1 }
 0x33c   : > { %1973 = vpush %v1577_v53 }
 0x33d   : > { %v1662_v47 = vadd.f32 %v1661_v43, %v1660_v39 }
 0x36b   : > { %s2528_s20 = spop %1969 }
 0x36c   : > { %s1972_s22 = spop %1971  ;;  %v1548_v20 = vstv %s2528_s20 }
 0x36d   : > { %s1565_s23 = smul.f32 0.0078125, %s1972_s22  ;;  %s1974_s24 = spop %1973  ;;  %v1549_v21 = vsel %vm1546_vm3, %v1548_v20, 0.0  ;;  %vm1723_vm3 = vcmask 64512  }
 0x36e   : > { %s1579_s26 = smul.f32 0.0078125, %s1974_s24 }
 0x36f   : > { %s1580_s27 = smul.f32 %s1565_s23, %s1565_s23  ;;  %v1601_v60 = vstv %s1565_s23 }
 0x370   : > { %v1602_v61 = vsel %vm2532_vm4, %v1601_v60, %v1551_v59 }
 0x371   : > { %s1581_s28 = ssub.f32 %s1579_s26, %s1580_s27 }
 0x373   : > { %s1582_s29 = smax.f32 %s2251_s17, %s1581_s28  ;;  %s1958_s28 = sshll.u32 %s2590_s25, 3 }
 0x374   : > { %s1583_s30 = sadd.f32 1e-05, %s1582_s29 }
 0x376   : > { %v1584_v2 = vstv %s1583_s30 }
 0x377   : > { %2073 = vrsqrt.f32 %v1584_v2  ;;  %vm1591_vm6 = vweird.f32 %v1584_v2 }
 0x37d   : > { %v2074_v6 = vpop.eup %2073 }
 0x37e   : > { %v1586_v8 = vmul.f32 %v2074_v6, %v1584_v2  ;;  %vm1592_vm5 = vweird.f32 %v2074_v6 }
 0x37f   : > { %vm1593_vm7 = vmor %vm1591_vm6, %vm1592_vm5 }
 0x380   : > { %v1587_v9 = vmul.f32 %v2074_v6, %v1586_v8 }
 0x382   : > { %v1588_v12 = vmul.f32 0.5, %v1587_v9 }
 0x384   : > { %v1589_v13 = vsub.f32 1.5, %v1588_v12 }
 0x386   : > { %v1590_v17 = vmul.f32 %v2074_v6, %v1589_v13 }
 0x388   : > { %v1594_v18 = vsel %vm1593_vm7, %v2074_v6, %v1590_v17 }
 0x389   : > { %1975 = vpush %v1594_v18 }
 0x38a   : > { %1977 = vpush %v1613_v19 }
 0x38b   : > { %1979 = vpush %v1626_v14  ;;  %v1720_v14 = vld [vmem:[#allocation7] sm:$0x3] }
 0x3ba   : > { %s1976_s7 = spop %1975 }
 0x3bb   : > { %v1599_v22 = vstv %s1976_s7  ;;  %s1978_s8 = spop %1977  ;;  %s312_s7 = scalar_lea.vmem %s2582_s6, %s1958_s28 }
 0x3bc   : > { %v1600_v23 = vsel %vm2532_vm4, %v1599_v22, %v1549_v21  ;;  %s1615_s9 = smul.f32 0.0078125, %s1978_s8  ;;  %s1980_s10 = spop %1979  ;;  %vm1765_vm4 = vcmask 719876  }
 0x3bd   : > { %s1628_s11 = smul.f32 0.0078125, %s1980_s10  ;;  %vm1766_vm5 = vmor %vm1765_vm4, %vm1727_vm2 }
 0x3be   : > { %s1629_s12 = smul.f32 %s1615_s9, %s1615_s9  ;;  %v1650_v25 = vstv %s1615_s9 }
 0x3bf   : > { %v1651_v26 = vsel %vm2548_vm10, %v1650_v25, %v1602_v61 }
 0x3c0   : > { %s1630_s13 = ssub.f32 %s1628_s11, %s1629_s12 }
 0x3c2   : > { %s1631_s14 = smax.f32 %s2251_s17, %s1630_s13 }
 0x3c3   : > { %s1632_s15 = sadd.f32 1e-05, %s1631_s14 }
 0x3c5   : > { %v1633_v31 = vstv %s1632_s15 }
 0x3c6   : > { %2075 = vrsqrt.f32 %v1633_v31  ;;  %vm1640_vm0 = vweird.f32 %v1633_v31 }
 0x3cc   : > { %v2076_v35 = vpop.eup %2075 }
 0x3cd   : > { %v1635_v37 = vmul.f32 %v2076_v35, %v1633_v31  ;;  %vm1641_vm11 = vweird.f32 %v2076_v35 }
 0x3ce   : > { %vm1642_vm12 = vmor %vm1640_vm0, %vm1641_vm11 }
 0x3cf   : > { %v1636_v38 = vmul.f32 %v2076_v35, %v1635_v37 }
 0x3d1   : > { %v1637_v41 = vmul.f32 0.5, %v1636_v38 }
 0x3d3   : > { %v1638_v42 = vsub.f32 1.5, %v1637_v41 }
 0x3d5   : > { %v1639_v45 = vmul.f32 %v2076_v35, %v1638_v42 }
 0x3d7   : > { %v1643_v46 = vsel %vm1642_vm12, %v2076_v35, %v1639_v45 }
 0x3d8   : > { %1981 = vpush %v1643_v46 }
 0x3d9   : > { %1983 = vpush %v1662_v47 }
 0x3da   : > { %1985 = vpush %v1675_v48 }
 0x409   : > { %s1982_s16 = spop %1981 }
 0x40a   : > { %v1648_v49 = vstv %s1982_s16  ;;  %s1984_s18 = spop %1983 }
 0x40b   : > { %v1649_v50 = vsel %vm2548_vm10, %v1648_v49, %v1600_v23  ;;  %s1664_s19 = smul.f32 0.0078125, %s1984_s18  ;;  %s1986_s20 = spop %1985 }
 0x40c   : > { %s1677_s22 = smul.f32 0.0078125, %s1986_s20 }
 0x40d   : > { %s1678_s23 = smul.f32 %s1664_s19, %s1664_s19  ;;  %v1699_v51 = vstv %s1664_s19 }
 0x40e   : > { %v1700_v53 = vsel %vm1694_vm13, %v1699_v51, %v1651_v26 }
 0x40f   : > { %s1679_s24 = ssub.f32 %s1677_s22, %s1678_s23 }
 0x411   : > { %s1680_s26 = smax.f32 %s2251_s17, %s1679_s24 }
 0x412   : > { %s1681_s27 = sadd.f32 1e-05, %s1680_s26 }
 0x414   : > { %v1682_v55 = vstv %s1681_s27 }
 0x415   : > { %2077 = vrsqrt.f32 %v1682_v55  ;;  %vm1689_vm15 = vweird.f32 %v1682_v55 }
 0x41b   : > { %v2078_v57 = vpop.eup %2077 }
 0x41c   : > { %v1684_v58 = vmul.f32 %v2078_v57, %v1682_v55  ;;  %vm1690_vm14 = vweird.f32 %v2078_v57 }
 0x41d   : > { %vm1691_vm1 = vmor %vm1689_vm15, %vm1690_vm14 }
 0x41e   : > { %v1685_v59 = vmul.f32 %v2078_v57, %v1684_v58 }
 0x420   : > { %v1686_v60 = vmul.f32 0.5, %v1685_v59 }
 0x422   : > { %v1687_v61 = vsub.f32 1.5, %v1686_v60 }
 0x424   : > { %v1688_v62 = vmul.f32 %v2078_v57, %v1687_v61 }
 0x426   : > { %v1692_v63 = vsel %vm1691_vm1, %v2078_v57, %v1688_v62 }
 0x427   : > { %1987 = vpush %v1692_v63 }
 0x458   : > { %s1988_s17 = spop %1987 }
 0x459   : > { %v1697_v2 = vstv %s1988_s17 }
 0x45a   : > { %v1698_v3 = vsel %vm1694_vm13, %v1697_v2, %v1649_v50 }
 0x45b   : > { %v1701_v4 = vmul.f32 %v1698_v3, %v1483_v1 }
 0x45d   : > { %v1702_v6 = vmul.f32 %v1701_v4, %v1700_v53  ;;  %1706 = vperm.xlu1 %2068, %v1701_v4  }
 0x45f   : > { %v1703_v7 = vsub.f32 %v1484_v5, %v1702_v6 }
 0x461   : > { %1713 = vperm.xlu2 %2069, %v1703_v7  }
 0x4bb   : > { %v1714_v11 = vpop.permute.xlu2 %1713 }
 0x4cf   : > { %v1707_v8 = vpop.permute.xlu1 %1706 }
 0x4d0   : > { %v1709_v9 = vmul.f32 %v1707_v8, %v2505_v54  ;;  %v1710_v10 = vmul.f32 %v1707_v8, %v2503_v52 }
 0x4d2   : > { %v1716_v12 = vadd.f32 %v1714_v11, %v1709_v9  ;;  %v1717_v13 = vadd.f32 %v1714_v11, %v1710_v10 }
 0x4d4   : > { %v1718_v15 = vmax.f32 %v1716_v12, 0.0  ;;  %v1719_v16 = vmax.f32 %v1717_v13, 0.0 }
 0x4d6   : > { %v1721_v56 = vpack.c.bf16 %v1718_v15, %v1718_v15  ;;  %v1722_v17 = vpack.c.bf16 %v1719_v16, %v1719_v16 }
 0x4d8   : > { %v1729_v18 = vsel %vm1727_vm2, %v1721_v56, 0  ;;  %v1732_v19 = vsel %vm1727_vm2, %v1722_v17, 0 }
 0x4d9   : > { %1741 = vmatpush.bf16.msrb.mxu2 %v1729_v18  ;;  %1754 = vmatpush.bf16.msrb.mxu3 %v1732_v19 }
 0x4dc   : > { %1954 = vmatmul.msk.bf16.vlgmr.msrb.gmra.mxu2 %vm1723_vm3, %v1720_v14  ;;  %1955 = vmatmul.msk.bf16.vlgmr.msrb.gmra.mxu3 %vm1723_vm3, %v1720_v14 }
 0x55f   : > { %v1743_v52 = vpop.f32.mrf.mxu2  ;;  %v1756_v54 = vpop.f32.mrf.mxu3 }
 0x560   : > { %v1762_v20 = vrot.slane %v1756_v54, 4 }
 0x562   : > { %v1763_v21 = vsel %vm1727_vm2, %v1743_v52, %v1762_v20 }
 0x563   : > { %1767 = vst.msk [vmem:[%s312_s7] sm:$0xff] %vm1766_vm5, %v1763_v21 }
 0x567   : > { %v1745_v22 = vpop.f32.mrf.mxu2  ;;  %v1758_v23 = vpop.f32.mrf.mxu3 }
 0x568 PF: > { %s19_s21 = sadd.s32 1, %s2217_s21  }
 0x569   : > { %p16_p7 = scmp.ge.s32.totalorder %s19_s21, 4  }
 0x56b   :  { %18 = sbr.rel (!%p16_p7) target bundleno = 3 (0x3), region = 117 }
 0x570   :  { %1789 = vsyncpa [#allocation3], 1 }
 0x571   :  { %1791 = vsyncpa [#allocation3 + $0x1], 1 }
 0x572   :  { %1792 = vsyncpa [#allocation5], 1 }
 0x573   :  { %1793 = vsyncpa [#allocation8], 1 }

// kernel: _lambda_.4
= control target key start
LH: loop header
LB: loop body
LE: loop exit
PB: predicated region body
PF: predicated region fallthrough
CT: control target
= control target key end

     0   :  { %s550_s12 = smov 0   ;;  %s659_s0 = inlined_call_operand.vmem [shape: f32[2,4,512], index: 0, kind: input, shape index: {}]   ;;  %s660_s1 = inlined_call_operand.vmem [shape: f32[4,1], index: 1, kind: input, shape index: {}]   ;;  %s661_s2 = inlined_call_operand.vmem [shape: f32[4,1], index: 2, kind: input, shape index: {}]   ;;  %s662_s3 = inlined_call_operand.vmem [shape: bf16[2,4,512], index: 3, kind: output, shape index: {}]  }
   0x1 LB: > { %s461_s13 = sadd.s32 4294967295, %s525_s12   ;;  %p465_p0 = scmp.ge.s32.totalorder %s525_s12, 1  ;;  %s525_s12 = sphi %s550_s12, %s13_s12  }
   0x2   : > { %p137_p1 = scmp.lt.s32.totalorder %s525_s12, 3 }
   0x4   : > { %p138_p2 = pnand %p465_p0, %p137_p1 }
   0x5   : > { %p161_p3 = scmp.lt.s32.totalorder (!%p138_p2), %s461_s13, 1  ;;  %s527_s24 = smov (!%p138_p2), 0.0  }
   0x6   : > { %141 = sbr.rel (%p138_p2) target bundleno = 668 (0x29c), region = 32 }
   0xb   : > { %s670_s13 = smov (!%p161_p3, %s461_s13), 1  ;;  %vm188_vm0 = vcmask 1043456   ;;  %v222_v38 = vlaneseq }
   0xc   : > { %s472_s14 = sshll.u32 %s670_s13, 4 }
   0xd   : > { %s165_s17 = scalar_lea.vmem %s659_s0, %s472_s14  ;;  %v595_v39 = vshrl.u32 %v222_v38, 7 }
   0xe   : > { %v564_v0 = vld [vmem:[%s165_s17] sm:$0xff]  ;;  %v566_v1 = vld [vmem:[%s165_s17 + $0x8] sm:$0xff] }
   0xf   : > { %177 = vst [vmem:[#allocation1] ss:$2 sm:$0xff] %v564_v0  ;;  %v198_v2 = vmul.f32 %v564_v0, %v564_v0  ;;  %v199_v3 = vmul.f32 %v566_v1, %v566_v1  ;;  %vm279_vm4 = vcmp.ge.s32.totalorder %v595_v39, 1  ;;  %vm280_vm5 = vcmp.lt.s32.totalorder %v595_v39, 2 }
  0x10   : > { %179 = vst [vmem:[#allocation1 + $0x10] ss:$2 sm:$0xff] %v566_v1  ;;  %vm247_vm6 = vcmp.lt.s32.totalorder %v595_v39, 1  ;;  %vm603_vm7 = vmand %vm279_vm4, %vm280_vm5  ;;  %vm310_vm11 = vcmp.ge.s32.totalorder %v595_v39, 2  ;;  %vm311_vm12 = vcmp.lt.s32.totalorder %v595_v39, 3 }
  0x11   : > { %vm621_vm13 = vmand %vm310_vm11, %vm311_vm12 }
  0x16   : > { %v180_v4 = vld.sshfl [vmem:[#allocation1] sm:$0xff pattern:$0x75316420]  ;;  %v181_v5 = vld.sshfl [vmem:[#allocation1 + $0x8] sm:$0xff pattern:$0x75316420] }
  0x17   : > { %v182_v6 = vld.sshfl [vmem:[#allocation1 + $0x10] sm:$0xff pattern:$0x75316420]  ;;  %v183_v7 = vld.sshfl [vmem:[#allocation1 + $0x18] sm:$0xff pattern:$0x75316420] }
  0x18   : > { %v189_v8 = vsel %vm188_vm0, %v180_v4, 0.0  ;;  %v190_v9 = vsel %vm188_vm0, %v181_v5, 0.0  ;;  %v192_v10 = vsel %vm188_vm0, %v182_v6, 0.0  ;;  %202 = vst [vmem:[#allocation1] ss:$2 sm:$0xff] %v198_v2  ;;  %v194_v12 = vsel %vm188_vm0, %v183_v7, 0.0 }
  0x19   : > { %v191_v11 = vadd.f32 %v190_v9, %v189_v8  ;;  %204 = vst [vmem:[#allocation1 + $0x10] ss:$2 sm:$0xff] %v199_v3 }
  0x1b   : > { %v193_v13 = vadd.f32 %v192_v10, %v191_v11 }
  0x1d   : > { %v195_v14 = vadd.f32 %v194_v12, %v193_v13 }
  0x1f   : > { %196 = vadd.xlane.f32.xlu0 %v195_v14  ;;  %v205_v15 = vld.sshfl [vmem:[#allocation1] sm:$0xff pattern:$0x75316420]  ;;  %v206_v16 = vld.sshfl [vmem:[#allocation1 + $0x8] sm:$0xff pattern:$0x75316420] }
  0x20   : > { %v207_v17 = vld.sshfl [vmem:[#allocation1 + $0x10] sm:$0xff pattern:$0x75316420]  ;;  %v208_v18 = vld.sshfl [vmem:[#allocation1 + $0x18] sm:$0xff pattern:$0x75316420] }
  0x21   : > { %v213_v19 = vsel %vm188_vm0, %v205_v15, 0.0  ;;  %v214_v20 = vsel %vm188_vm0, %v206_v16, 0.0  ;;  %v216_v21 = vsel %vm188_vm0, %v207_v17, 0.0  ;;  %v218_v23 = vsel %vm188_vm0, %v208_v18, 0.0 }
  0x22   : > { %v215_v22 = vadd.f32 %v214_v20, %v213_v19 }
  0x24   : > { %v217_v24 = vadd.f32 %v216_v21, %v215_v22 }
  0x26   : > { %v219_v25 = vadd.f32 %v218_v23, %v217_v24  ;;  %v528_v23 = vmov 0   ;;  %v173_v24 = vld [vmem:[%s660_s1] sm:$0xf] }
  0x27   : > { %509 = vset.pattern.permute.xlu1 %v528_v23  ;;  %510 = vset.pattern.permute.xlu0 %v528_v23 }
  0x28   : > { %220 = vadd.xlane.f32.xlu0 %v219_v25 }
  0x92   : > { %v582_v26 = vpop.xlane.xlu0 %196 }
  0x93   : > { %474 = vpush %v582_v26  ;;  %v254_v36 = vrot.slane %v582_v26, 1  ;;  %v286_v53 = vrot.slane %v582_v26, 2  ;;  %v317_v8 = vrot.slane %v582_v26, 3 }
  0x9b   : > { %v585_v27 = vpop.xlane.xlu0 %220 }
  0x9c   : > { %476 = vpush %v585_v27  ;;  %v259_v37 = vrot.slane %v585_v27, 1  ;;  %v290_v54 = vrot.slane %v585_v27, 2  ;;  %v321_v9 = vrot.slane %v585_v27, 3 }
  0xc4   : > { %s475_s18 = spop %474 }
  0xc5   : > { %s588_s19 = smul.f32 0.001953125, %s475_s18 }
  0xc7   : > { %s230_s20 = smul.f32 %s588_s19, %s588_s19  ;;  %v251_v40 = vstv %s588_s19 }
  0xc8   : > { %v252_v42 = vsel %vm247_vm6, %v251_v40, 0.0 }
  0xcd   : > { %s477_s21 = spop %476 }
  0xce   : > { %s229_s22 = smul.f32 0.001953125, %s477_s21 }
  0xd0   : > { %s231_s23 = ssub.f32 %s229_s22, %s230_s20 }
  0xd2   : > { %s232_s25 = smax.f32 %s527_s24, %s231_s23 }
  0xd3   : > { %s233_s26 = sadd.f32 1e-05, %s232_s25 }
  0xd5   : > { %v234_v28 = vstv %s233_s26 }
  0xd6   : > { %511 = vrsqrt.f32 %v234_v28  ;;  %vm241_vm2 = vweird.f32 %v234_v28 }
  0xdc   : > { %v512_v29 = vpop.eup %511 }
  0xdd   : > { %v236_v30 = vmul.f32 %v512_v29, %v234_v28  ;;  %vm242_vm1 = vweird.f32 %v512_v29 }
  0xde   : > { %vm243_vm3 = vmor %vm241_vm2, %vm242_vm1  ;;  %vm341_vm2 = vcmp.ge.s32.totalorder %v595_v39, 3 }
  0xdf   : > { %v237_v31 = vmul.f32 %v512_v29, %v236_v30 }
  0xe1   : > { %v238_v32 = vmul.f32 0.5, %v237_v31  ;;  %v529_v31 = vmov 839922192  }
  0xe3   : > { %v239_v33 = vsub.f32 1.5, %v238_v32  ;;  %v356_v32 = vunpack.c.l.s4 %v529_v31 }
  0xe5   : > { %v240_v34 = vmul.f32 %v512_v29, %v239_v33 }
  0xe7   : > { %v244_v35 = vsel %vm243_vm3, %v512_v29, %v240_v34  ;;  %vm342_vm3 = vcmp.lt.s32.totalorder %v595_v39, 4  ;;  %v174_v29 = vld [vmem:[%s661_s2] sm:$0xf]  ;;  %v357_v34 = vunpack.c.0.s8 %v356_v32 }
  0xe8   : > { %478 = vpush %v244_v35  ;;  %vm634_vm4 = vmand %vm341_vm2, %vm342_vm3 }
  0xe9   : > { %480 = vpush %v254_v36 }
  0xea   : > { %482 = vpush %v259_v37 }
 0x119   : > { %s599_s27 = spop %478 }
 0x11a   : > { %s481_s28 = spop %480  ;;  %v249_v55 = vstv %s599_s27 }
 0x11b   : > { %s257_s29 = smul.f32 0.001953125, %s481_s28  ;;  %s483_s30 = spop %482  ;;  %v250_v56 = vsel %vm247_vm6, %v249_v55, 0.0 }
 0x11c   : > { %s262_s4 = smul.f32 0.001953125, %s483_s30 }
 0x11d   : > { %s263_s5 = smul.f32 %s257_s29, %s257_s29  ;;  %v284_v43 = vstv %s257_s29 }
 0x11e   : > { %v285_v44 = vsel %vm603_vm7, %v284_v43, %v252_v42 }
 0x11f   : > { %s264_s6 = ssub.f32 %s262_s4, %s263_s5 }
 0x121   : > { %s265_s7 = smax.f32 %s527_s24, %s264_s6 }
 0x122   : > { %s266_s8 = sadd.f32 1e-05, %s265_s7  ;;  %s473_s7 = sshll.u32 %s670_s13, 3 }
 0x124   : > { %v267_v45 = vstv %s266_s8 }
 0x125   : > { %513 = vrsqrt.f32 %v267_v45  ;;  %vm274_vm9 = vweird.f32 %v267_v45 }
 0x12b   : > { %v514_v46 = vpop.eup %513 }
 0x12c   : > { %v269_v47 = vmul.f32 %v514_v46, %v267_v45  ;;  %vm275_vm8 = vweird.f32 %v514_v46 }
 0x12d   : > { %vm276_vm10 = vmor %vm274_vm9, %vm275_vm8  ;;  %vm395_vm8 = vcmask 1041408   ;;  %vm399_vm9 = vcmask 1045508  }
 0x12e   : > { %v270_v48 = vmul.f32 %v514_v46, %v269_v47 }
 0x130   : > { %v271_v49 = vmul.f32 0.5, %v270_v48 }
 0x132   : > { %v272_v50 = vsub.f32 1.5, %v271_v49 }
 0x134   : > { %v273_v51 = vmul.f32 %v514_v46, %v272_v50 }
 0x136   : > { %v277_v52 = vsel %vm276_vm10, %v514_v46, %v273_v51 }
 0x137   : > { %484 = vpush %v277_v52 }
 0x138   : > { %486 = vpush %v286_v53 }
 0x139   : > { %488 = vpush %v290_v54 }
 0x168   : > { %s485_s9 = spop %484 }
 0x169   : > { %v282_v57 = vstv %s485_s9  ;;  %s487_s10 = spop %486 }
 0x16a   : > { %v283_v58 = vsel %vm603_vm7, %v282_v57, %v250_v56  ;;  %s289_s11 = smul.f32 0.001953125, %s487_s10  ;;  %s489_s14 = spop %488 }
 0x16b   : > { %s293_s15 = smul.f32 0.001953125, %s489_s14  ;;  %s170_s10 = scalar_lea.vmem %s662_s3, %s473_s7 }
 0x16c   : > { %s294_s16 = smul.f32 %s289_s11, %s289_s11  ;;  %v315_v60 = vstv %s289_s11 }
 0x16d   : > { %v316_v61 = vsel %vm621_vm13, %v315_v60, %v285_v44 }
 0x16e   : > { %s295_s17 = ssub.f32 %s293_s15, %s294_s16 }
 0x170   : > { %s296_s18 = smax.f32 %s527_s24, %s295_s17 }
 0x171   : > { %s297_s19 = sadd.f32 1e-05, %s296_s18 }
 0x173   : > { %v298_v62 = vstv %s297_s19 }
 0x174   : > { %515 = vrsqrt.f32 %v298_v62  ;;  %vm305_vm15 = vweird.f32 %v298_v62 }
 0x17a   : > { %v516_v63 = vpop.eup %515 }
 0x17b   : > { %v300_v2 = vmul.f32 %v516_v63, %v298_v62  ;;  %vm306_vm14 = vweird.f32 %v516_v63 }
 0x17c   : > { %vm307_vm1 = vmor %vm305_vm15, %vm306_vm14 }
 0x17d   : > { %v301_v3 = vmul.f32 %v516_v63, %v300_v2 }
 0x17f   : > { %v302_v4 = vmul.f32 0.5, %v301_v3 }
 0x181   : > { %v303_v5 = vsub.f32 1.5, %v302_v4 }
 0x183   : > { %v304_v6 = vmul.f32 %v516_v63, %v303_v5 }
 0x185   : > { %v308_v7 = vsel %vm307_vm1, %v516_v63, %v304_v6 }
 0x186   : > { %490 = vpush %v308_v7 }
 0x187   : > { %492 = vpush %v317_v8 }
 0x188   : > { %494 = vpush %v321_v9 }
 0x1b7   : > { %s491_s20 = spop %490 }
 0x1b8   : > { %v313_v10 = vstv %s491_s20  ;;  %s493_s21 = spop %492 }
 0x1b9   : > { %v314_v11 = vsel %vm621_vm13, %v313_v10, %v283_v58  ;;  %s320_s22 = smul.f32 0.001953125, %s493_s21  ;;  %s495_s23 = spop %494 }
 0x1ba   : > { %s324_s25 = smul.f32 0.001953125, %s495_s23 }
 0x1bb   : > { %s325_s26 = smul.f32 %s320_s22, %s320_s22  ;;  %v346_v13 = vstv %s320_s22 }
 0x1bc   : > { %v347_v14 = vsel %vm634_vm4, %v346_v13, %v316_v61 }
 0x1bd   : > { %s326_s27 = ssub.f32 %s324_s25, %s325_s26 }
 0x1bf   : > { %s327_s28 = smax.f32 %s527_s24, %s326_s27 }
 0x1c0   : > { %s328_s29 = sadd.f32 1e-05, %s327_s28 }
 0x1c2   : > { %v329_v15 = vstv %s328_s29 }
 0x1c3   : > { %517 = vrsqrt.f32 %v329_v15  ;;  %vm336_vm6 = vweird.f32 %v329_v15 }
 0x1c9   : > { %v518_v16 = vpop.eup %517 }
 0x1ca   : > { %v331_v17 = vmul.f32 %v518_v16, %v329_v15  ;;  %vm337_vm5 = vweird.f32 %v518_v16 }
 0x1cb   : > { %vm338_vm7 = vmor %vm336_vm6, %vm337_vm5 }
 0x1cc   : > { %v332_v18 = vmul.f32 %v518_v16, %v331_v17 }
 0x1ce   : > { %v333_v19 = vmul.f32 0.5, %v332_v18 }
 0x1d0   : > { %v334_v20 = vsub.f32 1.5, %v333_v19 }
 0x1d2   : > { %v335_v21 = vmul.f32 %v518_v16, %v334_v20 }
 0x1d4   : > { %v339_v22 = vsel %vm338_vm7, %v518_v16, %v335_v21 }
 0x1d5   : > { %496 = vpush %v339_v22 }
 0x206   : > { %s497_s30 = spop %496 }
 0x207   : > { %v344_v25 = vstv %s497_s30 }
 0x208   : > { %v345_v26 = vsel %vm634_vm4, %v344_v25, %v314_v11 }
 0x209   : > { %v348_v27 = vmul.f32 %v345_v26, %v173_v24 }
 0x20b   : > { %353 = vperm.xlu1 %509, %v348_v27   ;;  %v349_v28 = vmul.f32 %v348_v27, %v347_v14 }
 0x20d   : > { %v350_v30 = vsub.f32 %v174_v29, %v349_v28 }
 0x213   : > { %364 = vperm.xlu1 %509, %v350_v30  }
 0x27d   : > { %v354_v33 = vpop.permute.xlu1 %353 }
 0x27e   : > { %v358_v35 = vperm.slane %v354_v33, %v357_v34 }
 0x280   : > { %v360_v37 = vmul.f32 %v358_v35, %v564_v0  ;;  %v361_v38 = vmul.f32 %v358_v35, %v566_v1 }
 0x285   : > { %v365_v36 = vpop.permute.xlu1 %364 }
 0x286   : > { %v369_v39 = vperm.slane %v365_v36, %v357_v34 }
 0x288   : > { %v371_v40 = vadd.f32 %v369_v39, %v360_v37  ;;  %v372_v41 = vadd.f32 %v369_v39, %v361_v38 }
 0x28a   : > { %v373_v42 = vmax.f32 %v371_v40, 0.0  ;;  %v374_v43 = vmax.f32 %v372_v41, 0.0 }
 0x28c   : > { %377 = vst [vmem:[#allocation1] ss:$2 sm:$0xff] %v373_v42 }
 0x28d   : > { %379 = vst [vmem:[#allocation1 + $0x10] ss:$2 sm:$0xff] %v374_v43 }
 0x293   : > { %v380_v44 = vld.sshfl [vmem:[#allocation1] sm:$0xff pattern:$0x75316420]  ;;  %v381_v45 = vld.sshfl [vmem:[#allocation1 + $0x8] sm:$0xff pattern:$0x75316420] }
 0x294   : > { %v382_v46 = vld.sshfl [vmem:[#allocation1 + $0x10] sm:$0xff pattern:$0x75316420]  ;;  %v383_v47 = vld.sshfl [vmem:[#allocation1 + $0x18] sm:$0xff pattern:$0x75316420]  ;;  %v388_v48 = vpack.c.bf16 %v381_v45, %v380_v44 }
 0x295   : > { %v389_v49 = vpack.c.bf16 %v383_v47, %v382_v46 }
 0x296   : > { %v392_v50 = vrot.slane %v388_v48, 2 }
 0x297   : > { %v393_v0 = vrot.slane %v389_v49, 4  ;;  %v394_v51 = vrot.slane %v389_v49, 6 }
 0x298   : > { %v398_v1 = vsel %vm395_vm8, %v388_v48, %v392_v50 }
 0x299   : > { %v402_v52 = vsel %vm399_vm9, %v393_v0, %v394_v51 }
 0x29a   : > { %v403_v53 = vsel %vm188_vm0, %v398_v1, %v402_v52 }
 0x29b   : > { %405 = vst [vmem:[%s170_s10] sm:$0xff] %v403_v53 }
 0x29c PF: > { %s13_s12 = sadd.s32 1, %s525_s12  }
 0x29d   : > { %p10_p4 = scmp.ge.s32.totalorder %s13_s12, 4  }
 0x29f   :  { %12 = sbr.rel (!%p10_p4) target bundleno = 1 (0x1), region = 65 }

// kernel: _lambda_.5
= control target key start
LH: loop header
LB: loop body
LE: loop exit
PB: predicated region body
PF: predicated region fallthrough
CT: control target
= control target key end

     0   :  { %s5521_s18 = smov 0   ;;  %s7470_s0 = inlined_call_operand.vmem [shape: bf16[2,8,1222], index: 0, kind: input, shape index: {}]   ;;  %s7471_s1 = inlined_call_operand.vmem [shape: bf16[27,8,8], index: 1, kind: input, shape index: {}]   ;;  %s7472_s2 = inlined_call_operand.vmem [shape: f32[8,1], index: 2, kind: input, shape index: {}]   ;;  %s7473_s3 = inlined_call_operand.vmem [shape: f32[8,1], index: 3, kind: input, shape index: {}]   ;;  %s7474_s4 = inlined_call_operand.vmem [shape: f32[1,1000], index: 4, kind: input, shape index: {}]   ;;  %s7475_s5 = inlined_call_operand.vmem [shape: f32[2,8,1000], index: 5, kind: output, shape index: {}]  }
   0x1 LB: > { %s5130_s19 = sadd.s32 4294967295, %s5461_s18   ;;  %p5134_p0 = scmp.ge.s32.totalorder %s5461_s18, 1  ;;  %s5461_s18 = sphi %s5521_s18, %s15_s18  }
   0x2   : > { %p187_p1 = scmp.lt.s32.totalorder %s5461_s18, 3 }
   0x4   : > { %p188_p2 = pnand %p5134_p0, %p187_p1 }
   0x5   : > { %p215_p3 = scmp.lt.s32.totalorder (!%p188_p2), %s5130_s19, 1  ;;  %s5463_s24 = smov (!%p188_p2), 127  }
   0x6   : > { %191 = sbr.rel (%p188_p2) target bundleno = 1880 (0x758), region = 40  ;;  %s5464_s25 = smov (!%p188_p2), 126  }
   0x7   : > { %s5465_s26 = smov (!%p188_p2), 118   ;;  %s5466_s27 = smov (!%p188_p2), 117  }
   0x8   : > { %s5467_s28 = smov (!%p188_p2), 116   ;;  %s5468_s29 = smov (!%p188_p2), 108  }
   0x9   : > { %s5469_s7 = smov (!%p188_p2), 107   ;;  %s5470_s8 = smov (!%p188_p2), 106  }
   0xa   : > { %s5471_s11 = smov (!%p188_p2), 28   ;;  %s5472_s14 = smov (!%p188_p2), 27  }
   0xb   : > { %s7481_s19 = smov (!%p215_p3, %s5130_s19), 1  ;;  %vm269_vm0 = vcmask 1039360   ;;  %vm281_vm1 = vcmask 1043456   ;;  %v5138_v25 = vld [vmem:[%s7471_s1 + $0x4] sm:$0xf]  ;;  %vm277_vm2 = vcmask 64512  }
   0xc   : > { %s5383_s20 = smul.u32 40, %s7481_s19  ;;  %vm559_vm3 = vcmask 1031168   ;;  %v230_v57 = vld [vmem:[%s7471_s1] sm:$0xf]  ;;  %vm724_vm4 = vcmask 965632   ;;  %vm889_vm5 = vcmask 957440  }
   0xd   : > { %s5473_s17 = smov 26   ;;  %vm1054_vm6 = vcmask 949248   ;;  %vm1219_vm7 = vcmask 883712   ;;  %vm1384_vm8 = vcmask 875520   ;;  %vm1549_vm9 = vcmask 867328   ;;  %s5477_s30 = smov 8  }
   0xe   : > { %s5535_s23 = scalar_lea.vmem %s7470_s0, %s5383_s20  ;;  %s5474_s20 = smov 18   ;;  %vm1744_vm10 = vcmask 228352   ;;  %vm1912_vm11 = vcmask 220160   ;;  %vm2080_vm12 = vcmask 211968   ;;  %vm2248_vm13 = vcmask 146432  }
   0xf   : > { %v228_v0 = vld [vmem:[%s5535_s23 + $0x10] sm:$0xff]  ;;  %v227_v1 = vld [vmem:[%s5535_s23 + $0x8] sm:$0xff]  ;;  %v226_v4 = vld [vmem:[%s5535_s23] sm:$0xff]  ;;  %vm2416_vm14 = vcmask 138240   ;;  %vm2584_vm15 = vcmask 130048   ;;  %s5483_s6 = smov 46  }
  0x10   : > { %v241_v2 = vunpack.c.l.b16 %v228_v0  ;;  %v239_v3 = vunpack.c.l.b16 %v227_v1  ;;  %v238_v5 = vunpack.c.h.b16 %v226_v4  ;;  %v240_v9 = vunpack.c.h.b16 %v227_v1  ;;  %v229_v11 = vld [vmem:[%s5535_s23 + $0x18] sm:$0xff]  ;;  %s5484_s9 = smov 45   ;;  %s5485_s10 = smov 44  }
  0x11   : > { %v237_v10 = vunpack.c.l.b16 %v226_v4  ;;  %v243_v12 = vunpack.c.l.b16 %v229_v11  ;;  %v244_v16 = vunpack.c.h.b16 %v229_v11  ;;  %v242_v17 = vunpack.c.h.b16 %v228_v0  ;;  %s5486_s13 = smov 36   ;;  %s5487_s16 = smov 35  }
  0x12   : > { %v5540_v6 = vpack.c.b16 %v241_v2, %v241_v2  ;;  %v5542_v7 = vpack.c.b16 %v239_v3, %v239_v3  ;;  %v5544_v8 = vpack.c.b16 %v238_v5, %v238_v5  ;;  %v5550_v13 = vpack.c.b16 %v240_v9, %v240_v9  ;;  %s5488_s21 = smov 34  }
  0x13   : > { %v5552_v14 = vpack.c.b16 %v237_v10, %v237_v10  ;;  %v5554_v15 = vpack.c.b16 %v243_v12, %v243_v12  ;;  %v5559_v18 = vpack.c.b16 %v244_v16, %v244_v16  ;;  %v5561_v19 = vpack.c.b16 %v242_v17, %v242_v17 }
  0x14   : > { %261 = vrot.lane.b32.xlu1 %v5540_v6, %s5463_s24  ;;  %257 = vrot.lane.b32.xlu0 %v5542_v7, %s5463_s24  ;;  %v417_v37 = vsel %vm281_vm1, %v5544_v8, 0  ;;  %v420_v38 = vsel %vm281_vm1, %v5542_v7, 0  ;;  %v423_v46 = vsel %vm281_vm1, %v5550_v13, 0  ;;  %v426_v53 = vsel %vm281_vm1, %v5540_v6, 0 }
  0x15   : > { %255 = vrot.lane.b32.xlu2 %v5544_v8, %s5463_s24  ;;  %v414_v47 = vsel %vm281_vm1, %v5552_v14, 0  ;;  %v429_v48 = vsel %vm281_vm1, %v5561_v19, 0  ;;  %v432_v51 = vsel %vm281_vm1, %v5554_v15, 0  ;;  %v435_v52 = vsel %vm281_vm1, %v5559_v18, 0 }
  0x1c   : > { %259 = vrot.lane.b32.xlu0 %v5550_v13, %s5463_s24  ;;  %253 = vrot.lane.b32.xlu1 %v5552_v14, %s5463_s24 }
  0x1d   : > { %265 = vrot.lane.b32.xlu2 %v5554_v15, %s5463_s24 }
  0x24   : > { %267 = vrot.lane.b32.xlu0 %v5559_v18, %s5463_s24  ;;  %263 = vrot.lane.b32.xlu1 %v5561_v19, %s5463_s24  ;;  %s5475_s24 = smov 17  }
  0x25   : > { %547 = vrot.lane.b32.xlu2 %v5542_v7, %s5464_s25 }
  0x2c   : > { %549 = vrot.lane.b32.xlu0 %v5550_v13, %s5464_s25  ;;  %551 = vrot.lane.b32.xlu1 %v5540_v6, %s5464_s25 }
  0x2d   : > { %543 = vrot.lane.b32.xlu2 %v5552_v14, %s5464_s25 }
  0x34   : > { %545 = vrot.lane.b32.xlu0 %v5544_v8, %s5464_s25  ;;  %555 = vrot.lane.b32.xlu1 %v5554_v15, %s5464_s25 }
  0x35   : > { %557 = vrot.lane.b32.xlu2 %v5559_v18, %s5464_s25 }
  0x3c   : > { %553 = vrot.lane.b32.xlu0 %v5561_v19, %s5464_s25  ;;  %712 = vrot.lane.b32.xlu1 %v5542_v7, %s5465_s26  ;;  %s5480_s25 = smov 56  }
  0x3d   : > { %714 = vrot.lane.b32.xlu2 %v5550_v13, %s5465_s26 }
  0x44   : > { %716 = vrot.lane.b32.xlu0 %v5540_v6, %s5465_s26  ;;  %708 = vrot.lane.b32.xlu1 %v5552_v14, %s5465_s26 }
  0x45   : > { %710 = vrot.lane.b32.xlu2 %v5544_v8, %s5465_s26 }
  0x4c   : > { %722 = vrot.lane.b32.xlu1 %v5559_v18, %s5465_s26  ;;  %720 = vrot.lane.b32.xlu0 %v5554_v15, %s5465_s26 }
  0x4d   : > { %718 = vrot.lane.b32.xlu2 %v5561_v19, %s5465_s26  ;;  %s5481_s26 = smov 55  }
  0x54   : > { %879 = vrot.lane.b32.xlu1 %v5550_v13, %s5466_s27  ;;  %877 = vrot.lane.b32.xlu0 %v5542_v7, %s5466_s27 }
  0x55   : > { %881 = vrot.lane.b32.xlu2 %v5540_v6, %s5466_s27 }
  0x5c   : > { %875 = vrot.lane.b32.xlu1 %v5544_v8, %s5466_s27  ;;  %873 = vrot.lane.b32.xlu0 %v5552_v14, %s5466_s27 }
  0x5d   : > { %885 = vrot.lane.b32.xlu2 %v5554_v15, %s5466_s27 }
  0x64   : > { %883 = vrot.lane.b32.xlu1 %v5561_v19, %s5466_s27  ;;  %887 = vrot.lane.b32.xlu0 %v5559_v18, %s5466_s27  ;;  %s5476_s27 = smov 16  }
  0x65   : > { %1042 = vrot.lane.b32.xlu2 %v5542_v7, %s5467_s28 }
  0x6c   : > { %1044 = vrot.lane.b32.xlu0 %v5550_v13, %s5467_s28  ;;  %1046 = vrot.lane.b32.xlu1 %v5540_v6, %s5467_s28 }
  0x6d   : > { %1038 = vrot.lane.b32.xlu2 %v5552_v14, %s5467_s28 }
  0x6f   : > { %v256_v20 = vpop.permute.xlu2 %255 }
  0x74   : > { %1040 = vrot.lane.b32.xlu0 %v5544_v8, %s5467_s28  ;;  %1050 = vrot.lane.b32.xlu1 %v5554_v15, %s5467_s28 }
  0x75   : > { %1052 = vrot.lane.b32.xlu2 %v5559_v18, %s5467_s28 }
  0x77   : > { %v266_v34 = vpop.permute.xlu2 %265 }
  0x7c   : > { %1048 = vrot.lane.b32.xlu0 %v5561_v19, %s5467_s28  ;;  %1207 = vrot.lane.b32.xlu1 %v5542_v7, %s5468_s29 }
  0x7d   : > { %1209 = vrot.lane.b32.xlu2 %v5550_v13, %s5468_s29 }
  0x7f   : > { %v548_v49 = vpop.permute.xlu2 %547 }
  0x84   : > { %1211 = vrot.lane.b32.xlu0 %v5540_v6, %s5468_s29  ;;  %1203 = vrot.lane.b32.xlu1 %v5552_v14, %s5468_s29 }
  0x85   : > { %1205 = vrot.lane.b32.xlu2 %v5544_v8, %s5468_s29 }
  0x86   : > { %v262_v21 = vpop.permute.xlu1 %261  ;;  %v258_v22 = vpop.permute.xlu0 %257 }
  0x87   : > { %v271_v23 = vsel %vm269_vm0, %v256_v20, %v258_v22  ;;  %v544_v55 = vpop.permute.xlu2 %543 }
  0x88   : > { %v286_v24 = vsel %vm281_vm1, %v271_v23, 0 }
  0x89   : > { %326 = vmatpush.bf16.msra.mxu1 %v286_v24 }
  0x8c   : > { %5140 = vmatmul.msk.bf16.vlgmr.msra.gmra.mxu1 %vm277_vm2, %v5138_v25  ;;  %1217 = vrot.lane.b32.xlu1 %v5559_v18, %s5468_s29 }
  0x8d   : > { %1215 = vrot.lane.b32.xlu0 %v5554_v15, %s5468_s29  ;;  %1213 = vrot.lane.b32.xlu2 %v5561_v19, %s5468_s29 }
  0x8e   : > { %v260_v26 = vpop.permute.xlu0 %259  ;;  %v254_v27 = vpop.permute.xlu1 %253 }
  0x8f   : > { %v270_v28 = vsel %vm269_vm0, %v254_v27, %v256_v20  ;;  %v272_v29 = vsel %vm269_vm0, %v258_v22, %v260_v26  ;;  %v273_v30 = vsel %vm269_vm0, %v260_v26, %v262_v21  ;;  %v558_v63 = vpop.permute.xlu2 %557 }
  0x90   : > { %v283_v31 = vsel %vm281_vm1, %v270_v28, 0  ;;  %v289_v32 = vsel %vm281_vm1, %v272_v29, 0  ;;  %v292_v33 = vsel %vm281_vm1, %v273_v30, 0  ;;  %v592_v20 = vsel %vm281_vm1, %v558_v63, 0 }
  0x91   : > { %313 = vmatpush.bf16.msra.mxu0 %v283_v31  ;;  %339 = vmatpush.bf16.msra.mxu2 %v289_v32 }
  0x92   : > { %352 = vmatpush.bf16.msra.mxu3 %v292_v33 }
  0x94   : > { %5141 = vmatmul.msk.bf16.vlgmr.msra.gmra.mxu2 %vm277_vm2, %v5138_v25  ;;  %5139 = vmatmul.msk.bf16.vlgmr.msra.gmra.mxu0 %vm277_vm2, %v5138_v25 }
  0x95   : > { %5142 = vmatmul.msk.bf16.vlgmr.msra.gmra.mxu3 %vm277_vm2, %v5138_v25  ;;  %1374 = vrot.lane.b32.xlu1 %v5550_v13, %s5469_s7 }
  0x96   : > { %v268_v35 = vpop.permute.xlu0 %267  ;;  %v264_v36 = vpop.permute.xlu1 %263  ;;  %1372 = vrot.lane.b32.xlu0 %v5542_v7, %s5469_s7  ;;  %1376 = vrot.lane.b32.xlu2 %v5540_v6, %s5469_s7 }
  0x97   : > { %v304_v39 = vsel %vm281_vm1, %v268_v35, 0  ;;  %v274_v40 = vsel %vm269_vm0, %v262_v21, %v264_v36  ;;  %v275_v41 = vsel %vm269_vm0, %v264_v36, %v266_v34  ;;  %v276_v42 = vsel %vm269_vm0, %v266_v34, %v268_v35  ;;  %v715_v9 = vpop.permute.xlu2 %714 }
  0x98   : > { %404 = vmatpush.bf16.msrb.mxu3 %v304_v39  ;;  %v295_v43 = vsel %vm281_vm1, %v274_v40, 0  ;;  %v298_v44 = vsel %vm281_vm1, %v275_v41, 0  ;;  %v301_v45 = vsel %vm281_vm1, %v276_v42, 0  ;;  %vm2920_vm0 = vcmask 56320  }
  0x99   : > { %365 = vmatpush.bf16.msrb.mxu0 %v295_v43  ;;  %378 = vmatpush.bf16.msrb.mxu1 %v298_v44 }
  0x9a   : > { %391 = vmatpush.bf16.msrb.mxu2 %v301_v45 }
  0x9c   : > { %483 = vmatpush.bf16.msra.mxu3 %v423_v46  ;;  %5144 = vmatmul.msk.bf16.vlgmr.msrb.gmra.mxu1 %vm277_vm2, %v5138_v25 }
  0x9d   : > { %457 = vmatpush.bf16.msra.mxu1 %v417_v37  ;;  %444 = vmatpush.bf16.msra.mxu0 %v414_v47 }
  0x9e   : > { %470 = vmatpush.bf16.msra.mxu2 %v420_v38  ;;  %1370 = vrot.lane.b32.xlu1 %v5544_v8, %s5469_s7  ;;  %v550_v50 = vpop.permute.xlu0 %549  ;;  %v552_v59 = vpop.permute.xlu1 %551 }
  0x9f   : > { %1368 = vrot.lane.b32.xlu0 %v5552_v14, %s5469_s7  ;;  %1380 = vrot.lane.b32.xlu2 %v5554_v15, %s5469_s7  ;;  %v562_v60 = vsel %vm559_vm3, %v548_v49, %v550_v50  ;;  %v563_v61 = vsel %vm559_vm3, %v550_v50, %v552_v59  ;;  %v711_v22 = vpop.permute.xlu2 %710 }
  0xa0   : > { %v577_v0 = vsel %vm281_vm1, %v562_v60, 0  ;;  %v580_v1 = vsel %vm281_vm1, %v563_v61, 0 }
  0xa1   : > { %509 = vmatpush.bf16.msrb.mxu1 %v429_v48 }
  0xa4   : > { %5143 = vmatmul.msk.bf16.vlgmr.msrb.gmra.mxu0 %vm277_vm2, %v5138_v25  ;;  %5145 = vmatmul.msk.bf16.vlgmr.msrb.gmra.mxu2 %vm277_vm2, %v5138_v25 }
  0xa5   : > { %5146 = vmatmul.msk.bf16.vlgmr.msrb.gmra.mxu3 %vm277_vm2, %v5138_v25  ;;  %522 = vmatpush.bf16.msrb.mxu2 %v432_v51  ;;  %v5155_v25 = vld [vmem:[%s7471_s1 + $0x8] sm:$0xf] }
  0xa6   : > { %535 = vmatpush.bf16.msrb.mxu3 %v435_v52  ;;  %496 = vmatpush.bf16.msrb.mxu0 %v426_v53  ;;  %v546_v54 = vpop.permute.xlu0 %545  ;;  %v556_v3 = vpop.permute.xlu1 %555 }
  0xa7   : > { %v561_v56 = vsel %vm559_vm3, %v546_v54, %v548_v49  ;;  %1378 = vrot.lane.b32.xlu1 %v5561_v19, %s5469_s7  ;;  %1382 = vrot.lane.b32.xlu0 %v5559_v18, %s5469_s7  ;;  %v560_v62 = vsel %vm559_vm3, %v544_v55, %v546_v54  ;;  %v566_v16 = vsel %vm559_vm3, %v556_v3, %v558_v63  ;;  %v719_v36 = vpop.permute.xlu2 %718  ;;  %v5164_v49 = vld [vmem:[%s7471_s1 + $0xc] sm:$0xf] }
  0xa8   : > { %1537 = vrot.lane.b32.xlu2 %v5542_v7, %s5470_s8  ;;  %v574_v58 = vsel %vm281_vm1, %v561_v56, 0  ;;  %v571_v2 = vsel %vm281_vm1, %v560_v62, 0  ;;  %v589_v21 = vsel %vm281_vm1, %v566_v16, 0  ;;  %v5173_v16 = vld [vmem:[%s7471_s1 + $0x10] sm:$0xf] }
  0xac   : > { %5148 = vmatmul.msk.bf16.vlgmr.msra.gmra.mxu1 %vm277_vm2, %v230_v57 }
  0xad   : > { %614 = vmatpush.bf16.msra.mxu1 %v574_v58 }
  0xae   : > { %v554_v4 = vpop.permute.xlu0 %553  ;;  %v713_v11 = vpop.permute.xlu1 %712 }
  0xaf   : > { %1539 = vrot.lane.b32.xlu0 %v5550_v13, %s5470_s8  ;;  %1541 = vrot.lane.b32.xlu1 %v5540_v6, %s5470_s8  ;;  %v565_v5 = vsel %vm559_vm3, %v554_v4, %v556_v3  ;;  %v564_v12 = vsel %vm559_vm3, %v552_v59, %v554_v4  ;;  %v726_v24 = vsel %vm724_vm4, %v711_v22, %v713_v11  ;;  %v882_v51 = vpop.permute.xlu2 %881  ;;  %vm3088_vm3 = vcmask 48128  }
  0xb0   : > { %1533 = vrot.lane.b32.xlu2 %v5552_v14, %s5470_s8  ;;  %v586_v10 = vsel %vm281_vm1, %v565_v5, 0  ;;  %v583_v17 = vsel %vm281_vm1, %v564_v12, 0  ;;  %v739_v26 = vsel %vm281_vm1, %v726_v24, 0  ;;  %v727_v28 = vsel %vm724_vm4, %v713_v11, %v715_v9 }
  0xb1   : > { %v742_v32 = vsel %vm281_vm1, %v727_v28, 0 }
  0xb4   : > { %5147 = vmatmul.msk.bf16.vlgmr.msra.gmra.mxu0 %vm277_vm2, %v230_v57  ;;  %5149 = vmatmul.msk.bf16.vlgmr.msra.gmra.mxu2 %vm277_vm2, %v230_v57 }
  0xb5   : > { %5150 = vmatmul.msk.bf16.vlgmr.msra.gmra.mxu3 %vm277_vm2, %v230_v57  ;;  %627 = vmatpush.bf16.msra.mxu2 %v577_v0 }
  0xb6   : > { %640 = vmatpush.bf16.msra.mxu3 %v580_v1  ;;  %601 = vmatpush.bf16.msra.mxu0 %v571_v2  ;;  %v709_v23 = vpop.permute.xlu1 %708  ;;  %v717_v27 = vpop.permute.xlu0 %716 }
  0xb7   : > { %1535 = vrot.lane.b32.xlu0 %v5544_v8, %s5470_s8  ;;  %1545 = vrot.lane.b32.xlu1 %v5554_v15, %s5470_s8  ;;  %v728_v29 = vsel %vm724_vm4, %v715_v9, %v717_v27  ;;  %v725_v30 = vsel %vm724_vm4, %v709_v23, %v711_v22  ;;  %v729_v41 = vsel %vm724_vm4, %v717_v27, %v719_v36  ;;  %v886_v59 = vpop.permute.xlu2 %885 }
  0xb8   : > { %1547 = vrot.lane.b32.xlu2 %v5559_v18, %s5470_s8  ;;  %v745_v33 = vsel %vm281_vm1, %v728_v29, 0  ;;  %v736_v34 = vsel %vm281_vm1, %v725_v30, 0  ;;  %v748_v43 = vsel %vm281_vm1, %v729_v41, 0 }
  0xbc   : > { %5152 = vmatmul.msk.bf16.vlgmr.msrb.gmra.mxu1 %vm277_vm2, %v230_v57 }
  0xbd   : > { %666 = vmatpush.bf16.msrb.mxu1 %v586_v10 }
  0xbe   : > { %v723_v31 = vpop.permute.xlu1 %722  ;;  %v721_v35 = vpop.permute.xlu0 %720 }
  0xbf   : > { %1543 = vrot.lane.b32.xlu0 %v5561_v19, %s5470_s8  ;;  %1730 = vrot.lane.b32.xlu1 %v5542_v7, %s5471_s11  ;;  %v730_v37 = vsel %vm724_vm4, %v719_v36, %v721_v35  ;;  %v731_v42 = vsel %vm724_vm4, %v721_v35, %v723_v31  ;;  %v757_v44 = vsel %vm281_vm1, %v723_v31, 0  ;;  %v1043_v0 = vpop.permute.xlu2 %1042  ;;  %s5478_s8 = smov 7   ;;  %vm3284_vm4 = vcmask 457728  }
  0xc0   : > { %1732 = vrot.lane.b32.xlu2 %v5550_v13, %s5471_s11  ;;  %v751_v39 = vsel %vm281_vm1, %v730_v37, 0  ;;  %v754_v45 = vsel %vm281_vm1, %v731_v42, 0 }
  0xc4   : > { %5153 = vmatmul.msk.bf16.vlgmr.msrb.gmra.mxu2 %vm277_vm2, %v230_v57  ;;  %5151 = vmatmul.msk.bf16.vlgmr.msrb.gmra.mxu0 %vm277_vm2, %v230_v57 }
  0xc5   : > { %5154 = vmatmul.msk.bf16.vlgmr.msrb.gmra.mxu3 %vm277_vm2, %v230_v57  ;;  %653 = vmatpush.bf16.msrb.mxu0 %v583_v17 }
  0xc6   : > { %692 = vmatpush.bf16.msrb.mxu3 %v592_v20  ;;  %679 = vmatpush.bf16.msrb.mxu2 %v589_v21  ;;  %v880_v38 = vpop.permute.xlu1 %879  ;;  %v878_v40 = vpop.permute.xlu0 %877 }
  0xc7   : > { %1734 = vrot.lane.b32.xlu0 %v5540_v6, %s5471_s11  ;;  %1726 = vrot.lane.b32.xlu1 %v5552_v14, %s5471_s11  ;;  %v892_v52 = vsel %vm889_vm5, %v878_v40, %v880_v38  ;;  %v893_v53 = vsel %vm889_vm5, %v880_v38, %v882_v51  ;;  %v1039_v10 = vpop.permute.xlu2 %1038 }
  0xc8   : > { %1728 = vrot.lane.b32.xlu2 %v5544_v8, %s5471_s11  ;;  %v907_v56 = vsel %vm281_vm1, %v892_v52, 0  ;;  %v910_v57 = vsel %vm281_vm1, %v893_v53, 0 }
  0xcc   : > { %5157 = vmatmul.msk.bf16.vlgmr.msra.gmra.mxu1 %vm277_vm2, %v5155_v25 }
  0xcd   : > { %779 = vmatpush.bf16.msra.mxu1 %v739_v26 }
  0xce   : > { %v876_v46 = vpop.permute.xlu1 %875  ;;  %v874_v47 = vpop.permute.xlu0 %873 }
  0xcf   : > { %1738 = vrot.lane.b32.xlu0 %v5554_v15, %s5471_s11  ;;  %1740 = vrot.lane.b32.xlu1 %v5559_v18, %s5471_s11  ;;  %v891_v48 = vsel %vm889_vm5, %v876_v46, %v878_v40  ;;  %v890_v54 = vsel %vm889_vm5, %v874_v47, %v876_v46  ;;  %v1053_v24 = vpop.permute.xlu2 %1052 }
  0xd0   : > { %v904_v50 = vsel %vm281_vm1, %v891_v48, 0  ;;  %v901_v58 = vsel %vm281_vm1, %v890_v54, 0  ;;  %v1087_v47 = vsel %vm281_vm1, %v1053_v24, 0 }
  0xd4   : > { %5158 = vmatmul.msk.bf16.vlgmr.msra.gmra.mxu2 %vm277_vm2, %v5155_v25  ;;  %5156 = vmatmul.msk.bf16.vlgmr.msra.gmra.mxu0 %vm277_vm2, %v5155_v25 }
  0xd5   : > { %5159 = vmatmul.msk.bf16.vlgmr.msra.gmra.mxu3 %vm277_vm2, %v5155_v25  ;;  %792 = vmatpush.bf16.msra.mxu2 %v742_v32 }
  0xd6   : > { %805 = vmatpush.bf16.msra.mxu3 %v745_v33  ;;  %766 = vmatpush.bf16.msra.mxu0 %v736_v34  ;;  %v888_v55 = vpop.permute.xlu0 %887  ;;  %v884_v60 = vpop.permute.xlu1 %883 }
  0xd7   : > { %1736 = vrot.lane.b32.xlu0 %v5561_v19, %s5471_s11  ;;  %1898 = vrot.lane.b32.xlu1 %v5542_v7, %s5472_s14  ;;  %v895_v61 = vsel %vm889_vm5, %v884_v60, %v886_v59  ;;  %v894_v1 = vsel %vm889_vm5, %v882_v51, %v884_v60  ;;  %v896_v2 = vsel %vm889_vm5, %v886_v59, %v888_v55  ;;  %v922_v4 = vsel %vm281_vm1, %v888_v55, 0  ;;  %v1210_v37 = vpop.permute.xlu2 %1209 }
  0xd8   : > { %v916_v63 = vsel %vm281_vm1, %v895_v61, 0  ;;  %v913_v3 = vsel %vm281_vm1, %v894_v1, 0  ;;  %v919_v5 = vsel %vm281_vm1, %v896_v2, 0  ;;  %vm3452_vm5 = vcmask 449536  }
  0xdc   : > { %5161 = vmatmul.msk.bf16.vlgmr.msrb.gmra.mxu1 %vm277_vm2, %v5155_v25 }
  0xdd   : > { %831 = vmatpush.bf16.msrb.mxu1 %v751_v39 }
  0xde   : > { %v1045_v62 = vpop.permute.xlu0 %1044  ;;  %v1047_v20 = vpop.permute.xlu1 %1046 }
  0xdf   : > { %1902 = vrot.lane.b32.xlu0 %v5540_v6, %s5472_s14  ;;  %1894 = vrot.lane.b32.xlu1 %v5552_v14, %s5472_s14  ;;  %v1057_v21 = vsel %vm1054_vm6, %v1043_v0, %v1045_v62  ;;  %v1058_v22 = vsel %vm1054_vm6, %v1045_v62, %v1047_v20 }
  0xe0   : > { %v1072_v27 = vsel %vm281_vm1, %v1057_v21, 0  ;;  %v1075_v28 = vsel %vm281_vm1, %v1058_v22, 0 }
  0xe4   : > { %5160 = vmatmul.msk.bf16.vlgmr.msrb.gmra.mxu0 %vm277_vm2, %v5155_v25  ;;  %5162 = vmatmul.msk.bf16.vlgmr.msrb.gmra.mxu2 %vm277_vm2, %v5155_v25 }
  0xe5   : > { %5163 = vmatmul.msk.bf16.vlgmr.msrb.gmra.mxu3 %vm277_vm2, %v5155_v25  ;;  %818 = vmatpush.bf16.msrb.mxu0 %v748_v43 }
  0xe6   : > { %857 = vmatpush.bf16.msrb.mxu3 %v757_v44  ;;  %844 = vmatpush.bf16.msrb.mxu2 %v754_v45  ;;  %v1041_v9 = vpop.permute.xlu0 %1040  ;;  %v1051_v30 = vpop.permute.xlu1 %1050 }
  0xe7   : > { %1906 = vrot.lane.b32.xlu0 %v5554_v15, %s5472_s14  ;;  %1908 = vrot.lane.b32.xlu1 %v5559_v18, %s5472_s14  ;;  %v1056_v11 = vsel %vm1054_vm6, %v1041_v9, %v1043_v0  ;;  %v1055_v23 = vsel %vm1054_vm6, %v1039_v10, %v1041_v9  ;;  %v1061_v43 = vsel %vm1054_vm6, %v1051_v30, %v1053_v24 }
  0xe8   : > { %v1069_v17 = vsel %vm281_vm1, %v1056_v11, 0  ;;  %v1066_v29 = vsel %vm281_vm1, %v1055_v23, 0  ;;  %v1084_v48 = vsel %vm281_vm1, %v1061_v43, 0 }
  0xec   : > { %5166 = vmatmul.msk.bf16.vlgmr.msra.gmra.mxu1 %vm277_vm2, %v5164_v49 }
  0xed   : > { %944 = vmatpush.bf16.msra.mxu1 %v904_v50 }
  0xee   : > { %v1049_v31 = vpop.permute.xlu0 %1048  ;;  %v1208_v39 = vpop.permute.xlu1 %1207 }
  0xef   : > { %1904 = vrot.lane.b32.xlu0 %v5561_v19, %s5472_s14  ;;  %2066 = vrot.lane.b32.xlu1 %v5542_v7, %s5473_s17  ;;  %v1060_v33 = vsel %vm1054_vm6, %v1049_v31, %v1051_v30  ;;  %v1059_v41 = vsel %vm1054_vm6, %v1047_v20, %v1049_v31  ;;  %v1222_v61 = vsel %vm1219_vm7, %v1208_v39, %v1210_v37  ;;  %vm3620_vm6 = vcmask 441344  }
  0xf0   : > { %v1081_v38 = vsel %vm281_vm1, %v1060_v33, 0  ;;  %v1078_v46 = vsel %vm281_vm1, %v1059_v41, 0 }
  0xf4   : > { %5165 = vmatmul.msk.bf16.vlgmr.msra.gmra.mxu0 %vm277_vm2, %v5164_v49  ;;  %5167 = vmatmul.msk.bf16.vlgmr.msra.gmra.mxu2 %vm277_vm2, %v5164_v49 }
  0xf5   : > { %5168 = vmatmul.msk.bf16.vlgmr.msra.gmra.mxu3 %vm277_vm2, %v5164_v49  ;;  %957 = vmatpush.bf16.msra.mxu2 %v907_v56  ;;  %v5182_v56 = vld [vmem:[%s7471_s1 + $0x14] sm:$0xf] }
  0xf6   : > { %970 = vmatpush.bf16.msra.mxu3 %v910_v57  ;;  %931 = vmatpush.bf16.msra.mxu0 %v901_v58  ;;  %v1204_v50 = vpop.permute.xlu1 %1203  ;;  %v1212_v59 = vpop.permute.xlu0 %1211 }
  0xf7   : > { %2070 = vrot.lane.b32.xlu0 %v5540_v6, %s5473_s17  ;;  %2062 = vrot.lane.b32.xlu1 %v5552_v14, %s5473_s17 }
  0xfc   : > { %5170 = vmatmul.msk.bf16.vlgmr.msrb.gmra.mxu1 %vm277_vm2, %v5164_v49 }
  0xfd   : > { %996 = vmatpush.bf16.msrb.mxu1 %v916_v63  ;;  %v1223_v63 = vsel %vm1219_vm7, %v1210_v37, %v1212_v59 }
  0xfe   : > { %v1218_v1 = vpop.permute.xlu1 %1217  ;;  %v1240_v9 = vsel %vm281_vm1, %v1223_v63, 0 }
  0xff   : > { %2074 = vrot.lane.b32.xlu0 %v5554_v15, %s5473_s17  ;;  %2076 = vrot.lane.b32.xlu1 %v5559_v18, %s5473_s17  ;;  %v1216_v11 = vpop.permute.xlu0 %1215 }
 0x104   : > { %5169 = vmatmul.msk.bf16.vlgmr.msrb.gmra.mxu0 %vm277_vm2, %v5164_v49  ;;  %5171 = vmatmul.msk.bf16.vlgmr.msrb.gmra.mxu2 %vm277_vm2, %v5164_v49 }
 0x105   : > { %5172 = vmatmul.msk.bf16.vlgmr.msrb.gmra.mxu3 %vm277_vm2, %v5164_v49  ;;  %983 = vmatpush.bf16.msrb.mxu0 %v913_v3  ;;  %v1206_v49 = vpop.permute.xlu2 %1205 }
 0x106   : > { %1022 = vmatpush.bf16.msrb.mxu3 %v922_v4  ;;  %1009 = vmatpush.bf16.msrb.mxu2 %v919_v5  ;;  %v1221_v52 = vsel %vm1219_vm7, %v1206_v49, %v1208_v39  ;;  %v1220_v0 = vsel %vm1219_vm7, %v1204_v50, %v1206_v49  ;;  %v1237_v5 = vsel %vm281_vm1, %v1222_v61, 0 }
 0x107   : > { %2072 = vrot.lane.b32.xlu0 %v5561_v19, %s5473_s17  ;;  %2234 = vrot.lane.b32.xlu1 %v5542_v7, %s5474_s20  ;;  %v1234_v58 = vsel %vm281_vm1, %v1221_v52, 0  ;;  %v1231_v10 = vsel %vm281_vm1, %v1220_v0, 0  ;;  %v5191_v52 = vld [vmem:[%s7471_s1 + $0x18] sm:$0xf] }
 0x108   : > { %v1373_v31 = vpop.permute.xlu0 %1372 }
 0x109   : > { %v5800_v12 = vpop.f32.mrf.mxu1 }
 0x10c   : > { %5175 = vmatmul.msk.bf16.vlgmr.msra.gmra.mxu1 %vm277_vm2, %v5173_v16 }
 0x10d   : > { %1109 = vmatpush.bf16.msra.mxu1 %v1069_v17 }
 0x10f   : > { %2238 = vrot.lane.b32.xlu0 %v5540_v6, %s5474_s20  ;;  %2230 = vrot.lane.b32.xlu1 %v5552_v14, %s5474_s20 }
 0x111   : > { %v5814_v25 = vpop.f32.mrf.mxu0  ;;  %v330_v26 = vpop.f32.mrf.mxu1 }
 0x112   : > { %v1369_v43 = vpop.permute.xlu0 %1368 }
 0x114   : > { %5174 = vmatmul.msk.bf16.vlgmr.msra.gmra.mxu0 %vm277_vm2, %v5173_v16  ;;  %5176 = vmatmul.msk.bf16.vlgmr.msra.gmra.mxu2 %vm277_vm2, %v5173_v16 }
 0x115   : > { %5177 = vmatmul.msk.bf16.vlgmr.msra.gmra.mxu3 %vm277_vm2, %v5173_v16  ;;  %1122 = vmatpush.bf16.msra.mxu2 %v1072_v27 }
 0x116   : > { %1135 = vmatpush.bf16.msra.mxu3 %v1075_v28  ;;  %1096 = vmatpush.bf16.msra.mxu0 %v1066_v29  ;;  %v1375_v29 = vpop.permute.xlu1 %1374 }
 0x117   : > { %v5822_v32 = vpop.f32.mrf.mxu2  ;;  %2242 = vrot.lane.b32.xlu0 %v5554_v15, %s5474_s20  ;;  %2244 = vrot.lane.b32.xlu1 %v5559_v18, %s5474_s20 }
 0x118   : > { %v5829_v34 = vpop.f32.mrf.mxu3 }
 0x119   : > { %v317_v35 = vpop.f32.mrf.mxu0  ;;  %v5831_v36 = vpop.f32.mrf.mxu1 }
 0x11a   : > { %v1226_v35 = vsel %vm1219_vm7, %v1216_v11, %v1218_v1 }
 0x11b   : > { %v1249_v41 = vsel %vm281_vm1, %v1226_v35, 0 }
 0x11c   : > { %5179 = vmatmul.msk.bf16.vlgmr.msrb.gmra.mxu1 %vm277_vm2, %v5173_v16 }
 0x11d   : > { %1161 = vmatpush.bf16.msrb.mxu1 %v1081_v38 }
 0x11f   : > { %v343_v40 = vpop.f32.mrf.mxu2  ;;  %2240 = vrot.lane.b32.xlu0 %v5561_v19, %s5474_s20  ;;  %2402 = vrot.lane.b32.xlu1 %v5542_v7, %s5475_s24 }
 0x120   : > { %v356_v42 = vpop.f32.mrf.mxu3  ;;  %v1252_v40 = vsel %vm281_vm1, %v1218_v1, 0 }
 0x121   : > { %v5839_v44 = vpop.f32.mrf.mxu0  ;;  %v382_v45 = vpop.f32.mrf.mxu1 }
 0x122   : > { %v1371_v42 = vpop.permute.xlu1 %1370 }
 0x123   : > { %v1386_v45 = vsel %vm1384_vm8, %v1371_v42, %v1373_v31 }
 0x124   : > { %5178 = vmatmul.msk.bf16.vlgmr.msrb.gmra.mxu0 %vm277_vm2, %v5173_v16  ;;  %5180 = vmatmul.msk.bf16.vlgmr.msrb.gmra.mxu2 %vm277_vm2, %v5173_v16 }
 0x125   : > { %5181 = vmatmul.msk.bf16.vlgmr.msrb.gmra.mxu3 %vm277_vm2, %v5173_v16  ;;  %1148 = vmatpush.bf16.msrb.mxu0 %v1078_v46  ;;  %v1214_v16 = vpop.permute.xlu2 %1213 }
 0x126   : > { %1187 = vmatpush.bf16.msrb.mxu3 %v1087_v47  ;;  %1174 = vmatpush.bf16.msrb.mxu2 %v1084_v48  ;;  %v1225_v21 = vsel %vm1219_vm7, %v1214_v16, %v1216_v11  ;;  %v1224_v33 = vsel %vm1219_vm7, %v1212_v59, %v1214_v16  ;;  %v1385_v59 = vsel %vm1384_vm8, %v1369_v43, %v1371_v42  ;;  %vm3788_vm7 = vcmask 375808  }
 0x127   : > { %v5847_v51 = vpop.f32.mrf.mxu2  ;;  %2406 = vrot.lane.b32.xlu0 %v5540_v6, %s5475_s24  ;;  %2398 = vrot.lane.b32.xlu1 %v5552_v14, %s5475_s24  ;;  %v1246_v30 = vsel %vm281_vm1, %v1225_v21, 0  ;;  %v1243_v39 = vsel %vm281_vm1, %v1224_v33, 0 }
 0x128   : > { %v5854_v53 = vpop.f32.mrf.mxu3 }
 0x129   : > { %v369_v54 = vpop.f32.mrf.mxu0  ;;  %v459_v55 = vpop.f32.mrf.mxu1 }
 0x12a   : > { %v5860_v57 = vadd.f32 %v459_v55, %v5800_v12  ;;  %v1700_v12 = vld [vmem:[%s5535_s23 + $0x20] sm:$0xf]  ;;  %v1399_v55 = vsel %vm281_vm1, %v1386_v45, 0 }
 0x12b   : > { %v1716_v17 = vunpack.c.l.b16 %v1700_v12 }
 0x12c   : > { %5184 = vmatmul.msk.bf16.vlgmr.msra.gmra.mxu1 %vm277_vm2, %v5182_v56 }
 0x12d   : > { %1274 = vmatpush.bf16.msra.mxu1 %v1234_v58  ;;  %v5889_v24 = vpack.c.b16 %v1716_v17, %v1716_v17 }
 0x12f   : > { %v395_v60 = vpop.f32.mrf.mxu2  ;;  %2410 = vrot.lane.b32.xlu0 %v5554_v15, %s5475_s24  ;;  %2412 = vrot.lane.b32.xlu1 %v5559_v18, %s5475_s24 }
 0x130   : > { %v408_v62 = vpop.f32.mrf.mxu3  ;;  %1742 = vrot.lane.b32.xlu2 %v5889_v24, %s5471_s11  ;;  %v1383_v60 = vpop.permute.xlu0 %1382  ;;  %s5479_s11 = smov 6  }
 0x131   : > { %v446_v2 = vpop.f32.mrf.mxu0  ;;  %v461_v3 = vpop.f32.mrf.mxu1  ;;  %v1417_v33 = vsel %vm281_vm1, %v1383_v60, 0 }
 0x132   : > { %v5872_v4 = vadd.f32 %v446_v2, %v5814_v25  ;;  %v1396_v2 = vsel %vm281_vm1, %v1385_v59, 0 }
 0x134   : > { %5183 = vmatmul.msk.bf16.vlgmr.msra.gmra.mxu0 %vm277_vm2, %v5182_v56  ;;  %5185 = vmatmul.msk.bf16.vlgmr.msra.gmra.mxu2 %vm277_vm2, %v5182_v56 }
 0x135   : > { %5186 = vmatmul.msk.bf16.vlgmr.msra.gmra.mxu3 %vm277_vm2, %v5182_v56  ;;  %1287 = vmatpush.bf16.msra.mxu2 %v1237_v5 }
 0x136   : > { %1300 = vmatpush.bf16.msra.mxu3 %v1240_v9  ;;  %1261 = vmatpush.bf16.msra.mxu0 %v1231_v10 }
 0x137   : > { %v472_v20 = vpop.f32.mrf.mxu2  ;;  %2408 = vrot.lane.b32.xlu0 %v5561_v19, %s5475_s24  ;;  %2570 = vrot.lane.b32.xlu1 %v5542_v7, %s5476_s27 }
 0x138   : > { %v5887_v22 = vadd.f32 %v472_v20, %v5822_v32  ;;  %v485_v23 = vpop.f32.mrf.mxu3  ;;  %1900 = vrot.lane.b32.xlu2 %v5550_v13, %s5472_s14  ;;  %v1540_v21 = vpop.permute.xlu0 %1539 }
 0x139   : > { %v5892_v25 = vadd.f32 %v485_v23, %v5829_v34  ;;  %v448_v26 = vpop.f32.mrf.mxu0  ;;  %v511_v27 = vpop.f32.mrf.mxu1 }
 0x13a   : > { %v5895_v28 = vadd.f32 %v511_v27, %v5831_v36 }
 0x13c   : > { %5188 = vmatmul.msk.bf16.vlgmr.msrb.gmra.mxu1 %vm277_vm2, %v5182_v56 }
 0x13d   : > { %1326 = vmatpush.bf16.msrb.mxu1 %v1246_v30 }
 0x13f   : > { %v474_v32 = vpop.f32.mrf.mxu2  ;;  %2574 = vrot.lane.b32.xlu0 %v5540_v6, %s5476_s27  ;;  %2566 = vrot.lane.b32.xlu1 %v5552_v14, %s5476_s27 }
 0x140   : > { %v487_v34 = vpop.f32.mrf.mxu3  ;;  %1896 = vrot.lane.b32.xlu2 %v5544_v8, %s5472_s14  ;;  %v1536_v35 = vpop.permute.xlu0 %1535 }
 0x141   : > { %v498_v37 = vpop.f32.mrf.mxu0  ;;  %v513_v38 = vpop.f32.mrf.mxu1 }
 0x142   : > { %v5904_v36 = vadd.f32 %v498_v37, %v5839_v44 }
 0x144   : > { %5187 = vmatmul.msk.bf16.vlgmr.msrb.gmra.mxu0 %vm277_vm2, %v5182_v56  ;;  %5189 = vmatmul.msk.bf16.vlgmr.msrb.gmra.mxu2 %vm277_vm2, %v5182_v56 }
 0x145   : > { %5190 = vmatmul.msk.bf16.vlgmr.msrb.gmra.mxu3 %vm277_vm2, %v5182_v56  ;;  %1313 = vmatpush.bf16.msrb.mxu0 %v1243_v39  ;;  %v1387_v56 = vsel %vm1384_vm8, %v1373_v31, %v1375_v29 }
 0x146   : > { %1352 = vmatpush.bf16.msrb.mxu3 %v1252_v40  ;;  %1339 = vmatpush.bf16.msrb.mxu2 %v1249_v41  ;;  %v1402_v0 = vsel %vm281_vm1, %v1387_v56, 0 }
 0x147   : > { %v524_v44 = vpop.f32.mrf.mxu2  ;;  %2578 = vrot.lane.b32.xlu0 %v5554_v15, %s5476_s27  ;;  %2580 = vrot.lane.b32.xlu1 %v5559_v18, %s5476_s27 }
 0x148   : > { %v5920_v46 = vadd.f32 %v524_v44, %v5847_v51  ;;  %v537_v47 = vpop.f32.mrf.mxu3  ;;  %v1377_v51 = vpop.permute.xlu2 %1376  ;;  %1910 = vrot.lane.b32.xlu2 %v5889_v24, %s5472_s14  ;;  %v5200_v44 = vld [vmem:[%s7471_s1 + $0x1c] sm:$0xf] }
 0x149   : > { %v5923_v48 = vadd.f32 %v537_v47, %v5854_v53  ;;  %v500_v49 = vpop.f32.mrf.mxu0  ;;  %v616_v50 = vpop.f32.mrf.mxu1  ;;  %v1388_v58 = vsel %vm1384_vm8, %v1375_v29, %v1377_v51 }
 0x14a   : > { %v5929_v54 = vadd.f32 %v616_v50, %v5860_v57  ;;  %v1405_v1 = vsel %vm281_vm1, %v1388_v58, 0 }
 0x14c   : > { %5193 = vmatmul.msk.bf16.vlgmr.msra.gmra.mxu1 %vm277_vm2, %v5191_v52 }
 0x14d   : > { %1439 = vmatpush.bf16.msra.mxu1 %v1399_v55 }
 0x14f   : > { %v526_v53 = vpop.f32.mrf.mxu2  ;;  %2576 = vrot.lane.b32.xlu0 %v5561_v19, %s5476_s27  ;;  %2738 = vrot.lane.b32.xlu1 %v5542_v7, %s5477_s30 }
 0x150   : > { %v539_v57 = vpop.f32.mrf.mxu3  ;;  %v1381_v3 = vpop.permute.xlu2 %1380  ;;  %2068 = vrot.lane.b32.xlu2 %v5550_v13, %s5473_s17 }
 0x151   : > { %v603_v61 = vpop.f32.mrf.mxu0  ;;  %v618_v62 = vpop.f32.mrf.mxu1  ;;  %v1391_v29 = vsel %vm1384_vm8, %v1381_v3, %v1383_v60 }
 0x152   : > { %v5943_v63 = vadd.f32 %v603_v61, %v5872_v4  ;;  %v1379_v4 = vpop.permute.xlu1 %1378  ;;  %v1414_v34 = vsel %vm281_vm1, %v1391_v29, 0  ;;  %v1544_v61 = vpop.permute.xlu0 %1543 }
 0x153   : > { %v1390_v9 = vsel %vm1384_vm8, %v1379_v4, %v1381_v3  ;;  %v1389_v27 = vsel %vm1384_vm8, %v1377_v51, %v1379_v4  ;;  %vm3956_vm8 = vcmask 367616  }
 0x154   : > { %5192 = vmatmul.msk.bf16.vlgmr.msra.gmra.mxu0 %vm277_vm2, %v5191_v52  ;;  %5194 = vmatmul.msk.bf16.vlgmr.msra.gmra.mxu2 %vm277_vm2, %v5191_v52  ;;  %v1411_v23 = vsel %vm281_vm1, %v1390_v9, 0  ;;  %v1408_v32 = vsel %vm281_vm1, %v1389_v27, 0 }
 0x155   : > { %5195 = vmatmul.msk.bf16.vlgmr.msra.gmra.mxu3 %vm277_vm2, %v5191_v52  ;;  %1452 = vmatpush.bf16.msra.mxu2 %v1402_v0 }
 0x156   : > { %1465 = vmatpush.bf16.msra.mxu3 %v1405_v1  ;;  %1426 = vmatpush.bf16.msra.mxu0 %v1396_v2 }
 0x157   : > { %v629_v5 = vpop.f32.mrf.mxu2  ;;  %2742 = vrot.lane.b32.xlu0 %v5540_v6, %s5477_s30  ;;  %2734 = vrot.lane.b32.xlu1 %v5552_v14, %s5477_s30 }
 0x158   : > { %v5959_v10 = vadd.f32 %v629_v5, %v5887_v22  ;;  %v642_v11 = vpop.f32.mrf.mxu3  ;;  %v1538_v22 = vpop.permute.xlu2 %1537  ;;  %2064 = vrot.lane.b32.xlu2 %v5544_v8, %s5473_s17 }
 0x159   : > { %v5962_v12 = vadd.f32 %v642_v11, %v5892_v25  ;;  %v605_v16 = vpop.f32.mrf.mxu0  ;;  %v668_v17 = vpop.f32.mrf.mxu1  ;;  %v1552_v49 = vsel %vm1549_vm9, %v1538_v22, %v1540_v21 }
 0x15a   : > { %v5965_v20 = vadd.f32 %v668_v17, %v5895_v28  ;;  %v1567_v57 = vsel %vm281_vm1, %v1552_v49, 0 }
 0x15c   : > { %5197 = vmatmul.msk.bf16.vlgmr.msrb.gmra.mxu1 %vm277_vm2, %v5191_v52 }
 0x15d   : > { %1491 = vmatpush.bf16.msrb.mxu1 %v1411_v23 }
 0x15f   : > { %v631_v26 = vpop.f32.mrf.mxu2  ;;  %2746 = vrot.lane.b32.xlu0 %v5554_v15, %s5477_s30  ;;  %2748 = vrot.lane.b32.xlu1 %v5559_v18, %s5477_s30 }
 0x160   : > { %v644_v25 = vpop.f32.mrf.mxu3  ;;  %v1534_v37 = vpop.permute.xlu2 %1533  ;;  %2078 = vrot.lane.b32.xlu2 %v5889_v24, %s5473_s17 }
 0x161   : > { %v655_v30 = vpop.f32.mrf.mxu0  ;;  %v670_v31 = vpop.f32.mrf.mxu1 }
 0x162   : > { %v5974_v28 = vadd.f32 %v655_v30, %v5904_v36  ;;  %v1551_v36 = vsel %vm1549_vm9, %v1536_v35, %v1538_v22  ;;  %v6047_v26 = vpop.permute.xlu0 %1734 }
 0x163   : > { %v1564_v47 = vsel %vm281_vm1, %v1551_v36, 0 }
 0x164   : > { %5196 = vmatmul.msk.bf16.vlgmr.msrb.gmra.mxu0 %vm277_vm2, %v5191_v52  ;;  %5198 = vmatmul.msk.bf16.vlgmr.msrb.gmra.mxu2 %vm277_vm2, %v5191_v52 }
 0x165   : > { %5199 = vmatmul.msk.bf16.vlgmr.msrb.gmra.mxu3 %vm277_vm2, %v5191_v52  ;;  %1478 = vmatpush.bf16.msrb.mxu0 %v1408_v32 }
 0x166   : > { %1517 = vmatpush.bf16.msrb.mxu3 %v1417_v33  ;;  %1504 = vmatpush.bf16.msrb.mxu2 %v1414_v34 }
 0x167   : > { %v681_v38 = vpop.f32.mrf.mxu2  ;;  %2744 = vrot.lane.b32.xlu0 %v5561_v19, %s5477_s30  ;;  %2906 = vrot.lane.b32.xlu1 %v5542_v7, %s5478_s8 }
 0x168   : > { %v5990_v39 = vadd.f32 %v681_v38, %v5920_v46  ;;  %v694_v40 = vpop.f32.mrf.mxu3  ;;  %v1542_v46 = vpop.permute.xlu1 %1541  ;;  %2236 = vrot.lane.b32.xlu2 %v5550_v13, %s5474_s20  ;;  %v6070_v38 = vld [vmem:[%s7471_s1 + $0x20] sm:$0xf] }
 0x169   : > { %v5993_v41 = vadd.f32 %v694_v40, %v5923_v48  ;;  %v657_v42 = vpop.f32.mrf.mxu0  ;;  %v781_v43 = vpop.f32.mrf.mxu1  ;;  %v1553_v52 = vsel %vm1549_vm9, %v1540_v21, %v1542_v46  ;;  %v1554_v16 = vsel %vm1549_vm9, %v1542_v46, %v1544_v61 }
 0x16a   : > { %v5999_v45 = vadd.f32 %v781_v43, %v5929_v54  ;;  %v1550_v54 = vsel %vm1549_vm9, %v1534_v37, %v1536_v35  ;;  %v1548_v55 = vpop.permute.xlu2 %1547  ;;  %v1570_v58 = vsel %vm281_vm1, %v1553_v52, 0  ;;  %v1573_v22 = vsel %vm281_vm1, %v1554_v16, 0 }
 0x16b   : > { %v1561_v59 = vsel %vm281_vm1, %v1550_v54, 0  ;;  %v1582_v27 = vsel %vm281_vm1, %v1548_v55, 0 }
 0x16c   : > { %5202 = vmatmul.msk.bf16.vlgmr.msra.gmra.mxu1 %vm277_vm2, %v5200_v44 }
 0x16d   : > { %1604 = vmatpush.bf16.msra.mxu1 %v1564_v47 }
 0x16f   : > { %v683_v48 = vpop.f32.mrf.mxu2  ;;  %2910 = vrot.lane.b32.xlu0 %v5540_v6, %s5478_s8  ;;  %2902 = vrot.lane.b32.xlu1 %v5552_v14, %s5478_s8 }
 0x170   : > { %v696_v50 = vpop.f32.mrf.mxu3  ;;  %v1546_v60 = vpop.permute.xlu1 %1545  ;;  %2232 = vrot.lane.b32.xlu2 %v5544_v8, %s5474_s20 }
 0x171   : > { %v768_v51 = vpop.f32.mrf.mxu0  ;;  %v783_v53 = vpop.f32.mrf.mxu1 }
 0x172   : > { %v6013_v56 = vadd.f32 %v768_v51, %v5943_v63  ;;  %v1555_v63 = vsel %vm1549_vm9, %v1544_v61, %v1546_v60  ;;  %v1733_v9 = vpop.permute.xlu2 %1732 }
 0x173   : > { %v1576_v11 = vsel %vm281_vm1, %v1555_v63, 0 }
 0x174   : > { %5201 = vmatmul.msk.bf16.vlgmr.msra.gmra.mxu0 %vm277_vm2, %v5200_v44  ;;  %5203 = vmatmul.msk.bf16.vlgmr.msra.gmra.mxu2 %vm277_vm2, %v5200_v44 }
 0x175   : > { %5204 = vmatmul.msk.bf16.vlgmr.msra.gmra.mxu3 %vm277_vm2, %v5200_v44  ;;  %1617 = vmatpush.bf16.msra.mxu2 %v1567_v57 }
 0x176   : > { %1630 = vmatpush.bf16.msra.mxu3 %v1570_v58  ;;  %1591 = vmatpush.bf16.msra.mxu0 %v1561_v59 }
 0x177   : > { %v794_v62 = vpop.f32.mrf.mxu2  ;;  %2914 = vrot.lane.b32.xlu0 %v5554_v15, %s5478_s8  ;;  %2916 = vrot.lane.b32.xlu1 %v5559_v18, %s5478_s8 }
 0x178   : > { %v6029_v0 = vadd.f32 %v794_v62, %v5959_v10  ;;  %v807_v1 = vpop.f32.mrf.mxu3  ;;  %2246 = vrot.lane.b32.xlu2 %v5889_v24, %s5474_s20  ;;  %v1731_v29 = vpop.permute.xlu1 %1730 }
 0x179   : > { %v6032_v2 = vadd.f32 %v807_v1, %v5962_v12  ;;  %v770_v3 = vpop.f32.mrf.mxu0  ;;  %v833_v4 = vpop.f32.mrf.mxu1  ;;  %v1556_v12 = vsel %vm1549_vm9, %v1546_v60, %v1548_v55  ;;  %v1747_v43 = vsel %vm1744_vm10, %v1731_v29, %v1733_v9  ;;  %vm4124_vm9 = vcmask 359424  }
 0x17a   : > { %v6035_v5 = vadd.f32 %v833_v4, %v5965_v20  ;;  %v1579_v25 = vsel %vm281_vm1, %v1556_v12, 0  ;;  %v1729_v30 = vpop.permute.xlu2 %1728  ;;  %v1763_v50 = vsel %vm281_vm1, %v1747_v43, 0 }
 0x17c   : > { %5206 = vmatmul.msk.bf16.vlgmr.msrb.gmra.mxu1 %vm277_vm2, %v5200_v44 }
 0x17d   : > { %1656 = vmatpush.bf16.msrb.mxu1 %v1576_v11 }
 0x17f   : > { %v796_v10 = vpop.f32.mrf.mxu2  ;;  %2912 = vrot.lane.b32.xlu0 %v5561_v19, %s5478_s8  ;;  %3074 = vrot.lane.b32.xlu1 %v5542_v7, %s5479_s11 }
 0x180   : > { %v809_v17 = vpop.f32.mrf.mxu3  ;;  %2404 = vrot.lane.b32.xlu2 %v5550_v13, %s5475_s24 }
 0x181   : > { %v820_v21 = vpop.f32.mrf.mxu0  ;;  %v835_v23 = vpop.f32.mrf.mxu1 }
 0x182   : > { %v6044_v20 = vadd.f32 %v820_v21, %v5974_v28  ;;  %v1746_v28 = vsel %vm1744_vm10, %v1729_v30, %v1731_v29 }
 0x183   : > { %v1760_v40 = vsel %vm281_vm1, %v1746_v28, 0 }
 0x184   : > { %5205 = vmatmul.msk.bf16.vlgmr.msrb.gmra.mxu0 %vm277_vm2, %v5200_v44  ;;  %5207 = vmatmul.msk.bf16.vlgmr.msrb.gmra.mxu2 %vm277_vm2, %v5200_v44 }
 0x185   : > { %5208 = vmatmul.msk.bf16.vlgmr.msrb.gmra.mxu3 %vm277_vm2, %v5200_v44  ;;  %1643 = vmatpush.bf16.msrb.mxu0 %v1573_v22 }
 0x186   : > { %1682 = vmatpush.bf16.msrb.mxu3 %v1582_v27  ;;  %1669 = vmatpush.bf16.msrb.mxu2 %v1579_v25 }
 0x187   : > { %v846_v31 = vpop.f32.mrf.mxu2  ;;  %3078 = vrot.lane.b32.xlu0 %v5540_v6, %s5479_s11  ;;  %3070 = vrot.lane.b32.xlu1 %v5552_v14, %s5479_s11 }
 0x188   : > { %v6062_v32 = vadd.f32 %v846_v31, %v5990_v39  ;;  %v859_v33 = vpop.f32.mrf.mxu3  ;;  %v1739_v39 = vpop.permute.xlu0 %1738  ;;  %2400 = vrot.lane.b32.xlu2 %v5544_v8, %s5475_s24 }
 0x189   : > { %v6065_v34 = vadd.f32 %v859_v33, %v5993_v41  ;;  %v822_v35 = vpop.f32.mrf.mxu0  ;;  %v946_v37 = vpop.f32.mrf.mxu1  ;;  %v6155_v33 = vld [vmem:[%s7471_s1 + $0x24] sm:$0xf] }
 0x18a   : > { %v6073_v36 = vadd.f32 %v946_v37, %v5999_v45  ;;  %v1727_v41 = vpop.permute.xlu1 %1726  ;;  %v1748_v45 = vsel %vm1744_vm10, %v1733_v9, %v6047_v26  ;;  %v1743_v55 = vpop.permute.xlu2 %1742 }
 0x18b   : > { %v1745_v47 = vsel %vm1744_vm10, %v1727_v41, %v1729_v30  ;;  %v1766_v52 = vsel %vm281_vm1, %v1748_v45, 0 }
 0x18c   : > { %5211 = vmatmul.msk.bf16.vlgmr.msra.gmra.mxu1 %vm277_vm2, %v6070_v38  ;;  %v1757_v54 = vsel %vm281_vm1, %v1745_v47, 0 }
 0x18d   : > { %1800 = vmatpush.bf16.msra.mxu1 %v1760_v40 }
 0x18f   : > { %v848_v42 = vpop.f32.mrf.mxu2  ;;  %3082 = vrot.lane.b32.xlu0 %v5554_v15, %s5479_s11  ;;  %3084 = vrot.lane.b32.xlu1 %v5559_v18, %s5479_s11 }
 0x190   : > { %v861_v44 = vpop.f32.mrf.mxu3  ;;  %v1737_v51 = vpop.permute.xlu0 %1736  ;;  %2414 = vrot.lane.b32.xlu2 %v5889_v24, %s5475_s24 }
 0x191   : > { %v933_v46 = vpop.f32.mrf.mxu0  ;;  %v948_v48 = vpop.f32.mrf.mxu1 }
 0x192   : > { %v6089_v49 = vadd.f32 %v933_v46, %v6013_v56  ;;  %v1750_v56 = vsel %vm1744_vm10, %v1737_v51, %v1739_v39  ;;  %v1741_v1 = vpop.permute.xlu1 %1740 }
 0x193   : > { %v1772_v63 = vsel %vm281_vm1, %v1750_v56, 0  ;;  %v1751_v9 = vsel %vm1744_vm10, %v1739_v39, %v1741_v1 }
 0x194   : > { %5210 = vmatmul.msk.bf16.vlgmr.msra.gmra.mxu0 %vm277_vm2, %v6070_v38  ;;  %5212 = vmatmul.msk.bf16.vlgmr.msra.gmra.mxu2 %vm277_vm2, %v6070_v38  ;;  %v1775_v21 = vsel %vm281_vm1, %v1751_v9, 0 }
 0x195   : > { %5213 = vmatmul.msk.bf16.vlgmr.msra.gmra.mxu3 %vm277_vm2, %v6070_v38  ;;  %1813 = vmatpush.bf16.msra.mxu2 %v1763_v50 }
 0x196   : > { %1826 = vmatpush.bf16.msra.mxu3 %v1766_v52  ;;  %1787 = vmatpush.bf16.msra.mxu0 %v1757_v54 }
 0x197   : > { %v959_v53 = vpop.f32.mrf.mxu2  ;;  %3080 = vrot.lane.b32.xlu0 %v5561_v19, %s5479_s11 }
 0x198   : > { %v6108_v57 = vadd.f32 %v959_v53, %v6029_v0  ;;  %v972_v58 = vpop.f32.mrf.mxu3  ;;  %v1901_v0 = vpop.permute.xlu2 %1900  ;;  %2572 = vrot.lane.b32.xlu2 %v5550_v13, %s5476_s27 }
 0x199   : > { %v6111_v59 = vadd.f32 %v972_v58, %v6032_v2  ;;  %v935_v60 = vpop.f32.mrf.mxu0  ;;  %v998_v61 = vpop.f32.mrf.mxu1  ;;  %v1749_v2 = vsel %vm1744_vm10, %v6047_v26, %v1737_v51 }
 0x19a   : > { %v6114_v62 = vadd.f32 %v998_v61, %v6035_v5  ;;  %v1752_v5 = vsel %vm1744_vm10, %v1741_v1, %v1743_v55  ;;  %v1769_v17 = vsel %vm281_vm1, %v1749_v2, 0  ;;  %v6129_v12 = vpop.permute.xlu0 %1902  ;;  %v1899_v22 = vpop.permute.xlu1 %1898  ;;  %vm4292_vm10 = vcmask 293888  }
 0x19b   : > { %v1778_v23 = vsel %vm281_vm1, %v1752_v5, 0  ;;  %v1915_v37 = vsel %vm1912_vm11, %v1899_v22, %v1901_v0 }
 0x19c   : > { %5215 = vmatmul.msk.bf16.vlgmr.msrb.gmra.mxu1 %vm277_vm2, %v6070_v38  ;;  %v1931_v44 = vsel %vm281_vm1, %v1915_v37, 0 }
 0x19d   : > { %1852 = vmatpush.bf16.msrb.mxu1 %v1772_v63 }
 0x19f   : > { %v961_v3 = vpop.f32.mrf.mxu2 }
 0x1a0   : > { %v974_v4 = vpop.f32.mrf.mxu3  ;;  %2568 = vrot.lane.b32.xlu2 %v5544_v8, %s5476_s27 }
 0x1a1   : > { %v985_v11 = vpop.f32.mrf.mxu0  ;;  %v1000_v10 = vpop.f32.mrf.mxu1 }
 0x1a2   : > { %v6126_v16 = vadd.f32 %v985_v11, %v6044_v20  ;;  %v1897_v20 = vpop.permute.xlu2 %1896  ;;  %v1907_v7 = vpop.permute.xlu0 %1906 }
 0x1a3   : > { %v1914_v27 = vsel %vm1912_vm11, %v1897_v20, %v1899_v22 }
 0x1a4   : > { %5214 = vmatmul.msk.bf16.vlgmr.msrb.gmra.mxu0 %vm277_vm2, %v6070_v38  ;;  %5216 = vmatmul.msk.bf16.vlgmr.msrb.gmra.mxu2 %vm277_vm2, %v6070_v38  ;;  %v1928_v6 = vsel %vm281_vm1, %v1914_v27, 0 }
 0x1a5   : > { %5217 = vmatmul.msk.bf16.vlgmr.msrb.gmra.mxu3 %vm277_vm2, %v6070_v38  ;;  %1839 = vmatpush.bf16.msrb.mxu0 %v1769_v17 }
 0x1a6   : > { %1865 = vmatpush.bf16.msrb.mxu2 %v1775_v21  ;;  %1878 = vmatpush.bf16.msrb.mxu3 %v1778_v23  ;;  %v5227_v21 = vld [vmem:[%s7471_s1 + $0x28] sm:$0xf] }
 0x1a7   : > { %v1011_v26 = vpop.f32.mrf.mxu2 }
 0x1a8   : > { %v6147_v25 = vadd.f32 %v1011_v26, %v6062_v32  ;;  %v1024_v29 = vpop.f32.mrf.mxu3  ;;  %v1895_v32 = vpop.permute.xlu1 %1894  ;;  %2582 = vrot.lane.b32.xlu2 %v5889_v24, %s5476_s27 }
 0x1a9   : > { %v6150_v30 = vadd.f32 %v1024_v29, %v6065_v34  ;;  %v987_v31 = vpop.f32.mrf.mxu0  ;;  %v1111_v28 = vpop.f32.mrf.mxu1  ;;  %v1913_v40 = vsel %vm1912_vm11, %v1895_v32, %v1897_v20 }
 0x1aa   : > { %v6158_v35 = vadd.f32 %v1111_v28, %v6073_v36  ;;  %v1916_v36 = vsel %vm1912_vm11, %v1901_v0, %v6129_v12  ;;  %v1911_v39 = vpop.permute.xlu2 %1910  ;;  %v1925_v14 = vsel %vm281_vm1, %v1913_v40, 0  ;;  %v1905_v45 = vpop.permute.xlu0 %1904 }
 0x1ab   : > { %v1934_v15 = vsel %vm281_vm1, %v1916_v36, 0  ;;  %v1918_v46 = vsel %vm1912_vm11, %v1905_v45, %v1907_v7  ;;  %v1917_v56 = vsel %vm1912_vm11, %v6129_v12, %v1905_v45 }
 0x1ac   : > { %5220 = vmatmul.msk.bf16.vlgmr.msra.gmra.mxu1 %vm277_vm2, %v6155_v33  ;;  %v1940_v51 = vsel %vm281_vm1, %v1918_v46, 0  ;;  %v1937_v63 = vsel %vm281_vm1, %v1917_v56, 0 }
 0x1ad   : > { %1968 = vmatpush.bf16.msra.mxu1 %v1928_v6 }
 0x1af   : > { %v1013_v34 = vpop.f32.mrf.mxu2 }
 0x1b0   : > { %v1026_v38 = vpop.f32.mrf.mxu3  ;;  %2740 = vrot.lane.b32.xlu2 %v5550_v13, %s5477_s30  ;;  %v1909_v19 = vpop.permute.xlu1 %1908 }
 0x1b1   : > { %v1098_v41 = vpop.f32.mrf.mxu0  ;;  %v1113_v42 = vpop.f32.mrf.mxu1  ;;  %v1919_v58 = vsel %vm1912_vm11, %v1907_v7, %v1909_v19 }
 0x1b2   : > { %v6174_v43 = vadd.f32 %v1098_v41, %v6089_v49  ;;  %v2069_v53 = vpop.permute.xlu2 %2068  ;;  %v6214_v1 = vpop.permute.xlu0 %2070  ;;  %v1943_v0 = vsel %vm281_vm1, %v1919_v58, 0 }
 0x1b4   : > { %5219 = vmatmul.msk.bf16.vlgmr.msra.gmra.mxu0 %vm277_vm2, %v6155_v33  ;;  %5221 = vmatmul.msk.bf16.vlgmr.msra.gmra.mxu2 %vm277_vm2, %v6155_v33 }
 0x1b5   : > { %5222 = vmatmul.msk.bf16.vlgmr.msra.gmra.mxu3 %vm277_vm2, %v6155_v33  ;;  %1981 = vmatpush.bf16.msra.mxu2 %v1931_v44 }
 0x1b6   : > { %1994 = vmatpush.bf16.msra.mxu3 %v1934_v15  ;;  %1955 = vmatpush.bf16.msra.mxu0 %v1925_v14 }
 0x1b7   : > { %v1124_v47 = vpop.f32.mrf.mxu2 }
 0x1b8   : > { %v6193_v48 = vadd.f32 %v1124_v47, %v6108_v57  ;;  %v1137_v49 = vpop.f32.mrf.mxu3  ;;  %2736 = vrot.lane.b32.xlu2 %v5544_v8, %s5477_s30  ;;  %v2067_v2 = vpop.permute.xlu1 %2066 }
 0x1b9   : > { %v6196_v50 = vadd.f32 %v1137_v49, %v6111_v59  ;;  %v1100_v52 = vpop.f32.mrf.mxu0  ;;  %v1163_v54 = vpop.f32.mrf.mxu1  ;;  %v1920_v59 = vsel %vm1912_vm11, %v1909_v19, %v1911_v39  ;;  %vm4460_vm11 = vcmask 285696  }
 0x1ba   : > { %v6199_v55 = vadd.f32 %v1163_v54, %v6114_v62  ;;  %v1946_v3 = vsel %vm281_vm1, %v1920_v59, 0  ;;  %v2065_v4 = vpop.permute.xlu2 %2064  ;;  %v2075_v20 = vpop.permute.xlu0 %2074 }
 0x1bb   : > { %v2082_v5 = vsel %vm2080_vm12, %v2065_v4, %v2067_v2 }
 0x1bc   : > { %5224 = vmatmul.msk.bf16.vlgmr.msrb.gmra.mxu1 %vm277_vm2, %v6155_v33  ;;  %v2096_v22 = vsel %vm281_vm1, %v2082_v5, 0 }
 0x1bd   : > { %2020 = vmatpush.bf16.msrb.mxu1 %v1940_v51 }
 0x1bf   : > { %v1126_v18 = vpop.f32.mrf.mxu2 }
 0x1c0   : > { %v1139_v57 = vpop.f32.mrf.mxu3  ;;  %2750 = vrot.lane.b32.xlu2 %v5889_v24, %s5477_s30  ;;  %v2063_v26 = vpop.permute.xlu1 %2062 }
 0x1c1   : > { %v1150_v60 = vpop.f32.mrf.mxu0  ;;  %v1165_v61 = vpop.f32.mrf.mxu1  ;;  %v2081_v31 = vsel %vm2080_vm12, %v2063_v26, %v2065_v4 }
 0x1c2   : > { %v6211_v62 = vadd.f32 %v1150_v60, %v6126_v16  ;;  %v2079_v28 = vpop.permute.xlu2 %2078  ;;  %v2093_v34 = vsel %vm281_vm1, %v2081_v31, 0  ;;  %v2073_v37 = vpop.permute.xlu0 %2072 }
 0x1c3   : > { %v2086_v36 = vsel %vm2080_vm12, %v2073_v37, %v2075_v20  ;;  %v2085_v46 = vsel %vm2080_vm12, %v6214_v1, %v2073_v37 }
 0x1c4   : > { %5223 = vmatmul.msk.bf16.vlgmr.msrb.gmra.mxu0 %vm277_vm2, %v6155_v33  ;;  %5225 = vmatmul.msk.bf16.vlgmr.msrb.gmra.mxu2 %vm277_vm2, %v6155_v33  ;;  %v2108_v15 = vsel %vm281_vm1, %v2086_v36, 0  ;;  %v2105_v51 = vsel %vm281_vm1, %v2085_v46, 0 }
 0x1c5   : > { %5226 = vmatmul.msk.bf16.vlgmr.msrb.gmra.mxu3 %vm277_vm2, %v6155_v33  ;;  %2007 = vmatpush.bf16.msrb.mxu0 %v1937_v63 }
 0x1c6   : > { %2033 = vmatpush.bf16.msrb.mxu2 %v1943_v0  ;;  %2046 = vmatpush.bf16.msrb.mxu3 %v1946_v3  ;;  %v5236_v0 = vld [vmem:[%s7471_s1 + $0x2c] sm:$0xf] }
 0x1c7   : > { %v1176_v9 = vpop.f32.mrf.mxu2 }
 0x1c8   : > { %v6228_v11 = vadd.f32 %v1176_v9, %v6147_v25  ;;  %v1189_v10 = vpop.f32.mrf.mxu3  ;;  %v2083_v25 = vsel %vm2080_vm12, %v2067_v2, %v2069_v53  ;;  %2908 = vrot.lane.b32.xlu2 %v5550_v13, %s5478_s8  ;;  %v2077_v45 = vpop.permute.xlu1 %2076 }
 0x1c9   : > { %v6231_v16 = vadd.f32 %v1189_v10, %v6150_v30  ;;  %v1152_v17 = vpop.f32.mrf.mxu0  ;;  %v1276_v12 = vpop.f32.mrf.mxu1  ;;  %v2084_v30 = vsel %vm2080_vm12, %v2069_v53, %v6214_v1  ;;  %v2099_v7 = vsel %vm281_vm1, %v2083_v25, 0  ;;  %v2087_v49 = vsel %vm2080_vm12, %v2075_v20, %v2077_v45 }
 0x1ca   : > { %v6237_v23 = vadd.f32 %v1276_v12, %v6158_v35  ;;  %v2102_v32 = vsel %vm281_vm1, %v2084_v30, 0  ;;  %v2237_v14 = vpop.permute.xlu2 %2236  ;;  %v6280_v53 = vpop.permute.xlu0 %2238  ;;  %v2111_v19 = vsel %vm281_vm1, %v2087_v49, 0 }
 0x1cc   : > { %5229 = vmatmul.msk.bf16.vlgmr.msra.gmra.mxu1 %vm277_vm2, %v5227_v21 }
 0x1cd   : > { %2136 = vmatpush.bf16.msra.mxu1 %v2096_v22 }
 0x1cf   : > { %v1178_v27 = vpop.f32.mrf.mxu2 }
 0x1d0   : > { %v1191_v29 = vpop.f32.mrf.mxu3  ;;  %2904 = vrot.lane.b32.xlu2 %v5544_v8, %s5478_s8  ;;  %v2235_v56 = vpop.permute.xlu1 %2234 }
 0x1d1   : > { %v1263_v33 = vpop.f32.mrf.mxu0  ;;  %v1278_v35 = vpop.f32.mrf.mxu1 }
 0x1d2   : > { %v6248_v6 = vadd.f32 %v1263_v33, %v6174_v43  ;;  %v2233_v57 = vpop.permute.xlu2 %2232  ;;  %v2243_v4 = vpop.permute.xlu0 %2242 }
 0x1d3   : > { %v2250_v59 = vsel %vm2248_vm13, %v2233_v57, %v2235_v56 }
 0x1d4   : > { %5228 = vmatmul.msk.bf16.vlgmr.msra.gmra.mxu0 %vm277_vm2, %v5227_v21  ;;  %5230 = vmatmul.msk.bf16.vlgmr.msra.gmra.mxu2 %vm277_vm2, %v5227_v21  ;;  %v2264_v2 = vsel %vm281_vm1, %v2250_v59, 0 }
 0x1d5   : > { %5231 = vmatmul.msk.bf16.vlgmr.msra.gmra.mxu3 %vm277_vm2, %v5227_v21  ;;  %2149 = vmatpush.bf16.msra.mxu2 %v2099_v7 }
 0x1d6   : > { %2162 = vmatpush.bf16.msra.mxu3 %v2102_v32  ;;  %2123 = vmatpush.bf16.msra.mxu0 %v2093_v34 }
 0x1d7   : > { %v1289_v38 = vpop.f32.mrf.mxu2 }
 0x1d8   : > { %v6260_v40 = vadd.f32 %v1289_v38, %v6193_v48  ;;  %v1302_v39 = vpop.f32.mrf.mxu3  ;;  %2918 = vrot.lane.b32.xlu2 %v5889_v24, %s5478_s8  ;;  %v2231_v9 = vpop.permute.xlu1 %2230 }
 0x1d9   : > { %v6263_v41 = vadd.f32 %v1302_v39, %v6196_v50  ;;  %v1265_v42 = vpop.f32.mrf.mxu0  ;;  %v1328_v43 = vpop.f32.mrf.mxu1  ;;  %v2088_v50 = vsel %vm2080_vm12, %v2077_v45, %v2079_v28  ;;  %v2249_v17 = vsel %vm2248_vm13, %v2231_v9, %v2233_v57  ;;  %vm4628_vm12 = vcmask 277504  }
 0x1da   : > { %v6266_v44 = vadd.f32 %v1328_v43, %v6199_v55  ;;  %v2114_v18 = vsel %vm281_vm1, %v2088_v50, 0  ;;  %v2247_v12 = vpop.permute.xlu2 %2246  ;;  %v2261_v26 = vsel %vm281_vm1, %v2249_v17, 0  ;;  %v2241_v27 = vpop.permute.xlu0 %2240 }
 0x1db   : > { %v2254_v29 = vsel %vm2248_vm13, %v2241_v27, %v2243_v4  ;;  %v2253_v37 = vsel %vm2248_vm13, %v6280_v53, %v2241_v27 }
 0x1dc   : > { %5233 = vmatmul.msk.bf16.vlgmr.msrb.gmra.mxu1 %vm277_vm2, %v5227_v21 }
 0x1dd   : > { %2188 = vmatpush.bf16.msrb.mxu1 %v2108_v15 }
 0x1df   : > { %v1291_v47 = vpop.f32.mrf.mxu2 }
 0x1e0   : > { %v1304_v48 = vpop.f32.mrf.mxu3  ;;  %3076 = vrot.lane.b32.xlu2 %v5550_v13, %s5479_s11  ;;  %v2245_v32 = vpop.permute.xlu1 %2244 }
 0x1e1   : > { %v1315_v52 = vpop.f32.mrf.mxu0  ;;  %v1330_v54 = vpop.f32.mrf.mxu1  ;;  %v2255_v36 = vsel %vm2248_vm13, %v2243_v4, %v2245_v32 }
 0x1e2   : > { %v6277_v55 = vadd.f32 %v1315_v52, %v6211_v62  ;;  %v2405_v7 = vpop.permute.xlu2 %2404  ;;  %v2407_v43 = vpop.permute.xlu0 %2406 }
 0x1e3   : > { %v2420_v59 = vsel %vm2416_vm14, %v2405_v7, %v2407_v43 }
 0x1e4   : > { %5232 = vmatmul.msk.bf16.vlgmr.msrb.gmra.mxu0 %vm277_vm2, %v5227_v21  ;;  %5234 = vmatmul.msk.bf16.vlgmr.msrb.gmra.mxu2 %vm277_vm2, %v5227_v21 }
 0x1e5   : > { %5235 = vmatmul.msk.bf16.vlgmr.msrb.gmra.mxu3 %vm277_vm2, %v5227_v21  ;;  %2175 = vmatpush.bf16.msrb.mxu0 %v2105_v51 }
 0x1e6   : > { %2201 = vmatpush.bf16.msrb.mxu2 %v2111_v19  ;;  %2214 = vmatpush.bf16.msrb.mxu3 %v2114_v18 }
 0x1e7   : > { %v1341_v58 = vpop.f32.mrf.mxu2 }
 0x1e8   : > { %v6291_v60 = vadd.f32 %v1341_v58, %v6228_v11  ;;  %v1354_v61 = vpop.f32.mrf.mxu3  ;;  %v2251_v11 = vsel %vm2248_vm13, %v2235_v56, %v2237_v14  ;;  %3072 = vrot.lane.b32.xlu2 %v5544_v8, %s5479_s11 }
 0x1e9   : > { %v6294_v62 = vadd.f32 %v1354_v61, %v6231_v16  ;;  %v1317_v63 = vpop.f32.mrf.mxu0  ;;  %v1441_v1 = vpop.f32.mrf.mxu1  ;;  %v2252_v16 = vsel %vm2248_vm13, %v2237_v14, %v6280_v53  ;;  %v2267_v13 = vsel %vm281_vm1, %v2251_v11, 0 }
 0x1ea   : > { %v6300_v3 = vadd.f32 %v1441_v1, %v6237_v23  ;;  %v2270_v20 = vsel %vm281_vm1, %v2252_v16, 0  ;;  %v2403_v14 = vpop.permute.xlu1 %2402  ;;  %v2401_v45 = vpop.permute.xlu2 %2400 }
 0x1eb   : > { %v2418_v46 = vsel %vm2416_vm14, %v2401_v45, %v2403_v14  ;;  %v2411_v19 = vpop.permute.xlu0 %2410  ;;  %v2419_v57 = vsel %vm2416_vm14, %v2403_v14, %v2405_v7 }
 0x1ec   : > { %5238 = vmatmul.msk.bf16.vlgmr.msra.gmra.mxu1 %vm277_vm2, %v5236_v0  ;;  %v2432_v53 = vsel %vm281_vm1, %v2418_v46, 0 }
 0x1ed   : > { %2304 = vmatpush.bf16.msra.mxu1 %v2264_v2 }
 0x1ef   : > { %v1343_v5 = vpop.f32.mrf.mxu2 }
 0x1f0   : > { %v1356_v10 = vpop.f32.mrf.mxu3  ;;  %3086 = vrot.lane.b32.xlu2 %v5889_v24, %s5479_s11  ;;  %v2273_v24 = vsel %vm281_vm1, %v2253_v37, 0 }
 0x1f1   : > { %v1428_v21 = vpop.f32.mrf.mxu0  ;;  %v1443_v23 = vpop.f32.mrf.mxu1 }
 0x1f2   : > { %v6311_v22 = vadd.f32 %v1428_v21, %v6248_v6  ;;  %v2276_v6 = vsel %vm281_vm1, %v2254_v29, 0  ;;  %v2399_v18 = vpop.permute.xlu1 %2398  ;;  %v2415_v61 = vpop.permute.xlu2 %2414 }
 0x1f3   : > { %v2409_v4 = vpop.permute.xlu0 %2408 }
 0x1f4   : > { %5237 = vmatmul.msk.bf16.vlgmr.msra.gmra.mxu0 %vm277_vm2, %v5236_v0  ;;  %5239 = vmatmul.msk.bf16.vlgmr.msra.gmra.mxu2 %vm277_vm2, %v5236_v0  ;;  %v2422_v5 = vsel %vm2416_vm14, %v2409_v4, %v2411_v19 }
 0x1f5   : > { %5240 = vmatmul.msk.bf16.vlgmr.msra.gmra.mxu3 %vm277_vm2, %v5236_v0  ;;  %2317 = vmatpush.bf16.msra.mxu2 %v2267_v13  ;;  %v2444_v23 = vsel %vm281_vm1, %v2422_v5, 0 }
 0x1f6   : > { %2330 = vmatpush.bf16.msra.mxu3 %v2270_v20  ;;  %2291 = vmatpush.bf16.msra.mxu0 %v2261_v26  ;;  %v2421_v26 = vsel %vm2416_vm14, %v2407_v43, %v2409_v4 }
 0x1f7   : > { %v1454_v25 = vpop.f32.mrf.mxu2 }
 0x1f8   : > { %v6323_v30 = vadd.f32 %v1454_v25, %v6260_v40  ;;  %v1467_v8 = vpop.f32.mrf.mxu3  ;;  %v2256_v40 = vsel %vm2248_vm13, %v2245_v32, %v2247_v12 }
 0x1f9   : > { %v6326_v31 = vadd.f32 %v1467_v8, %v6263_v41  ;;  %v1430_v28 = vpop.f32.mrf.mxu0  ;;  %v1493_v33 = vpop.f32.mrf.mxu1  ;;  %v2282_v15 = vsel %vm281_vm1, %v2256_v40, 0 }
 0x1fa   : > { %v6329_v35 = vadd.f32 %v1493_v33, %v6266_v44  ;;  %v2279_v44 = vsel %vm281_vm1, %v2255_v36, 0  ;;  %v2413_v13 = vpop.permute.xlu1 %2412  ;;  %v2441_v28 = vsel %vm281_vm1, %v2421_v26, 0 }
 0x1fb   : > { %v2423_v25 = vsel %vm2416_vm14, %v2411_v19, %v2413_v13  ;;  %v2424_v29 = vsel %vm2416_vm14, %v2413_v13, %v2415_v61  ;;  %v6394_v33 = vpop.permute.xlu0 %2574  ;;  %v3236_v61 = vld [vmem:[%s5535_s23 + $0x4] sm:$0xff] }
 0x1fc   : > { %5242 = vmatmul.msk.bf16.vlgmr.msrb.gmra.mxu1 %vm277_vm2, %v5236_v0 }
 0x1fd   : > { %2356 = vmatpush.bf16.msrb.mxu1 %v2276_v6  ;;  %v2450_v6 = vsel %vm281_vm1, %v2424_v29, 0 }
 0x1ff   : > { %v1456_v34 = vpop.f32.mrf.mxu2 }
 0x200   : > { %v1469_v38 = vpop.f32.mrf.mxu3  ;;  %v3238_v34 = vld [vmem:[%s5535_s23 + $0x14] sm:$0xff] }
 0x201   : > { %v1480_v39 = vpop.f32.mrf.mxu0  ;;  %v1495_v41 = vpop.f32.mrf.mxu1  ;;  %v3252_v37 = vunpack.c.l.b16 %v3238_v34 }
 0x202   : > { %v6340_v42 = vadd.f32 %v1480_v39, %v6277_v55  ;;  %v5245_v55 = vld [vmem:[%s7471_s1 + $0x30] sm:$0xf]  ;;  %v2571_v7 = vpop.permute.xlu1 %2570 }
 0x203   : > { %v6406_v41 = vpack.c.b16 %v3252_v37, %v3252_v37  ;;  %v2579_v46 = vpop.permute.xlu0 %2578 }
 0x204   : > { %5241 = vmatmul.msk.bf16.vlgmr.msrb.gmra.mxu0 %vm277_vm2, %v5236_v0  ;;  %5243 = vmatmul.msk.bf16.vlgmr.msrb.gmra.mxu2 %vm277_vm2, %v5236_v0 }
 0x205   : > { %5244 = vmatmul.msk.bf16.vlgmr.msrb.gmra.mxu3 %vm277_vm2, %v5236_v0  ;;  %2343 = vmatpush.bf16.msrb.mxu0 %v2273_v24  ;;  %v2435_v0 = vsel %vm281_vm1, %v2419_v57, 0 }
 0x206   : > { %2369 = vmatpush.bf16.msrb.mxu2 %v2279_v44  ;;  %2382 = vmatpush.bf16.msrb.mxu3 %v2282_v15  ;;  %v6414_v44 = vld [vmem:[%s7471_s1 + $0x34] sm:$0xf] }
 0x207   : > { %v1506_v47 = vpop.f32.mrf.mxu2  ;;  %3274 = vrot.lane.b32.xlu0 %v6406_v41, %s5480_s25 }
 0x208   : > { %v6350_v48 = vadd.f32 %v1506_v47, %v6291_v60  ;;  %v1519_v49 = vpop.f32.mrf.mxu3  ;;  %v2417_v60 = vsel %vm2416_vm14, %v2399_v18, %v2401_v45  ;;  %v3237_v45 = vld [vmem:[%s5535_s23 + $0xc] sm:$0xff] }
 0x209   : > { %v6353_v50 = vadd.f32 %v1519_v49, %v6294_v62  ;;  %v1482_v52 = vpop.f32.mrf.mxu0  ;;  %v1606_v54 = vpop.f32.mrf.mxu1  ;;  %v2429_v2 = vsel %vm281_vm1, %v2417_v60, 0  ;;  %v3250_v47 = vunpack.c.l.b16 %v3237_v45 }
 0x20a   : > { %v6359_v51 = vadd.f32 %v1606_v54, %v6300_v3  ;;  %v2438_v3 = vsel %vm281_vm1, %v2420_v59, 0  ;;  %v2567_v49 = vpop.permute.xlu1 %2566 }
 0x20c   : > { %5247 = vmatmul.msk.bf16.vlgmr.msra.gmra.mxu1 %vm277_vm2, %v5245_v55 }
 0x20d   : > { %2472 = vmatpush.bf16.msra.mxu1 %v2432_v53 }
 0x20f   : > { %v1508_v56 = vpop.f32.mrf.mxu2 }
 0x210   : > { %v1521_v58 = vpop.f32.mrf.mxu3 }
 0x211   : > { %v1593_v62 = vpop.f32.mrf.mxu0  ;;  %v1608_v63 = vpop.f32.mrf.mxu1 }
 0x212   : > { %v6367_v1 = vadd.f32 %v1593_v62, %v6311_v22  ;;  %v2573_v22 = vpop.permute.xlu2 %2572 }
 0x213   : > { %v2588_v19 = vsel %vm2584_vm15, %v2573_v22, %v6394_v33 }
 0x214   : > { %5246 = vmatmul.msk.bf16.vlgmr.msra.gmra.mxu0 %vm277_vm2, %v5245_v55  ;;  %5248 = vmatmul.msk.bf16.vlgmr.msra.gmra.mxu2 %vm277_vm2, %v5245_v55  ;;  %v2606_v62 = vsel %vm281_vm1, %v2588_v19, 0 }
 0x215   : > { %5249 = vmatmul.msk.bf16.vlgmr.msra.gmra.mxu3 %vm277_vm2, %v5245_v55  ;;  %2485 = vmatpush.bf16.msra.mxu2 %v2435_v0  ;;  %v3248_v0 = vunpack.c.l.b16 %v3236_v61 }
 0x216   : > { %2498 = vmatpush.bf16.msra.mxu3 %v2438_v3  ;;  %2459 = vmatpush.bf16.msra.mxu0 %v2429_v2  ;;  %v3253_v3 = vunpack.c.h.b16 %v3238_v34  ;;  %v2577_v2 = vpop.permute.xlu0 %2576 }
 0x217   : > { %v1619_v9 = vpop.f32.mrf.mxu2 }
 0x218   : > { %v6377_v11 = vadd.f32 %v1619_v9, %v6323_v30  ;;  %v1632_v10 = vpop.f32.mrf.mxu3  ;;  %v2590_v9 = vsel %vm2584_vm15, %v2577_v2, %v2579_v46  ;;  %v6456_v5 = vpack.c.b16 %v3253_v3, %v3253_v3 }
 0x219   : > { %v6380_v16 = vadd.f32 %v1632_v10, %v6326_v31  ;;  %v1595_v17 = vpop.f32.mrf.mxu0  ;;  %v1658_v12 = vpop.f32.mrf.mxu1 }
 0x21a   : > { %v6383_v21 = vadd.f32 %v1658_v12, %v6329_v35  ;;  %v2447_v35 = vsel %vm281_vm1, %v2423_v25, 0  ;;  %v2569_v32 = vpop.permute.xlu2 %2568 }
 0x21b   : > { %v2586_v36 = vsel %vm2584_vm15, %v2569_v32, %v2571_v7  ;;  %v2585_v18 = vsel %vm2584_vm15, %v2567_v49, %v2569_v32  ;;  %v6514_v49 = vld [vmem:[%s7471_s1 + $0x38] sm:$0xf] }
 0x21c   : > { %5251 = vmatmul.msk.bf16.vlgmr.msrb.gmra.mxu1 %vm277_vm2, %v5245_v55  ;;  %v2600_v14 = vsel %vm281_vm1, %v2586_v36, 0  ;;  %v2597_v63 = vsel %vm281_vm1, %v2585_v18, 0 }
 0x21d   : > { %2524 = vmatpush.bf16.msrb.mxu1 %v2444_v23 }
 0x21e   : > { %v6488_v37 = vpop.permute.xlu0 %2742 }
 0x21f   : > { %v1621_v20 = vpop.f32.mrf.mxu2 }
 0x220   : > { %v1634_v27 = vpop.f32.mrf.mxu3  ;;  %v2612_v20 = vsel %vm281_vm1, %v2590_v9, 0 }
 0x221   : > { %v1645_v30 = vpop.f32.mrf.mxu0  ;;  %v1660_v8 = vpop.f32.mrf.mxu1 }
 0x222   : > { %v6391_v31 = vadd.f32 %v1645_v30, %v6340_v42  ;;  %v2583_v56 = vpop.permute.xlu2 %2582  ;;  %v2581_v27 = vpop.permute.xlu1 %2580 }
 0x224   : > { %5250 = vmatmul.msk.bf16.vlgmr.msrb.gmra.mxu0 %vm277_vm2, %v5245_v55  ;;  %5252 = vmatmul.msk.bf16.vlgmr.msrb.gmra.mxu2 %vm277_vm2, %v5245_v55 }
 0x225   : > { %5253 = vmatmul.msk.bf16.vlgmr.msrb.gmra.mxu3 %vm277_vm2, %v5245_v55  ;;  %2511 = vmatpush.bf16.msrb.mxu0 %v2441_v28  ;;  %v2587_v55 = vsel %vm2584_vm15, %v2571_v7, %v2573_v22  ;;  %v2591_v28 = vsel %vm2584_vm15, %v2579_v46, %v2581_v27 }
 0x226   : > { %2537 = vmatpush.bf16.msrb.mxu2 %v2447_v35  ;;  %2550 = vmatpush.bf16.msrb.mxu3 %v2450_v6  ;;  %v2603_v60 = vsel %vm281_vm1, %v2587_v55, 0  ;;  %v2592_v35 = vsel %vm2584_vm15, %v2581_v27, %v2583_v56 }
 0x227   : > { %v1671_v38 = vpop.f32.mrf.mxu2 }
 0x228   : > { %v6404_v40 = vadd.f32 %v1671_v38, %v6350_v48  ;;  %v1684_v39 = vpop.f32.mrf.mxu3  ;;  %v3239_v48 = vld [vmem:[%s5535_s23 + $0x1c] sm:$0xff]  ;;  %v2618_v38 = vsel %vm281_vm1, %v2592_v35, 0 }
 0x229   : > { %v6409_v42 = vadd.f32 %v1684_v39, %v6353_v50  ;;  %v1647_v24 = vpop.f32.mrf.mxu0  ;;  %v1802_v43 = vpop.f32.mrf.mxu1  ;;  %v6426_v50 = vpack.c.b16 %v3250_v47, %v3250_v47  ;;  %v3254_v52 = vunpack.c.l.b16 %v3239_v48  ;;  %v3255_v25 = vunpack.c.h.b16 %v3239_v48 }
 0x22a   : > { %v6417_v15 = vadd.f32 %v1802_v43, %v6359_v51  ;;  %v2741_v26 = vpop.permute.xlu2 %2740  ;;  %v2739_v36 = vpop.permute.xlu1 %2738  ;;  %v3249_v39 = vunpack.c.h.b16 %v3236_v61 }
 0x22b   : > { %3270 = vrot.lane.b32.xlu1 %v6426_v50, %s5480_s25  ;;  %v6431_v51 = vpack.c.b16 %v3254_v52, %v3254_v52  ;;  %v6474_v29 = vpack.c.b16 %v3255_v25, %v3255_v25 }
 0x22c   : > { %5256 = vmatmul.msk.bf16.vlgmr.msra.gmra.mxu1 %vm277_vm2, %v6414_v44 }
 0x22d   : > { %2640 = vmatpush.bf16.msra.mxu1 %v2600_v14  ;;  %3278 = vrot.lane.b32.xlu0 %v6431_v51, %s5480_s25  ;;  %v6501_v14 = vpack.c.b16 %v3249_v39, %v3249_v39 }
 0x22f   : > { %v1673_v54 = vpop.f32.mrf.mxu2 }
 0x230   : > { %v1686_v53 = vpop.f32.mrf.mxu3 }
 0x231   : > { %v1789_v57 = vpop.f32.mrf.mxu0  ;;  %v1804_v58 = vpop.f32.mrf.mxu1  ;;  %v2755_v53 = vsel %vm277_vm2, %v2739_v36, %v2741_v26 }
 0x232   : > { %v6437_v59 = vadd.f32 %v1789_v57, %v6367_v1  ;;  %v6451_v1 = vpack.c.b16 %v3248_v0, %v3248_v0  ;;  %v2735_v54 = vpop.permute.xlu1 %2734  ;;  %v2771_v61 = vsel %vm281_vm1, %v2755_v53, 0 }
 0x234   : > { %5255 = vmatmul.msk.bf16.vlgmr.msra.gmra.mxu0 %vm277_vm2, %v6414_v44  ;;  %5257 = vmatmul.msk.bf16.vlgmr.msra.gmra.mxu2 %vm277_vm2, %v6414_v44 }
 0x235   : > { %5258 = vmatmul.msk.bf16.vlgmr.msra.gmra.mxu3 %vm277_vm2, %v6414_v44  ;;  %2653 = vmatpush.bf16.msra.mxu2 %v2603_v60 }
 0x236   : > { %2666 = vmatpush.bf16.msra.mxu3 %v2606_v62  ;;  %2627 = vmatpush.bf16.msra.mxu0 %v2597_v63 }
 0x237   : > { %v1815_v4 = vpop.f32.mrf.mxu2  ;;  %3266 = vrot.lane.b32.xlu1 %v6451_v1, %s5480_s25  ;;  %3276 = vrot.lane.b32.xlu0 %v6456_v5, %s5480_s25 }
 0x238   : > { %v6459_v10 = vadd.f32 %v1815_v4, %v6377_v11  ;;  %v1828_v17 = vpop.f32.mrf.mxu3  ;;  %v3251_v11 = vunpack.c.h.b16 %v3237_v45 }
 0x239   : > { %v6462_v12 = vadd.f32 %v1828_v17, %v6380_v16  ;;  %v1791_v23 = vpop.f32.mrf.mxu0  ;;  %v1854_v22 = vpop.f32.mrf.mxu1 }
 0x23a   : > { %v6465_v13 = vadd.f32 %v1854_v22, %v6383_v21  ;;  %v6472_v16 = vpack.c.b16 %v3251_v11, %v3251_v11  ;;  %v2589_v21 = vsel %vm2584_vm15, %v6394_v33, %v2577_v2  ;;  %v2615_v33 = vsel %vm281_vm1, %v2591_v28, 0  ;;  %v2749_v25 = vpop.permute.xlu1 %2748 }
 0x23b   : > { %v2609_v34 = vsel %vm281_vm1, %v2589_v21, 0 }
 0x23c   : > { %5260 = vmatmul.msk.bf16.vlgmr.msrb.gmra.mxu1 %vm277_vm2, %v6414_v44  ;;  %3272 = vrot.lane.b32.xlu2 %v6472_v16, %s5480_s25 }
 0x23d   : > { %2692 = vmatpush.bf16.msrb.mxu1 %v2612_v20 }
 0x23f   : > { %v1817_v30 = vpop.f32.mrf.mxu2  ;;  %3280 = vrot.lane.b32.xlu1 %v6474_v29, %s5480_s25  ;;  %3442 = vrot.lane.b32.xlu0 %v6406_v41, %s5481_s26 }
 0x240   : > { %v1830_v8 = vpop.f32.mrf.mxu3 }
 0x241   : > { %v1841_v6 = vpop.f32.mrf.mxu0  ;;  %v1856_v7 = vpop.f32.mrf.mxu1 }
 0x242   : > { %v6485_v32 = vadd.f32 %v1841_v6, %v6391_v31  ;;  %v2737_v31 = vpop.permute.xlu2 %2736 }
 0x243   : > { %v2754_v43 = vsel %vm277_vm2, %v2737_v31, %v2739_v36  ;;  %v2753_v18 = vsel %vm277_vm2, %v2735_v54, %v2737_v31 }
 0x244   : > { %5259 = vmatmul.msk.bf16.vlgmr.msrb.gmra.mxu0 %vm277_vm2, %v6414_v44  ;;  %5261 = vmatmul.msk.bf16.vlgmr.msrb.gmra.mxu2 %vm277_vm2, %v6414_v44  ;;  %v2768_v52 = vsel %vm281_vm1, %v2754_v43, 0  ;;  %v2765_v63 = vsel %vm281_vm1, %v2753_v18, 0 }
 0x245   : > { %5262 = vmatmul.msk.bf16.vlgmr.msrb.gmra.mxu3 %vm277_vm2, %v6414_v44  ;;  %2679 = vmatpush.bf16.msrb.mxu0 %v2609_v34 }
 0x246   : > { %2705 = vmatpush.bf16.msrb.mxu2 %v2615_v33  ;;  %2718 = vmatpush.bf16.msrb.mxu3 %v2618_v38  ;;  %v2907_v38 = vpop.permute.xlu1 %2906 }
 0x247   : > { %v1867_v24 = vpop.f32.mrf.mxu2  ;;  %3438 = vrot.lane.b32.xlu1 %v6426_v50, %s5481_s26  ;;  %3268 = vrot.lane.b32.xlu2 %v6501_v14, %s5480_s25 }
 0x248   : > { %v6504_v45 = vadd.f32 %v1867_v24, %v6404_v40  ;;  %v1880_v47 = vpop.f32.mrf.mxu3  ;;  %3446 = vrot.lane.b32.xlu0 %v6431_v51, %s5481_s26 }
 0x249   : > { %v6509_v46 = vadd.f32 %v1880_v47, %v6409_v42  ;;  %v1843_v44 = vpop.f32.mrf.mxu0  ;;  %v1970_v48 = vpop.f32.mrf.mxu1 }
 0x24a   : > { %v6519_v40 = vadd.f32 %v1970_v48, %v6417_v15  ;;  %v2747_v42 = vpop.permute.xlu0 %2746  ;;  %v2756_v15 = vsel %vm277_vm2, %v2741_v26, %v6488_v37  ;;  %v2751_v56 = vpop.permute.xlu2 %2750  ;;  %v6604_v48 = vld [vmem:[%s7471_s1 + $0x3c] sm:$0xf] }
 0x24b   : > { %v2774_v62 = vsel %vm281_vm1, %v2756_v15, 0  ;;  %v2759_v21 = vsel %vm277_vm2, %v2747_v42, %v2749_v25  ;;  %v2760_v8 = vsel %vm277_vm2, %v2749_v25, %v2751_v56 }
 0x24c   : > { %5265 = vmatmul.msk.bf16.vlgmr.msra.gmra.mxu1 %vm277_vm2, %v6514_v49  ;;  %v2786_v33 = vsel %vm281_vm1, %v2760_v8, 0 }
 0x24d   : > { %2808 = vmatpush.bf16.msra.mxu1 %v2768_v52 }
 0x24e   : > { %v2903_v52 = vpop.permute.xlu1 %2902 }
 0x24f   : > { %v1869_v55 = vpop.f32.mrf.mxu2  ;;  %3434 = vrot.lane.b32.xlu1 %v6451_v1, %s5481_s26 }
 0x250   : > { %v1882_v19 = vpop.f32.mrf.mxu3  ;;  %3444 = vrot.lane.b32.xlu0 %v6456_v5, %s5481_s26 }
 0x251   : > { %v1957_v57 = vpop.f32.mrf.mxu0  ;;  %v1972_v58 = vpop.f32.mrf.mxu1 }
 0x252   : > { %v6533_v60 = vadd.f32 %v1957_v57, %v6437_v59  ;;  %v3240_v59 = vld [vmem:[%s5535_s23 + $0x24] sm:$0xf]  ;;  %v2745_v0 = vpop.permute.xlu0 %2744  ;;  %s5482_s23 = smov 54  }
 0x253   : > { %v3256_v3 = vunpack.c.l.b16 %v3240_v59  ;;  %v2758_v4 = vsel %vm277_vm2, %v2745_v0, %v2747_v42 }
 0x254   : > { %5264 = vmatmul.msk.bf16.vlgmr.msra.gmra.mxu0 %vm277_vm2, %v6514_v49  ;;  %5266 = vmatmul.msk.bf16.vlgmr.msra.gmra.mxu2 %vm277_vm2, %v6514_v49  ;;  %v2780_v11 = vsel %vm281_vm1, %v2758_v4, 0 }
 0x255   : > { %5267 = vmatmul.msk.bf16.vlgmr.msra.gmra.mxu3 %vm277_vm2, %v6514_v49  ;;  %2821 = vmatpush.bf16.msra.mxu2 %v2771_v61  ;;  %v6551_v23 = vpack.c.b16 %v3256_v3, %v3256_v3 }
 0x256   : > { %2834 = vmatpush.bf16.msra.mxu3 %v2774_v62  ;;  %2795 = vmatpush.bf16.msra.mxu0 %v2765_v63 }
 0x257   : > { %v1983_v2 = vpop.f32.mrf.mxu2  ;;  %3448 = vrot.lane.b32.xlu1 %v6474_v29, %s5481_s26  ;;  %3282 = vrot.lane.b32.xlu2 %v6551_v23, %s5480_s25 }
 0x258   : > { %v6549_v9 = vadd.f32 %v1983_v2, %v6459_v10  ;;  %v1996_v17 = vpop.f32.mrf.mxu3  ;;  %v2909_v10 = vpop.permute.xlu2 %2908  ;;  %3610 = vrot.lane.b32.xlu0 %v6406_v41, %s5482_s23 }
 0x259   : > { %v6556_v22 = vadd.f32 %v1996_v17, %v6462_v12  ;;  %v1959_v20 = vpop.f32.mrf.mxu0  ;;  %v2022_v26 = vpop.f32.mrf.mxu1  ;;  %v2923_v54 = vsel %vm2920_vm0, %v2907_v38, %v2909_v10 }
 0x25a   : > { %v6559_v27 = vadd.f32 %v2022_v26, %v6465_v13  ;;  %v2757_v13 = vsel %vm277_vm2, %v6488_v37, %v2745_v0  ;;  %v6578_v34 = vpop.permute.xlu0 %2910  ;;  %v2783_v37 = vsel %vm281_vm1, %v2759_v21, 0  ;;  %v2939_v57 = vsel %vm281_vm1, %v2923_v54, 0 }
 0x25b   : > { %v2777_v7 = vsel %vm281_vm1, %v2757_v13, 0 }
 0x25c   : > { %5269 = vmatmul.msk.bf16.vlgmr.msrb.gmra.mxu1 %vm277_vm2, %v6514_v49 }
 0x25d   : > { %2860 = vmatpush.bf16.msrb.mxu1 %v2780_v11 }
 0x25f   : > { %v1985_v12 = vpop.f32.mrf.mxu2  ;;  %3606 = vrot.lane.b32.xlu1 %v6426_v50, %s5482_s23  ;;  %3440 = vrot.lane.b32.xlu2 %v6472_v16, %s5481_s26 }
 0x260   : > { %v1998_v30 = vpop.f32.mrf.mxu3  ;;  %3614 = vrot.lane.b32.xlu0 %v6431_v51, %s5482_s23 }
 0x261   : > { %v2009_v28 = vpop.f32.mrf.mxu0  ;;  %v2024_v35 = vpop.f32.mrf.mxu1 }
 0x262   : > { %v6575_v6 = vadd.f32 %v2009_v28, %v6485_v32  ;;  %v2905_v32 = vpop.permute.xlu2 %2904 }
 0x263   : > { %v2922_v31 = vsel %vm2920_vm0, %v2905_v32, %v2907_v38  ;;  %v2921_v53 = vsel %vm2920_vm0, %v2903_v52, %v2905_v32 }
 0x264   : > { %5268 = vmatmul.msk.bf16.vlgmr.msrb.gmra.mxu0 %vm277_vm2, %v6514_v49  ;;  %5270 = vmatmul.msk.bf16.vlgmr.msrb.gmra.mxu2 %vm277_vm2, %v6514_v49  ;;  %v2933_v61 = vsel %vm281_vm1, %v2921_v53, 0 }
 0x265   : > { %5271 = vmatmul.msk.bf16.vlgmr.msrb.gmra.mxu3 %vm277_vm2, %v6514_v49  ;;  %2847 = vmatpush.bf16.msrb.mxu0 %v2777_v7 }
 0x266   : > { %2873 = vmatpush.bf16.msrb.mxu2 %v2783_v37  ;;  %2886 = vmatpush.bf16.msrb.mxu3 %v2786_v33 }
 0x267   : > { %v2035_v36 = vpop.f32.mrf.mxu2  ;;  %3602 = vrot.lane.b32.xlu1 %v6451_v1, %s5482_s23  ;;  %3436 = vrot.lane.b32.xlu2 %v6501_v14, %s5481_s26 }
 0x268   : > { %v6594_v39 = vadd.f32 %v2035_v36, %v6504_v45  ;;  %v2048_v24 = vpop.f32.mrf.mxu3  ;;  %v2936_v45 = vsel %vm281_vm1, %v2922_v31, 0  ;;  %3612 = vrot.lane.b32.xlu0 %v6456_v5, %s5482_s23 }
 0x269   : > { %v6599_v43 = vadd.f32 %v2048_v24, %v6509_v46  ;;  %v2011_v47 = vpop.f32.mrf.mxu0  ;;  %v2138_v44 = vpop.f32.mrf.mxu1  ;;  %v6693_v24 = vld [vmem:[%s7471_s1 + $0x40] sm:$0xf] }
 0x26a   : > { %v6607_v49 = vadd.f32 %v2138_v44, %v6519_v40  ;;  %v2915_v46 = vpop.permute.xlu0 %2914  ;;  %v2924_v40 = vsel %vm2920_vm0, %v2909_v10, %v6578_v34  ;;  %v2919_v19 = vpop.permute.xlu2 %2918 }
 0x26b   : > { %v2942_v58 = vsel %vm281_vm1, %v2924_v40, 0 }
 0x26c   : > { %5274 = vmatmul.msk.bf16.vlgmr.msra.gmra.mxu1 %vm277_vm2, %v6604_v48 }
 0x26d   : > { %2976 = vmatpush.bf16.msra.mxu1 %v2936_v45 }
 0x26f   : > { %v2037_v42 = vpop.f32.mrf.mxu2  ;;  %3616 = vrot.lane.b32.xlu1 %v6474_v29, %s5482_s23  ;;  %3450 = vrot.lane.b32.xlu2 %v6551_v23, %s5481_s26 }
 0x270   : > { %v2050_v55 = vpop.f32.mrf.mxu3  ;;  %3778 = vrot.lane.b32.xlu0 %v6406_v41, %s5483_s6 }
 0x271   : > { %v2125_v15 = vpop.f32.mrf.mxu0  ;;  %v2140_v18 = vpop.f32.mrf.mxu1 }
 0x272   : > { %v6623_v56 = vadd.f32 %v2125_v15, %v6533_v60  ;;  %v2913_v60 = vpop.permute.xlu0 %2912  ;;  %v3077_v26 = vpop.permute.xlu2 %3076 }
 0x273   : > { %v2926_v63 = vsel %vm2920_vm0, %v2913_v60, %v2915_v46  ;;  %v2925_v11 = vsel %vm2920_vm0, %v6578_v34, %v2913_v60 }
 0x274   : > { %5273 = vmatmul.msk.bf16.vlgmr.msra.gmra.mxu0 %vm277_vm2, %v6604_v48  ;;  %5275 = vmatmul.msk.bf16.vlgmr.msra.gmra.mxu2 %vm277_vm2, %v6604_v48  ;;  %v2948_v20 = vsel %vm281_vm1, %v2926_v63, 0  ;;  %v2945_v21 = vsel %vm281_vm1, %v2925_v11, 0 }
 0x275   : > { %5276 = vmatmul.msk.bf16.vlgmr.msra.gmra.mxu3 %vm277_vm2, %v6604_v48  ;;  %2989 = vmatpush.bf16.msra.mxu2 %v2939_v57 }
 0x276   : > { %3002 = vmatpush.bf16.msra.mxu3 %v2942_v58  ;;  %2963 = vmatpush.bf16.msra.mxu0 %v2933_v61 }
 0x277   : > { %v2151_v62 = vpop.f32.mrf.mxu2  ;;  %3774 = vrot.lane.b32.xlu1 %v6426_v50, %s5483_s6  ;;  %3608 = vrot.lane.b32.xlu2 %v6472_v16, %s5482_s23 }
 0x278   : > { %v6640_v59 = vadd.f32 %v2151_v62, %v6549_v9  ;;  %v2164_v0 = vpop.f32.mrf.mxu3  ;;  %3782 = vrot.lane.b32.xlu0 %v6431_v51, %s5483_s6  ;;  %v2917_v9 = vpop.permute.xlu1 %2916 }
 0x279   : > { %v6645_v3 = vadd.f32 %v2164_v0, %v6556_v22  ;;  %v2127_v2 = vpop.f32.mrf.mxu0  ;;  %v2190_v4 = vpop.f32.mrf.mxu1  ;;  %v2927_v10 = vsel %vm2920_vm0, %v2915_v46, %v2917_v9  ;;  %v2928_v25 = vsel %vm2920_vm0, %v2917_v9, %v2919_v19 }
 0x27a   : > { %v6648_v17 = vadd.f32 %v2190_v4, %v6559_v27  ;;  %v6667_v8 = vpop.permute.xlu0 %3078  ;;  %v2951_v28 = vsel %vm281_vm1, %v2927_v10, 0  ;;  %v2954_v35 = vsel %vm281_vm1, %v2928_v25, 0 }
 0x27b   : > { %v3092_v46 = vsel %vm3088_vm3, %v3077_v26, %v6667_v8 }
 0x27c   : > { %5278 = vmatmul.msk.bf16.vlgmr.msrb.gmra.mxu1 %vm277_vm2, %v6604_v48  ;;  %v3110_v19 = vsel %vm281_vm1, %v3092_v46, 0 }
 0x27d   : > { %3028 = vmatpush.bf16.msrb.mxu1 %v2948_v20 }
 0x27f   : > { %v2153_v22 = vpop.f32.mrf.mxu2  ;;  %3770 = vrot.lane.b32.xlu1 %v6451_v1, %s5483_s6  ;;  %3604 = vrot.lane.b32.xlu2 %v6501_v14, %s5482_s23 }
 0x280   : > { %v2166_v27 = vpop.f32.mrf.mxu3  ;;  %3780 = vrot.lane.b32.xlu0 %v6456_v5, %s5483_s6  ;;  %v3075_v7 = vpop.permute.xlu1 %3074 }
 0x281   : > { %v2177_v12 = vpop.f32.mrf.mxu0  ;;  %v2192_v13 = vpop.f32.mrf.mxu1  ;;  %v3091_v45 = vsel %vm3088_vm3, %v3075_v7, %v3077_v26 }
 0x282   : > { %v6664_v30 = vadd.f32 %v2177_v12, %v6575_v6  ;;  %v3073_v6 = vpop.permute.xlu2 %3072  ;;  %v3107_v53 = vsel %vm281_vm1, %v3091_v45, 0 }
 0x283   : > { %v3090_v37 = vsel %vm3088_vm3, %v3073_v6, %v3075_v7 }
 0x284   : > { %5277 = vmatmul.msk.bf16.vlgmr.msrb.gmra.mxu0 %vm277_vm2, %v6604_v48  ;;  %5279 = vmatmul.msk.bf16.vlgmr.msrb.gmra.mxu2 %vm277_vm2, %v6604_v48 }
 0x285   : > { %5280 = vmatmul.msk.bf16.vlgmr.msrb.gmra.mxu3 %vm277_vm2, %v6604_v48  ;;  %3015 = vmatpush.bf16.msrb.mxu0 %v2945_v21 }
 0x286   : > { %3041 = vmatpush.bf16.msrb.mxu2 %v2951_v28  ;;  %3054 = vmatpush.bf16.msrb.mxu3 %v2954_v35 }
 0x287   : > { %v2203_v34 = vpop.f32.mrf.mxu2  ;;  %3784 = vrot.lane.b32.xlu1 %v6474_v29, %s5483_s6  ;;  %3618 = vrot.lane.b32.xlu2 %v6551_v23, %s5482_s23 }
 0x288   : > { %v6683_v33 = vadd.f32 %v2203_v34, %v6594_v39  ;;  %v2216_v38 = vpop.f32.mrf.mxu3  ;;  %v3104_v39 = vsel %vm281_vm1, %v3090_v37, 0  ;;  %3946 = vrot.lane.b32.xlu0 %v6406_v41, %s5484_s9  ;;  %v3071_v44 = vpop.permute.xlu1 %3070 }
 0x289   : > { %v6688_v32 = vadd.f32 %v2216_v38, %v6599_v43  ;;  %v2179_v36 = vpop.f32.mrf.mxu0  ;;  %v2306_v31 = vpop.f32.mrf.mxu1  ;;  %v3089_v52 = vsel %vm3088_vm3, %v3071_v44, %v3073_v6  ;;  %v6782_v38 = vld [vmem:[%s7471_s1 + $0x44] sm:$0xf] }
 0x28a   : > { %v6696_v47 = vadd.f32 %v2306_v31, %v6607_v49  ;;  %v3083_v43 = vpop.permute.xlu0 %3082  ;;  %v3087_v42 = vpop.permute.xlu2 %3086  ;;  %v3101_v15 = vsel %vm281_vm1, %v3089_v52, 0 }
 0x28c   : > { %5283 = vmatmul.msk.bf16.vlgmr.msra.gmra.mxu1 %vm277_vm2, %v6693_v24 }
 0x28d   : > { %3144 = vmatpush.bf16.msra.mxu1 %v3104_v39 }
 0x28f   : > { %v2205_v48 = vpop.f32.mrf.mxu2  ;;  %3942 = vrot.lane.b32.xlu1 %v6426_v50, %s5484_s9  ;;  %3776 = vrot.lane.b32.xlu2 %v6472_v16, %s5483_s6 }
 0x290   : > { %v2218_v49 = vpop.f32.mrf.mxu3  ;;  %3950 = vrot.lane.b32.xlu0 %v6431_v51, %s5484_s9 }
 0x291   : > { %v2293_v54 = vpop.f32.mrf.mxu0  ;;  %v2308_v55 = vpop.f32.mrf.mxu1 }
 0x292   : > { %v6712_v40 = vadd.f32 %v2293_v54, %v6623_v56  ;;  %v3081_v18 = vpop.permute.xlu0 %3080 }
 0x293   : > { %v3094_v57 = vsel %vm3088_vm3, %v3081_v18, %v3083_v43  ;;  %v3093_v20 = vsel %vm3088_vm3, %v6667_v8, %v3081_v18 }
 0x294   : > { %5282 = vmatmul.msk.bf16.vlgmr.msra.gmra.mxu0 %vm277_vm2, %v6693_v24  ;;  %5284 = vmatmul.msk.bf16.vlgmr.msra.gmra.mxu2 %vm277_vm2, %v6693_v24  ;;  %v3116_v2 = vsel %vm281_vm1, %v3094_v57, 0  ;;  %v3113_v10 = vsel %vm281_vm1, %v3093_v20, 0 }
 0x295   : > { %5285 = vmatmul.msk.bf16.vlgmr.msra.gmra.mxu3 %vm277_vm2, %v6693_v24  ;;  %3157 = vmatpush.bf16.msra.mxu2 %v3107_v53 }
 0x296   : > { %3170 = vmatpush.bf16.msra.mxu3 %v3110_v19  ;;  %3131 = vmatpush.bf16.msra.mxu0 %v3101_v15  ;;  %v3273_v4 = vpop.permute.xlu2 %3272 }
 0x297   : > { %v2319_v56 = vpop.f32.mrf.mxu2  ;;  %3938 = vrot.lane.b32.xlu1 %v6451_v1, %s5484_s9  ;;  %3772 = vrot.lane.b32.xlu2 %v6501_v14, %s5483_s6 }
 0x298   : > { %v6729_v58 = vadd.f32 %v2319_v56, %v6640_v59  ;;  %v2332_v61 = vpop.f32.mrf.mxu3  ;;  %3948 = vrot.lane.b32.xlu0 %v6456_v5, %s5484_s9  ;;  %v3085_v59 = vpop.permute.xlu1 %3084 }
 0x299   : > { %v6734_v60 = vadd.f32 %v2332_v61, %v6645_v3  ;;  %v2295_v62 = vpop.f32.mrf.mxu0  ;;  %v2358_v63 = vpop.f32.mrf.mxu1  ;;  %v3095_v26 = vsel %vm3088_vm3, %v3083_v43, %v3085_v59  ;;  %v3096_v9 = vsel %vm3088_vm3, %v3085_v59, %v3087_v42 }
 0x29a   : > { %v6737_v0 = vadd.f32 %v2358_v63, %v6648_v17  ;;  %v6756_v25 = vpop.permute.xlu0 %3274  ;;  %v3119_v12 = vsel %vm281_vm1, %v3095_v26, 0  ;;  %v3122_v13 = vsel %vm281_vm1, %v3096_v9, 0 }
 0x29c   : > { %5287 = vmatmul.msk.bf16.vlgmr.msrb.gmra.mxu1 %vm277_vm2, %v6693_v24 }
 0x29d   : > { %3196 = vmatpush.bf16.msrb.mxu1 %v3116_v2 }
 0x29f   : > { %v2321_v3 = vpop.f32.mrf.mxu2  ;;  %3952 = vrot.lane.b32.xlu1 %v6474_v29, %s5484_s9  ;;  %3786 = vrot.lane.b32.xlu2 %v6551_v23, %s5483_s6 }
 0x2a0   : > { %v2334_v17 = vpop.f32.mrf.mxu3  ;;  %4114 = vrot.lane.b32.xlu0 %v6406_v41, %s5485_s10  ;;  %v3271_v21 = vpop.permute.xlu1 %3270 }
 0x2a1   : > { %v2345_v22 = vpop.f32.mrf.mxu0  ;;  %v2360_v11 = vpop.f32.mrf.mxu1  ;;  %v3287_v39 = vsel %vm3284_vm4, %v3271_v21, %v3273_v4 }
 0x2a2   : > { %v6753_v27 = vadd.f32 %v2345_v22, %v6664_v30  ;;  %v3269_v30 = vpop.permute.xlu2 %3268  ;;  %v3303_v46 = vsel %vm281_vm1, %v3287_v39, 0 }
 0x2a3   : > { %v3286_v28 = vsel %vm3284_vm4, %v3269_v30, %v3271_v21 }
 0x2a4   : > { %5286 = vmatmul.msk.bf16.vlgmr.msrb.gmra.mxu0 %vm277_vm2, %v6693_v24  ;;  %5288 = vmatmul.msk.bf16.vlgmr.msrb.gmra.mxu2 %vm277_vm2, %v6693_v24 }
 0x2a5   : > { %5289 = vmatmul.msk.bf16.vlgmr.msrb.gmra.mxu3 %vm277_vm2, %v6693_v24  ;;  %3183 = vmatpush.bf16.msrb.mxu0 %v3113_v10 }
 0x2a6   : > { %3209 = vmatpush.bf16.msrb.mxu2 %v3119_v12  ;;  %3222 = vmatpush.bf16.msrb.mxu3 %v3122_v13 }
 0x2a7   : > { %v2371_v8 = vpop.f32.mrf.mxu2  ;;  %4110 = vrot.lane.b32.xlu1 %v6426_v50, %s5485_s10  ;;  %3944 = vrot.lane.b32.xlu2 %v6472_v16, %s5484_s9 }
 0x2a8   : > { %v6772_v35 = vadd.f32 %v2371_v8, %v6683_v33  ;;  %v2384_v7 = vpop.f32.mrf.mxu3  ;;  %v3300_v33 = vsel %vm281_vm1, %v3286_v28, 0  ;;  %4118 = vrot.lane.b32.xlu0 %v6431_v51, %s5485_s10 }
 0x2a9   : > { %v6777_v6 = vadd.f32 %v2384_v7, %v6688_v32  ;;  %v2347_v34 = vpop.f32.mrf.mxu0  ;;  %v2474_v37 = vpop.f32.mrf.mxu1  ;;  %v6871_v7 = vld [vmem:[%s7471_s1 + $0x48] sm:$0xf] }
 0x2aa   : > { %v6785_v36 = vadd.f32 %v2474_v37, %v6696_v47  ;;  %v3279_v32 = vpop.permute.xlu0 %3278  ;;  %v3267_v31 = vpop.permute.xlu1 %3266  ;;  %v3288_v47 = vsel %vm3284_vm4, %v3273_v4, %v6756_v25 }
 0x2ab   : > { %v3285_v44 = vsel %vm3284_vm4, %v3267_v31, %v3269_v30  ;;  %v3306_v52 = vsel %vm281_vm1, %v3288_v47, 0 }
 0x2ac   : > { %5292 = vmatmul.msk.bf16.vlgmr.msra.gmra.mxu1 %vm277_vm2, %v6782_v38  ;;  %v3297_v42 = vsel %vm281_vm1, %v3285_v44, 0 }
 0x2ad   : > { %3340 = vmatpush.bf16.msra.mxu1 %v3300_v33 }
 0x2af   : > { %v2373_v24 = vpop.f32.mrf.mxu2  ;;  %4106 = vrot.lane.b32.xlu1 %v6451_v1, %s5485_s10  ;;  %3940 = vrot.lane.b32.xlu2 %v6501_v14, %s5484_s9 }
 0x2b0   : > { %v2386_v43 = vpop.f32.mrf.mxu3  ;;  %4116 = vrot.lane.b32.xlu0 %v6456_v5, %s5485_s10 }
 0x2b1   : > { %v2461_v48 = vpop.f32.mrf.mxu0  ;;  %v2476_v45 = vpop.f32.mrf.mxu1 }
 0x2b2   : > { %v6801_v49 = vadd.f32 %v2461_v48, %v6712_v40  ;;  %v3283_v54 = vpop.permute.xlu2 %3282  ;;  %v3277_v55 = vpop.permute.xlu0 %3276 }
 0x2b3   : > { %v3290_v53 = vsel %vm3284_vm4, %v3277_v55, %v3279_v32 }
 0x2b4   : > { %5291 = vmatmul.msk.bf16.vlgmr.msra.gmra.mxu0 %vm277_vm2, %v6782_v38  ;;  %5293 = vmatmul.msk.bf16.vlgmr.msra.gmra.mxu2 %vm277_vm2, %v6782_v38  ;;  %v3312_v62 = vsel %vm281_vm1, %v3290_v53, 0 }
 0x2b5   : > { %5294 = vmatmul.msk.bf16.vlgmr.msra.gmra.mxu3 %vm277_vm2, %v6782_v38  ;;  %3353 = vmatpush.bf16.msra.mxu2 %v3303_v46 }
 0x2b6   : > { %3366 = vmatpush.bf16.msra.mxu3 %v3306_v52  ;;  %3327 = vmatpush.bf16.msra.mxu0 %v3297_v42 }
 0x2b7   : > { %v2487_v40 = vpop.f32.mrf.mxu2  ;;  %4120 = vrot.lane.b32.xlu1 %v6474_v29, %s5485_s10  ;;  %3954 = vrot.lane.b32.xlu2 %v6551_v23, %s5484_s9 }
 0x2b8   : > { %v6818_v19 = vadd.f32 %v2487_v40, %v6729_v58  ;;  %v2500_v15 = vpop.f32.mrf.mxu3  ;;  %4282 = vrot.lane.b32.xlu0 %v6406_v41, %s5486_s13  ;;  %v3281_v58 = vpop.permute.xlu1 %3280 }
 0x2b9   : > { %v6823_v18 = vadd.f32 %v2500_v15, %v6734_v60  ;;  %v2463_v56 = vpop.f32.mrf.mxu0  ;;  %v2526_v57 = vpop.f32.mrf.mxu1  ;;  %v3291_v4 = vsel %vm3284_vm4, %v3279_v32, %v3281_v58  ;;  %v3292_v59 = vsel %vm3284_vm4, %v3281_v58, %v3283_v54 }
 0x2ba   : > { %v6826_v61 = vadd.f32 %v2526_v57, %v6737_v0  ;;  %v3441_v60 = vpop.permute.xlu2 %3440  ;;  %v3289_v0 = vsel %vm3284_vm4, %v6756_v25, %v3277_v55  ;;  %v6845_v9 = vpop.permute.xlu0 %3442  ;;  %v3315_v22 = vsel %vm281_vm1, %v3291_v4, 0  ;;  %v3318_v11 = vsel %vm281_vm1, %v3292_v59, 0 }
 0x2bb   : > { %v3309_v26 = vsel %vm281_vm1, %v3289_v0, 0 }
 0x2bc   : > { %5296 = vmatmul.msk.bf16.vlgmr.msrb.gmra.mxu1 %vm277_vm2, %v6782_v38 }
 0x2bd   : > { %3392 = vmatpush.bf16.msrb.mxu1 %v3312_v62 }
 0x2bf   : > { %v2489_v63 = vpop.f32.mrf.mxu2  ;;  %4278 = vrot.lane.b32.xlu1 %v6426_v50, %s5486_s13  ;;  %4112 = vrot.lane.b32.xlu2 %v6472_v16, %s5485_s10 }
 0x2c0   : > { %v2502_v2 = vpop.f32.mrf.mxu3  ;;  %4286 = vrot.lane.b32.xlu0 %v6431_v51, %s5486_s13  ;;  %v3439_v10 = vpop.permute.xlu1 %3438 }
 0x2c1   : > { %v2513_v3 = vpop.f32.mrf.mxu0  ;;  %v2528_v20 = vpop.f32.mrf.mxu1  ;;  %v3455_v33 = vsel %vm3452_vm5, %v3439_v10, %v3441_v60 }
 0x2c2   : > { %v6842_v17 = vadd.f32 %v2513_v3, %v6753_v27  ;;  %v3437_v27 = vpop.permute.xlu2 %3436  ;;  %v3471_v44 = vsel %vm281_vm1, %v3455_v33, 0 }
 0x2c3   : > { %v3454_v12 = vsel %vm3452_vm5, %v3437_v27, %v3439_v10 }
 0x2c4   : > { %5295 = vmatmul.msk.bf16.vlgmr.msrb.gmra.mxu0 %vm277_vm2, %v6782_v38  ;;  %5297 = vmatmul.msk.bf16.vlgmr.msrb.gmra.mxu2 %vm277_vm2, %v6782_v38 }
 0x2c5   : > { %5298 = vmatmul.msk.bf16.vlgmr.msrb.gmra.mxu3 %vm277_vm2, %v6782_v38  ;;  %3379 = vmatpush.bf16.msrb.mxu0 %v3309_v26 }
 0x2c6   : > { %3405 = vmatpush.bf16.msrb.mxu2 %v3315_v22  ;;  %3418 = vmatpush.bf16.msrb.mxu3 %v3318_v11 }
 0x2c7   : > { %v2539_v25 = vpop.f32.mrf.mxu2  ;;  %4274 = vrot.lane.b32.xlu1 %v6451_v1, %s5486_s13  ;;  %4108 = vrot.lane.b32.xlu2 %v6501_v14, %s5485_s10 }
 0x2c8   : > { %v6861_v13 = vadd.f32 %v2539_v25, %v6772_v35  ;;  %v2552_v21 = vpop.f32.mrf.mxu3  ;;  %v3468_v35 = vsel %vm281_vm1, %v3454_v12, 0  ;;  %4284 = vrot.lane.b32.xlu0 %v6456_v5, %s5486_s13  ;;  %v3435_v37 = vpop.permute.xlu1 %3434 }
 0x2c9   : > { %v6866_v30 = vadd.f32 %v2552_v21, %v6777_v6  ;;  %v2515_v8 = vpop.f32.mrf.mxu0  ;;  %v2642_v28 = vpop.f32.mrf.mxu1  ;;  %v3453_v31 = vsel %vm3452_vm5, %v3435_v37, %v3437_v27  ;;  %v6960_v21 = vld [vmem:[%s7471_s1 + $0x4c] sm:$0xf] }
 0x2ca   : > { %v6874_v34 = vadd.f32 %v2642_v28, %v6785_v36  ;;  %v3447_v6 = vpop.permute.xlu0 %3446  ;;  %v3456_v36 = vsel %vm3452_vm5, %v3441_v60, %v6845_v9  ;;  %v3451_v24 = vpop.permute.xlu2 %3450  ;;  %v3465_v45 = vsel %vm281_vm1, %v3453_v31, 0 }
 0x2cb   : > { %v3474_v48 = vsel %vm281_vm1, %v3456_v36, 0 }
 0x2cc   : > { %5301 = vmatmul.msk.bf16.vlgmr.msra.gmra.mxu1 %vm277_vm2, %v6871_v7 }
 0x2cd   : > { %3508 = vmatpush.bf16.msra.mxu1 %v3468_v35 }
 0x2cf   : > { %v2541_v38 = vpop.f32.mrf.mxu2  ;;  %4288 = vrot.lane.b32.xlu1 %v6474_v29, %s5486_s13  ;;  %4122 = vrot.lane.b32.xlu2 %v6551_v23, %s5485_s10 }
 0x2d0   : > { %v2554_v32 = vpop.f32.mrf.mxu3  ;;  %4450 = vrot.lane.b32.xlu0 %v6406_v41, %s5487_s16 }
 0x2d1   : > { %v2629_v39 = vpop.f32.mrf.mxu0  ;;  %v2644_v43 = vpop.f32.mrf.mxu1 }
 0x2d2   : > { %v6890_v47 = vadd.f32 %v2629_v39, %v6801_v49  ;;  %v3445_v49 = vpop.permute.xlu0 %3444  ;;  %v3609_v57 = vpop.permute.xlu2 %3608 }
 0x2d3   : > { %v3458_v52 = vsel %vm3452_vm5, %v3445_v49, %v3447_v6  ;;  %v3457_v62 = vsel %vm3452_vm5, %v6845_v9, %v3445_v49 }
 0x2d4   : > { %5300 = vmatmul.msk.bf16.vlgmr.msra.gmra.mxu0 %vm277_vm2, %v6871_v7  ;;  %5302 = vmatmul.msk.bf16.vlgmr.msra.gmra.mxu2 %vm277_vm2, %v6871_v7  ;;  %v3480_v56 = vsel %vm281_vm1, %v3458_v52, 0  ;;  %v3477_v4 = vsel %vm281_vm1, %v3457_v62, 0 }
 0x2d5   : > { %5303 = vmatmul.msk.bf16.vlgmr.msra.gmra.mxu3 %vm277_vm2, %v6871_v7  ;;  %3521 = vmatpush.bf16.msra.mxu2 %v3471_v44 }
 0x2d6   : > { %3534 = vmatpush.bf16.msra.mxu3 %v3474_v48  ;;  %3495 = vmatpush.bf16.msra.mxu0 %v3465_v45 }
 0x2d7   : > { %v2655_v46 = vpop.f32.mrf.mxu2  ;;  %4446 = vrot.lane.b32.xlu1 %v6426_v50, %s5487_s16  ;;  %4280 = vrot.lane.b32.xlu2 %v6472_v16, %s5486_s13 }
 0x2d8   : > { %v6907_v42 = vadd.f32 %v2655_v46, %v6818_v19  ;;  %v2668_v54 = vpop.f32.mrf.mxu3  ;;  %4454 = vrot.lane.b32.xlu0 %v6431_v51, %s5487_s16  ;;  %v3449_v19 = vpop.permute.xlu1 %3448 }
 0x2d9   : > { %v6912_v55 = vadd.f32 %v2668_v54, %v6823_v18  ;;  %v2631_v40 = vpop.f32.mrf.mxu0  ;;  %v2694_v53 = vpop.f32.mrf.mxu1  ;;  %v3459_v58 = vsel %vm3452_vm5, %v3447_v6, %v3449_v19  ;;  %v3460_v60 = vsel %vm3452_vm5, %v3449_v19, %v3451_v24 }
 0x2da   : > { %v6915_v15 = vadd.f32 %v2694_v53, %v6826_v61  ;;  %v6934_v59 = vpop.permute.xlu0 %3610  ;;  %v3483_v3 = vsel %vm281_vm1, %v3459_v58, 0  ;;  %v3486_v20 = vsel %vm281_vm1, %v3460_v60, 0 }
 0x2db   : > { %v3624_v6 = vsel %vm3620_vm6, %v3609_v57, %v6934_v59 }
 0x2dc   : > { %5305 = vmatmul.msk.bf16.vlgmr.msrb.gmra.mxu1 %vm277_vm2, %v6871_v7  ;;  %v3642_v31 = vsel %vm281_vm1, %v3624_v6, 0 }
 0x2dd   : > { %3560 = vmatpush.bf16.msrb.mxu1 %v3480_v56 }
 0x2df   : > { %v2657_v18 = vpop.f32.mrf.mxu2  ;;  %4442 = vrot.lane.b32.xlu1 %v6451_v1, %s5487_s16  ;;  %4276 = vrot.lane.b32.xlu2 %v6501_v14, %s5486_s13 }
 0x2e0   : > { %v2670_v61 = vpop.f32.mrf.mxu3  ;;  %4452 = vrot.lane.b32.xlu0 %v6456_v5, %s5487_s16  ;;  %v3607_v26 = vpop.permute.xlu1 %3606 }
 0x2e1   : > { %v2681_v63 = vpop.f32.mrf.mxu0  ;;  %v2696_v0 = vpop.f32.mrf.mxu1  ;;  %v3623_v35 = vsel %vm3620_vm6, %v3607_v26, %v3609_v57 }
 0x2e2   : > { %v6931_v2 = vadd.f32 %v2681_v63, %v6842_v17  ;;  %v3605_v17 = vpop.permute.xlu2 %3604  ;;  %v3639_v36 = vsel %vm281_vm1, %v3623_v35, 0 }
 0x2e3   : > { %v3622_v22 = vsel %vm3620_vm6, %v3605_v17, %v3607_v26 }
 0x2e4   : > { %5304 = vmatmul.msk.bf16.vlgmr.msrb.gmra.mxu0 %vm277_vm2, %v6871_v7  ;;  %5306 = vmatmul.msk.bf16.vlgmr.msrb.gmra.mxu2 %vm277_vm2, %v6871_v7 }
 0x2e5   : > { %5307 = vmatmul.msk.bf16.vlgmr.msrb.gmra.mxu3 %vm277_vm2, %v6871_v7  ;;  %3547 = vmatpush.bf16.msrb.mxu0 %v3477_v4 }
 0x2e6   : > { %3573 = vmatpush.bf16.msrb.mxu2 %v3483_v3  ;;  %3586 = vmatpush.bf16.msrb.mxu3 %v3486_v20  ;;  %v5317_v3 = vld [vmem:[%s7471_s1 + $0x50] sm:$0xf] }
 0x2e7   : > { %v2707_v9 = vpop.f32.mrf.mxu2  ;;  %4456 = vrot.lane.b32.xlu1 %v6474_v29, %s5487_s16  ;;  %4290 = vrot.lane.b32.xlu2 %v6551_v23, %s5486_s13 }
 0x2e8   : > { %v6950_v11 = vadd.f32 %v2707_v9, %v6861_v13  ;;  %v2720_v10 = vpop.f32.mrf.mxu3  ;;  %v3636_v13 = vsel %vm281_vm1, %v3622_v22, 0  ;;  %4618 = vrot.lane.b32.xlu0 %v6406_v41, %s5488_s21  ;;  %v3603_v28 = vpop.permute.xlu1 %3602 }
 0x2e9   : > { %v6955_v27 = vadd.f32 %v2720_v10, %v6866_v30  ;;  %v2683_v25 = vpop.f32.mrf.mxu0  ;;  %v2810_v12 = vpop.f32.mrf.mxu1  ;;  %v3621_v37 = vsel %vm3620_vm6, %v3603_v28, %v3605_v17 }
 0x2ea   : > { %v6963_v8 = vadd.f32 %v2810_v12, %v6874_v34  ;;  %v3615_v30 = vpop.permute.xlu0 %3614  ;;  %v3619_v38 = vpop.permute.xlu2 %3618  ;;  %v3633_v24 = vsel %vm281_vm1, %v3621_v37, 0 }
 0x2ec   : > { %5310 = vmatmul.msk.bf16.vlgmr.msra.gmra.mxu1 %vm277_vm2, %v6960_v21 }
 0x2ed   : > { %3676 = vmatpush.bf16.msra.mxu1 %v3636_v13 }
 0x2ef   : > { %v2709_v7 = vpop.f32.mrf.mxu2  ;;  %4614 = vrot.lane.b32.xlu1 %v6426_v50, %s5488_s21  ;;  %4448 = vrot.lane.b32.xlu2 %v6472_v16, %s5487_s16 }
 0x2f0   : > { %v2722_v34 = vpop.f32.mrf.mxu3  ;;  %4622 = vrot.lane.b32.xlu0 %v6431_v51, %s5488_s21 }
 0x2f1   : > { %v2797_v41 = vpop.f32.mrf.mxu0  ;;  %v2812_v33 = vpop.f32.mrf.mxu1 }
 0x2f2   : > { %v6979_v32 = vadd.f32 %v2797_v41, %v6890_v47  ;;  %v3613_v50 = vpop.permute.xlu0 %3612  ;;  %v3777_v52 = vpop.permute.xlu2 %3776 }
 0x2f3   : > { %v3626_v51 = vsel %vm3620_vm6, %v3613_v50, %v3615_v30  ;;  %v3625_v54 = vsel %vm3620_vm6, %v6934_v59, %v3613_v50 }
 0x2f4   : > { %5309 = vmatmul.msk.bf16.vlgmr.msra.gmra.mxu0 %vm277_vm2, %v6960_v21  ;;  %5311 = vmatmul.msk.bf16.vlgmr.msra.gmra.mxu2 %vm277_vm2, %v6960_v21  ;;  %v3648_v46 = vsel %vm281_vm1, %v3626_v51, 0  ;;  %v3645_v57 = vsel %vm281_vm1, %v3625_v54, 0 }
 0x2f5   : > { %5312 = vmatmul.msk.bf16.vlgmr.msra.gmra.mxu3 %vm277_vm2, %v6960_v21  ;;  %3689 = vmatpush.bf16.msra.mxu2 %v3639_v36 }
 0x2f6   : > { %3702 = vmatpush.bf16.msra.mxu3 %v3642_v31  ;;  %3663 = vmatpush.bf16.msra.mxu0 %v3633_v24 }
 0x2f7   : > { %v2823_v39 = vpop.f32.mrf.mxu2  ;;  %4610 = vrot.lane.b32.xlu1 %v6451_v1, %s5488_s21  ;;  %4444 = vrot.lane.b32.xlu2 %v6501_v14, %s5487_s16 }
 0x2f8   : > { %v6996_v43 = vadd.f32 %v2823_v39, %v6907_v42  ;;  %v2836_v47 = vpop.f32.mrf.mxu3  ;;  %4620 = vrot.lane.b32.xlu0 %v6456_v5, %s5488_s21  ;;  %v3617_v42 = vpop.permute.xlu1 %3616 }
 0x2f9   : > { %v7001_v44 = vadd.f32 %v2836_v47, %v6912_v55  ;;  %v2799_v48 = vpop.f32.mrf.mxu0  ;;  %v2862_v45 = vpop.f32.mrf.mxu1  ;;  %v3627_v40 = vsel %vm3620_vm6, %v3615_v30, %v3617_v42  ;;  %v3628_v53 = vsel %vm3620_vm6, %v3617_v42, %v3619_v38 }
 0x2fa   : > { %v7004_v49 = vadd.f32 %v2862_v45, %v6915_v15  ;;  %v7023_v19 = vpop.permute.xlu0 %3778  ;;  %v3651_v18 = vsel %vm281_vm1, %v3627_v40, 0  ;;  %v3654_v62 = vsel %vm281_vm1, %v3628_v53, 0 }
 0x2fc   : > { %5314 = vmatmul.msk.bf16.vlgmr.msrb.gmra.mxu1 %vm277_vm2, %v6960_v21 }
 0x2fd   : > { %3728 = vmatpush.bf16.msrb.mxu1 %v3648_v46 }
 0x2ff   : > { %v2825_v1 = vpop.f32.mrf.mxu2  ;;  %4624 = vrot.lane.b32.xlu1 %v6474_v29, %s5488_s21  ;;  %4458 = vrot.lane.b32.xlu2 %v6551_v23, %s5487_s16  ;;  %v3773_v29 = vpop.permute.xlu2 %3772 }
 0x300   : > { %v2838_v55 = vpop.f32.mrf.mxu3  ;;  %v3775_v61 = vpop.permute.xlu1 %3774 }
 0x301   : > { %v2849_v15 = vpop.f32.mrf.mxu0  ;;  %v2864_v56 = vpop.f32.mrf.mxu1  ;;  %v3790_v60 = vsel %vm3788_vm7, %v3773_v29, %v3775_v61 }
 0x302   : > { %v7020_v5 = vadd.f32 %v2849_v15, %v6931_v2  ;;  %v3804_v26 = vsel %vm281_vm1, %v3790_v60, 0  ;;  %v3783_v17 = vpop.permute.xlu0 %3782 }
 0x304   : > { %5313 = vmatmul.msk.bf16.vlgmr.msrb.gmra.mxu0 %vm277_vm2, %v6960_v21  ;;  %5315 = vmatmul.msk.bf16.vlgmr.msrb.gmra.mxu2 %vm277_vm2, %v6960_v21 }
 0x305   : > { %5316 = vmatmul.msk.bf16.vlgmr.msrb.gmra.mxu3 %vm277_vm2, %v6960_v21  ;;  %3715 = vmatpush.bf16.msrb.mxu0 %v3645_v57 }
 0x306   : > { %3741 = vmatpush.bf16.msrb.mxu2 %v3651_v18  ;;  %3754 = vmatpush.bf16.msrb.mxu3 %v3654_v62 }
 0x307   : > { %v2875_v58 = vpop.f32.mrf.mxu2  ;;  %4616 = vrot.lane.b32.xlu2 %v6472_v16, %s5488_s21  ;;  %v3787_v12 = vpop.permute.xlu2 %3786 }
 0x308   : > { %v7037_v63 = vadd.f32 %v2875_v58, %v6950_v11  ;;  %v2888_v0 = vpop.f32.mrf.mxu3  ;;  %v3771_v9 = vpop.permute.xlu1 %3770  ;;  %v3791_v11 = vsel %vm3788_vm7, %v3775_v61, %v3777_v52 }
 0x309   : > { %v7040_v2 = vadd.f32 %v2888_v0, %v6955_v27  ;;  %v2851_v4 = vpop.f32.mrf.mxu0  ;;  %v2978_v59 = vpop.f32.mrf.mxu1  ;;  %v3792_v27 = vsel %vm3788_vm7, %v3777_v52, %v7023_v19  ;;  %v3789_v25 = vsel %vm3788_vm7, %v3771_v9, %v3773_v29  ;;  %v3807_v16 = vsel %vm281_vm1, %v3791_v11, 0 }
 0x30a   : > { %v7046_v20 = vadd.f32 %v2978_v59, %v6963_v8  ;;  %v3810_v30 = vsel %vm281_vm1, %v3792_v27, 0  ;;  %v3801_v28 = vsel %vm281_vm1, %v3789_v25, 0  ;;  %v3781_v7 = vpop.permute.xlu0 %3780 }
 0x30b   : > { %v3794_v34 = vsel %vm3788_vm7, %v3781_v7, %v3783_v17  ;;  %v3793_v50 = vsel %vm3788_vm7, %v7023_v19, %v3781_v7 }
 0x30c   : > { %5319 = vmatmul.msk.bf16.vlgmr.msra.gmra.mxu1 %vm277_vm2, %v5317_v3 }
 0x30d   : > { %3844 = vmatpush.bf16.msra.mxu1 %v3804_v26 }
 0x30f   : > { %v2877_v22 = vpop.f32.mrf.mxu2  ;;  %4612 = vrot.lane.b32.xlu2 %v6501_v14, %s5488_s21  ;;  %v3945_v36 = vpop.permute.xlu2 %3944 }
 0x310   : > { %v2890_v10 = vpop.f32.mrf.mxu3  ;;  %v3785_v31 = vpop.permute.xlu1 %3784 }
 0x311   : > { %v2965_v21 = vpop.f32.mrf.mxu0  ;;  %v2980_v8 = vpop.f32.mrf.mxu1  ;;  %v3795_v51 = vsel %vm3788_vm7, %v3783_v17, %v3785_v31 }
 0x312   : > { %v7057_v13 = vadd.f32 %v2965_v21, %v6979_v32  ;;  %v3816_v32 = vsel %vm281_vm1, %v3794_v34, 0  ;;  %v3947_v45 = vpop.permute.xlu0 %3946 }
 0x313   : > { %v3960_v60 = vsel %vm3956_vm8, %v3945_v36, %v3947_v45 }
 0x314   : > { %5318 = vmatmul.msk.bf16.vlgmr.msra.gmra.mxu0 %vm277_vm2, %v5317_v3  ;;  %5320 = vmatmul.msk.bf16.vlgmr.msra.gmra.mxu2 %vm277_vm2, %v5317_v3 }
 0x315   : > { %5321 = vmatmul.msk.bf16.vlgmr.msra.gmra.mxu3 %vm277_vm2, %v5317_v3  ;;  %3857 = vmatpush.bf16.msra.mxu2 %v3807_v16 }
 0x316   : > { %3870 = vmatpush.bf16.msra.mxu3 %v3810_v30  ;;  %3831 = vmatpush.bf16.msra.mxu0 %v3801_v28 }
 0x317   : > { %v2991_v35 = vpop.f32.mrf.mxu2  ;;  %4626 = vrot.lane.b32.xlu2 %v6551_v23, %s5488_s21  ;;  %v3813_v23 = vsel %vm281_vm1, %v3793_v50, 0  ;;  %v3941_v42 = vpop.permute.xlu2 %3940  ;;  %s5489_s21 = smov 0.0  }
 0x318   : > { %v7069_v6 = vadd.f32 %v2991_v35, %v6996_v43  ;;  %v3004_v14 = vpop.f32.mrf.mxu3  ;;  %v3796_v43 = vsel %vm3788_vm7, %v3785_v31, %v3787_v12  ;;  %v3943_v52 = vpop.permute.xlu1 %3942 }
 0x319   : > { %v7072_v37 = vadd.f32 %v3004_v14, %v7001_v44  ;;  %v2967_v38 = vpop.f32.mrf.mxu0  ;;  %v3030_v41 = vpop.f32.mrf.mxu1  ;;  %v3822_v46 = vsel %vm281_vm1, %v3796_v43, 0  ;;  %v3958_v54 = vsel %vm3956_vm8, %v3941_v42, %v3943_v52  ;;  %v3959_v29 = vsel %vm3956_vm8, %v3943_v52, %v3945_v36 }
 0x31a   : > { %v7075_v33 = vadd.f32 %v3030_v41, %v7004_v49  ;;  %v3819_v49 = vsel %vm281_vm1, %v3795_v51, 0  ;;  %v3972_v19 = vsel %vm281_vm1, %v3958_v54, 0  ;;  %v3951_v18 = vpop.permute.xlu0 %3950 }
 0x31c   : > { %5323 = vmatmul.msk.bf16.vlgmr.msrb.gmra.mxu1 %vm277_vm2, %v5317_v3 }
 0x31d   : > { %3896 = vmatpush.bf16.msrb.mxu1 %v3816_v32 }
 0x31f   : > { %v2993_v24 = vpop.f32.mrf.mxu2  ;;  %v3955_v0 = vpop.permute.xlu2 %3954 }
 0x320   : > { %v3006_v39 = vpop.f32.mrf.mxu3  ;;  %v3939_v62 = vpop.permute.xlu1 %3938 }
 0x321   : > { %v3017_v47 = vpop.f32.mrf.mxu0  ;;  %v3032_v44 = vpop.f32.mrf.mxu1 }
 0x322   : > { %v7086_v48 = vadd.f32 %v3017_v47, %v7020_v5  ;;  %v5326_v5 = vld [vmem:[%s7471_s1 + $0x54] sm:$0xf]  ;;  %v3949_v17 = vpop.permute.xlu0 %3948 }
 0x323   : > { %v3962_v22 = vsel %vm3956_vm8, %v3949_v17, %v3951_v18  ;;  %v3961_v28 = vsel %vm3956_vm8, %v3947_v45, %v3949_v17 }
 0x324   : > { %5322 = vmatmul.msk.bf16.vlgmr.msrb.gmra.mxu0 %vm277_vm2, %v5317_v3  ;;  %5324 = vmatmul.msk.bf16.vlgmr.msrb.gmra.mxu2 %vm277_vm2, %v5317_v3  ;;  %v3984_v8 = vsel %vm281_vm1, %v3962_v22, 0  ;;  %v3981_v38 = vsel %vm281_vm1, %v3961_v28, 0 }
 0x325   : > { %5325 = vmatmul.msk.bf16.vlgmr.msrb.gmra.mxu3 %vm277_vm2, %v5317_v3  ;;  %3883 = vmatpush.bf16.msrb.mxu0 %v3813_v23  ;;  %v3975_v3 = vsel %vm281_vm1, %v3959_v29, 0 }
 0x326   : > { %3909 = vmatpush.bf16.msrb.mxu2 %v3819_v49  ;;  %3922 = vmatpush.bf16.msrb.mxu3 %v3822_v46 }
 0x327   : > { %v3043_v1 = vpop.f32.mrf.mxu2 }
 0x328   : > { %v7096_v55 = vadd.f32 %v3043_v1, %v7037_v63  ;;  %v3056_v40 = vpop.f32.mrf.mxu3  ;;  %v3957_v63 = vsel %vm3956_vm8, %v3939_v62, %v3941_v42  ;;  %v3953_v16 = vpop.permute.xlu1 %3952 }
 0x329   : > { %v7099_v53 = vadd.f32 %v3056_v40, %v7040_v2  ;;  %v3019_v15 = vpop.f32.mrf.mxu0  ;;  %v3146_v56 = vpop.f32.mrf.mxu1  ;;  %v3969_v26 = vsel %vm281_vm1, %v3957_v63, 0  ;;  %v3963_v35 = vsel %vm3956_vm8, %v3951_v18, %v3953_v16  ;;  %v3964_v34 = vsel %vm3956_vm8, %v3953_v16, %v3955_v0 }
 0x32a   : > { %v7105_v57 = vadd.f32 %v3146_v56, %v7046_v20  ;;  %v3978_v20 = vsel %vm281_vm1, %v3960_v60, 0  ;;  %v4115_v41 = vpop.permute.xlu0 %4114  ;;  %v3990_v32 = vsel %vm281_vm1, %v3964_v34, 0 }
 0x32c   : > { %5328 = vmatmul.msk.bf16.vlgmr.msra.gmra.mxu1 %vm277_vm2, %v5326_v5 }
 0x32d   : > { %4012 = vmatpush.bf16.msra.mxu1 %v3972_v19 }
 0x32f   : > { %v3045_v61 = vpop.f32.mrf.mxu2 }
 0x330   : > { %v3058_v58 = vpop.f32.mrf.mxu3  ;;  %v4111_v36 = vpop.permute.xlu1 %4110 }
 0x331   : > { %v3133_v2 = vpop.f32.mrf.mxu0  ;;  %v3148_v4 = vpop.f32.mrf.mxu1 }
 0x332   : > { %v7113_v59 = vadd.f32 %v3133_v2, %v7057_v13  ;;  %v4113_v13 = vpop.permute.xlu2 %4112  ;;  %v4119_v49 = vpop.permute.xlu0 %4118 }
 0x333   : > { %v4127_v42 = vsel %vm4124_vm9, %v4111_v36, %v4113_v13  ;;  %v4128_v54 = vsel %vm4124_vm9, %v4113_v13, %v4115_v41 }
 0x334   : > { %5327 = vmatmul.msk.bf16.vlgmr.msra.gmra.mxu0 %vm277_vm2, %v5326_v5  ;;  %5329 = vmatmul.msk.bf16.vlgmr.msra.gmra.mxu2 %vm277_vm2, %v5326_v5 }
 0x335   : > { %5330 = vmatmul.msk.bf16.vlgmr.msra.gmra.mxu3 %vm277_vm2, %v5326_v5  ;;  %4025 = vmatpush.bf16.msra.mxu2 %v3975_v3 }
 0x336   : > { %4038 = vmatpush.bf16.msra.mxu3 %v3978_v20  ;;  %3999 = vmatpush.bf16.msra.mxu0 %v3969_v26 }
 0x337   : > { %v3159_v9 = vpop.f32.mrf.mxu2 }
 0x338   : > { %v7123_v11 = vadd.f32 %v3159_v9, %v7069_v6  ;;  %v3172_v10 = vpop.f32.mrf.mxu3  ;;  %v4107_v46 = vpop.permute.xlu1 %4106 }
 0x339   : > { %v7126_v27 = vadd.f32 %v3172_v10, %v7072_v37  ;;  %v3135_v25 = vpop.f32.mrf.mxu0  ;;  %v3198_v12 = vpop.f32.mrf.mxu1 }
 0x33a   : > { %v7129_v21 = vadd.f32 %v3198_v12, %v7075_v33  ;;  %v3987_v33 = vsel %vm281_vm1, %v3963_v35, 0  ;;  %v4109_v31 = vpop.permute.xlu2 %4108  ;;  %v4117_v18 = vpop.permute.xlu0 %4116 }
 0x33b   : > { %v4126_v50 = vsel %vm4124_vm9, %v4109_v31, %v4111_v36  ;;  %v4130_v61 = vsel %vm4124_vm9, %v4117_v18, %v4119_v49  ;;  %v4129_v26 = vsel %vm4124_vm9, %v4115_v41, %v4117_v18 }
 0x33c   : > { %5332 = vmatmul.msk.bf16.vlgmr.msrb.gmra.mxu1 %vm277_vm2, %v5326_v5  ;;  %v4140_v45 = vsel %vm281_vm1, %v4126_v50, 0  ;;  %v4152_v4 = vsel %vm281_vm1, %v4130_v61, 0  ;;  %v4149_v25 = vsel %vm281_vm1, %v4129_v26, 0 }
 0x33d   : > { %4064 = vmatpush.bf16.msrb.mxu1 %v3984_v8 }
 0x33f   : > { %v3161_v30 = vpop.f32.mrf.mxu2 }
 0x340   : > { %v3174_v7 = vpop.f32.mrf.mxu3  ;;  %v4121_v3 = vpop.permute.xlu1 %4120 }
 0x341   : > { %v3185_v6 = vpop.f32.mrf.mxu0  ;;  %v3200_v14 = vpop.f32.mrf.mxu1  ;;  %v4131_v9 = vsel %vm4124_vm9, %v4119_v49, %v4121_v3 }
 0x342   : > { %v7137_v37 = vadd.f32 %v3185_v6, %v7086_v48  ;;  %v5335_v48 = vld [vmem:[%s7471_s1 + $0x58] sm:$0xf]  ;;  %v4123_v40 = vpop.permute.xlu2 %4122  ;;  %v4283_v12 = vpop.permute.xlu0 %4282 }
 0x343   : > { %v4132_v22 = vsel %vm4124_vm9, %v4121_v3, %v4123_v40 }
 0x344   : > { %5331 = vmatmul.msk.bf16.vlgmr.msrb.gmra.mxu0 %vm277_vm2, %v5326_v5  ;;  %5333 = vmatmul.msk.bf16.vlgmr.msrb.gmra.mxu2 %vm277_vm2, %v5326_v5  ;;  %v4158_v8 = vsel %vm281_vm1, %v4132_v22, 0 }
 0x345   : > { %5334 = vmatmul.msk.bf16.vlgmr.msrb.gmra.mxu3 %vm277_vm2, %v5326_v5  ;;  %4051 = vmatpush.bf16.msrb.mxu0 %v3981_v38  ;;  %v4143_v5 = vsel %vm281_vm1, %v4127_v42, 0 }
 0x346   : > { %4077 = vmatpush.bf16.msrb.mxu2 %v3987_v33  ;;  %4090 = vmatpush.bf16.msrb.mxu3 %v3990_v32 }
 0x347   : > { %v3211_v24 = vpop.f32.mrf.mxu2 }
 0x348   : > { %v7147_v39 = vadd.f32 %v3211_v24, %v7096_v55  ;;  %v3224_v51 = vpop.f32.mrf.mxu3  ;;  %v4125_v55 = vsel %vm4124_vm9, %v4107_v46, %v4109_v31  ;;  %v4279_v13 = vpop.permute.xlu1 %4278 }
 0x349   : > { %v7150_v43 = vadd.f32 %v3224_v51, %v7099_v53  ;;  %v3187_v47 = vpop.f32.mrf.mxu0  ;;  %v3342_v44 = vpop.f32.mrf.mxu1  ;;  %v4137_v19 = vsel %vm281_vm1, %v4125_v55, 0 }
 0x34a   : > { %v7156_v23 = vadd.f32 %v3342_v44, %v7105_v57  ;;  %v4146_v57 = vsel %vm281_vm1, %v4128_v54, 0  ;;  %v4287_v33 = vpop.permute.xlu0 %4286 }
 0x34c   : > { %5337 = vmatmul.msk.bf16.vlgmr.msra.gmra.mxu1 %vm277_vm2, %v5335_v48 }
 0x34d   : > { %4180 = vmatpush.bf16.msra.mxu1 %v4140_v45 }
 0x34f   : > { %v3213_v52 = vpop.f32.mrf.mxu2 }
 0x350   : > { %v3226_v1 = vpop.f32.mrf.mxu3  ;;  %v4275_v32 = vpop.permute.xlu1 %4274 }
 0x351   : > { %v3329_v53 = vpop.f32.mrf.mxu0  ;;  %v3344_v15 = vpop.f32.mrf.mxu1 }
 0x352   : > { %v7164_v56 = vadd.f32 %v3329_v53, %v7113_v59  ;;  %v4281_v59 = vpop.permute.xlu2 %4280  ;;  %v4285_v49 = vpop.permute.xlu0 %4284 }
 0x353   : > { %v4295_v31 = vsel %vm4292_vm10, %v4279_v13, %v4281_v59  ;;  %v4296_v50 = vsel %vm4292_vm10, %v4281_v59, %v4283_v12  ;;  %v4298_v52 = vsel %vm4292_vm10, %v4285_v49, %v4287_v33 }
 0x354   : > { %5336 = vmatmul.msk.bf16.vlgmr.msra.gmra.mxu0 %vm277_vm2, %v5335_v48  ;;  %5338 = vmatmul.msk.bf16.vlgmr.msra.gmra.mxu2 %vm277_vm2, %v5335_v48  ;;  %v4320_v15 = vsel %vm281_vm1, %v4298_v52, 0 }
 0x355   : > { %5339 = vmatmul.msk.bf16.vlgmr.msra.gmra.mxu3 %vm277_vm2, %v5335_v48  ;;  %4193 = vmatpush.bf16.msra.mxu2 %v4143_v5 }
 0x356   : > { %4206 = vmatpush.bf16.msra.mxu3 %v4146_v57  ;;  %4167 = vmatpush.bf16.msra.mxu0 %v4137_v19  ;;  %v4297_v19 = vsel %vm4292_vm10, %v4283_v12, %v4285_v49 }
 0x357   : > { %v3355_v62 = vpop.f32.mrf.mxu2 }
 0x358   : > { %v7174_v29 = vadd.f32 %v3355_v62, %v7123_v11  ;;  %v3368_v58 = vpop.f32.mrf.mxu3  ;;  %v4289_v5 = vpop.permute.xlu1 %4288 }
 0x359   : > { %v7177_v60 = vadd.f32 %v3368_v58, %v7126_v27  ;;  %v3331_v63 = vpop.f32.mrf.mxu0  ;;  %v3394_v0 = vpop.f32.mrf.mxu1  ;;  %v4299_v62 = vsel %vm4292_vm10, %v4287_v33, %v4289_v5 }
 0x35a   : > { %v7180_v2 = vadd.f32 %v3394_v0, %v7129_v21  ;;  %v4155_v21 = vsel %vm281_vm1, %v4131_v9, 0  ;;  %v4277_v16 = vpop.permute.xlu2 %4276  ;;  %v4317_v63 = vsel %vm281_vm1, %v4297_v19, 0  ;;  %v4451_v0 = vpop.permute.xlu0 %4450 }
 0x35b   : > { %v4294_v28 = vsel %vm4292_vm10, %v4277_v16, %v4279_v13 }
 0x35c   : > { %5341 = vmatmul.msk.bf16.vlgmr.msrb.gmra.mxu1 %vm277_vm2, %v5335_v48  ;;  %v4308_v41 = vsel %vm281_vm1, %v4294_v28, 0 }
 0x35d   : > { %4232 = vmatpush.bf16.msrb.mxu1 %v4152_v4 }
 0x35f   : > { %v3357_v20 = vpop.f32.mrf.mxu2 }
 0x360   : > { %v3370_v17 = vpop.f32.mrf.mxu3  ;;  %v4447_v59 = vpop.permute.xlu1 %4446 }
 0x361   : > { %v3381_v11 = vpop.f32.mrf.mxu0  ;;  %v3396_v10 = vpop.f32.mrf.mxu1 }
 0x362   : > { %v7188_v27 = vadd.f32 %v3381_v11, %v7137_v37  ;;  %v5344_v37 = vld [vmem:[%s7471_s1 + $0x5c] sm:$0xf]  ;;  %v4291_v51 = vpop.permute.xlu2 %4290 }
 0x363   : > { %v4300_v61 = vsel %vm4292_vm10, %v4289_v5, %v4291_v51 }
 0x364   : > { %5340 = vmatmul.msk.bf16.vlgmr.msrb.gmra.mxu0 %vm277_vm2, %v5335_v48  ;;  %5342 = vmatmul.msk.bf16.vlgmr.msrb.gmra.mxu2 %vm277_vm2, %v5335_v48  ;;  %v4326_v4 = vsel %vm281_vm1, %v4300_v61, 0 }
 0x365   : > { %5343 = vmatmul.msk.bf16.vlgmr.msrb.gmra.mxu3 %vm277_vm2, %v5335_v48  ;;  %4219 = vmatpush.bf16.msrb.mxu0 %v4149_v25  ;;  %v4311_v48 = vsel %vm281_vm1, %v4295_v31, 0 }
 0x366   : > { %4245 = vmatpush.bf16.msrb.mxu2 %v4155_v21  ;;  %4258 = vmatpush.bf16.msrb.mxu3 %v4158_v8  ;;  %v4455_v21 = vpop.permute.xlu0 %4454 }
 0x367   : > { %v3407_v30 = vpop.f32.mrf.mxu2 }
 0x368   : > { %v7198_v7 = vadd.f32 %v3407_v30, %v7147_v39  ;;  %v3420_v35 = vpop.f32.mrf.mxu3  ;;  %v4293_v39 = vsel %vm4292_vm10, %v4275_v32, %v4277_v16  ;;  %v4443_v8 = vpop.permute.xlu1 %4442 }
 0x369   : > { %v7201_v34 = vadd.f32 %v3420_v35, %v7150_v43  ;;  %v3383_v6 = vpop.f32.mrf.mxu0  ;;  %v3510_v14 = vpop.f32.mrf.mxu1  ;;  %v4305_v45 = vsel %vm281_vm1, %v4293_v39, 0 }
 0x36a   : > { %v7207_v38 = vadd.f32 %v3510_v14, %v7156_v23  ;;  %v4314_v23 = vsel %vm281_vm1, %v4296_v50, 0 }
 0x36c   : > { %5346 = vmatmul.msk.bf16.vlgmr.msra.gmra.mxu1 %vm277_vm2, %v5344_v37 }
 0x36d   : > { %4348 = vmatpush.bf16.msra.mxu1 %v4308_v41 }
 0x36e   : > { %v4453_v33 = vpop.permute.xlu0 %4452 }
 0x36f   : > { %v3409_v36 = vpop.f32.mrf.mxu2 }
 0x370   : > { %v3422_v24 = vpop.f32.mrf.mxu3  ;;  %v4466_v36 = vsel %vm4460_vm11, %v4453_v33, %v4455_v21 }
 0x371   : > { %v3497_v43 = vpop.f32.mrf.mxu0  ;;  %v3512_v47 = vpop.f32.mrf.mxu1 }
 0x372   : > { %v7215_v44 = vadd.f32 %v3497_v43, %v7164_v56  ;;  %v4449_v56 = vpop.permute.xlu2 %4448  ;;  %v4488_v47 = vsel %vm281_vm1, %v4466_v36, 0 }
 0x373   : > { %v4463_v16 = vsel %vm4460_vm11, %v4447_v59, %v4449_v56  ;;  %v4464_v28 = vsel %vm4460_vm11, %v4449_v56, %v4451_v0 }
 0x374   : > { %5345 = vmatmul.msk.bf16.vlgmr.msra.gmra.mxu0 %vm277_vm2, %v5344_v37  ;;  %5347 = vmatmul.msk.bf16.vlgmr.msra.gmra.mxu2 %vm277_vm2, %v5344_v37 }
 0x375   : > { %5348 = vmatmul.msk.bf16.vlgmr.msra.gmra.mxu3 %vm277_vm2, %v5344_v37  ;;  %4361 = vmatpush.bf16.msra.mxu2 %v4311_v48  ;;  %v4457_v48 = vpop.permute.xlu1 %4456 }
 0x376   : > { %4374 = vmatpush.bf16.msra.mxu3 %v4314_v23  ;;  %4335 = vmatpush.bf16.msra.mxu0 %v4305_v45  ;;  %v4465_v45 = vsel %vm4460_vm11, %v4451_v0, %v4453_v33 }
 0x377   : > { %v3523_v46 = vpop.f32.mrf.mxu2 }
 0x378   : > { %v7225_v42 = vadd.f32 %v3523_v46, %v7174_v29  ;;  %v3536_v1 = vpop.f32.mrf.mxu3  ;;  %v4467_v46 = vsel %vm4460_vm11, %v4455_v21, %v4457_v48 }
 0x379   : > { %v7228_v54 = vadd.f32 %v3536_v1, %v7177_v60  ;;  %v3499_v55 = vpop.f32.mrf.mxu0  ;;  %v3562_v40 = vpop.f32.mrf.mxu1 }
 0x37a   : > { %v7231_v53 = vadd.f32 %v3562_v40, %v7180_v2  ;;  %v4323_v2 = vsel %vm281_vm1, %v4299_v62, 0  ;;  %v4445_v3 = vpop.permute.xlu2 %4444  ;;  %v4485_v55 = vsel %vm281_vm1, %v4465_v45, 0  ;;  %v4619_v40 = vpop.permute.xlu0 %4618 }
 0x37b   : > { %v4462_v26 = vsel %vm4460_vm11, %v4445_v3, %v4447_v59 }
 0x37c   : > { %5350 = vmatmul.msk.bf16.vlgmr.msrb.gmra.mxu1 %vm277_vm2, %v5344_v37  ;;  %v4476_v12 = vsel %vm281_vm1, %v4462_v26, 0 }
 0x37d   : > { %4400 = vmatpush.bf16.msrb.mxu1 %v4320_v15  ;;  %v4615_v56 = vpop.permute.xlu1 %4614 }
 0x37f   : > { %v3525_v57 = vpop.f32.mrf.mxu2 }
 0x380   : > { %v3538_v18 = vpop.f32.mrf.mxu3 }
 0x381   : > { %v3549_v29 = vpop.f32.mrf.mxu0  ;;  %v3564_v58 = vpop.f32.mrf.mxu1 }
 0x382   : > { %v7239_v60 = vadd.f32 %v3549_v29, %v7188_v27  ;;  %v5353_v27 = vld [vmem:[%s7471_s1 + $0x60] sm:$0xf]  ;;  %v4459_v35 = vpop.permute.xlu2 %4458 }
 0x383   : > { %v4468_v52 = vsel %vm4460_vm11, %v4457_v48, %v4459_v35 }
 0x384   : > { %5349 = vmatmul.msk.bf16.vlgmr.msrb.gmra.mxu0 %vm277_vm2, %v5344_v37  ;;  %5351 = vmatmul.msk.bf16.vlgmr.msrb.gmra.mxu2 %vm277_vm2, %v5344_v37  ;;  %v4494_v15 = vsel %vm281_vm1, %v4468_v52, 0 }
 0x385   : > { %5352 = vmatmul.msk.bf16.vlgmr.msrb.gmra.mxu3 %vm277_vm2, %v5344_v37  ;;  %4387 = vmatpush.bf16.msrb.mxu0 %v4317_v63  ;;  %v4479_v37 = vsel %vm281_vm1, %v4463_v16, 0 }
 0x386   : > { %4413 = vmatpush.bf16.msrb.mxu2 %v4323_v2  ;;  %4426 = vmatpush.bf16.msrb.mxu3 %v4326_v4  ;;  %v4623_v2 = vpop.permute.xlu0 %4622  ;;  %v4611_v4 = vpop.permute.xlu1 %4610 }
 0x387   : > { %v3575_v20 = vpop.f32.mrf.mxu2 }
 0x388   : > { %v7249_v17 = vadd.f32 %v3575_v20, %v7198_v7  ;;  %v3588_v9 = vpop.f32.mrf.mxu3  ;;  %v4461_v7 = vsel %vm4460_vm11, %v4443_v8, %v4445_v3 }
 0x389   : > { %v7252_v22 = vadd.f32 %v3588_v9, %v7201_v34  ;;  %v3551_v11 = vpop.f32.mrf.mxu0  ;;  %v3678_v10 = vpop.f32.mrf.mxu1  ;;  %v4473_v41 = vsel %vm281_vm1, %v4461_v7, 0 }
 0x38a   : > { %v7258_v25 = vadd.f32 %v3678_v10, %v7207_v38  ;;  %v4482_v38 = vsel %vm281_vm1, %v4464_v28, 0 }
 0x38c   : > { %5355 = vmatmul.msk.bf16.vlgmr.msra.gmra.mxu1 %vm277_vm2, %v5353_v27 }
 0x38d   : > { %4516 = vmatpush.bf16.msra.mxu1 %v4476_v12 }
 0x38e   : > { %v4621_v12 = vpop.permute.xlu0 %4620 }
 0x38f   : > { %v3577_v13 = vpop.f32.mrf.mxu2  ;;  %v4634_v8 = vsel %vm4628_vm12, %v4621_v12, %v4623_v2 }
 0x390   : > { %v3590_v30 = vpop.f32.mrf.mxu3 }
 0x391   : > { %v3665_v34 = vpop.f32.mrf.mxu0  ;;  %v3680_v6 = vpop.f32.mrf.mxu1 }
 0x392   : > { %v7266_v14 = vadd.f32 %v3665_v34, %v7215_v44  ;;  %v4617_v44 = vpop.permute.xlu2 %4616  ;;  %v4656_v34 = vsel %vm281_vm1, %v4634_v8, 0  ;;  %v4625_v6 = vpop.permute.xlu1 %4624 }
 0x393   : > { %v4631_v3 = vsel %vm4628_vm12, %v4615_v56, %v4617_v44  ;;  %v4632_v26 = vsel %vm4628_vm12, %v4617_v44, %v4619_v40  ;;  %v4635_v33 = vsel %vm4628_vm12, %v4623_v2, %v4625_v6 }
 0x394   : > { %5354 = vmatmul.msk.bf16.vlgmr.msra.gmra.mxu0 %vm277_vm2, %v5353_v27  ;;  %5356 = vmatmul.msk.bf16.vlgmr.msra.gmra.mxu2 %vm277_vm2, %v5353_v27  ;;  %v4647_v10 = vsel %vm281_vm1, %v4631_v3, 0 }
 0x395   : > { %5357 = vmatmul.msk.bf16.vlgmr.msra.gmra.mxu3 %vm277_vm2, %v5353_v27  ;;  %4529 = vmatpush.bf16.msra.mxu2 %v4479_v37 }
 0x396   : > { %4542 = vmatpush.bf16.msra.mxu3 %v4482_v38  ;;  %4503 = vmatpush.bf16.msra.mxu0 %v4473_v41  ;;  %v4633_v38 = vsel %vm4628_vm12, %v4619_v40, %v4621_v12 }
 0x397   : > { %v3691_v32 = vpop.f32.mrf.mxu2 }
 0x398   : > { %v7276_v31 = vadd.f32 %v3691_v32, %v7225_v42  ;;  %v3704_v24 = vpop.f32.mrf.mxu3 }
 0x399   : > { %v7279_v50 = vadd.f32 %v3704_v24, %v7228_v54  ;;  %v3667_v39 = vpop.f32.mrf.mxu0  ;;  %v3730_v51 = vpop.f32.mrf.mxu1 }
 0x39a   : > { %v7282_v43 = vadd.f32 %v3730_v51, %v7231_v53  ;;  %v4491_v53 = vsel %vm281_vm1, %v4467_v46, 0  ;;  %v4613_v5 = vpop.permute.xlu2 %4612  ;;  %v4659_v39 = vsel %vm281_vm1, %v4635_v33, 0 }
 0x39b   : > { %v4630_v19 = vsel %vm4628_vm12, %v4613_v5, %v4615_v56 }
 0x39c   : > { %5359 = vmatmul.msk.bf16.vlgmr.msrb.gmra.mxu1 %vm277_vm2, %v5353_v27  ;;  %v4644_v0 = vsel %vm281_vm1, %v4630_v19, 0 }
 0x39d   : > { %4568 = vmatpush.bf16.msrb.mxu1 %v4488_v47 }
 0x39f   : > { %v3693_v23 = vpop.f32.mrf.mxu2 }
 0x3a0   : > { %v3706_v49 = vpop.f32.mrf.mxu3 }
 0x3a1   : > { %v3717_v42 = vpop.f32.mrf.mxu0  ;;  %v3732_v1 = vpop.f32.mrf.mxu1  ;;  %v5371_v49 = vld [vmem:[%s7471_s1 + $0x68] sm:$0xf] }
 0x3a2   : > { %v7290_v54 = vadd.f32 %v3717_v42, %v7239_v60  ;;  %v5362_v60 = vld [vmem:[%s7471_s1 + $0x64] sm:$0xf] }
 0x3a4   : > { %5358 = vmatmul.msk.bf16.vlgmr.msrb.gmra.mxu0 %vm277_vm2, %v5353_v27  ;;  %5360 = vmatmul.msk.bf16.vlgmr.msrb.gmra.mxu2 %vm277_vm2, %v5353_v27 }
 0x3a5   : > { %5361 = vmatmul.msk.bf16.vlgmr.msrb.gmra.mxu3 %vm277_vm2, %v5353_v27  ;;  %4555 = vmatpush.bf16.msrb.mxu0 %v4485_v55  ;;  %v4650_v27 = vsel %vm281_vm1, %v4632_v26, 0 }
 0x3a6   : > { %4581 = vmatpush.bf16.msrb.mxu2 %v4491_v53  ;;  %4594 = vmatpush.bf16.msrb.mxu3 %v4494_v15 }
 0x3a7   : > { %v3743_v57 = vpop.f32.mrf.mxu2 }
 0x3a8   : > { %v3766_v18 = vadd.f32 %v3743_v57, %v7249_v17  ;;  %v3756_v62 = vpop.f32.mrf.mxu3  ;;  %v4629_v17 = vsel %vm4628_vm12, %v4611_v4, %v4613_v5 }
 0x3a9   : > { %v3767_v61 = vadd.f32 %v3756_v62, %v7252_v22  ;;  %v3719_v29 = vpop.f32.mrf.mxu0  ;;  %v3846_v58 = vpop.f32.mrf.mxu1 }
 0x3aa   : > { %v3929_v63 = vadd.f32 %v3846_v58, %v7258_v25  ;;  %v4641_v25 = vsel %vm281_vm1, %v4629_v17, 0 }
 0x3ac   : > { %5364 = vmatmul.msk.bf16.vlgmr.msra.gmra.mxu1 %vm277_vm2, %v5362_v60 }
 0x3ad   : > { %4684 = vmatpush.bf16.msra.mxu1 %v4644_v0 }
 0x3af   : > { %v3745_v59 = vpop.f32.mrf.mxu2 }
 0x3b0   : > { %v3758_v20 = vpop.f32.mrf.mxu3 }
 0x3b1   : > { %v3833_v9 = vpop.f32.mrf.mxu0  ;;  %v3848_v22 = vpop.f32.mrf.mxu1 }
 0x3b2   : > { %v3928_v11 = vadd.f32 %v3833_v9, %v7266_v14  ;;  %v4627_v14 = vpop.permute.xlu2 %4626 }
 0x3b3   : > { %v4636_v32 = vsel %vm4628_vm12, %v4625_v6, %v4627_v14 }
 0x3b4   : > { %5363 = vmatmul.msk.bf16.vlgmr.msra.gmra.mxu0 %vm277_vm2, %v5362_v60  ;;  %5365 = vmatmul.msk.bf16.vlgmr.msra.gmra.mxu2 %vm277_vm2, %v5362_v60  ;;  %v4662_v51 = vsel %vm281_vm1, %v4636_v32, 0 }
 0x3b5   : > { %5366 = vmatmul.msk.bf16.vlgmr.msra.gmra.mxu3 %vm277_vm2, %v5362_v60  ;;  %4697 = vmatpush.bf16.msra.mxu2 %v4647_v10 }
 0x3b6   : > { %4710 = vmatpush.bf16.msra.mxu3 %v4650_v27  ;;  %4671 = vmatpush.bf16.msra.mxu0 %v4641_v25 }
 0x3b7   : > { %v3859_v21 = vpop.f32.mrf.mxu2 }
 0x3b8   : > { %v3930_v13 = vadd.f32 %v3859_v21, %v7276_v31  ;;  %v3872_v16 = vpop.f32.mrf.mxu3 }
 0x3b9   : > { %v3931_v30 = vadd.f32 %v3872_v16, %v7279_v50  ;;  %v3835_v28 = vpop.f32.mrf.mxu0  ;;  %v3898_v7 = vpop.f32.mrf.mxu1  ;;  %v4653_v50 = vsel %vm281_vm1, %v4633_v38, 0  ;;  %vm4810_vm1 = vcmask 850944  }
 0x3ba   : > { %v3933_v35 = vadd.f32 %v3898_v7, %v7282_v43 }
 0x3bc   : > { %5368 = vmatmul.msk.bf16.vlgmr.msrb.gmra.mxu1 %vm277_vm2, %v5362_v60 }
 0x3bd   : > { %4736 = vmatpush.bf16.msrb.mxu1 %v4656_v34 }
 0x3bf   : > { %v3861_v37 = vpop.f32.mrf.mxu2 }
 0x3c0   : > { %v3874_v41 = vpop.f32.mrf.mxu3 }
 0x3c1   : > { %v3885_v36 = vpop.f32.mrf.mxu0  ;;  %v3900_v31 = vpop.f32.mrf.mxu1 }
 0x3c2   : > { %v3932_v24 = vadd.f32 %v3885_v36, %v7290_v54 }
 0x3c4   : > { %5367 = vmatmul.msk.bf16.vlgmr.msrb.gmra.mxu0 %vm277_vm2, %v5362_v60  ;;  %5369 = vmatmul.msk.bf16.vlgmr.msrb.gmra.mxu2 %vm277_vm2, %v5362_v60 }
 0x3c5   : > { %5370 = vmatmul.msk.bf16.vlgmr.msrb.gmra.mxu3 %vm277_vm2, %v5362_v60  ;;  %4723 = vmatpush.bf16.msrb.mxu0 %v4653_v50 }
 0x3c6   : > { %4749 = vmatpush.bf16.msrb.mxu2 %v4659_v39  ;;  %4762 = vmatpush.bf16.msrb.mxu3 %v4662_v51 }
 0x3c7   : > { %v3911_v43 = vpop.f32.mrf.mxu2 }
 0x3c8   : > { %v3934_v47 = vadd.f32 %v3911_v43, %v3766_v18  ;;  %v3924_v44 = vpop.f32.mrf.mxu3 }
 0x3c9   : > { %v3935_v48 = vadd.f32 %v3924_v44, %v3767_v61  ;;  %v3887_v23 = vpop.f32.mrf.mxu0  ;;  %v4014_v45 = vpop.f32.mrf.mxu1 }
 0x3ca   : > { %v4097_v46 = vadd.f32 %v4014_v45, %v3929_v63 }
 0x3cc   : > { %5373 = vmatmul.msk.bf16.vlgmr.msra.gmra.mxu1 %vm277_vm2, %v5371_v49 }
 0x3cf   : > { %v3913_v52 = vpop.f32.mrf.mxu2 }
 0x3d0   : > { %v3926_v42 = vpop.f32.mrf.mxu3 }
 0x3d1   : > { %v4001_v1 = vpop.f32.mrf.mxu0  ;;  %v4016_v54 = vpop.f32.mrf.mxu1 }
 0x3d2   : > { %v4096_v55 = vadd.f32 %v4001_v1, %v3928_v11 }
 0x3d4   : > { %5372 = vmatmul.msk.bf16.vlgmr.msra.gmra.mxu0 %vm277_vm2, %v5371_v49  ;;  %5374 = vmatmul.msk.bf16.vlgmr.msra.gmra.mxu2 %vm277_vm2, %v5371_v49 }
 0x3d5   : > { %5375 = vmatmul.msk.bf16.vlgmr.msra.gmra.mxu3 %vm277_vm2, %v5371_v49 }
 0x3d7   : > { %v4027_v40 = vpop.f32.mrf.mxu2 }
 0x3d8   : > { %v4098_v53 = vadd.f32 %v4027_v40, %v3930_v13  ;;  %v4040_v15 = vpop.f32.mrf.mxu3 }
 0x3d9   : > { %v4099_v56 = vadd.f32 %v4040_v15, %v3931_v30  ;;  %v4003_v5 = vpop.f32.mrf.mxu0  ;;  %v4066_v57 = vpop.f32.mrf.mxu1 }
 0x3da   : > { %v4101_v19 = vadd.f32 %v4066_v57, %v3933_v35 }
 0x3dc   : > { %5377 = vmatmul.msk.bf16.vlgmr.msrb.gmra.mxu1 %vm277_vm2, %v5371_v49 }
 0x3df   : > { %v4029_v18 = vpop.f32.mrf.mxu2 }
 0x3e0   : > { %v4042_v62 = vpop.f32.mrf.mxu3 }
 0x3e1   : > { %v4053_v61 = vpop.f32.mrf.mxu0  ;;  %v4068_v29 = vpop.f32.mrf.mxu1 }
 0x3e2   : > { %v4100_v58 = vadd.f32 %v4053_v61, %v3932_v24 }
 0x3e4   : > { %5376 = vmatmul.msk.bf16.vlgmr.msrb.gmra.mxu0 %vm277_vm2, %v5371_v49  ;;  %5378 = vmatmul.msk.bf16.vlgmr.msrb.gmra.mxu2 %vm277_vm2, %v5371_v49 }
 0x3e5   : > { %5379 = vmatmul.msk.bf16.vlgmr.msrb.gmra.mxu3 %vm277_vm2, %v5371_v49  ;;  %vm4835_vm2 = vcmask 1024  }
 0x3e7   : > { %v4079_v60 = vpop.f32.mrf.mxu2 }
 0x3e8   : > { %v4102_v63 = vadd.f32 %v4079_v60, %v3934_v47  ;;  %v4092_v0 = vpop.f32.mrf.mxu3 }
 0x3e9   : > { %v4103_v2 = vadd.f32 %v4092_v0, %v3935_v48  ;;  %v4055_v4 = vpop.f32.mrf.mxu0  ;;  %v4182_v59 = vpop.f32.mrf.mxu1 }
 0x3ea   : > { %v4265_v3 = vadd.f32 %v4182_v59, %v4097_v46 }
 0x3ef   : > { %v4081_v20 = vpop.f32.mrf.mxu2 }
 0x3f0   : > { %v4094_v26 = vpop.f32.mrf.mxu3 }
 0x3f1   : > { %v4169_v17 = vpop.f32.mrf.mxu0  ;;  %v4184_v9 = vpop.f32.mrf.mxu1  ;;  %v4778_v26 = vld [vmem:[%s7474_s4] sm:$0xff] }
 0x3f2   : > { %v4264_v22 = vadd.f32 %v4169_v17, %v4096_v55 }
 0x3f7   : > { %v4195_v11 = vpop.f32.mrf.mxu2 }
 0x3f8   : > { %v4266_v10 = vadd.f32 %v4195_v11, %v4098_v53  ;;  %v4208_v27 = vpop.f32.mrf.mxu3 }
 0x3f9   : > { %v4267_v25 = vadd.f32 %v4208_v27, %v4099_v56  ;;  %v4171_v12 = vpop.f32.mrf.mxu0  ;;  %v4234_v21 = vpop.f32.mrf.mxu1  ;;  %v4781_v27 = vperm.slane %v4778_v26, 1 }
 0x3fa   : > { %v4269_v8 = vadd.f32 %v4234_v21, %v4101_v19 }
 0x3ff   : > { %v4197_v13 = vpop.f32.mrf.mxu2 }
 0x400   : > { %v4210_v16 = vpop.f32.mrf.mxu3 }
 0x401   : > { %v4221_v30 = vpop.f32.mrf.mxu0  ;;  %v4236_v28 = vpop.f32.mrf.mxu1 }
 0x402   : > { %v7344_v7 = vadd.f32 %v4221_v30, %v4100_v58 }
 0x407   : > { %v4247_v35 = vpop.f32.mrf.mxu2 }
 0x408   : > { %v7346_v34 = vadd.f32 %v4247_v35, %v4102_v63  ;;  %v4260_v6 = vpop.f32.mrf.mxu3 }
 0x409   : > { %v7348_v14 = vadd.f32 %v4260_v6, %v4103_v2  ;;  %v4223_v37 = vpop.f32.mrf.mxu0  ;;  %v4350_v38 = vpop.f32.mrf.mxu1 }
 0x40a   : > { %v4433_v41 = vadd.f32 %v4350_v38, %v4265_v3 }
 0x40f   : > { %v4249_v33 = vpop.f32.mrf.mxu2 }
 0x410   : > { %v4262_v32 = vpop.f32.mrf.mxu3 }
 0x411   : > { %v4337_v36 = vpop.f32.mrf.mxu0  ;;  %v4352_v31 = vpop.f32.mrf.mxu1 }
 0x412   : > { %v4432_v24 = vadd.f32 %v4337_v36, %v4264_v22  ;;  %v4780_v22 = vperm.slane %v4778_v26, 0 }
 0x417   : > { %v4363_v50 = vpop.f32.mrf.mxu2 }
 0x418   : > { %v4434_v39 = vadd.f32 %v4363_v50, %v4266_v10  ;;  %v4376_v51 = vpop.f32.mrf.mxu3 }
 0x419   : > { %v4435_v43 = vadd.f32 %v4376_v51, %v4267_v25  ;;  %v4339_v47 = vpop.f32.mrf.mxu0  ;;  %v4402_v44 = vpop.f32.mrf.mxu1  ;;  %v4782_v25 = vperm.slane %v4778_v26, 2 }
 0x41a   : > { %v4437_v48 = vadd.f32 %v4402_v44, %v4269_v8 }
 0x41f   : > { %v4365_v23 = vpop.f32.mrf.mxu2 }
 0x420   : > { %v4378_v45 = vpop.f32.mrf.mxu3  ;;  %v4784_v23 = vperm.slane %v4778_v26, 4 }
 0x421   : > { %v4389_v49 = vpop.f32.mrf.mxu0  ;;  %v4404_v46 = vpop.f32.mrf.mxu1 }
 0x422   : > { %v4436_v33 = vadd.f32 %v4389_v49, %v7344_v7  ;;  %v4785_v7 = vperm.slane %v4778_v26, 5 }
 0x427   : > { %v7350_v52 = vpop.f32.mrf.mxu2 }
 0x428   : > { %v7352_v42 = vpop.f32.mrf.mxu3 }
 0x429   : > { %v4391_v1 = vpop.f32.mrf.mxu0  ;;  %v4518_v54 = vpop.f32.mrf.mxu1 }
 0x42a   : > { %v4601_v17 = vadd.f32 %v4518_v54, %v4433_v41  ;;  %v4783_v41 = vperm.slane %v4778_v26, 3 }
 0x42f   : > { %v4417_v55 = vpop.f32.mrf.mxu2 }
 0x430   : > { %v4430_v40 = vpop.f32.mrf.mxu3  ;;  %v4438_v55 = vadd.f32 %v7350_v52, %v7346_v34 }
 0x431   : > { %v4505_v53 = vpop.f32.mrf.mxu0  ;;  %v4520_v15 = vpop.f32.mrf.mxu1 }
 0x432   : > { %v4600_v20 = vadd.f32 %v4505_v53, %v4432_v24  ;;  %v4439_v15 = vadd.f32 %v7352_v42, %v7348_v14 }
 0x437   : > { %v4531_v56 = vpop.f32.mrf.mxu2 }
 0x438   : > { %v4544_v5 = vpop.f32.mrf.mxu3  ;;  %v4602_v11 = vadd.f32 %v4531_v56, %v4434_v39 }
 0x439   : > { %v4507_v57 = vpop.f32.mrf.mxu0  ;;  %v4570_v19 = vpop.f32.mrf.mxu1  ;;  %v4603_v28 = vadd.f32 %v4544_v5, %v4435_v43  ;;  %v4786_v5 = vperm.slane %v4778_v26, 6 }
 0x43a   : > { %v4605_v24 = vadd.f32 %v4570_v19, %v4437_v48 }
 0x43f   : > { %v4533_v18 = vpop.f32.mrf.mxu2 }
 0x440   : > { %v4546_v62 = vpop.f32.mrf.mxu3 }
 0x441   : > { %v4557_v61 = vpop.f32.mrf.mxu0  ;;  %v4572_v29 = vpop.f32.mrf.mxu1 }
 0x442   : > { %v4604_v50 = vadd.f32 %v4557_v61, %v4436_v33 }
 0x447   : > { %v4583_v58 = vpop.f32.mrf.mxu2 }
 0x448   : > { %v4596_v60 = vpop.f32.mrf.mxu3  ;;  %v4606_v56 = vadd.f32 %v4583_v58, %v4438_v55 }
 0x449   : > { %v4559_v63 = vpop.f32.mrf.mxu0  ;;  %v4686_v0 = vpop.f32.mrf.mxu1  ;;  %v4607_v61 = vadd.f32 %v4596_v60, %v4439_v15 }
 0x44a   : > { %v7359_v10 = vadd.f32 %v4686_v0, %v4601_v17  ;;  %v4787_v63 = vperm.slane %v4778_v26, 7 }
 0x44c   : > { %v4797_v35 = vmul.f32 %v4781_v27, %v7359_v10 }
 0x44e   : > { %v4816_v32 = vmul.f32 %v4797_v35, %v7359_v10 }
 0x44f   : > { %v4585_v2 = vpop.f32.mrf.mxu2 }
 0x450   : > { %v4598_v4 = vpop.f32.mrf.mxu3 }
 0x451   : > { %v4673_v59 = vpop.f32.mrf.mxu0  ;;  %v4688_v3 = vpop.f32.mrf.mxu1 }
 0x452   : > { %v7357_v9 = vadd.f32 %v4673_v59, %v4600_v20 }
 0x454   : > { %v4796_v21 = vmul.f32 %v4780_v22, %v7357_v9 }
 0x456   : > { %v4815_v37 = vmul.f32 %v4796_v21, %v7357_v9  ;;  %v4804_v36 = vadd.f32 %v4797_v35, %v4796_v21 }
 0x457   : > { %v4699_v12 = vpop.f32.mrf.mxu2 }
 0x458   : > { %v7362_v8 = vadd.f32 %v4699_v12, %v4602_v11  ;;  %v4712_v13 = vpop.f32.mrf.mxu3  ;;  %v4823_v51 = vadd.f32 %v4816_v32, %v4815_v37 }
 0x459   : > { %v4675_v16 = vpop.f32.mrf.mxu0  ;;  %v4738_v30 = vpop.f32.mrf.mxu1  ;;  %v7367_v38 = vadd.f32 %v4712_v13, %v4603_v28 }
 0x45a   : > { %v4798_v6 = vmul.f32 %v4782_v25, %v7362_v8  ;;  %v7373_v54 = vadd.f32 %v4738_v30, %v4605_v24 }
 0x45b   : > { %v4799_v47 = vmul.f32 %v4783_v41, %v7367_v38 }
 0x45c   : > { %v4817_v31 = vmul.f32 %v4798_v6, %v7362_v8  ;;  %v4805_v43 = vadd.f32 %v4804_v36, %v4798_v6  ;;  %v4801_v19 = vmul.f32 %v4785_v7, %v7373_v54 }
 0x45d   : > { %v4818_v40 = vmul.f32 %v4799_v47, %v7367_v38 }
 0x45e   : > { %v4824_v1 = vadd.f32 %v4823_v51, %v4817_v31  ;;  %v4806_v48 = vadd.f32 %v4805_v43, %v4799_v47  ;;  %v4820_v14 = vmul.f32 %v4801_v19, %v7373_v54 }
 0x45f   : > { %v4701_v39 = vpop.f32.mrf.mxu2 }
 0x460   : > { %v4714_v44 = vpop.f32.mrf.mxu3  ;;  %v4825_v57 = vadd.f32 %v4824_v1, %v4818_v40 }
 0x461   : > { %v4725_v45 = vpop.f32.mrf.mxu0  ;;  %v4740_v46 = vpop.f32.mrf.mxu1 }
 0x462   : > { %v7375_v49 = vadd.f32 %v4725_v45, %v4604_v50 }
 0x464   : > { %v4800_v53 = vmul.f32 %v4784_v23, %v7375_v49 }
 0x466   : > { %v4807_v18 = vadd.f32 %v4806_v48, %v4800_v53  ;;  %v4819_v62 = vmul.f32 %v4800_v53, %v7375_v49 }
 0x467   : > { %v4751_v29 = vpop.f32.mrf.mxu2 }
 0x468   : > { %v4826_v34 = vadd.f32 %v4825_v57, %v4819_v62  ;;  %v7385_v52 = vadd.f32 %v4751_v29, %v4606_v56  ;;  %v4764_v0 = vpop.f32.mrf.mxu3  ;;  %v4808_v58 = vadd.f32 %v4807_v18, %v4801_v19 }
 0x469   : > { %v7387_v2 = vadd.f32 %v4764_v0, %v4607_v61  ;;  %v4727_v4 = vpop.f32.mrf.mxu0 }
 0x46a   : > { %v4802_v42 = vmul.f32 %v4786_v5, %v7385_v52  ;;  %v4827_v20 = vadd.f32 %v4826_v34, %v4820_v14 }
 0x46b   : > { %v4803_v59 = vmul.f32 %v4787_v63, %v7387_v2 }
 0x46c   : > { %v4821_v3 = vmul.f32 %v4802_v42, %v7385_v52  ;;  %v4809_v60 = vadd.f32 %v4808_v58, %v4802_v42 }
 0x46d   : > { %v4822_v26 = vmul.f32 %v4803_v59, %v7387_v2  ;;  %v4811_v17 = vsel %vm4810_vm1, %v4803_v59, 0.0 }
 0x46e   : > { %v4812_v22 = vadd.f32 %v4811_v17, %v4809_v60  ;;  %v4828_v11 = vadd.f32 %v4827_v20, %v4821_v3 }
 0x46f   : > { %v4753_v27 = vpop.f32.mrf.mxu2  ;;  %v4829_v25 = vsel %vm4810_vm1, %v4822_v26, 0.0 }
 0x470   : > { %v4766_v12 = vpop.f32.mrf.mxu3  ;;  %4813 = vadd.xlane.f32.xlu1 %v4812_v22  ;;  %v4830_v21 = vadd.f32 %v4829_v25, %v4828_v11  ;;  %v4833_v27 = vlaneseq }
 0x472   : > { %4831 = vadd.xlane.f32.xlu2 %v4830_v21  ;;  %v7409_v25 = vshrl.u32 %v4833_v27, 7 }
 0x474   : > { %vm4925_vm0 = vcmp.ge.s32.totalorder %v7409_v25, 2  ;;  %vm4926_vm3 = vcmp.lt.s32.totalorder %v7409_v25, 4  ;;  %vm4875_vm4 = vcmp.lt.s32.totalorder %v7409_v25, 2  ;;  %vm4974_vm9 = vcmp.ge.s32.totalorder %v7409_v25, 4 }
 0x475   : > { %vm7417_vm5 = vmand %vm4925_vm0, %vm4926_vm3  ;;  %vm4975_vm10 = vcmp.lt.s32.totalorder %v7409_v25, 6 }
 0x476   : > { %vm7433_vm11 = vmand %vm4974_vm9, %vm4975_vm10 }
 0x4e3   : > { %v4814_v13 = vpop.xlane.xlu1 %4813 }
 0x4e4   : > { %v4836_v16 = vsel %vm4835_vm2, %v4814_v13, 0.0  ;;  %v4882_v30 = vrot.slane %v4814_v13, 2  ;;  %v4932_v37 = vrot.slane %v4814_v13, 4  ;;  %v4981_v50 = vrot.slane %v4814_v13, 6 }
 0x4e5   : > { %v4832_v28 = vpop.xlane.xlu2 %4831  ;;  %4837 = vadd.xlane.f32.xlu0 %v4836_v16 }
 0x4e6   : > { %v4847_v35 = vsel %vm4835_vm2, %v4832_v28, 0.0  ;;  %v4884_v6 = vsel %vm4835_vm2, %v4882_v30, 0.0  ;;  %v4896_v41 = vrot.slane %v4832_v28, 2  ;;  %v4945_v33 = vrot.slane %v4832_v28, 4 }
 0x4e7   : > { %4848 = vadd.xlane.f32.xlu2 %v4847_v35  ;;  %4885 = vadd.xlane.f32.xlu1 %v4884_v6  ;;  %v4934_v32 = vsel %vm4835_vm2, %v4932_v37, 0.0  ;;  %v4994_v24 = vrot.slane %v4832_v28, 6  ;;  %v4983_v51 = vsel %vm4835_vm2, %v4981_v50, 0.0 }
 0x4e8   : > { %v4898_v36 = vsel %vm4835_vm2, %v4896_v41, 0.0  ;;  %v4947_v31 = vsel %vm4835_vm2, %v4945_v33, 0.0 }
 0x4e9   : > { %v4996_v39 = vsel %vm4835_vm2, %v4994_v24, 0.0 }
 0x4ed   : > { %4935 = vadd.xlane.f32.xlu0 %v4934_v32 }
 0x4ef   : > { %4899 = vadd.xlane.f32.xlu2 %v4898_v36  ;;  %4948 = vadd.xlane.f32.xlu1 %v4947_v31 }
 0x4f5   : > { %4997 = vadd.xlane.f32.xlu0 %v4996_v39 }
 0x4f7   : > { %4984 = vadd.xlane.f32.xlu2 %v4983_v51 }
 0x558   : > { %v4838_v43 = vpop.xlane.xlu0 %4837 }
 0x559   : > { %v4839_v47 = vrot.slane %v4838_v43, 4 }
 0x55a   : > { %v4849_v44 = vpop.xlane.xlu2 %4848  ;;  %v4886_v5 = vpop.xlane.xlu1 %4885 }
 0x55b   : > { %v4840_v23 = vadd.f32 %v4839_v47, %v4838_v43  ;;  %v4850_v45 = vrot.slane %v4849_v44, 4  ;;  %v4887_v19 = vrot.slane %v4886_v5, 4 }
 0x55d   : > { %v4841_v46 = vrot.slane %v4840_v23, 2  ;;  %v4851_v1 = vadd.f32 %v4850_v45, %v4849_v44  ;;  %v4888_v61 = vadd.f32 %v4887_v19, %v4886_v5 }
 0x55f   : > { %v4852_v7 = vrot.slane %v4851_v1, 2  ;;  %v4842_v55 = vadd.f32 %v4841_v46, %v4840_v23  ;;  %v4889_v63 = vrot.slane %v4888_v61, 2 }
 0x560   : > { %v4936_v28 = vpop.xlane.xlu0 %4935 }
 0x561   : > { %v4843_v48 = vrot.slane %v4842_v55, 1  ;;  %v4853_v40 = vadd.f32 %v4852_v7, %v4851_v1  ;;  %v4890_v42 = vadd.f32 %v4889_v63, %v4888_v61  ;;  %v4937_v6 = vrot.slane %v4936_v28, 4 }
 0x562   : > { %v4900_v57 = vpop.xlane.xlu2 %4899  ;;  %v4949_v35 = vpop.xlane.xlu1 %4948 }
 0x563   : > { %v4844_v53 = vadd.f32 %v4843_v48, %v4842_v55  ;;  %v4854_v15 = vrot.slane %v4853_v40, 1  ;;  %v4901_v18 = vrot.slane %v4900_v57, 4  ;;  %v4891_v60 = vrot.slane %v4890_v42, 1 }
 0x564   : > { %v4950_v37 = vrot.slane %v4949_v35, 4  ;;  %v4938_v33 = vadd.f32 %v4937_v6, %v4936_v28 }
 0x565   : > { %5384 = vpush %v4844_v53  ;;  %v4855_v56 = vadd.f32 %v4854_v15, %v4853_v40  ;;  %v4902_v29 = vadd.f32 %v4901_v18, %v4900_v57  ;;  %v4892_v22 = vadd.f32 %v4891_v60, %v4890_v42 }
 0x566   : > { %v4951_v32 = vadd.f32 %v4950_v37, %v4949_v35  ;;  %v4939_v36 = vrot.slane %v4938_v33, 2 }
 0x567   : > { %5386 = vpush %v4855_v56  ;;  %v4903_v0 = vrot.slane %v4902_v29, 2 }
 0x568   : > { %v4952_v24 = vrot.slane %v4951_v32, 2  ;;  %v4940_v51 = vadd.f32 %v4939_v36, %v4938_v33  ;;  %v4998_v18 = vpop.xlane.xlu0 %4997 }
 0x569   : > { %v4904_v58 = vadd.f32 %v4903_v0, %v4902_v29  ;;  %v4999_v61 = vrot.slane %v4998_v18, 4 }
 0x56a   : > { %v4953_v43 = vadd.f32 %v4952_v24, %v4951_v32  ;;  %v4941_v23 = vrot.slane %v4940_v51, 1  ;;  %v4985_v19 = vpop.xlane.xlu2 %4984  ;;  %v4776_v24 = vld [vmem:[%s7472_s2] sm:$0xff] }
 0x56b   : > { %v4905_v20 = vrot.slane %v4904_v58, 1 }
 0x56c   : > { %v4954_v45 = vrot.slane %v4953_v43, 1  ;;  %v4942_v7 = vadd.f32 %v4941_v23, %v4940_v51 }
 0x56d   : > { %v4906_v11 = vadd.f32 %v4905_v20, %v4904_v58 }
 0x56e   : > { %v4955_v55 = vadd.f32 %v4954_v45, %v4953_v43  ;;  %v4777_v43 = vld [vmem:[%s7473_s3] sm:$0xff] }
 0x596   : > { %s5385_s13 = spop %5384 }
 0x597   : > { %s7404_s14 = smul.f32 0.0009765625, %s5385_s13 }
 0x598   : > { %s5387_s16 = spop %5386 }
 0x599   : > { %s4858_s15 = smul.f32 %s7404_s14, %s7404_s14  ;;  %v4879_v12 = vstv %s7404_s14 }
 0x59a   : > { %s4857_s17 = smul.f32 0.0009765625, %s5387_s16  ;;  %v4880_v13 = vsel %vm4875_vm4, %v4879_v12, 0.0 }
 0x59c   : > { %s4859_s20 = ssub.f32 %s4857_s17, %s4858_s15 }
 0x59e   : > { %s4860_s22 = smax.f32 %s5489_s21, %s4859_s20 }
 0x59f   : > { %s4861_s24 = sadd.f32 1e-05, %s4860_s22 }
 0x5a1   : > { %v4862_v62 = vstv %s4861_s24 }
 0x5a2   : > { %5447 = vrsqrt.f32 %v4862_v62  ;;  %vm4869_vm14 = vweird.f32 %v4862_v62 }
 0x5a8   : > { %v5448_v34 = vpop.eup %5447 }
 0x5a9   : > { %v4864_v4 = vmul.f32 %v5448_v34, %v4862_v62  ;;  %vm4870_vm13 = vweird.f32 %v5448_v34  ;;  %v4986_v62 = vrot.slane %v4985_v19, 4 }
 0x5aa   : > { %vm4871_vm15 = vmor %vm4869_vm14, %vm4870_vm13  ;;  %vm5023_vm14 = vcmp.ge.s32.totalorder %v7409_v25, 6 }
 0x5ab   : > { %v4865_v14 = vmul.f32 %v5448_v34, %v4864_v4  ;;  %v4987_v63 = vadd.f32 %v4986_v62, %v4985_v19 }
 0x5ad   : > { %v4866_v59 = vmul.f32 0.5, %v4865_v14  ;;  %v4988_v0 = vrot.slane %v4987_v63, 2 }
 0x5af   : > { %v4867_v3 = vsub.f32 1.5, %v4866_v59  ;;  %v4989_v59 = vadd.f32 %v4988_v0, %v4987_v63 }
 0x5b1   : > { %v4868_v26 = vmul.f32 %v5448_v34, %v4867_v3 }
 0x5b3   : > { %v4872_v17 = vsel %vm4871_vm15, %v5448_v34, %v4868_v26  ;;  %v5000_v34 = vadd.f32 %v4999_v61, %v4998_v18  ;;  %v4990_v26 = vrot.slane %v4989_v59, 1 }
 0x5b4   : > { %5388 = vpush %v4872_v17 }
 0x5b5   : > { %5390 = vpush %v4892_v22  ;;  %v5001_v14 = vrot.slane %v5000_v34, 2  ;;  %v4991_v27 = vadd.f32 %v4990_v26, %v4989_v59 }
 0x5b6   : > { %5392 = vpush %v4906_v11 }
 0x5b7   : > { %v5002_v3 = vadd.f32 %v5001_v14, %v5000_v34 }
 0x5b9   : > { %v5003_v17 = vrot.slane %v5002_v3, 1 }
 0x5bb   : > { %v5004_v12 = vadd.f32 %v5003_v17, %v5002_v3 }
 0x5e5   : > { %s7413_s25 = spop %5388 }
 0x5e6   : > { %s5391_s26 = spop %5390  ;;  %v4877_v48 = vstv %s7413_s25 }
 0x5e7   : > { %s4894_s27 = smul.f32 0.0009765625, %s5391_s26  ;;  %s5393_s28 = spop %5392  ;;  %v4878_v40 = vsel %vm4875_vm4, %v4877_v48, 0.0 }
 0x5e8   : > { %s4908_s23 = smul.f32 0.0009765625, %s5393_s28 }
 0x5e9   : > { %s4909_s29 = smul.f32 %s4894_s27, %s4894_s27  ;;  %v4930_v16 = vstv %s4894_s27 }
 0x5ea   : > { %v4931_v30 = vsel %vm7417_vm5, %v4930_v16, %v4880_v13 }
 0x5eb   : > { %s4910_s30 = ssub.f32 %s4908_s23, %s4909_s29 }
 0x5ed   : > { %s4911_s6 = smax.f32 %s5489_s21, %s4910_s30 }
 0x5ee   : > { %s4912_s7 = sadd.f32 1e-05, %s4911_s6 }
 0x5f0   : > { %v4913_v41 = vstv %s4912_s7 }
 0x5f1   : > { %5449 = vrsqrt.f32 %v4913_v41  ;;  %vm4920_vm7 = vweird.f32 %v4913_v41 }
 0x5f7   : > { %v5450_v31 = vpop.eup %5449 }
 0x5f8   : > { %v4915_v50 = vmul.f32 %v5450_v31, %v4913_v41  ;;  %vm4921_vm6 = vweird.f32 %v5450_v31 }
 0x5f9   : > { %vm4922_vm8 = vmor %vm4920_vm7, %vm4921_vm6 }
 0x5fa   : > { %v4916_v39 = vmul.f32 %v5450_v31, %v4915_v50 }
 0x5fc   : > { %v4917_v47 = vmul.f32 0.5, %v4916_v39 }
 0x5fe   : > { %v4918_v44 = vsub.f32 1.5, %v4917_v47 }
 0x600   : > { %v4919_v46 = vmul.f32 %v5450_v31, %v4918_v44 }
 0x602   : > { %v4923_v1 = vsel %vm4922_vm8, %v5450_v31, %v4919_v46  ;;  %v5490_v31 = vmov 0  }
 0x603   : > { %5394 = vpush %v4923_v1  ;;  %5444 = vset.pattern.permute.xlu1 %v5490_v31  ;;  %5445 = vset.pattern.permute.xlu2 %v5490_v31 }
 0x604   : > { %5396 = vpush %v4942_v7  ;;  %5446 = vset.pattern.permute.xlu0 %v5490_v31 }
 0x605   : > { %5398 = vpush %v4955_v55 }
 0x634   : > { %s5395_s8 = spop %5394 }
 0x635   : > { %v4928_v53 = vstv %s5395_s8  ;;  %s5397_s9 = spop %5396  ;;  %s5382_s8 = sshll.u32 %s7481_s19, 6 }
 0x636   : > { %v4929_v15 = vsel %vm7417_vm5, %v4928_v53, %v4878_v40  ;;  %s4944_s10 = smul.f32 0.0009765625, %s5397_s9  ;;  %s5399_s11 = spop %5398 }
 0x637   : > { %s4957_s12 = smul.f32 0.0009765625, %s5399_s11 }
 0x638   : > { %s4958_s13 = smul.f32 %s4944_s10, %s4944_s10  ;;  %v4979_v5 = vstv %s4944_s10  ;;  %s224_s10 = scalar_lea.vmem %s7475_s5, %s5382_s8 }
 0x639   : > { %v4980_v57 = vsel %vm7433_vm11, %v4979_v5, %v4931_v30 }
 0x63a   : > { %s4959_s14 = ssub.f32 %s4957_s12, %s4958_s13 }
 0x63c   : > { %s4960_s15 = smax.f32 %s5489_s21, %s4959_s14 }
 0x63d   : > { %s4961_s16 = sadd.f32 1e-05, %s4960_s15 }
 0x63f   : > { %v4962_v29 = vstv %s4961_s16 }
 0x640   : > { %5451 = vrsqrt.f32 %v4962_v29  ;;  %vm4969_vm2 = vweird.f32 %v4962_v29 }
 0x646   : > { %v5452_v4 = vpop.eup %5451 }
 0x647   : > { %v4964_v42 = vmul.f32 %v5452_v4, %v4962_v29  ;;  %vm4970_vm12 = vweird.f32 %v5452_v4 }
 0x648   : > { %vm4971_vm13 = vmor %vm4969_vm2, %vm4970_vm12 }
 0x649   : > { %v4965_v58 = vmul.f32 %v5452_v4, %v4964_v42 }
 0x64b   : > { %v4966_v60 = vmul.f32 0.5, %v4965_v58 }
 0x64d   : > { %v4967_v20 = vsub.f32 1.5, %v4966_v60 }
 0x64f   : > { %v4968_v22 = vmul.f32 %v5452_v4, %v4967_v20 }
 0x651   : > { %v4972_v11 = vsel %vm4971_vm13, %v5452_v4, %v4968_v22 }
 0x652   : > { %5400 = vpush %v4972_v11 }
 0x653   : > { %5402 = vpush %v4991_v27 }
 0x654   : > { %5404 = vpush %v5004_v12 }
 0x683   : > { %s5401_s17 = spop %5400 }
 0x684   : > { %v4977_v21 = vstv %s5401_s17  ;;  %s5403_s20 = spop %5402 }
 0x685   : > { %v4978_v13 = vsel %vm7433_vm11, %v4977_v21, %v4929_v15  ;;  %s4993_s22 = smul.f32 0.0009765625, %s5403_s20  ;;  %s5405_s24 = spop %5404 }
 0x686   : > { %s5006_s25 = smul.f32 0.0009765625, %s5405_s24 }
 0x687   : > { %s5007_s26 = smul.f32 %s4993_s22, %s4993_s22  ;;  %v5028_v16 = vstv %s4993_s22 }
 0x688   : > { %v5029_v30 = vsel %vm5023_vm14, %v5028_v16, %v4980_v57 }
 0x689   : > { %s5008_s27 = ssub.f32 %s5006_s25, %s5007_s26 }
 0x68b   : > { %s5009_s28 = smax.f32 %s5489_s21, %s5008_s27 }
 0x68c   : > { %s5010_s23 = sadd.f32 1e-05, %s5009_s28 }
 0x68e   : > { %v5011_v28 = vstv %s5010_s23 }
 0x68f   : > { %5453 = vrsqrt.f32 %v5011_v28  ;;  %vm5018_vm0 = vweird.f32 %v5011_v28 }
 0x695   : > { %v5454_v35 = vpop.eup %5453 }
 0x696   : > { %v5013_v6 = vmul.f32 %v5454_v35, %v5011_v28  ;;  %vm5019_vm15 = vweird.f32 %v5454_v35 }
 0x697   : > { %vm5020_vm3 = vmor %vm5018_vm0, %vm5019_vm15 }
 0x698   : > { %v5014_v37 = vmul.f32 %v5454_v35, %v5013_v6 }
 0x69a   : > { %v5015_v41 = vmul.f32 0.5, %v5014_v37 }
 0x69c   : > { %v5016_v33 = vsub.f32 1.5, %v5015_v41 }
 0x69e   : > { %v5017_v32 = vmul.f32 %v5454_v35, %v5016_v33 }
 0x6a0   : > { %v5021_v36 = vsel %vm5020_vm3, %v5454_v35, %v5017_v32 }
 0x6a1   : > { %5406 = vpush %v5021_v36 }
 0x6d2   : > { %s5407_s30 = spop %5406 }
 0x6d3   : > { %v5026_v50 = vstv %s5407_s30 }
 0x6d4   : > { %v5027_v39 = vsel %vm5023_vm14, %v5026_v50, %v4978_v13 }
 0x6d5   : > { %v5030_v51 = vmul.f32 %v5027_v39, %v4776_v24 }
 0x6d7   : > { %v5031_v47 = vmul.f32 %v5030_v51, %v5029_v30  ;;  %5035 = vperm.xlu1 %5444, %v5030_v51  }
 0x6d9   : > { %v5032_v44 = vsub.f32 %v4777_v43, %v5031_v47 }
 0x6db   : > { %5048 = vperm.xlu2 %5445, %v5032_v44  }
 0x735   : > { %v5049_v7 = vpop.permute.xlu2 %5048 }
 0x749   : > { %v5036_v23 = vpop.permute.xlu1 %5035 }
 0x74a   : > { %v5038_v45 = vmul.f32 %v5036_v23, %v7357_v9  ;;  %v5039_v46 = vmul.f32 %v5036_v23, %v7359_v10  ;;  %v5040_v1 = vmul.f32 %v5036_v23, %v7362_v8  ;;  %v5041_v25 = vmul.f32 %v5036_v23, %v7367_v38 }
 0x74b   : > { %v5042_v55 = vmul.f32 %v5036_v23, %v7375_v49  ;;  %v5043_v48 = vmul.f32 %v5036_v23, %v7373_v54  ;;  %v5044_v40 = vmul.f32 %v5036_v23, %v7385_v52  ;;  %v5045_v53 = vmul.f32 %v5036_v23, %v7387_v2 }
 0x74c   : > { %v5051_v15 = vadd.f32 %v5049_v7, %v5038_v45  ;;  %v5052_v56 = vadd.f32 %v5049_v7, %v5039_v46  ;;  %v5053_v5 = vadd.f32 %v5049_v7, %v5040_v1  ;;  %v5054_v57 = vadd.f32 %v5049_v7, %v5041_v25 }
 0x74d   : > { %v5055_v9 = vadd.f32 %v5049_v7, %v5042_v55  ;;  %v5056_v10 = vadd.f32 %v5049_v7, %v5043_v48  ;;  %v5057_v8 = vadd.f32 %v5049_v7, %v5044_v40  ;;  %v5058_v18 = vadd.f32 %v5049_v7, %v5045_v53 }
 0x74e   : > { %v5059_v38 = vmax.f32 %v5051_v15, 0.0  ;;  %v5060_v19 = vmax.f32 %v5052_v56, 0.0  ;;  %v5061_v49 = vmax.f32 %v5053_v5, 0.0  ;;  %v5062_v54 = vmax.f32 %v5054_v57, 0.0 }
 0x74f   : > { %v5063_v62 = vmax.f32 %v5055_v9, 0.0  ;;  %v5064_v52 = vmax.f32 %v5056_v10, 0.0  ;;  %v5065_v2 = vmax.f32 %v5057_v8, 0.0  ;;  %v5066_v61 = vmax.f32 %v5058_v18, 0.0 }
 0x750   : > { %5067 = vst [vmem:[%s224_s10] sm:$0xff] %v5059_v38 }
 0x751   : > { %5068 = vst [vmem:[%s224_s10 + $0x8] sm:$0xff] %v5060_v19 }
 0x752   : > { %5069 = vst [vmem:[%s224_s10 + $0x10] sm:$0xff] %v5061_v49 }
 0x753   : > { %5070 = vst [vmem:[%s224_s10 + $0x18] sm:$0xff] %v5062_v54 }
 0x754   : > { %5071 = vst [vmem:[%s224_s10 + $0x20] sm:$0xff] %v5063_v62 }
 0x755   : > { %5072 = vst [vmem:[%s224_s10 + $0x28] sm:$0xff] %v5064_v52 }
 0x756   : > { %5073 = vst [vmem:[%s224_s10 + $0x30] sm:$0xff] %v5065_v2 }
 0x757   : > { %5074 = vst.msk [vmem:[%s224_s10 + $0x38] sm:$0xff] %vm4810_vm1, %v5066_v61 }
 0x758 PF: > { %s15_s18 = sadd.s32 1, %s5461_s18  }
 0x759   : > { %p12_p4 = scmp.ge.s32.totalorder %s15_s18, 4  }
 0x75b   :  { %14 = sbr.rel (!%p12_p4) target bundleno = 1 (0x1), region = 96 }

</bundles_post_ra>
